<compile_context>
chip_gen: v7x
topology: tpu7x:2x2x1
jax: 0.10.0
libtpu: 0.0.40
codegen_flags: <defaults>
</compile_context>

<pallas_src>
import jax
import jax.numpy as jnp
from jax.experimental import pallas as pl
from jax.experimental.pallas import tpu as pltpu


# ---------------------------------------------------------------------------
# Fused kernel: 3x (matmul + bias + sigmoid) + final FC matmul + bias.
# All operands live in VMEM; activations stay on-chip between layers.
# ---------------------------------------------------------------------------
def _lenet_fused_kernel(x_ref, m1_ref, b1_ref, m2_ref, b2_ref, m3_ref, b3_ref,
                        mfc_ref, bfc_ref, o_ref):
    def dense(h_bf16, m_ref, b_ref, activate):
        acc = jnp.dot(h_bf16, m_ref[...], preferred_element_type=jnp.float32)
        acc = acc + b_ref[...]                      # (1, N) bias broadcasts over rows
        if activate:
            # sigmoid(x) == 0.5*(tanh(x/2)+1): single EUP transcendental,
            # numerically safe for large |x| (no exp overflow).
            acc = 0.5 * jnp.tanh(0.5 * acc) + 0.5
        return acc

    # x arrives as f32; bf16 cast rides free on VPU slots under the MXU.
    h = dense(x_ref[...].astype(jnp.bfloat16), m1_ref, b1_ref, True)   # (TM, 2432)
    h = dense(h.astype(jnp.bfloat16), m2_ref, b2_ref, True)            # (TM, 640)
    h = dense(h.astype(jnp.bfloat16), m3_ref, b3_ref, True)            # (TM, 640)
    out = dense(h.astype(jnp.bfloat16), mfc_ref, bfc_ref, False)       # (TM, 128)
    o_ref[...] = out.astype(o_ref.dtype)


# ---------------------------------------------------------------------------
# Weight preprocessing (init-time, exact): conv -> dense matrix on the
# NCHW-flattened activation vector (flatten order = (c, h, w), matching
# PyTorch's out.view(B, -1)).
# ---------------------------------------------------------------------------
def conv_to_dense(w, b, hin, win, *, stride, pad):
    """w: (Cout, Cin, K, K) PyTorch layout.  Returns M: (Cin*Hin*Win, Cout*Hout*Wout)
    and bvec: (Cout*Hout*Wout,) such that y_flat = x_flat @ M + bvec."""
    cout, cin, k, _ = w.shape
    hout = (hin + 2 * pad - k) // stride + 1
    wout = (win + 2 * pad - k) // stride + 1

    hi = jnp.arange(hin)[:, None]
    ho = jnp.arange(hout)[None, :]
    kh = hi - (stride * ho - pad)                          # (hin, hout)
    vh = ((kh >= 0) & (kh < k)).astype(w.dtype)
    khc = jnp.clip(kh, 0, k - 1)

    wi = jnp.arange(win)[:, None]
    wo = jnp.arange(wout)[None, :]
    kw = wi - (stride * wo - pad)                          # (win, wout)
    vw = ((kw >= 0) & (kw < k)).astype(w.dtype)
    kwc = jnp.clip(kw, 0, k - 1)

    wg = w[:, :, khc, :]                                   # (cout, cin, hin, hout, k)
    wg = wg[:, :, :, :, kwc]                               # (cout, cin, hin, hout, win, wout)
    wg = wg * vh[None, None, :, :, None, None] * vw[None, None, None, None, :, :]
    m = jnp.transpose(wg, (1, 2, 4, 0, 3, 5)).reshape(cin * hin * win,
                                                      cout * hout * wout)
    bvec = jnp.repeat(b, hout * wout)                      # (co, ho, wo) order
    return m, bvec


def _round_up(n, m=128):
    return ((n + m - 1) // m) * m


def _pad2(a, rows, cols):
    return jnp.pad(a, ((0, rows - a.shape[0]), (0, cols - a.shape[1])))


def prepare_params(params, num_classes=10):
    """One-time preprocessing: build lane-dense (128-padded) bf16 matrices."""
    m1, b1 = conv_to_dense(params["w1"], params["b1"], 28, 28, stride=2, pad=2)  # (784, 2352)
    m2, b2 = conv_to_dense(params["w2"], params["b2"], 14, 14, stride=2, pad=2)  # (2352, 588)
    m3, b3 = conv_to_dense(params["w3"], params["b3"], 7, 7, stride=1, pad=2)    # (588, 588)
    mfc = params["wfc"].T                                                        # (588, 10)
    bfc = params["bfc"]

    k1 = _round_up(m1.shape[0])                            # 784 -> 896 (lane-dense LHS)
    n1, n2, n3 = _round_up(m1.shape[1]), _round_up(m2.shape[1]), _round_up(m3.shape[1])
    nfc = _round_up(num_classes)
    # Zero-pad output columns (lane-dense) and each next layer's input rows
    # (so padded activation slots never contribute).
    return {
        "m1": _pad2(m1, k1, n1).astype(jnp.bfloat16),
        "b1": _pad2(b1.reshape(1, -1), 1, n1).astype(jnp.float32),
        "m2": _pad2(m2, n1, n2).astype(jnp.bfloat16),
        "b2": _pad2(b2.reshape(1, -1), 1, n2).astype(jnp.float32),
        "m3": _pad2(m3, n2, n3).astype(jnp.bfloat16),
        "b3": _pad2(b3.reshape(1, -1), 1, n3).astype(jnp.float32),
        "mfc": _pad2(mfc, n3, nfc).astype(jnp.bfloat16),
        "bfc": _pad2(bfc.reshape(1, -1), 1, nfc).astype(jnp.float32),
    }


# ---------------------------------------------------------------------------
# Forward pass (single pallas_call)
# ---------------------------------------------------------------------------
def lenet_forward(x_nchw, prep, num_classes=10):
    b = x_nchw.shape[0]
    k1 = prep["m1"].shape[0]       # 896 (padded)
    n1 = prep["m1"].shape[1]       # 2432
    n2 = prep["m2"].shape[1]       # 640
    n3 = prep["m3"].shape[1]       # 640
    no = prep["bfc"].shape[1]      # 128
    kin = x_nchw.shape[1] * x_nchw.shape[2] * x_nchw.shape[3]   # 784

    def rup(n, m):
        return ((n + m - 1) // m) * m

    # Row tile: multiples of 16 (bf16 sublane packing).  For 16 < B <= 1024
    # split into >= 2 grid steps so both v7x TensorCores are used; cap at 512
    # rows (fits comfortably in 32-48 MiB VMEM with single-buffered weights).
    if b <= 16:
        tm = 16
    elif b <= 1024:
        tm = rup((b + 1) // 2, 16)
    else:
        tm = 512
    bp = rup(b, tm)

    # Keep x in f32 here; the bf16 cast happens inside the kernel (avoids a
    # separate un-hidden XLA cast pass over HBM).  Pad features 784 -> 896.
    xf = x_nchw.reshape(b, -1)
    xf = jnp.pad(xf, ((0, bp - b), (0, k1 - kin)))

    def weight_spec(a):
        # Constant index_map across the grid -> single-buffer (saves ~7.5 MiB).
        return pl.BlockSpec(a.shape, lambda i: (0, 0),
                            pipeline_mode=pl.Buffered(1))

    weight_bytes = sum(int(v.size) * v.dtype.itemsize for v in prep.values())
    cost = pl.CostEstimate(
        flops=2 * bp * (k1 * n1 + n1 * n2 + n2 * n3 + n3 * no),
        transcendentals=bp * (n1 + n2 + n3),
        bytes_accessed=int(weight_bytes + xf.size * 4 + bp * no * 4),
    )

    out = pl.pallas_call(
        _lenet_fused_kernel,
        out_shape=jax.ShapeDtypeStruct((bp, no), jnp.float32),
        grid=(bp // tm,),
        in_specs=[
            pl.BlockSpec((tm, k1), lambda i: (i, 0)),
            weight_spec(prep["m1"]), weight_spec(prep["b1"]),
            weight_spec(prep["m2"]), weight_spec(prep["b2"]),
            weight_spec(prep["m3"]), weight_spec(prep["b3"]),
            weight_spec(prep["mfc"]), weight_spec(prep["bfc"]),
        ],
        out_specs=pl.BlockSpec((tm, no), lambda i: (i, 0)),
        compiler_params=pltpu.CompilerParams(
            dimension_semantics=("parallel",),       # shards rows across v7x's 2 TCs
            vmem_limit_bytes=48 * 1024 * 1024,       # headroom for tm=512 f32 acc
        ),
        cost_estimate=cost,
    )(xf, prep["m1"], prep["b1"], prep["m2"], prep["b2"],
      prep["m3"], prep["b3"], prep["mfc"], prep["bfc"])

    return out[:b, :num_classes]


# ---------------------------------------------------------------------------
# Pure-JAX reference (PyTorch semantics) for a correctness check.
# ---------------------------------------------------------------------------
def lenet_reference(x, params):
    def conv_sig(h, w, bias, stride):
        y = jax.lax.conv_general_dilated(
            h, w, window_strides=(stride, stride), padding=((2, 2), (2, 2)),
            dimension_numbers=("NCHW", "OIHW", "NCHW"))
        return jax.nn.sigmoid(y + bias[None, :, None, None])

    h = conv_sig(x, params["w1"], params["b1"], 2)
    h = conv_sig(h, params["w2"], params["b2"], 2)
    h = conv_sig(h, params["w3"], params["b3"], 1)
    flat = h.reshape(h.shape[0], -1)
    return flat @ params["wfc"].T + params["bfc"]


# ---------------------------------------------------------------------------
# Deterministic parameter init (shapes from LeNet.__init__; synthetic values)
# ---------------------------------------------------------------------------
def init_params(key, channel=1, hidden=588, num_classes=10):
    ks = jax.random.split(key, 8)

    def uni(k, shape, fan_in):
        bound = 1.0 / (fan_in ** 0.5)
        return jax.random.uniform(k, shape, jnp.float32, -bound, bound)

    return {
        "w1": uni(ks[0], (12, channel, 5, 5), channel * 25),
        "b1": uni(ks[1], (12,), channel * 25),
        "w2": uni(ks[2], (12, 12, 5, 5), 12 * 25),
        "b2": uni(ks[3], (12,), 12 * 25),
        "w3": uni(ks[4], (12, 12, 5, 5), 12 * 25),
        "b3": uni(ks[5], (12,), 12 * 25),
        "wfc": uni(ks[6], (num_classes, hidden), hidden),
        "bfc": uni(ks[7], (num_classes,), hidden),
    }


if __name__ == "__main__":
    key = jax.random.PRNGKey(0)
    k_x, k_p = jax.random.split(key)

    # batch=2, channel=1, 28x28 (implied by hidden=588 = 12*7*7)
    x = jax.random.normal(k_x, (2, 1, 28, 28), dtype=jnp.float32)
    params = init_params(k_p)
    prep = prepare_params(params)            # one-time weight preprocessing

    out = jax.jit(lenet_forward)(x, prep)
    out = jax.block_until_ready(out)
    assert out.shape == (2, 10), out.shape
    assert out.dtype == jnp.float32

    ref = lenet_reference(x, params)
    assert jnp.allclose(out, ref, atol=8e-2, rtol=0.0), float(
        jnp.max(jnp.abs(out - ref)))
    print("KERNEL_OK")
</pallas_src>

<mosaic_0001>
module attributes {stable_mosaic.version = 11 : i64} {
  func.func @_lenet_fused_kernel(%arg0: i32, %arg1: memref<16x896xf32, #tpu.memory_space<vmem>>, %arg2: memref<896x2432xbf16, #tpu.memory_space<vmem>>, %arg3: memref<1x2432xf32, #tpu.memory_space<vmem>>, %arg4: memref<2432x640xbf16, #tpu.memory_space<vmem>>, %arg5: memref<1x640xf32, #tpu.memory_space<vmem>>, %arg6: memref<640x640xbf16, #tpu.memory_space<vmem>>, %arg7: memref<1x640xf32, #tpu.memory_space<vmem>>, %arg8: memref<640x128xbf16, #tpu.memory_space<vmem>>, %arg9: memref<1x128xf32, #tpu.memory_space<vmem>>, %arg10: memref<16x128xf32, #tpu.memory_space<vmem>>) attributes {dimension_semantics = [#tpu.dimension_semantics<parallel>], iteration_bounds = array<i64: 1>, scalar_prefetch = 0 : i64, scratch_operands = 0 : i64, tpu.core_type = #tpu.core_type<tc>, window_params = [{transform_indices = @transform_0, window_bounds = array<i64: 16, 896>}, {pipeline_mode = #tpu.pipeline_mode<synchronous>, transform_indices = @transform_1, window_bounds = array<i64: 896, 2432>}, {pipeline_mode = #tpu.pipeline_mode<synchronous>, transform_indices = @transform_2, window_bounds = array<i64: 1, 2432>}, {pipeline_mode = #tpu.pipeline_mode<synchronous>, transform_indices = @transform_3, window_bounds = array<i64: 2432, 640>}, {pipeline_mode = #tpu.pipeline_mode<synchronous>, transform_indices = @transform_4, window_bounds = array<i64: 1, 640>}, {pipeline_mode = #tpu.pipeline_mode<synchronous>, transform_indices = @transform_5, window_bounds = array<i64: 640, 640>}, {pipeline_mode = #tpu.pipeline_mode<synchronous>, transform_indices = @transform_6, window_bounds = array<i64: 1, 640>}, {pipeline_mode = #tpu.pipeline_mode<synchronous>, transform_indices = @transform_7, window_bounds = array<i64: 640, 128>}, {pipeline_mode = #tpu.pipeline_mode<synchronous>, transform_indices = @transform_8, window_bounds = array<i64: 1, 128>}, {transform_indices = @transform_9, window_bounds = array<i64: 16, 128>}]} {
    %c0 = arith.constant 0 : index
    %c0_0 = arith.constant 0 : index
    %0 = vector.load %arg1[%c0, %c0_0] : memref<16x896xf32, #tpu.memory_space<vmem>>, vector<16x896xf32>
    %1 = arith.truncf %0 : vector<16x896xf32> to vector<16x896xbf16>
    %c0_1 = arith.constant 0 : index
    %c0_2 = arith.constant 0 : index
    %2 = vector.load %arg2[%c0_1, %c0_2] : memref<896x2432xbf16, #tpu.memory_space<vmem>>, vector<896x2432xbf16>
    %cst = arith.constant dense<0.000000e+00> : vector<16x2432xf32>
    %3 = tpu.matmul %1, %2, %cst {dimension_numbers = #tpu.dot_dimension_numbers<[1], [0], [0], [1], [0, 0, 1, 1], [], []>} : vector<16x896xbf16>, vector<896x2432xbf16>, vector<16x2432xf32> -> vector<16x2432xf32>
    %c0_3 = arith.constant 0 : index
    %c0_4 = arith.constant 0 : index
    %4 = vector.load %arg3[%c0_3, %c0_4] : memref<1x2432xf32, #tpu.memory_space<vmem>>, vector<1x2432xf32>
    %5 = vector.broadcast %4 : vector<1x2432xf32> to vector<16x2432xf32>
    %6 = arith.addf %3, %5 : vector<16x2432xf32>
    %cst_5 = arith.constant 5.000000e-01 : f32
    %7 = vector.broadcast %cst_5 : f32 to vector<16x2432xf32>
    %8 = arith.mulf %7, %6 : vector<16x2432xf32>
    %9 = math.tanh %8 : vector<16x2432xf32>
    %cst_6 = arith.constant 5.000000e-01 : f32
    %10 = vector.broadcast %cst_6 : f32 to vector<16x2432xf32>
    %11 = arith.mulf %10, %9 : vector<16x2432xf32>
    %cst_7 = arith.constant 5.000000e-01 : f32
    %12 = vector.broadcast %cst_7 : f32 to vector<16x2432xf32>
    %13 = arith.addf %11, %12 : vector<16x2432xf32>
    %14 = arith.truncf %13 : vector<16x2432xf32> to vector<16x2432xbf16>
    %c0_8 = arith.constant 0 : index
    %c0_9 = arith.constant 0 : index
    %15 = vector.load %arg4[%c0_8, %c0_9] : memref<2432x640xbf16, #tpu.memory_space<vmem>>, vector<2432x640xbf16>
    %cst_10 = arith.constant dense<0.000000e+00> : vector<16x640xf32>
    %16 = tpu.matmul %14, %15, %cst_10 {dimension_numbers = #tpu.dot_dimension_numbers<[1], [0], [0], [1], [0, 0, 1, 1], [], []>} : vector<16x2432xbf16>, vector<2432x640xbf16>, vector<16x640xf32> -> vector<16x640xf32>
    %c0_11 = arith.constant 0 : index
    %c0_12 = arith.constant 0 : index
    %17 = vector.load %arg5[%c0_11, %c0_12] : memref<1x640xf32, #tpu.memory_space<vmem>>, vector<1x640xf32>
    %18 = vector.broadcast %17 : vector<1x640xf32> to vector<16x640xf32>
    %19 = arith.addf %16, %18 : vector<16x640xf32>
    %cst_13 = arith.constant 5.000000e-01 : f32
    %20 = vector.broadcast %cst_13 : f32 to vector<16x640xf32>
    %21 = arith.mulf %20, %19 : vector<16x640xf32>
    %22 = math.tanh %21 : vector<16x640xf32>
    %cst_14 = arith.constant 5.000000e-01 : f32
    %23 = vector.broadcast %cst_14 : f32 to vector<16x640xf32>
    %24 = arith.mulf %23, %22 : vector<16x640xf32>
    %cst_15 = arith.constant 5.000000e-01 : f32
    %25 = vector.broadcast %cst_15 : f32 to vector<16x640xf32>
    %26 = arith.addf %24, %25 : vector<16x640xf32>
    %27 = arith.truncf %26 : vector<16x640xf32> to vector<16x640xbf16>
    %c0_16 = arith.constant 0 : index
    %c0_17 = arith.constant 0 : index
    %28 = vector.load %arg6[%c0_16, %c0_17] : memref<640x640xbf16, #tpu.memory_space<vmem>>, vector<640x640xbf16>
    %cst_18 = arith.constant dense<0.000000e+00> : vector<16x640xf32>
    %29 = tpu.matmul %27, %28, %cst_18 {dimension_numbers = #tpu.dot_dimension_numbers<[1], [0], [0], [1], [0, 0, 1, 1], [], []>} : vector<16x640xbf16>, vector<640x640xbf16>, vector<16x640xf32> -> vector<16x640xf32>
    %c0_19 = arith.constant 0 : index
    %c0_20 = arith.constant 0 : index
    %30 = vector.load %arg7[%c0_19, %c0_20] : memref<1x640xf32, #tpu.memory_space<vmem>>, vector<1x640xf32>
    %31 = vector.broadcast %30 : vector<1x640xf32> to vector<16x640xf32>
    %32 = arith.addf %29, %31 : vector<16x640xf32>
    %cst_21 = arith.constant 5.000000e-01 : f32
    %33 = vector.broadcast %cst_21 : f32 to vector<16x640xf32>
    %34 = arith.mulf %33, %32 : vector<16x640xf32>
    %35 = math.tanh %34 : vector<16x640xf32>
    %cst_22 = arith.constant 5.000000e-01 : f32
    %36 = vector.broadcast %cst_22 : f32 to vector<16x640xf32>
    %37 = arith.mulf %36, %35 : vector<16x640xf32>
    %cst_23 = arith.constant 5.000000e-01 : f32
    %38 = vector.broadcast %cst_23 : f32 to vector<16x640xf32>
    %39 = arith.addf %37, %38 : vector<16x640xf32>
    %40 = arith.truncf %39 : vector<16x640xf32> to vector<16x640xbf16>
    %c0_24 = arith.constant 0 : index
    %c0_25 = arith.constant 0 : index
    %41 = vector.load %arg8[%c0_24, %c0_25] : memref<640x128xbf16, #tpu.memory_space<vmem>>, vector<640x128xbf16>
    %cst_26 = arith.constant dense<0.000000e+00> : vector<16x128xf32>
    %42 = tpu.matmul %40, %41, %cst_26 {dimension_numbers = #tpu.dot_dimension_numbers<[1], [0], [0], [1], [0, 0, 1, 1], [], []>} : vector<16x640xbf16>, vector<640x128xbf16>, vector<16x128xf32> -> vector<16x128xf32>
    %c0_27 = arith.constant 0 : index
    %c0_28 = arith.constant 0 : index
    %43 = vector.load %arg9[%c0_27, %c0_28] : memref<1x128xf32, #tpu.memory_space<vmem>>, vector<1x128xf32>
    %44 = vector.broadcast %43 : vector<1x128xf32> to vector<16x128xf32>
    %45 = arith.addf %42, %44 : vector<16x128xf32>
    %c0_29 = arith.constant 0 : index
    %c0_30 = arith.constant 0 : index
    %46 = vector.load %arg10[%c0_29, %c0_30] : memref<16x128xf32, #tpu.memory_space<vmem>>, vector<16x128xf32>
    tpu.vector_store %arg10[%c0_29, %c0_30], %45 {strides = array<i32>} : memref<16x128xf32, #tpu.memory_space<vmem>>, vector<16x128xf32>,
    return
  }
  func.func @transform_0(%arg0: i32) -> (i32, i32) {
    %c0_i32 = arith.constant 0 : i32
    %c0_i32_0 = arith.constant 0 : i32
    return %arg0, %c0_i32 : i32, i32
  }
  func.func @transform_1(%arg0: i32) -> (i32, i32) {
    %c0_i32 = arith.constant 0 : i32
    %c0_i32_0 = arith.constant 0 : i32
    %c0_i32_1 = arith.constant 0 : i32
    return %c0_i32, %c0_i32_0 : i32, i32
  }
  func.func @transform_2(%arg0: i32) -> (i32, i32) {
    %c0_i32 = arith.constant 0 : i32
    %c0_i32_0 = arith.constant 0 : i32
    %c0_i32_1 = arith.constant 0 : i32
    return %c0_i32, %c0_i32_0 : i32, i32
  }
  func.func @transform_3(%arg0: i32) -> (i32, i32) {
    %c0_i32 = arith.constant 0 : i32
    %c0_i32_0 = arith.constant 0 : i32
    %c0_i32_1 = arith.constant 0 : i32
    return %c0_i32, %c0_i32_0 : i32, i32
  }
  func.func @transform_4(%arg0: i32) -> (i32, i32) {
    %c0_i32 = arith.constant 0 : i32
    %c0_i32_0 = arith.constant 0 : i32
    %c0_i32_1 = arith.constant 0 : i32
    return %c0_i32, %c0_i32_0 : i32, i32
  }
  func.func @transform_5(%arg0: i32) -> (i32, i32) {
    %c0_i32 = arith.constant 0 : i32
    %c0_i32_0 = arith.constant 0 : i32
    %c0_i32_1 = arith.constant 0 : i32
    return %c0_i32, %c0_i32_0 : i32, i32
  }
  func.func @transform_6(%arg0: i32) -> (i32, i32) {
    %c0_i32 = arith.constant 0 : i32
    %c0_i32_0 = arith.constant 0 : i32
    %c0_i32_1 = arith.constant 0 : i32
    return %c0_i32, %c0_i32_0 : i32, i32
  }
  func.func @transform_7(%arg0: i32) -> (i32, i32) {
    %c0_i32 = arith.constant 0 : i32
    %c0_i32_0 = arith.constant 0 : i32
    %c0_i32_1 = arith.constant 0 : i32
    return %c0_i32, %c0_i32_0 : i32, i32
  }
  func.func @transform_8(%arg0: i32) -> (i32, i32) {
    %c0_i32 = arith.constant 0 : i32
    %c0_i32_0 = arith.constant 0 : i32
    %c0_i32_1 = arith.constant 0 : i32
    return %c0_i32, %c0_i32_0 : i32, i32
  }
  func.func @transform_9(%arg0: i32) -> (i32, i32) {
    %c0_i32 = arith.constant 0 : i32
    %c0_i32_0 = arith.constant 0 : i32
    return %arg0, %c0_i32 : i32, i32
  }
}

</mosaic_0001>

<bundles_post_ra>
// kernel: lenet_forward.1
= control target key start
LH: loop header
LB: loop body
LE: loop exit
PB: predicated region body
PF: predicated region fallthrough
CT: control target
= control target key end

     0   :  { %14 = vsyncpa [#allocation3], 0  ;;  %s23670_s0 = inlined_call_operand.vmem [shape: f32[16,896], index: 0, kind: input, shape index: {}]   ;;  %s23671_s1 = inlined_call_operand.hbm [shape: bf16[896,2432], index: 1, kind: input, shape index: {}]   ;;  %s23672_s2 = inlined_call_operand.hbm [shape: f32[1,2432], index: 2, kind: input, shape index: {}]   ;;  %s23673_s3 = inlined_call_operand.hbm [shape: bf16[2432,640], index: 3, kind: input, shape index: {}]   ;;  %s23674_s4 = inlined_call_operand.hbm [shape: f32[1,640], index: 4, kind: input, shape index: {}]   ;;  %s23675_s5 = inlined_call_operand.hbm [shape: bf16[640,640], index: 5, kind: input, shape index: {}]   ;;  %s23676_s6 = inlined_call_operand.hbm [shape: f32[1,640], index: 6, kind: input, shape index: {}]   ;;  %s23677_s7 = inlined_call_operand.hbm [shape: bf16[640,128], index: 7, kind: input, shape index: {}]   ;;  %s23678_s8 = inlined_call_operand.hbm [shape: f32[1,128], index: 8, kind: input, shape index: {}]   ;;  %s23679_s9 = inlined_call_operand.vmem [shape: f32[16,128], index: 9, kind: output, shape index: {}]  }
   0x1   :  { %15 = vsyncpa [#allocation5], 0 }
   0x2   :  { %16 = vsyncpa [#allocation8], 0 }
   0x3   :  { %17 = vsyncpa [#allocation11], 0 }
   0x4   :  { %18 = vsyncpa [#allocation14], 0  ;;  %s23090_s30 = smov [#allocation4]   ;;  %s23091_s11 = smov [#allocation7]  }
   0x5   :  { %s39_s10 = sshll.u32 %s23090_s30, 4  ;;  %s61_s12 = sshll.u32 %s23091_s11, 4  ;;  %s40_s10 = int_to_ptr.vmem [resolvable:$true] %s39_s10  ;;  %s62_s12 = int_to_ptr.vmem [resolvable:$true] %s61_s12 }
   0x6   :  { %s22904_s15 = scalar_lea.hbm %s23672_s2, 304 }
   0x7   :  { %p22905_p0 = scmp.ne.s32.totalorder %s23672_s2, %s22904_s15  ;;  %p22908_p1 = scmp.lt.u32.totalorder %s22904_s15, %s23672_s2 }
   0x9   :  { %p22910_p2 = pnand %p22908_p1, %p22905_p0 }
   0xb   :  { %22913 = shalt.err (!%p22910_p2)
}
   0xc   :  { %s22914_s20 = scalar_lea.vmem %s40_s10, 304  ;;  %s22918_s21 = scalar_lea.vmem %s40_s10, 320 }
   0xd   :  { %p22915_p3 = scmp.ne.s32.totalorder %s40_s10, %s22914_s20  ;;  %p22919_p4 = scmp.lt.s32.totalorder %s40_s10, %s40_s10 }
   0xe   :  { %p22920_p5 = scmp.lt.s32.totalorder %s22918_s21, %s22914_s20 }
  0x10   :  { %p22921_p6 = por %p22920_p5, %p22919_p4 }
  0x12   :  { %p22922_p7 = pnand %p22921_p6, %p22915_p3 }
  0x14   :  { %22925 = shalt.err (!%p22922_p7)
}
  0x15   :  { %42 = dma.hbm_to_vmem [thread:$0]  %s23672_s2, 304, %s40_s10, [#allocation5]  }
  0x16   :  { %s22926_s26 = scalar_lea.hbm %s23674_s4, 80 }
  0x17   :  { %p22927_p8 = scmp.ne.s32.totalorder %s23674_s4, %s22926_s26  ;;  %p22930_p9 = scmp.lt.u32.totalorder %s22926_s26, %s23674_s4 }
  0x19   :  { %p22932_p10 = pnand %p22930_p9, %p22927_p8 }
  0x1b   :  { %22935 = shalt.err (!%p22932_p10)
}
  0x1c   :  { %s22936_s11 = scalar_lea.vmem %s62_s12, 80  ;;  %s22940_s13 = scalar_lea.vmem %s62_s12, 96 }
  0x1d   :  { %p22937_p11 = scmp.ne.s32.totalorder %s62_s12, %s22936_s11  ;;  %p22941_p12 = scmp.lt.s32.totalorder %s62_s12, %s62_s12 }
  0x1e   :  { %p22942_p13 = scmp.lt.s32.totalorder %s22940_s13, %s22936_s11 }
  0x20   :  { %p22943_p0 = por %p22942_p13, %p22941_p12 }
  0x22   :  { %p22944_p1 = pnand %p22943_p0, %p22937_p11 }
  0x24   :  { %22947 = shalt.err (!%p22944_p1)
}
  0x25   :  { %64 = dma.hbm_to_vmem [thread:$0]  %s23674_s4, 80, %s62_s12, [#allocation8]  }
  0x26   :  { %s23092_s14 = smov [#allocation10]   ;;  %s23093_s16 = smov [#allocation2]  }
  0x27   :  { %s83_s15 = sshll.u32 %s23092_s14, 4  ;;  %s26_s17 = sshll.u32 %s23093_s16, 4  ;;  %s84_s15 = int_to_ptr.vmem [resolvable:$true] %s83_s15  ;;  %s23181_s17 = int_to_ptr.vmem [resolvable:$true] %s26_s17 }
  0x28   :  { %s22948_s20 = scalar_lea.hbm %s23676_s6, 80 }
  0x29   :  { %p22949_p2 = scmp.ne.s32.totalorder %s23676_s6, %s22948_s20  ;;  %p22952_p3 = scmp.lt.u32.totalorder %s22948_s20, %s23676_s6 }
  0x2b   :  { %p22954_p4 = pnand %p22952_p3, %p22949_p2 }
  0x2d   :  { %22957 = shalt.err (!%p22954_p4)
}
  0x2e   :  { %s22958_s4 = scalar_lea.vmem %s84_s15, 80  ;;  %s22962_s12 = scalar_lea.vmem %s84_s15, 96 }
  0x2f   :  { %p22959_p5 = scmp.ne.s32.totalorder %s84_s15, %s22958_s4  ;;  %p22963_p6 = scmp.lt.s32.totalorder %s84_s15, %s84_s15 }
  0x30   :  { %p22964_p7 = scmp.lt.s32.totalorder %s22962_s12, %s22958_s4 }
  0x32   :  { %p22965_p8 = por %p22964_p7, %p22963_p6 }
  0x34   :  { %p22966_p9 = pnand %p22965_p8, %p22959_p5 }
  0x36   :  { %22969 = shalt.err (!%p22966_p9)
}
  0x37   :  { %86 = dma.hbm_to_vmem [thread:$0]  %s23676_s6, 80, %s84_s15, [#allocation11]  }
  0x38   :  { %s22970_s29 = scalar_lea.hbm %s23671_s1, 136192 }
  0x39   :  { %p22971_p10 = scmp.ne.s32.totalorder %s23671_s1, %s22970_s29  ;;  %p22974_p11 = scmp.lt.u32.totalorder %s22970_s29, %s23671_s1 }
  0x3b   :  { %p22976_p12 = pnand %p22974_p11, %p22971_p10 }
  0x3d   :  { %22979 = shalt.err (!%p22976_p12)
}
  0x3e   :  { %s22980_s10 = scalar_lea.vmem %s23181_s17, 136192  ;;  %p22985_p0 = scmp.lt.s32.totalorder %s23181_s17, %s23181_s17 }
  0x3f   :  { %p22981_p13 = scmp.ne.s32.totalorder %s23181_s17, %s22980_s10  ;;  %p22986_p1 = scmp.lt.s32.totalorder %s22980_s10, %s22980_s10 }
  0x41   :  { %p22987_p2 = por %p22986_p1, %p22985_p0 }
  0x43   :  { %p22988_p3 = pnand %p22987_p2, %p22981_p13 }
  0x45   :  { %22991 = shalt.err (!%p22988_p3)
}
  0x46   :  { %s23094_s6 = smov 1216   ;;  %s23095_s14 = smov 76  }
  0x47   :  { %32 = dma.hbm_to_vmem [thread:$0]  %s23671_s1, 136192, %s23181_s17, [#allocation3], %s23094_s6, %s23094_s6, %s23095_s14  }
  0x48   :  { %s23096_s18 = smov [#allocation6]   ;;  %s22992_s22 = scalar_lea.hbm %s23673_s3, 97280 }
  0x49   :  { %s48_s19 = sshll.u32 %s23096_s18, 4  ;;  %p22993_p4 = scmp.ne.s32.totalorder %s23673_s3, %s22992_s22  ;;  %s49_s19 = int_to_ptr.vmem [resolvable:$true] %s48_s19 }
  0x4a   :  { %p22996_p5 = scmp.lt.u32.totalorder %s22992_s22, %s23673_s3 }
  0x4c   :  { %p22998_p6 = pnand %p22996_p5, %p22993_p4 }
  0x4e   :  { %23001 = shalt.err (!%p22998_p6)
}
  0x4f   :  { %s23002_s25 = scalar_lea.vmem %s49_s19, 97280  ;;  %p23007_p8 = scmp.lt.s32.totalorder %s49_s19, %s49_s19 }
  0x50   :  { %p23003_p7 = scmp.ne.s32.totalorder %s49_s19, %s23002_s25  ;;  %p23008_p9 = scmp.lt.s32.totalorder %s23002_s25, %s23002_s25 }
  0x52   :  { %p23009_p10 = por %p23008_p9, %p23007_p8 }
  0x54   :  { %p23010_p11 = pnand %p23009_p10, %p23003_p7 }
  0x56   :  { %23013 = shalt.err (!%p23010_p11)
}
  0x57   :  { %s23097_s1 = smov 320   ;;  %s23098_s17 = smov 20  }
  0x58   :  { %54 = dma.hbm_to_vmem [thread:$0]  %s23673_s3, 97280, %s49_s19, [#allocation5], %s23097_s1, %s23097_s1, %s23098_s17  }
  0x59   :  { %s23099_s28 = smov [#allocation9]   ;;  %s23100_s30 = smov [#allocation12]  }
  0x5a   :  { %s70_s29 = sshll.u32 %s23099_s28, 4  ;;  %s92_s11 = sshll.u32 %s23100_s30, 4  ;;  %s71_s29 = int_to_ptr.vmem [resolvable:$true] %s70_s29  ;;  %s93_s11 = int_to_ptr.vmem [resolvable:$true] %s92_s11 }
  0x5b   :  { %s23014_s10 = scalar_lea.hbm %s23675_s5, 25600 }
  0x5c   :  { %p23015_p12 = scmp.ne.s32.totalorder %s23675_s5, %s23014_s10  ;;  %p23018_p13 = scmp.lt.u32.totalorder %s23014_s10, %s23675_s5 }
  0x5e   :  { %p23020_p0 = pnand %p23018_p13, %p23015_p12 }
  0x60   :  { %23023 = shalt.err (!%p23020_p0)
}
  0x61   :  { %s23024_s3 = scalar_lea.vmem %s71_s29, 25600  ;;  %p23029_p2 = scmp.lt.s32.totalorder %s71_s29, %s71_s29 }
  0x62   :  { %p23025_p1 = scmp.ne.s32.totalorder %s71_s29, %s23024_s3  ;;  %p23030_p3 = scmp.lt.s32.totalorder %s23024_s3, %s23024_s3 }
  0x64   :  { %p23031_p4 = por %p23030_p3, %p23029_p2 }
  0x66   :  { %p23032_p5 = pnand %p23031_p4, %p23025_p1 }
  0x68   :  { %23035 = shalt.err (!%p23032_p5)
}
  0x69   :  { %76 = dma.hbm_to_vmem [thread:$0]  %s23675_s5, 25600, %s71_s29, [#allocation8], %s23097_s1, %s23097_s1, %s23098_s17  }
  0x6a   :  { %s23036_s22 = scalar_lea.hbm %s23677_s7, 5120 }
  0x6b   :  { %p23037_p6 = scmp.ne.s32.totalorder %s23677_s7, %s23036_s22  ;;  %p23040_p7 = scmp.lt.u32.totalorder %s23036_s22, %s23677_s7 }
  0x6d   :  { %p23042_p8 = pnand %p23040_p7, %p23037_p6 }
  0x6f   :  { %23045 = shalt.err (!%p23042_p8)
}
  0x70   :  { %s23046_s25 = scalar_lea.vmem %s93_s11, 5120  ;;  %p23051_p10 = scmp.lt.s32.totalorder %s93_s11, %s93_s11 }
  0x71   :  { %p23047_p9 = scmp.ne.s32.totalorder %s93_s11, %s23046_s25  ;;  %p23052_p11 = scmp.lt.s32.totalorder %s23046_s25, %s23046_s25 }
  0x73   :  { %p23053_p12 = por %p23052_p11, %p23051_p10 }
  0x75   :  { %p23054_p13 = pnand %p23053_p12, %p23047_p9 }
  0x77   :  { %23057 = shalt.err (!%p23054_p13)
}
  0x78   :  { %s23101_s5 = smov 64   ;;  %s23102_s1 = smov 4  }
  0x79   :  { %98 = dma.hbm_to_vmem [thread:$0]  %s23677_s7, 5120, %s93_s11, [#allocation11], %s23101_s5, %s23101_s5, %s23102_s1  }
  0x7a   :  { %s23103_s27 = smov [#allocation13]   ;;  %s23058_s13 = scalar_lea.hbm %s23678_s8, 16 }
  0x7b   :  { %s105_s28 = sshll.u32 %s23103_s27, 4  ;;  %p23059_p0 = scmp.ne.s32.totalorder %s23678_s8, %s23058_s13  ;;  %s106_s28 = int_to_ptr.vmem [resolvable:$true] %s105_s28 }
  0x7c   :  { %p23062_p1 = scmp.lt.u32.totalorder %s23058_s13, %s23678_s8 }
  0x7e   :  { %p23064_p2 = pnand %p23062_p1, %p23059_p0 }
  0x80   :  { %23067 = shalt.err (!%p23064_p2)
}
  0x81   :  { %s23068_s15 = scalar_lea.vmem %s106_s28, 16  ;;  %s23072_s7 = scalar_lea.vmem %s106_s28, 32 }
  0x82   :  { %p23069_p3 = scmp.ne.s32.totalorder %s106_s28, %s23068_s15  ;;  %p23073_p4 = scmp.lt.s32.totalorder %s106_s28, %s106_s28 }
  0x83   :  { %p23074_p5 = scmp.lt.s32.totalorder %s23072_s7, %s23068_s15 }
  0x85   :  { %p23075_p6 = por %p23074_p5, %p23073_p4 }
  0x87   :  { %p23076_p7 = pnand %p23075_p6, %p23069_p3 }
  0x89   :  { %23079 = shalt.err (!%p23076_p7)
}
  0x8a   :  { %108 = dma.hbm_to_vmem [thread:$0]  %s23678_s8, 16, %s106_s28, [#allocation14]  }
  0x8b   :  { %23080 = dma.done.wait [#allocation3], 136192  }
  0x8c   :  { %23081 = vsyncadd [#allocation3], 4294831104 }
  0x8d   :  { %23082 = dma.done.wait [#allocation5], 97584  }
  0x8e   :  { %23083 = vsyncadd [#allocation5], 4294869712 }
  0x8f   :  { %23084 = dma.done.wait [#allocation8], 25680  }
  0x90   :  { %23085 = vsyncadd [#allocation8], 4294941616 }
  0x91   :  { %23086 = dma.done.wait [#allocation11], 5200  }
  0x92   :  { %23087 = vsyncadd [#allocation11], 4294962096 }
  0x93   :  { %23088 = dma.done.wait [#allocation14], 16  }
  0x94   :  { %23089 = vsyncadd [#allocation14], 4294967280  ;;  %v19833_v0 = vld [vmem:[#allocation2 + $0x4] ss:$76 sps:$4 sm:$0xff]   ;;  %v19835_v1 = vld [vmem:[#allocation2 + $0xc] ss:$76 sps:$4 sm:$0xff]  }
  0x95   :  { %6752 = vmatprep.subr.bf16.mxu0 %v19833_v0  ;;  %v19837_v2 = vld [vmem:[#allocation2] ss:$76 sps:$4 sm:$0xff]   ;;  %v19838_v3 = vld [vmem:[#allocation2 + $0x8] ss:$76 sps:$4 sm:$0xff]   ;;  %6924 = vmatprep.subr.bf16.mxu1 %v19835_v1  ;;  %v19841_v5 = vld [vmem:[#allocation2 + $0xa4] ss:$76 sps:$4 sm:$0xff]  }
  0x96   :  { %v19839_v4 = vld [vmem:[#allocation2 + $0x9c] ss:$76 sps:$4 sm:$0xff]   ;;  %6753 = vmatpush1.bf16.msra.mxu0 %v19837_v2  ;;  %6925 = vmatpush1.bf16.msra.mxu1 %v19838_v3  ;;  %v19843_v6 = vld [vmem:[#allocation2 + $0x98] ss:$76 sps:$4 sm:$0xff]   ;;  %v19844_v7 = vld [vmem:[#allocation2 + $0xa0] ss:$76 sps:$4 sm:$0xff]  }
  0x97   :  { %6754 = vmatprep.subr.bf16.mxu0 %v19839_v4  ;;  %6926 = vmatprep.subr.bf16.mxu1 %v19841_v5  ;;  %v19845_v8 = vld [vmem:[#allocation2 + $0x134] ss:$76 sps:$4 sm:$0xff]   ;;  %v19847_v9 = vld [vmem:[#allocation2 + $0x13c] ss:$76 sps:$4 sm:$0xff]   ;;  %v19850_v11 = vld [vmem:[#allocation2 + $0x138] ss:$76 sps:$4 sm:$0xff]  }
  0x98   :  { %v19849_v10 = vld [vmem:[#allocation2 + $0x130] ss:$76 sps:$4 sm:$0xff]   ;;  %v19851_v12 = vld [vmem:[#allocation2 + $0x1cc] ss:$76 sps:$4 sm:$0xff]   ;;  %v19853_v13 = vld [vmem:[#allocation2 + $0x1d4] ss:$76 sps:$4 sm:$0xff]  }
  0x99   :  { %v19855_v14 = vld [vmem:[#allocation2 + $0x1c8] ss:$76 sps:$4 sm:$0xff]   ;;  %v19856_v15 = vld [vmem:[#allocation2 + $0x1d0] ss:$76 sps:$4 sm:$0xff]   ;;  %v19859_v17 = vld [vmem:[#allocation2 + $0x26c] ss:$76 sps:$4 sm:$0xff]  }
  0x9a   :  { %6755 = vmatpush1.bf16.msra.mxu0 %v19843_v6  ;;  %6927 = vmatpush1.bf16.msra.mxu1 %v19844_v7  ;;  %v19857_v16 = vld [vmem:[#allocation2 + $0x264] ss:$76 sps:$4 sm:$0xff]   ;;  %v19861_v18 = vld [vmem:[#allocation2 + $0x260] ss:$76 sps:$4 sm:$0xff]   ;;  %v19862_v19 = vld [vmem:[#allocation2 + $0x268] ss:$76 sps:$4 sm:$0xff]  }
  0x9b   :  { %6756 = vmatprep.subr.bf16.mxu0 %v19845_v8  ;;  %6928 = vmatprep.subr.bf16.mxu1 %v19847_v9  ;;  %v19863_v20 = vld [vmem:[#allocation2 + $0x2fc] ss:$76 sps:$4 sm:$0xff]   ;;  %v19865_v21 = vld [vmem:[#allocation2 + $0x304] ss:$76 sps:$4 sm:$0xff]   ;;  %v19868_v23 = vld [vmem:[#allocation2 + $0x300] ss:$76 sps:$4 sm:$0xff]  }
  0x9c   :  { %v19867_v22 = vld [vmem:[#allocation2 + $0x2f8] ss:$76 sps:$4 sm:$0xff]   ;;  %v19869_v24 = vld [vmem:[#allocation2 + $0x394] ss:$76 sps:$4 sm:$0xff]   ;;  %v19871_v25 = vld [vmem:[#allocation2 + $0x39c] ss:$76 sps:$4 sm:$0xff]  }
  0x9d   :  { %v19873_v26 = vld [vmem:[#allocation2 + $0x390] ss:$76 sps:$4 sm:$0xff]   ;;  %v19874_v27 = vld [vmem:[#allocation2 + $0x398] ss:$76 sps:$4 sm:$0xff]   ;;  %v19877_v29 = vld [vmem:[#allocation2 + $0x434] ss:$76 sps:$4 sm:$0xff]  }
  0x9e   :  { %6757 = vmatpush1.bf16.msra.mxu0 %v19849_v10  ;;  %6929 = vmatpush1.bf16.msra.mxu1 %v19850_v11  ;;  %v19875_v28 = vld [vmem:[#allocation2 + $0x42c] ss:$76 sps:$4 sm:$0xff]   ;;  %v19879_v30 = vld [vmem:[#allocation2 + $0x428] ss:$76 sps:$4 sm:$0xff]   ;;  %v19880_v31 = vld [vmem:[#allocation2 + $0x430] ss:$76 sps:$4 sm:$0xff]  }
  0x9f   :  { %6758 = vmatprep.subr.bf16.mxu0 %v19851_v12  ;;  %6930 = vmatprep.subr.bf16.mxu1 %v19853_v13  ;;  %v19881_v32 = vld [vmem:[#allocation2 + $0x4c4] ss:$76 sps:$4 sm:$0xff]   ;;  %v19883_v33 = vld [vmem:[#allocation2 + $0x4cc] ss:$76 sps:$4 sm:$0xff]   ;;  %v19886_v35 = vld [vmem:[#allocation2 + $0x4c8] ss:$76 sps:$4 sm:$0xff]  }
  0xa0   :  { %v19885_v34 = vld [vmem:[#allocation2 + $0x4c0] ss:$76 sps:$4 sm:$0xff]   ;;  %v19887_v36 = vld [vmem:[#allocation2 + $0x55c] ss:$76 sps:$4 sm:$0xff]   ;;  %v19889_v37 = vld [vmem:[#allocation2 + $0x564] ss:$76 sps:$4 sm:$0xff]  }
  0xa1   :  { %v19891_v38 = vld [vmem:[#allocation2 + $0x558] ss:$76 sps:$4 sm:$0xff]   ;;  %v19892_v39 = vld [vmem:[#allocation2 + $0x560] ss:$76 sps:$4 sm:$0xff]   ;;  %v19895_v41 = vld [vmem:[#allocation2 + $0x5fc] ss:$76 sps:$4 sm:$0xff]  }
  0xa2   :  { %6759 = vmatpush1.bf16.msra.mxu0 %v19855_v14  ;;  %6931 = vmatpush1.bf16.msra.mxu1 %v19856_v15  ;;  %v19893_v40 = vld [vmem:[#allocation2 + $0x5f4] ss:$76 sps:$4 sm:$0xff]   ;;  %v19897_v42 = vld [vmem:[#allocation2 + $0x5f0] ss:$76 sps:$4 sm:$0xff]   ;;  %v19898_v43 = vld [vmem:[#allocation2 + $0x5f8] ss:$76 sps:$4 sm:$0xff]  }
  0xa3   :  { %6760 = vmatprep.subr.bf16.mxu0 %v19857_v16  ;;  %6932 = vmatprep.subr.bf16.mxu1 %v19859_v17  ;;  %v19899_v44 = vld [vmem:[#allocation2 + $0x68c] ss:$76 sps:$4 sm:$0xff]   ;;  %v19901_v45 = vld [vmem:[#allocation2 + $0x694] ss:$76 sps:$4 sm:$0xff]   ;;  %v19904_v49 = vld [vmem:[#allocation2 + $0x690] ss:$76 sps:$4 sm:$0xff]  }
  0xa4   :  { %v135_v46 = vld [vmem:[%s23670_s0 + $0x8] sm:$0xff]  ;;  %v142_v47 = vld [vmem:[%s23670_s0 + $0x40] sm:$0xff]  ;;  %v19921_v61 = vld [vmem:[#allocation2 + $0x850] ss:$76 sps:$4 sm:$0xff]   ;;  %vm23106_vm0 = vmmov 0  }
  0xa5   :  { %v19903_v48 = vld [vmem:[#allocation2 + $0x688] ss:$76 sps:$4 sm:$0xff]   ;;  %v23266_v50 = vpack.c.bf16 %v142_v47, %v135_v46  ;;  %v19905_v51 = vld [vmem:[#allocation2 + $0x724] ss:$76 sps:$4 sm:$0xff]   ;;  %v19907_v52 = vld [vmem:[#allocation2 + $0x72c] ss:$76 sps:$4 sm:$0xff]  }
  0xa6   :  { %6761 = vmatpush1.bf16.msra.mxu0 %v19861_v18  ;;  %6933 = vmatpush1.bf16.msra.mxu1 %v19862_v19  ;;  %v19909_v53 = vld [vmem:[#allocation2 + $0x720] ss:$76 sps:$4 sm:$0xff]   ;;  %v19910_v54 = vld [vmem:[#allocation2 + $0x728] ss:$76 sps:$4 sm:$0xff]   ;;  %v19913_v56 = vld [vmem:[#allocation2 + $0x7c4] ss:$76 sps:$4 sm:$0xff]  }
  0xa7   :  { %6762 = vmatprep.subr.bf16.mxu0 %v19863_v20  ;;  %6934 = vmatprep.subr.bf16.mxu1 %v19865_v21  ;;  %v19911_v55 = vld [vmem:[#allocation2 + $0x7bc] ss:$76 sps:$4 sm:$0xff]   ;;  %v19915_v57 = vld [vmem:[#allocation2 + $0x7b8] ss:$76 sps:$4 sm:$0xff]   ;;  %v19916_v58 = vld [vmem:[#allocation2 + $0x7c0] ss:$76 sps:$4 sm:$0xff]  }
  0xa8   :  { %6784 = vmatprep.mubr.bf16.mxu0 %v23266_v50  ;;  %6956 = vmatprep.mubr.bf16.mxu1 %v23266_v50  ;;  %v19917_v59 = vld [vmem:[#allocation2 + $0x854] ss:$76 sps:$4 sm:$0xff]   ;;  %v19919_v60 = vld [vmem:[#allocation2 + $0x85c] ss:$76 sps:$4 sm:$0xff]   ;;  %v19922_v62 = vld [vmem:[#allocation2 + $0x858] ss:$76 sps:$4 sm:$0xff]  }
  0xa9   :  { %v19923_v63 = vld [vmem:[#allocation2 + $0x8ec] ss:$76 sps:$4 sm:$0xff]   ;;  %v19925_v0 = vld [vmem:[#allocation2 + $0x8f4] ss:$76 sps:$4 sm:$0xff]   ;;  %v19928_v2 = vld [vmem:[#allocation2 + $0x8f0] ss:$76 sps:$4 sm:$0xff]  }
  0xaa   :  { %6763 = vmatpush1.bf16.msra.mxu0 %v19867_v22  ;;  %6935 = vmatpush1.bf16.msra.mxu1 %v19868_v23  ;;  %v19927_v1 = vld [vmem:[#allocation2 + $0x8e8] ss:$76 sps:$4 sm:$0xff]   ;;  %v19931_v3 = vld [vmem:[#allocation2 + $0x984] ss:$76 sps:$4 sm:$0xff]   ;;  %v141_v5 = vld [vmem:[%s23670_s0 + $0x38] sm:$0xff] }
  0xab   :  { %6764 = vmatprep.subr.bf16.mxu0 %v19869_v24  ;;  %6936 = vmatprep.subr.bf16.mxu1 %v19871_v25  ;;  %v134_v4 = vld [vmem:[%s23670_s0] sm:$0xff]  ;;  %v19934_v6 = vld [vmem:[#allocation2 + $0x98c] ss:$76 sps:$4 sm:$0xff]   ;;  %v19932_v8 = vld [vmem:[#allocation2 + $0x988] ss:$76 sps:$4 sm:$0xff]  }
  0xac   :  { %v19929_v7 = vld [vmem:[#allocation2 + $0x980] ss:$76 sps:$4 sm:$0xff]   ;;  %v23276_v9 = vpack.c.bf16 %v141_v5, %v134_v4  ;;  %v19937_v10 = vld [vmem:[#allocation2 + $0xa1c] ss:$76 sps:$4 sm:$0xff]   ;;  %v19940_v11 = vld [vmem:[#allocation2 + $0xa24] ss:$76 sps:$4 sm:$0xff]  }
  0xad   :  { %v19935_v12 = vld [vmem:[#allocation2 + $0xa18] ss:$76 sps:$4 sm:$0xff]   ;;  %v19938_v13 = vld [vmem:[#allocation2 + $0xa20] ss:$76 sps:$4 sm:$0xff]   ;;  %v19946_v15 = vld [vmem:[#allocation2 + $0xabc] ss:$76 sps:$4 sm:$0xff]  }
  0xae   :  { %6765 = vmatpush1.bf16.msra.mxu0 %v19873_v26  ;;  %6937 = vmatpush1.bf16.msra.mxu1 %v19874_v27  ;;  %v19943_v14 = vld [vmem:[#allocation2 + $0xab4] ss:$76 sps:$4 sm:$0xff]   ;;  %v19941_v16 = vld [vmem:[#allocation2 + $0xab0] ss:$76 sps:$4 sm:$0xff]   ;;  %v19944_v17 = vld [vmem:[#allocation2 + $0xab8] ss:$76 sps:$4 sm:$0xff]  }
  0xaf   :  { %6766 = vmatprep.subr.bf16.mxu0 %v19875_v28  ;;  %6938 = vmatprep.subr.bf16.mxu1 %v19877_v29  ;;  %v19949_v18 = vld [vmem:[#allocation2 + $0xb4c] ss:$76 sps:$4 sm:$0xff]   ;;  %v19952_v19 = vld [vmem:[#allocation2 + $0xb54] ss:$76 sps:$4 sm:$0xff]   ;;  %v19950_v21 = vld [vmem:[#allocation2 + $0xb50] ss:$76 sps:$4 sm:$0xff]  }
  0xb0   :  { %v19947_v20 = vld [vmem:[#allocation2 + $0xb48] ss:$76 sps:$4 sm:$0xff]   ;;  %v19955_v22 = vld [vmem:[#allocation2 + $0xbe4] ss:$76 sps:$4 sm:$0xff]   ;;  %v19958_v23 = vld [vmem:[#allocation2 + $0xbec] ss:$76 sps:$4 sm:$0xff]  }
  0xb1   :  { %v19953_v24 = vld [vmem:[#allocation2 + $0xbe0] ss:$76 sps:$4 sm:$0xff]   ;;  %v19956_v25 = vld [vmem:[#allocation2 + $0xbe8] ss:$76 sps:$4 sm:$0xff]   ;;  %v19964_v27 = vld [vmem:[#allocation2 + $0xc84] ss:$76 sps:$4 sm:$0xff]  }
  0xb2   :  { %6767 = vmatpush1.bf16.msra.mxu0 %v19879_v30  ;;  %6939 = vmatpush1.bf16.msra.mxu1 %v19880_v31  ;;  %v19961_v26 = vld [vmem:[#allocation2 + $0xc7c] ss:$76 sps:$4 sm:$0xff]   ;;  %v19959_v28 = vld [vmem:[#allocation2 + $0xc78] ss:$76 sps:$4 sm:$0xff]   ;;  %v19962_v29 = vld [vmem:[#allocation2 + $0xc80] ss:$76 sps:$4 sm:$0xff]  }
  0xb3   :  { %6768 = vmatprep.subr.bf16.mxu0 %v19881_v32  ;;  %6940 = vmatprep.subr.bf16.mxu1 %v19883_v33  ;;  %v19967_v30 = vld [vmem:[#allocation2 + $0xd14] ss:$76 sps:$4 sm:$0xff]   ;;  %v19970_v31 = vld [vmem:[#allocation2 + $0xd1c] ss:$76 sps:$4 sm:$0xff]   ;;  %v19988_v46 = vld [vmem:[#allocation2 + $0xee4] ss:$76 sps:$4 sm:$0xff]  }
  0xb4   :  { %v137_v32 = vld [vmem:[%s23670_s0 + $0x18] sm:$0xff]  ;;  %v144_v33 = vld [vmem:[%s23670_s0 + $0x50] sm:$0xff] }
  0xb5   :  { %v19983_v47 = vld [vmem:[#allocation2 + $0xed8] ss:$76 sps:$4 sm:$0xff]   ;;  %v20013_v4 = vld [vmem:[#allocation2 + $0x11d0] ss:$76 sps:$4 sm:$0xff]  }
  0xb6   :  { %6769 = vmatpush1.bf16.msra.mxu0 %v19885_v34  ;;  %6941 = vmatpush1.bf16.msra.mxu1 %v19886_v35  ;;  %v19965_v34 = vld [vmem:[#allocation2 + $0xd10] ss:$76 sps:$4 sm:$0xff]   ;;  %v19968_v35 = vld [vmem:[#allocation2 + $0xd18] ss:$76 sps:$4 sm:$0xff]  }
  0xb7   :  { %6770 = vmatprep.subr.bf16.mxu0 %v19887_v36  ;;  %6942 = vmatprep.subr.bf16.mxu1 %v19889_v37  ;;  %v23286_v36 = vpack.c.bf16 %v144_v33, %v137_v32  ;;  %v19973_v37 = vld [vmem:[#allocation2 + $0xdac] ss:$76 sps:$4 sm:$0xff]   ;;  %v20046_v32 = vld [vmem:[#allocation2 + $0x14d0] ss:$76 sps:$4 sm:$0xff]  }
  0xb8   :  { %v20016_v5 = vld [vmem:[#allocation2 + $0x11d8] ss:$76 sps:$4 sm:$0xff]  }
  0xb9   :  { %v20051_v33 = vld [vmem:[#allocation2 + $0x1564] ss:$76 sps:$4 sm:$0xff]  }
  0xba   :  { %6771 = vmatpush1.bf16.msra.mxu0 %v19891_v38  ;;  %6943 = vmatpush1.bf16.msra.mxu1 %v19892_v39  ;;  %v19976_v38 = vld [vmem:[#allocation2 + $0xdb4] ss:$76 sps:$4 sm:$0xff]  }
  0xbb   :  { %6772 = vmatprep.subr.bf16.mxu0 %v19893_v40  ;;  %6944 = vmatprep.subr.bf16.mxu1 %v19895_v41  ;;  %v19971_v39 = vld [vmem:[#allocation2 + $0xda8] ss:$76 sps:$4 sm:$0xff]   ;;  %v19974_v40 = vld [vmem:[#allocation2 + $0xdb0] ss:$76 sps:$4 sm:$0xff]  }
  0xbc   :  { %v19979_v41 = vld [vmem:[#allocation2 + $0xe44] ss:$76 sps:$4 sm:$0xff]  }
  0xbe   :  { %6773 = vmatpush1.bf16.msra.mxu0 %v19897_v42  ;;  %6945 = vmatpush1.bf16.msra.mxu1 %v19898_v43  ;;  %v19982_v42 = vld [vmem:[#allocation2 + $0xe4c] ss:$76 sps:$4 sm:$0xff]  }
  0xbf   :  { %6774 = vmatprep.subr.bf16.mxu0 %v19899_v44  ;;  %6946 = vmatprep.subr.bf16.mxu1 %v19901_v45  ;;  %v19977_v43 = vld [vmem:[#allocation2 + $0xe40] ss:$76 sps:$4 sm:$0xff]   ;;  %v19980_v44 = vld [vmem:[#allocation2 + $0xe48] ss:$76 sps:$4 sm:$0xff]  }
  0xc0   :  { %v19985_v45 = vld [vmem:[#allocation2 + $0xedc] ss:$76 sps:$4 sm:$0xff]  }
  0xc2   :  { %6775 = vmatpush1.bf16.msra.mxu0 %v19903_v48  ;;  %6947 = vmatpush1.bf16.msra.mxu1 %v19904_v49  ;;  %v19986_v48 = vld [vmem:[#allocation2 + $0xee0] ss:$76 sps:$4 sm:$0xff]  }
  0xc3   :  { %6776 = vmatprep.subr.bf16.mxu0 %v19905_v51  ;;  %6948 = vmatprep.subr.bf16.mxu1 %v19907_v52  ;;  %v19991_v49 = vld [vmem:[#allocation2 + $0xf74] ss:$76 sps:$4 sm:$0xff]   ;;  %v19994_v51 = vld [vmem:[#allocation2 + $0xf7c] ss:$76 sps:$4 sm:$0xff]  }
  0xc4   :  { %v19989_v52 = vld [vmem:[#allocation2 + $0xf70] ss:$76 sps:$4 sm:$0xff]  }
  0xc6   :  { %6777 = vmatpush1.bf16.msra.mxu0 %v19909_v53  ;;  %6949 = vmatpush1.bf16.msra.mxu1 %v19910_v54  ;;  %v19992_v53 = vld [vmem:[#allocation2 + $0xf78] ss:$76 sps:$4 sm:$0xff]  }
  0xc7   :  { %6778 = vmatprep.subr.bf16.mxu0 %v19911_v55  ;;  %6950 = vmatprep.subr.bf16.mxu1 %v19913_v56  ;;  %v19997_v54 = vld [vmem:[#allocation2 + $0x100c] ss:$76 sps:$4 sm:$0xff]   ;;  %v20000_v55 = vld [vmem:[#allocation2 + $0x1014] ss:$76 sps:$4 sm:$0xff]  }
  0xc8   :  { %v19995_v56 = vld [vmem:[#allocation2 + $0x1008] ss:$76 sps:$4 sm:$0xff]  }
  0xca   :  { %6779 = vmatpush1.bf16.msra.mxu0 %v19915_v57  ;;  %6951 = vmatpush1.bf16.msra.mxu1 %v19916_v58  ;;  %v19998_v57 = vld [vmem:[#allocation2 + $0x1010] ss:$76 sps:$4 sm:$0xff]  }
  0xcb   :  { %6780 = vmatprep.subr.bf16.mxu0 %v19917_v59  ;;  %6952 = vmatprep.subr.bf16.mxu1 %v19919_v60  ;;  %v20003_v58 = vld [vmem:[#allocation2 + $0x10a4] ss:$76 sps:$4 sm:$0xff]   ;;  %v20006_v59 = vld [vmem:[#allocation2 + $0x10ac] ss:$76 sps:$4 sm:$0xff]  }
  0xcc   :  { %v20001_v60 = vld [vmem:[#allocation2 + $0x10a0] ss:$76 sps:$4 sm:$0xff]  }
  0xce   :  { %6781 = vmatpush1.bf16.msra.mxu0 %v19921_v61  ;;  %6953 = vmatpush1.bf16.msra.mxu1 %v19922_v62  ;;  %v20004_v61 = vld [vmem:[#allocation2 + $0x10a8] ss:$76 sps:$4 sm:$0xff]  }
  0xcf   :  { %6782 = vmatprep.subr.bf16.mxu0 %v19923_v63  ;;  %6954 = vmatprep.subr.bf16.mxu1 %v19925_v0  ;;  %v20009_v62 = vld [vmem:[#allocation2 + $0x113c] ss:$76 sps:$4 sm:$0xff]   ;;  %v20012_v63 = vld [vmem:[#allocation2 + $0x1144] ss:$76 sps:$4 sm:$0xff]  }
  0xd0   :  { %v20007_v0 = vld [vmem:[#allocation2 + $0x1138] ss:$76 sps:$4 sm:$0xff]  }
  0xd2   :  { %6783 = vmatpush1.bf16.msra.mxu0 %v19927_v1  ;;  %6955 = vmatpush1.bf16.msra.mxu1 %v19928_v2  ;;  %v20010_v1 = vld [vmem:[#allocation2 + $0x1140] ss:$76 sps:$4 sm:$0xff]  }
  0xd3   :  { %6795 = vmatprep.subr.bf16.mxu0 %v19931_v3  ;;  %6967 = vmatprep.subr.bf16.mxu1 %v19934_v6  ;;  %v20015_v2 = vld [vmem:[#allocation2 + $0x11d4] ss:$76 sps:$4 sm:$0xff]   ;;  %v20018_v3 = vld [vmem:[#allocation2 + $0x11dc] ss:$76 sps:$4 sm:$0xff]   ;;  %v20021_v6 = vld [vmem:[#allocation2 + $0x126c] ss:$76 sps:$4 sm:$0xff]  }
  0xd5   :  { %6785 = vmatmul.mubr.bf16.vlgmr.msra.gmra.mrb[0].mxu0 %v23276_v9  ;;  %6957 = vmatmul.mubr.bf16.vlgmr.msra.gmra.mrb[0].mxu1 %v23276_v9 }
  0xd6   :  { %6796 = vmatpush1.bf16.msra.mxu0 %v19929_v7  ;;  %6968 = vmatpush1.bf16.msra.mxu1 %v19932_v8  ;;  %v20024_v7 = vld [vmem:[#allocation2 + $0x1274] ss:$76 sps:$4 sm:$0xff]  }
  0xd7   :  { %6797 = vmatprep.subr.bf16.mxu0 %v19937_v10  ;;  %6969 = vmatprep.subr.bf16.mxu1 %v19940_v11  ;;  %v20019_v8 = vld [vmem:[#allocation2 + $0x1268] ss:$76 sps:$4 sm:$0xff]   ;;  %v20022_v10 = vld [vmem:[#allocation2 + $0x1270] ss:$76 sps:$4 sm:$0xff]  }
  0xd8   :  { %6827 = vmatprep.mubr.bf16.mxu0 %v23286_v36  ;;  %6999 = vmatprep.mubr.bf16.mxu1 %v23286_v36  ;;  %v20027_v11 = vld [vmem:[#allocation2 + $0x1304] ss:$76 sps:$4 sm:$0xff]  }
  0xda   :  { %6798 = vmatpush1.bf16.msra.mxu0 %v19935_v12  ;;  %6970 = vmatpush1.bf16.msra.mxu1 %v19938_v13  ;;  %v136_v12 = vld [vmem:[%s23670_s0 + $0x10] sm:$0xff]  ;;  %v143_v13 = vld [vmem:[%s23670_s0 + $0x48] sm:$0xff] }
  0xdb   :  { %6799 = vmatprep.subr.bf16.mxu0 %v19943_v14  ;;  %6971 = vmatprep.subr.bf16.mxu1 %v19946_v15  ;;  %v20030_v14 = vld [vmem:[#allocation2 + $0x130c] ss:$76 sps:$4 sm:$0xff]  }
  0xdc   :  { %v20025_v15 = vld [vmem:[#allocation2 + $0x1300] ss:$76 sps:$4 sm:$0xff]  }
  0xde   :  { %6800 = vmatpush1.bf16.msra.mxu0 %v19941_v16  ;;  %6972 = vmatpush1.bf16.msra.mxu1 %v19944_v17  ;;  %v20028_v16 = vld [vmem:[#allocation2 + $0x1308] ss:$76 sps:$4 sm:$0xff]   ;;  %v23296_v17 = vpack.c.bf16 %v143_v13, %v136_v12 }
  0xdf   :  { %6801 = vmatprep.subr.bf16.mxu0 %v19949_v18  ;;  %6973 = vmatprep.subr.bf16.mxu1 %v19952_v19  ;;  %v20033_v18 = vld [vmem:[#allocation2 + $0x139c] ss:$76 sps:$4 sm:$0xff]   ;;  %v20036_v19 = vld [vmem:[#allocation2 + $0x13a4] ss:$76 sps:$4 sm:$0xff]   ;;  %v20111_v12 = vld [vmem:[#allocation2 + $0x1b54] ss:$76 sps:$4 sm:$0xff]  }
  0xe0   :  { %v20114_v13 = vld [vmem:[#allocation2 + $0x1b5c] ss:$76 sps:$4 sm:$0xff]  }
  0xe2   :  { %6802 = vmatpush1.bf16.msra.mxu0 %v19947_v20  ;;  %6974 = vmatpush1.bf16.msra.mxu1 %v19950_v21  ;;  %v139_v20 = vld [vmem:[%s23670_s0 + $0x28] sm:$0xff]  ;;  %v146_v21 = vld [vmem:[%s23670_s0 + $0x60] sm:$0xff] }
  0xe3   :  { %6803 = vmatprep.subr.bf16.mxu0 %v19955_v22  ;;  %6975 = vmatprep.subr.bf16.mxu1 %v19958_v23  ;;  %v20031_v22 = vld [vmem:[#allocation2 + $0x1398] ss:$76 sps:$4 sm:$0xff]   ;;  %v20034_v23 = vld [vmem:[#allocation2 + $0x13a0] ss:$76 sps:$4 sm:$0xff]  }
  0xe6   :  { %6804 = vmatpush1.bf16.msra.mxu0 %v19953_v24  ;;  %6976 = vmatpush1.bf16.msra.mxu1 %v19956_v25  ;;  %v23306_v24 = vpack.c.bf16 %v146_v21, %v139_v20  ;;  %v20039_v25 = vld [vmem:[#allocation2 + $0x1434] ss:$76 sps:$4 sm:$0xff]   ;;  %v20118_v20 = vld [vmem:[#allocation2 + $0x1bf0] ss:$76 sps:$4 sm:$0xff]  }
  0xe7   :  { %6805 = vmatprep.subr.bf16.mxu0 %v19961_v26  ;;  %6977 = vmatprep.subr.bf16.mxu1 %v19964_v27  ;;  %v20042_v26 = vld [vmem:[#allocation2 + $0x143c] ss:$76 sps:$4 sm:$0xff]   ;;  %v138_v21 = vld [vmem:[%s23670_s0 + $0x20] sm:$0xff] }
  0xe8   :  { %v20037_v27 = vld [vmem:[#allocation2 + $0x1430] ss:$76 sps:$4 sm:$0xff]  }
  0xea   :  { %6806 = vmatpush1.bf16.msra.mxu0 %v19959_v28  ;;  %6978 = vmatpush1.bf16.msra.mxu1 %v19962_v29  ;;  %v20040_v28 = vld [vmem:[#allocation2 + $0x1438] ss:$76 sps:$4 sm:$0xff]  }
  0xeb   :  { %6807 = vmatprep.subr.bf16.mxu0 %v19967_v30  ;;  %6979 = vmatprep.subr.bf16.mxu1 %v19970_v31  ;;  %v20045_v29 = vld [vmem:[#allocation2 + $0x14cc] ss:$76 sps:$4 sm:$0xff]   ;;  %v20048_v30 = vld [vmem:[#allocation2 + $0x14d4] ss:$76 sps:$4 sm:$0xff]  }
  0xec   :  { %v20043_v31 = vld [vmem:[#allocation2 + $0x14c8] ss:$76 sps:$4 sm:$0xff]  }
  0xee   :  { %6808 = vmatpush1.bf16.msra.mxu0 %v19965_v34  ;;  %6980 = vmatpush1.bf16.msra.mxu1 %v19968_v35  ;;  %v20054_v34 = vld [vmem:[#allocation2 + $0x156c] ss:$76 sps:$4 sm:$0xff]  }
  0xef   :  { %6809 = vmatprep.subr.bf16.mxu0 %v19973_v37  ;;  %6981 = vmatprep.subr.bf16.mxu1 %v19976_v38  ;;  %v20049_v35 = vld [vmem:[#allocation2 + $0x1560] ss:$76 sps:$4 sm:$0xff]   ;;  %v20052_v37 = vld [vmem:[#allocation2 + $0x1568] ss:$76 sps:$4 sm:$0xff]  }
  0xf0   :  { %v20057_v38 = vld [vmem:[#allocation2 + $0x15fc] ss:$76 sps:$4 sm:$0xff]  }
  0xf2   :  { %6810 = vmatpush1.bf16.msra.mxu0 %v19971_v39  ;;  %6982 = vmatpush1.bf16.msra.mxu1 %v19974_v40  ;;  %v20060_v39 = vld [vmem:[#allocation2 + $0x1604] ss:$76 sps:$4 sm:$0xff]  }
  0xf3   :  { %6811 = vmatprep.subr.bf16.mxu0 %v19979_v41  ;;  %6983 = vmatprep.subr.bf16.mxu1 %v19982_v42  ;;  %v20055_v40 = vld [vmem:[#allocation2 + $0x15f8] ss:$76 sps:$4 sm:$0xff]   ;;  %v20058_v41 = vld [vmem:[#allocation2 + $0x1600] ss:$76 sps:$4 sm:$0xff]  }
  0xf4   :  { %v20063_v42 = vld [vmem:[#allocation2 + $0x1694] ss:$76 sps:$4 sm:$0xff]  }
  0xf6   :  { %6812 = vmatpush1.bf16.msra.mxu0 %v19977_v43  ;;  %6984 = vmatpush1.bf16.msra.mxu1 %v19980_v44  ;;  %v20066_v43 = vld [vmem:[#allocation2 + $0x169c] ss:$76 sps:$4 sm:$0xff]  }
  0xf7   :  { %6813 = vmatprep.subr.bf16.mxu0 %v19985_v45  ;;  %6985 = vmatprep.subr.bf16.mxu1 %v19988_v46  ;;  %v20061_v44 = vld [vmem:[#allocation2 + $0x1690] ss:$76 sps:$4 sm:$0xff]   ;;  %v20064_v45 = vld [vmem:[#allocation2 + $0x1698] ss:$76 sps:$4 sm:$0xff]  }
  0xf8   :  { %v20069_v46 = vld [vmem:[#allocation2 + $0x172c] ss:$76 sps:$4 sm:$0xff]  }
  0xfa   :  { %6814 = vmatpush1.bf16.msra.mxu0 %v19983_v47  ;;  %6986 = vmatpush1.bf16.msra.mxu1 %v19986_v48  ;;  %v20072_v47 = vld [vmem:[#allocation2 + $0x1734] ss:$76 sps:$4 sm:$0xff]  }
  0xfb   :  { %6815 = vmatprep.subr.bf16.mxu0 %v19991_v49  ;;  %6987 = vmatprep.subr.bf16.mxu1 %v19994_v51  ;;  %v20067_v48 = vld [vmem:[#allocation2 + $0x1728] ss:$76 sps:$4 sm:$0xff]   ;;  %v20070_v49 = vld [vmem:[#allocation2 + $0x1730] ss:$76 sps:$4 sm:$0xff]  }
  0xfc   :  { %v20075_v51 = vld [vmem:[#allocation2 + $0x17c4] ss:$76 sps:$4 sm:$0xff]  }
  0xfe   :  { %6816 = vmatpush1.bf16.msra.mxu0 %v19989_v52  ;;  %6988 = vmatpush1.bf16.msra.mxu1 %v19992_v53  ;;  %v20078_v52 = vld [vmem:[#allocation2 + $0x17cc] ss:$76 sps:$4 sm:$0xff]  }
  0xff   :  { %6817 = vmatprep.subr.bf16.mxu0 %v19997_v54  ;;  %6989 = vmatprep.subr.bf16.mxu1 %v20000_v55  ;;  %v20073_v53 = vld [vmem:[#allocation2 + $0x17c0] ss:$76 sps:$4 sm:$0xff]   ;;  %v20076_v54 = vld [vmem:[#allocation2 + $0x17c8] ss:$76 sps:$4 sm:$0xff]  }
 0x100   :  { %v20081_v55 = vld [vmem:[#allocation2 + $0x185c] ss:$76 sps:$4 sm:$0xff]  }
 0x102   :  { %6818 = vmatpush1.bf16.msra.mxu0 %v19995_v56  ;;  %6990 = vmatpush1.bf16.msra.mxu1 %v19998_v57  ;;  %v20084_v56 = vld [vmem:[#allocation2 + $0x1864] ss:$76 sps:$4 sm:$0xff]  }
 0x103   :  { %6819 = vmatprep.subr.bf16.mxu0 %v20003_v58  ;;  %6991 = vmatprep.subr.bf16.mxu1 %v20006_v59  ;;  %v20079_v57 = vld [vmem:[#allocation2 + $0x1858] ss:$76 sps:$4 sm:$0xff]   ;;  %v20082_v58 = vld [vmem:[#allocation2 + $0x1860] ss:$76 sps:$4 sm:$0xff]  }
 0x104   :  { %v20087_v59 = vld [vmem:[#allocation2 + $0x18f4] ss:$76 sps:$4 sm:$0xff]  }
 0x106   :  { %6820 = vmatpush1.bf16.msra.mxu0 %v20001_v60  ;;  %6992 = vmatpush1.bf16.msra.mxu1 %v20004_v61  ;;  %v20090_v60 = vld [vmem:[#allocation2 + $0x18fc] ss:$76 sps:$4 sm:$0xff]  }
 0x107   :  { %6821 = vmatprep.subr.bf16.mxu0 %v20009_v62  ;;  %6993 = vmatprep.subr.bf16.mxu1 %v20012_v63  ;;  %v20085_v61 = vld [vmem:[#allocation2 + $0x18f0] ss:$76 sps:$4 sm:$0xff]   ;;  %v20088_v62 = vld [vmem:[#allocation2 + $0x18f8] ss:$76 sps:$4 sm:$0xff]  }
 0x108   :  { %v20093_v63 = vld [vmem:[#allocation2 + $0x198c] ss:$76 sps:$4 sm:$0xff]  }
 0x10a   :  { %6822 = vmatpush1.bf16.msra.mxu0 %v20007_v0  ;;  %6994 = vmatpush1.bf16.msra.mxu1 %v20010_v1  ;;  %v20096_v0 = vld [vmem:[#allocation2 + $0x1994] ss:$76 sps:$4 sm:$0xff]  }
 0x10b   :  { %6823 = vmatprep.subr.bf16.mxu0 %v20015_v2  ;;  %6995 = vmatprep.subr.bf16.mxu1 %v20018_v3  ;;  %v20091_v1 = vld [vmem:[#allocation2 + $0x1988] ss:$76 sps:$4 sm:$0xff]   ;;  %v20094_v2 = vld [vmem:[#allocation2 + $0x1990] ss:$76 sps:$4 sm:$0xff]  }
 0x10c   :  { %v20099_v3 = vld [vmem:[#allocation2 + $0x1a24] ss:$76 sps:$4 sm:$0xff]  }
 0x10e   :  { %6824 = vmatpush1.bf16.msra.mxu0 %v20013_v4  ;;  %6996 = vmatpush1.bf16.msra.mxu1 %v20016_v5  ;;  %v20102_v4 = vld [vmem:[#allocation2 + $0x1a2c] ss:$76 sps:$4 sm:$0xff]  }
 0x10f   :  { %6825 = vmatprep.subr.bf16.mxu0 %v20021_v6  ;;  %6997 = vmatprep.subr.bf16.mxu1 %v20024_v7  ;;  %v20097_v5 = vld [vmem:[#allocation2 + $0x1a20] ss:$76 sps:$4 sm:$0xff]   ;;  %v20100_v6 = vld [vmem:[#allocation2 + $0x1a28] ss:$76 sps:$4 sm:$0xff]  }
 0x110   :  { %v20105_v7 = vld [vmem:[#allocation2 + $0x1abc] ss:$76 sps:$4 sm:$0xff]  }
 0x112   :  { %6826 = vmatpush1.bf16.msra.mxu0 %v20019_v8  ;;  %6998 = vmatpush1.bf16.msra.mxu1 %v20022_v10  ;;  %v20108_v8 = vld [vmem:[#allocation2 + $0x1ac4] ss:$76 sps:$4 sm:$0xff]  }
 0x113   :  { %6838 = vmatprep.subr.bf16.mxu0 %v20027_v11  ;;  %7010 = vmatprep.subr.bf16.mxu1 %v20030_v14  ;;  %v20103_v10 = vld [vmem:[#allocation2 + $0x1ab8] ss:$76 sps:$4 sm:$0xff]   ;;  %v20106_v11 = vld [vmem:[#allocation2 + $0x1ac0] ss:$76 sps:$4 sm:$0xff]   ;;  %v20109_v14 = vld [vmem:[#allocation2 + $0x1b50] ss:$76 sps:$4 sm:$0xff]  }
 0x115   :  { %6828 = vmatmul.mubr.bf16.vlgmr.msra.gmra.mrb[0].mxu0 %v23296_v17  ;;  %7000 = vmatmul.mubr.bf16.vlgmr.msra.gmra.mrb[0].mxu1 %v23296_v17 }
 0x116   :  { %6839 = vmatpush1.bf16.msra.mxu0 %v20025_v15  ;;  %7011 = vmatpush1.bf16.msra.mxu1 %v20028_v16  ;;  %v20112_v15 = vld [vmem:[#allocation2 + $0x1b58] ss:$76 sps:$4 sm:$0xff]  }
 0x117   :  { %6840 = vmatprep.subr.bf16.mxu0 %v20033_v18  ;;  %7012 = vmatprep.subr.bf16.mxu1 %v20036_v19  ;;  %v20117_v16 = vld [vmem:[#allocation2 + $0x1bec] ss:$76 sps:$4 sm:$0xff]   ;;  %v20120_v18 = vld [vmem:[#allocation2 + $0x1bf4] ss:$76 sps:$4 sm:$0xff]  }
 0x118   :  { %6870 = vmatprep.mubr.bf16.mxu0 %v23306_v24  ;;  %7042 = vmatprep.mubr.bf16.mxu1 %v23306_v24  ;;  %v20115_v19 = vld [vmem:[#allocation2 + $0x1be8] ss:$76 sps:$4 sm:$0xff]  }
 0x11a   :  { %6841 = vmatpush1.bf16.msra.mxu0 %v20031_v22  ;;  %7013 = vmatpush1.bf16.msra.mxu1 %v20034_v23  ;;  %v145_v22 = vld [vmem:[%s23670_s0 + $0x58] sm:$0xff]  ;;  %v20123_v23 = vld [vmem:[#allocation2 + $0x1c84] ss:$76 sps:$4 sm:$0xff]  }
 0x11b   :  { %6842 = vmatprep.subr.bf16.mxu0 %v20039_v25  ;;  %7014 = vmatprep.subr.bf16.mxu1 %v20042_v26  ;;  %v20126_v25 = vld [vmem:[#allocation2 + $0x1c8c] ss:$76 sps:$4 sm:$0xff]   ;;  %v23316_v26 = vpack.c.bf16 %v145_v22, %v138_v21  ;;  %v20204_v22 = vld [vmem:[#allocation2 + $0x314] ss:$76 sps:$4 sm:$0xff]  }
 0x11c   :  { %v20201_v21 = vld [vmem:[#allocation2 + $0x30c] ss:$76 sps:$4 sm:$0xff]  }
 0x11e   :  { %6843 = vmatpush1.bf16.msra.mxu0 %v20037_v27  ;;  %7015 = vmatpush1.bf16.msra.mxu1 %v20040_v28  ;;  %v20121_v27 = vld [vmem:[#allocation2 + $0x1c80] ss:$76 sps:$4 sm:$0xff]   ;;  %v20124_v28 = vld [vmem:[#allocation2 + $0x1c88] ss:$76 sps:$4 sm:$0xff]  }
 0x11f   :  { %6844 = vmatprep.subr.bf16.mxu0 %v20045_v29  ;;  %7016 = vmatprep.subr.bf16.mxu1 %v20048_v30  ;;  %v20129_v29 = vld [vmem:[#allocation2 + $0x1d1c] ss:$76 sps:$4 sm:$0xff]   ;;  %v20132_v30 = vld [vmem:[#allocation2 + $0x1d24] ss:$76 sps:$4 sm:$0xff]  }
 0x122   :  { %6845 = vmatpush1.bf16.msra.mxu0 %v20043_v31  ;;  %7017 = vmatpush1.bf16.msra.mxu1 %v20046_v32  ;;  %v20127_v31 = vld [vmem:[#allocation2 + $0x1d18] ss:$76 sps:$4 sm:$0xff]   ;;  %v20130_v32 = vld [vmem:[#allocation2 + $0x1d20] ss:$76 sps:$4 sm:$0xff]  }
 0x123   :  { %6846 = vmatprep.subr.bf16.mxu0 %v20051_v33  ;;  %7018 = vmatprep.subr.bf16.mxu1 %v20054_v34  ;;  %v20135_v33 = vld [vmem:[#allocation2 + $0x1db4] ss:$76 sps:$4 sm:$0xff]   ;;  %v20138_v34 = vld [vmem:[#allocation2 + $0x1dbc] ss:$76 sps:$4 sm:$0xff]  }
 0x126   :  { %6847 = vmatpush1.bf16.msra.mxu0 %v20049_v35  ;;  %7019 = vmatpush1.bf16.msra.mxu1 %v20052_v37  ;;  %v23104_v35 = vmov 0   ;;  %v20133_v37 = vld [vmem:[#allocation2 + $0x1db0] ss:$76 sps:$4 sm:$0xff]  }
 0x127   :  { %6848 = vmatprep.subr.bf16.mxu0 %v20057_v38  ;;  %7020 = vmatprep.subr.bf16.mxu1 %v20060_v39  ;;  %v20136_v38 = vld [vmem:[#allocation2 + $0x1db8] ss:$76 sps:$4 sm:$0xff]  }
 0x128   :  { %v20141_v39 = vld [vmem:[#allocation2 + $0x1e4c] ss:$76 sps:$4 sm:$0xff]  }
 0x12a   :  { %6849 = vmatpush1.bf16.msra.mxu0 %v20055_v40  ;;  %7021 = vmatpush1.bf16.msra.mxu1 %v20058_v41  ;;  %v20144_v40 = vld [vmem:[#allocation2 + $0x1e54] ss:$76 sps:$4 sm:$0xff]  }
 0x12b   :  { %6850 = vmatprep.subr.bf16.mxu0 %v20063_v42  ;;  %7022 = vmatprep.subr.bf16.mxu1 %v20066_v43  ;;  %v20139_v41 = vld [vmem:[#allocation2 + $0x1e48] ss:$76 sps:$4 sm:$0xff]   ;;  %v20142_v42 = vld [vmem:[#allocation2 + $0x1e50] ss:$76 sps:$4 sm:$0xff]  }
 0x12c   :  { %v20147_v43 = vld [vmem:[#allocation2 + $0x1ee4] ss:$76 sps:$4 sm:$0xff]  }
 0x12e   :  { %6851 = vmatpush1.bf16.msra.mxu0 %v20061_v44  ;;  %7023 = vmatpush1.bf16.msra.mxu1 %v20064_v45  ;;  %v20150_v44 = vld [vmem:[#allocation2 + $0x1eec] ss:$76 sps:$4 sm:$0xff]  }
 0x12f   :  { %6852 = vmatprep.subr.bf16.mxu0 %v20069_v46  ;;  %7024 = vmatprep.subr.bf16.mxu1 %v20072_v47  ;;  %v20145_v45 = vld [vmem:[#allocation2 + $0x1ee0] ss:$76 sps:$4 sm:$0xff]   ;;  %v20148_v46 = vld [vmem:[#allocation2 + $0x1ee8] ss:$76 sps:$4 sm:$0xff]  }
 0x130   :  { %v20153_v47 = vld [vmem:[#allocation2 + $0x1f7c] ss:$76 sps:$4 sm:$0xff]  }
 0x132   :  { %6853 = vmatpush1.bf16.msra.mxu0 %v20067_v48  ;;  %7025 = vmatpush1.bf16.msra.mxu1 %v20070_v49  ;;  %v20156_v48 = vld [vmem:[#allocation2 + $0x1f84] ss:$76 sps:$4 sm:$0xff]  }
 0x133   :  { %6854 = vmatprep.subr.bf16.mxu0 %v20075_v51  ;;  %7026 = vmatprep.subr.bf16.mxu1 %v20078_v52  ;;  %v20151_v49 = vld [vmem:[#allocation2 + $0x1f78] ss:$76 sps:$4 sm:$0xff]   ;;  %v20154_v51 = vld [vmem:[#allocation2 + $0x1f80] ss:$76 sps:$4 sm:$0xff]  }
 0x134   :  { %v20159_v52 = vld [vmem:[#allocation2 + $0x2014] ss:$76 sps:$4 sm:$0xff]  }
 0x136   :  { %6855 = vmatpush1.bf16.msra.mxu0 %v20073_v53  ;;  %7027 = vmatpush1.bf16.msra.mxu1 %v20076_v54  ;;  %v20162_v53 = vld [vmem:[#allocation2 + $0x201c] ss:$76 sps:$4 sm:$0xff]  }
 0x137   :  { %6856 = vmatprep.subr.bf16.mxu0 %v20081_v55  ;;  %7028 = vmatprep.subr.bf16.mxu1 %v20084_v56  ;;  %v20157_v54 = vld [vmem:[#allocation2 + $0x2010] ss:$76 sps:$4 sm:$0xff]   ;;  %v20160_v55 = vld [vmem:[#allocation2 + $0x2018] ss:$76 sps:$4 sm:$0xff]  }
 0x138   :  { %v20165_v56 = vld [vmem:[#allocation2 + $0x20ac] ss:$76 sps:$4 sm:$0xff]  }
 0x13a   :  { %6857 = vmatpush1.bf16.msra.mxu0 %v20079_v57  ;;  %7029 = vmatpush1.bf16.msra.mxu1 %v20082_v58  ;;  %v20168_v57 = vld [vmem:[#allocation2 + $0x20b4] ss:$76 sps:$4 sm:$0xff]  }
 0x13b   :  { %6858 = vmatprep.subr.bf16.mxu0 %v20087_v59  ;;  %7030 = vmatprep.subr.bf16.mxu1 %v20090_v60  ;;  %v20163_v58 = vld [vmem:[#allocation2 + $0x20a8] ss:$76 sps:$4 sm:$0xff]   ;;  %v20166_v59 = vld [vmem:[#allocation2 + $0x20b0] ss:$76 sps:$4 sm:$0xff]  }
 0x13c   :  { %v140_v60 = vld [vmem:[%s23670_s0 + $0x30] sm:$0xff] }
 0x13e   :  { %6859 = vmatpush1.bf16.msra.mxu0 %v20085_v61  ;;  %7031 = vmatpush1.bf16.msra.mxu1 %v20088_v62  ;;  %v147_v61 = vld [vmem:[%s23670_s0 + $0x68] sm:$0xff]  ;;  %v20171_v62 = vld [vmem:[#allocation2 + $0x14] ss:$76 sps:$4 sm:$0xff]  }
 0x13f   :  { %6860 = vmatprep.subr.bf16.mxu0 %v20093_v63  ;;  %7032 = vmatprep.subr.bf16.mxu1 %v20096_v0  ;;  %v20174_v63 = vld [vmem:[#allocation2 + $0x1c] ss:$76 sps:$4 sm:$0xff]   ;;  %v23328_v0 = vpack.c.bf16 %v147_v61, %v140_v60 }
 0x140   :  { %v20247_v60 = vld [vmem:[#allocation2 + $0x7c8] ss:$76 sps:$4 sm:$0xff]   ;;  %v20250_v61 = vld [vmem:[#allocation2 + $0x7d0] ss:$76 sps:$4 sm:$0xff]  }
 0x142   :  { %6861 = vmatpush1.bf16.msra.mxu0 %v20091_v1  ;;  %7033 = vmatpush1.bf16.msra.mxu1 %v20094_v2  ;;  %v20169_v1 = vld [vmem:[#allocation2 + $0x10] ss:$76 sps:$4 sm:$0xff]   ;;  %v20172_v2 = vld [vmem:[#allocation2 + $0x18] ss:$76 sps:$4 sm:$0xff]  }
 0x143   :  { %6862 = vmatprep.subr.bf16.mxu0 %v20099_v3  ;;  %7034 = vmatprep.subr.bf16.mxu1 %v20102_v4  ;;  %v20177_v3 = vld [vmem:[#allocation2 + $0xac] ss:$76 sps:$4 sm:$0xff]   ;;  %v20180_v4 = vld [vmem:[#allocation2 + $0xb4] ss:$76 sps:$4 sm:$0xff]  }
 0x146   :  { %6863 = vmatpush1.bf16.msra.mxu0 %v20097_v5  ;;  %7035 = vmatpush1.bf16.msra.mxu1 %v20100_v6  ;;  %v20175_v5 = vld [vmem:[#allocation2 + $0xa8] ss:$76 sps:$4 sm:$0xff]   ;;  %v20178_v6 = vld [vmem:[#allocation2 + $0xb0] ss:$76 sps:$4 sm:$0xff]  }
 0x147   :  { %6864 = vmatprep.subr.bf16.mxu0 %v20105_v7  ;;  %7036 = vmatprep.subr.bf16.mxu1 %v20108_v8  ;;  %v20183_v7 = vld [vmem:[#allocation2 + $0x144] ss:$76 sps:$4 sm:$0xff]   ;;  %v20186_v8 = vld [vmem:[#allocation2 + $0x14c] ss:$76 sps:$4 sm:$0xff]  }
 0x14a   :  { %6865 = vmatpush1.bf16.msra.mxu0 %v20103_v10  ;;  %7037 = vmatpush1.bf16.msra.mxu1 %v20106_v11  ;;  %v20181_v10 = vld [vmem:[#allocation2 + $0x140] ss:$76 sps:$4 sm:$0xff]   ;;  %v20184_v11 = vld [vmem:[#allocation2 + $0x148] ss:$76 sps:$4 sm:$0xff]  }
 0x14b   :  { %6866 = vmatprep.subr.bf16.mxu0 %v20111_v12  ;;  %7038 = vmatprep.subr.bf16.mxu1 %v20114_v13  ;;  %v20189_v12 = vld [vmem:[#allocation2 + $0x1dc] ss:$76 sps:$4 sm:$0xff]   ;;  %v20192_v13 = vld [vmem:[#allocation2 + $0x1e4] ss:$76 sps:$4 sm:$0xff]  }
 0x14e   :  { %6867 = vmatpush1.bf16.msra.mxu0 %v20109_v14  ;;  %7039 = vmatpush1.bf16.msra.mxu1 %v20112_v15  ;;  %v20187_v14 = vld [vmem:[#allocation2 + $0x1d8] ss:$76 sps:$4 sm:$0xff]   ;;  %v20190_v15 = vld [vmem:[#allocation2 + $0x1e0] ss:$76 sps:$4 sm:$0xff]  }
 0x14f   :  { %6868 = vmatprep.subr.bf16.mxu0 %v20117_v16  ;;  %7040 = vmatprep.subr.bf16.mxu1 %v20120_v18  ;;  %v20195_v16 = vld [vmem:[#allocation2 + $0x274] ss:$76 sps:$4 sm:$0xff]   ;;  %v20198_v18 = vld [vmem:[#allocation2 + $0x27c] ss:$76 sps:$4 sm:$0xff]  }
 0x152   :  { %6869 = vmatpush1.bf16.msra.mxu0 %v20115_v19  ;;  %7041 = vmatpush1.bf16.msra.mxu1 %v20118_v20  ;;  %v20193_v19 = vld [vmem:[#allocation2 + $0x270] ss:$76 sps:$4 sm:$0xff]   ;;  %v20196_v20 = vld [vmem:[#allocation2 + $0x278] ss:$76 sps:$4 sm:$0xff]  }
 0x153   :  { %6881 = vmatprep.subr.bf16.mxu0 %v20123_v23  ;;  %7053 = vmatprep.subr.bf16.mxu1 %v20126_v25  ;;  %v20199_v23 = vld [vmem:[#allocation2 + $0x308] ss:$76 sps:$4 sm:$0xff]   ;;  %v20202_v25 = vld [vmem:[#allocation2 + $0x310] ss:$76 sps:$4 sm:$0xff]  }
 0x155   :  { %6871 = vmatmul.mubr.bf16.vlgmr.msra.gmra.mrb[0].mxu0 %v23316_v26  ;;  %7043 = vmatmul.mubr.bf16.vlgmr.msra.gmra.mrb[0].mxu1 %v23316_v26 }
 0x156   :  { %6882 = vmatpush1.bf16.msra.mxu0 %v20121_v27  ;;  %7054 = vmatpush1.bf16.msra.mxu1 %v20124_v28  ;;  %v20207_v27 = vld [vmem:[#allocation2 + $0x3a4] ss:$76 sps:$4 sm:$0xff]   ;;  %v20210_v28 = vld [vmem:[#allocation2 + $0x3ac] ss:$76 sps:$4 sm:$0xff]  }
 0x157   :  { %6883 = vmatprep.subr.bf16.mxu0 %v20129_v29  ;;  %7055 = vmatprep.subr.bf16.mxu1 %v20132_v30  ;;  %v20205_v29 = vld [vmem:[#allocation2 + $0x3a0] ss:$76 sps:$4 sm:$0xff]   ;;  %v20208_v30 = vld [vmem:[#allocation2 + $0x3a8] ss:$76 sps:$4 sm:$0xff]  }
 0x158   :  { %6913 = vmatprep.mubr.bf16.mxu0 %v23104_v35  ;;  %7085 = vmatprep.mubr.bf16.mxu1 %v23104_v35 }
 0x15a   :  { %6884 = vmatpush1.bf16.msra.mxu0 %v20127_v31  ;;  %7056 = vmatpush1.bf16.msra.mxu1 %v20130_v32  ;;  %v20213_v31 = vld [vmem:[#allocation2 + $0x43c] ss:$76 sps:$4 sm:$0xff]   ;;  %v20216_v32 = vld [vmem:[#allocation2 + $0x444] ss:$76 sps:$4 sm:$0xff]  }
 0x15b   :  { %6885 = vmatprep.subr.bf16.mxu0 %v20135_v33  ;;  %7057 = vmatprep.subr.bf16.mxu1 %v20138_v34  ;;  %v20211_v33 = vld [vmem:[#allocation2 + $0x438] ss:$76 sps:$4 sm:$0xff]   ;;  %v20214_v34 = vld [vmem:[#allocation2 + $0x440] ss:$76 sps:$4 sm:$0xff]  }
 0x15e   :  { %6886 = vmatpush1.bf16.msra.mxu0 %v20133_v37  ;;  %7058 = vmatpush1.bf16.msra.mxu1 %v20136_v38  ;;  %v20219_v37 = vld [vmem:[#allocation2 + $0x4d4] ss:$76 sps:$4 sm:$0xff]   ;;  %v20222_v38 = vld [vmem:[#allocation2 + $0x4dc] ss:$76 sps:$4 sm:$0xff]  }
 0x15f   :  { %6887 = vmatprep.subr.bf16.mxu0 %v20141_v39  ;;  %7059 = vmatprep.subr.bf16.mxu1 %v20144_v40  ;;  %v20217_v39 = vld [vmem:[#allocation2 + $0x4d0] ss:$76 sps:$4 sm:$0xff]   ;;  %v20220_v40 = vld [vmem:[#allocation2 + $0x4d8] ss:$76 sps:$4 sm:$0xff]  }
 0x162   :  { %6888 = vmatpush1.bf16.msra.mxu0 %v20139_v41  ;;  %7060 = vmatpush1.bf16.msra.mxu1 %v20142_v42  ;;  %v20225_v41 = vld [vmem:[#allocation2 + $0x56c] ss:$76 sps:$4 sm:$0xff]   ;;  %v20228_v42 = vld [vmem:[#allocation2 + $0x574] ss:$76 sps:$4 sm:$0xff]  }
 0x163   :  { %6889 = vmatprep.subr.bf16.mxu0 %v20147_v43  ;;  %7061 = vmatprep.subr.bf16.mxu1 %v20150_v44  ;;  %v20223_v43 = vld [vmem:[#allocation2 + $0x568] ss:$76 sps:$4 sm:$0xff]   ;;  %v20226_v44 = vld [vmem:[#allocation2 + $0x570] ss:$76 sps:$4 sm:$0xff]  }
 0x166   :  { %6890 = vmatpush1.bf16.msra.mxu0 %v20145_v45  ;;  %7062 = vmatpush1.bf16.msra.mxu1 %v20148_v46  ;;  %v20231_v45 = vld [vmem:[#allocation2 + $0x604] ss:$76 sps:$4 sm:$0xff]   ;;  %v20234_v46 = vld [vmem:[#allocation2 + $0x60c] ss:$76 sps:$4 sm:$0xff]  }
 0x167   :  { %6891 = vmatprep.subr.bf16.mxu0 %v20153_v47  ;;  %7063 = vmatprep.subr.bf16.mxu1 %v20156_v48  ;;  %v20229_v47 = vld [vmem:[#allocation2 + $0x600] ss:$76 sps:$4 sm:$0xff]   ;;  %v20232_v48 = vld [vmem:[#allocation2 + $0x608] ss:$76 sps:$4 sm:$0xff]  }
 0x16a   :  { %6892 = vmatpush1.bf16.msra.mxu0 %v20151_v49  ;;  %7064 = vmatpush1.bf16.msra.mxu1 %v20154_v51  ;;  %v20237_v49 = vld [vmem:[#allocation2 + $0x69c] ss:$76 sps:$4 sm:$0xff]   ;;  %v20240_v51 = vld [vmem:[#allocation2 + $0x6a4] ss:$76 sps:$4 sm:$0xff]  }
 0x16b   :  { %6893 = vmatprep.subr.bf16.mxu0 %v20159_v52  ;;  %7065 = vmatprep.subr.bf16.mxu1 %v20162_v53  ;;  %v20235_v52 = vld [vmem:[#allocation2 + $0x698] ss:$76 sps:$4 sm:$0xff]   ;;  %v20238_v53 = vld [vmem:[#allocation2 + $0x6a0] ss:$76 sps:$4 sm:$0xff]  }
 0x16e   :  { %6894 = vmatpush1.bf16.msra.mxu0 %v20157_v54  ;;  %7066 = vmatpush1.bf16.msra.mxu1 %v20160_v55  ;;  %v20243_v54 = vld [vmem:[#allocation2 + $0x734] ss:$76 sps:$4 sm:$0xff]   ;;  %v20246_v55 = vld [vmem:[#allocation2 + $0x73c] ss:$76 sps:$4 sm:$0xff]  }
 0x16f   :  { %6895 = vmatprep.subr.bf16.mxu0 %v20165_v56  ;;  %7067 = vmatprep.subr.bf16.mxu1 %v20168_v57  ;;  %v20241_v56 = vld [vmem:[#allocation2 + $0x730] ss:$76 sps:$4 sm:$0xff]   ;;  %v20244_v57 = vld [vmem:[#allocation2 + $0x738] ss:$76 sps:$4 sm:$0xff]  }
 0x172   :  { %6896 = vmatpush1.bf16.msra.mxu0 %v20163_v58  ;;  %7068 = vmatpush1.bf16.msra.mxu1 %v20166_v59  ;;  %v20249_v58 = vld [vmem:[#allocation2 + $0x7cc] ss:$76 sps:$4 sm:$0xff]   ;;  %v20252_v59 = vld [vmem:[#allocation2 + $0x7d4] ss:$76 sps:$4 sm:$0xff]  }
 0x173   :  { %7096 = vmatprep.subr.bf16.mxu0 %v20171_v62  ;;  %7268 = vmatprep.subr.bf16.mxu1 %v20174_v63  ;;  %v20255_v62 = vld [vmem:[#allocation2 + $0x864] ss:$76 sps:$4 sm:$0xff]   ;;  %v20258_v63 = vld [vmem:[#allocation2 + $0x86c] ss:$76 sps:$4 sm:$0xff]  }
 0x175   :  { %6914 = vmatmul.mubr.bf16.vlgmr.msra.gmra.mrb[0].mxu0 %v23328_v0  ;;  %7086 = vmatmul.mubr.bf16.vlgmr.msra.gmra.mrb[0].mxu1 %v23328_v0 }
 0x176   :  { %7097 = vmatpush1.bf16.msra.mxu0 %v20169_v1  ;;  %7269 = vmatpush1.bf16.msra.mxu1 %v20172_v2  ;;  %v20253_v1 = vld [vmem:[#allocation2 + $0x860] ss:$76 sps:$4 sm:$0xff]   ;;  %v20256_v2 = vld [vmem:[#allocation2 + $0x868] ss:$76 sps:$4 sm:$0xff]  }
 0x177   :  { %7098 = vmatprep.subr.bf16.mxu0 %v20177_v3  ;;  %7270 = vmatprep.subr.bf16.mxu1 %v20180_v4  ;;  %v20261_v3 = vld [vmem:[#allocation2 + $0x8fc] ss:$76 sps:$4 sm:$0xff]   ;;  %v20264_v4 = vld [vmem:[#allocation2 + $0x904] ss:$76 sps:$4 sm:$0xff]  }
 0x178   :  { %7128 = vmatprep.mubr.bf16.mxu0 %v23266_v50  ;;  %7300 = vmatprep.mubr.bf16.mxu1 %v23266_v50 }
 0x17a   :  { %7099 = vmatpush1.bf16.msra.mxu0 %v20175_v5  ;;  %7271 = vmatpush1.bf16.msra.mxu1 %v20178_v6  ;;  %v20259_v5 = vld [vmem:[#allocation2 + $0x8f8] ss:$76 sps:$4 sm:$0xff]   ;;  %v20262_v6 = vld [vmem:[#allocation2 + $0x900] ss:$76 sps:$4 sm:$0xff]  }
 0x17b   :  { %7100 = vmatprep.subr.bf16.mxu0 %v20183_v7  ;;  %7272 = vmatprep.subr.bf16.mxu1 %v20186_v8  ;;  %v20267_v7 = vld [vmem:[#allocation2 + $0x994] ss:$76 sps:$4 sm:$0xff]   ;;  %v20270_v8 = vld [vmem:[#allocation2 + $0x99c] ss:$76 sps:$4 sm:$0xff]  }
 0x17e   :  { %7101 = vmatpush1.bf16.msra.mxu0 %v20181_v10  ;;  %7273 = vmatpush1.bf16.msra.mxu1 %v20184_v11  ;;  %v20265_v10 = vld [vmem:[#allocation2 + $0x990] ss:$76 sps:$4 sm:$0xff]   ;;  %v20268_v11 = vld [vmem:[#allocation2 + $0x998] ss:$76 sps:$4 sm:$0xff]  }
 0x17f   :  { %7102 = vmatprep.subr.bf16.mxu0 %v20189_v12  ;;  %7274 = vmatprep.subr.bf16.mxu1 %v20192_v13  ;;  %v20273_v12 = vld [vmem:[#allocation2 + $0xa2c] ss:$76 sps:$4 sm:$0xff]   ;;  %v20276_v13 = vld [vmem:[#allocation2 + $0xa34] ss:$76 sps:$4 sm:$0xff]  }
 0x182   :  { %7103 = vmatpush1.bf16.msra.mxu0 %v20187_v14  ;;  %7275 = vmatpush1.bf16.msra.mxu1 %v20190_v15  ;;  %v20271_v14 = vld [vmem:[#allocation2 + $0xa28] ss:$76 sps:$4 sm:$0xff]   ;;  %v20274_v15 = vld [vmem:[#allocation2 + $0xa30] ss:$76 sps:$4 sm:$0xff]  }
 0x183   :  { %7104 = vmatprep.subr.bf16.mxu0 %v20195_v16  ;;  %7276 = vmatprep.subr.bf16.mxu1 %v20198_v18  ;;  %v20279_v16 = vld [vmem:[#allocation2 + $0xac4] ss:$76 sps:$4 sm:$0xff]   ;;  %v20282_v18 = vld [vmem:[#allocation2 + $0xacc] ss:$76 sps:$4 sm:$0xff]  }
 0x186   :  { %7105 = vmatpush1.bf16.msra.mxu0 %v20193_v19  ;;  %7277 = vmatpush1.bf16.msra.mxu1 %v20196_v20  ;;  %v20277_v19 = vld [vmem:[#allocation2 + $0xac0] ss:$76 sps:$4 sm:$0xff]   ;;  %v20280_v20 = vld [vmem:[#allocation2 + $0xac8] ss:$76 sps:$4 sm:$0xff]  }
 0x187   :  { %7106 = vmatprep.subr.bf16.mxu0 %v20201_v21  ;;  %7278 = vmatprep.subr.bf16.mxu1 %v20204_v22  ;;  %v20285_v21 = vld [vmem:[#allocation2 + $0xb5c] ss:$76 sps:$4 sm:$0xff]   ;;  %v20288_v22 = vld [vmem:[#allocation2 + $0xb64] ss:$76 sps:$4 sm:$0xff]  }
 0x18a   :  { %7107 = vmatpush1.bf16.msra.mxu0 %v20199_v23  ;;  %7279 = vmatpush1.bf16.msra.mxu1 %v20202_v25  ;;  %v20283_v23 = vld [vmem:[#allocation2 + $0xb58] ss:$76 sps:$4 sm:$0xff]   ;;  %v20286_v25 = vld [vmem:[#allocation2 + $0xb60] ss:$76 sps:$4 sm:$0xff]  }
 0x18b   :  { %7108 = vmatprep.subr.bf16.mxu0 %v20207_v27  ;;  %7280 = vmatprep.subr.bf16.mxu1 %v20210_v28  ;;  %v20291_v27 = vld [vmem:[#allocation2 + $0xbf4] ss:$76 sps:$4 sm:$0xff]   ;;  %v20294_v28 = vld [vmem:[#allocation2 + $0xbfc] ss:$76 sps:$4 sm:$0xff]  }
 0x18e   :  { %7109 = vmatpush1.bf16.msra.mxu0 %v20205_v29  ;;  %7281 = vmatpush1.bf16.msra.mxu1 %v20208_v30  ;;  %v20289_v29 = vld [vmem:[#allocation2 + $0xbf0] ss:$76 sps:$4 sm:$0xff]   ;;  %v20292_v30 = vld [vmem:[#allocation2 + $0xbf8] ss:$76 sps:$4 sm:$0xff]  }
 0x18f   :  { %7110 = vmatprep.subr.bf16.mxu0 %v20213_v31  ;;  %7282 = vmatprep.subr.bf16.mxu1 %v20216_v32  ;;  %v20297_v31 = vld [vmem:[#allocation2 + $0xc8c] ss:$76 sps:$4 sm:$0xff]   ;;  %v20300_v32 = vld [vmem:[#allocation2 + $0xc94] ss:$76 sps:$4 sm:$0xff]  }
 0x192   :  { %7111 = vmatpush1.bf16.msra.mxu0 %v20211_v33  ;;  %7283 = vmatpush1.bf16.msra.mxu1 %v20214_v34  ;;  %v20295_v33 = vld [vmem:[#allocation2 + $0xc88] ss:$76 sps:$4 sm:$0xff]   ;;  %v20298_v34 = vld [vmem:[#allocation2 + $0xc90] ss:$76 sps:$4 sm:$0xff]  }
 0x193   :  { %7112 = vmatprep.subr.bf16.mxu0 %v20219_v37  ;;  %7284 = vmatprep.subr.bf16.mxu1 %v20222_v38  ;;  %v20303_v37 = vld [vmem:[#allocation2 + $0xd24] ss:$76 sps:$4 sm:$0xff]   ;;  %v20306_v38 = vld [vmem:[#allocation2 + $0xd2c] ss:$76 sps:$4 sm:$0xff]  }
 0x196   :  { %7113 = vmatpush1.bf16.msra.mxu0 %v20217_v39  ;;  %7285 = vmatpush1.bf16.msra.mxu1 %v20220_v40  ;;  %v20301_v39 = vld [vmem:[#allocation2 + $0xd20] ss:$76 sps:$4 sm:$0xff]   ;;  %v20304_v40 = vld [vmem:[#allocation2 + $0xd28] ss:$76 sps:$4 sm:$0xff]  }
 0x197   :  { %7114 = vmatprep.subr.bf16.mxu0 %v20225_v41  ;;  %7286 = vmatprep.subr.bf16.mxu1 %v20228_v42  ;;  %v20309_v41 = vld [vmem:[#allocation2 + $0xdbc] ss:$76 sps:$4 sm:$0xff]   ;;  %v20312_v42 = vld [vmem:[#allocation2 + $0xdc4] ss:$76 sps:$4 sm:$0xff]  }
 0x19a   :  { %7115 = vmatpush1.bf16.msra.mxu0 %v20223_v43  ;;  %7287 = vmatpush1.bf16.msra.mxu1 %v20226_v44  ;;  %v20307_v43 = vld [vmem:[#allocation2 + $0xdb8] ss:$76 sps:$4 sm:$0xff]   ;;  %v20310_v44 = vld [vmem:[#allocation2 + $0xdc0] ss:$76 sps:$4 sm:$0xff]  }
 0x19b   :  { %7116 = vmatprep.subr.bf16.mxu0 %v20231_v45  ;;  %7288 = vmatprep.subr.bf16.mxu1 %v20234_v46  ;;  %v20315_v45 = vld [vmem:[#allocation2 + $0xe54] ss:$76 sps:$4 sm:$0xff]   ;;  %v20318_v46 = vld [vmem:[#allocation2 + $0xe5c] ss:$76 sps:$4 sm:$0xff]  }
 0x19e   :  { %7117 = vmatpush1.bf16.msra.mxu0 %v20229_v47  ;;  %7289 = vmatpush1.bf16.msra.mxu1 %v20232_v48  ;;  %v20313_v47 = vld [vmem:[#allocation2 + $0xe50] ss:$76 sps:$4 sm:$0xff]   ;;  %v20316_v48 = vld [vmem:[#allocation2 + $0xe58] ss:$76 sps:$4 sm:$0xff]  }
 0x19f   :  { %7118 = vmatprep.subr.bf16.mxu0 %v20237_v49  ;;  %7290 = vmatprep.subr.bf16.mxu1 %v20240_v51  ;;  %v20321_v49 = vld [vmem:[#allocation2 + $0xeec] ss:$76 sps:$4 sm:$0xff]   ;;  %v20324_v51 = vld [vmem:[#allocation2 + $0xef4] ss:$76 sps:$4 sm:$0xff]  }
 0x1a2   :  { %7119 = vmatpush1.bf16.msra.mxu0 %v20235_v52  ;;  %7291 = vmatpush1.bf16.msra.mxu1 %v20238_v53  ;;  %v20319_v52 = vld [vmem:[#allocation2 + $0xee8] ss:$76 sps:$4 sm:$0xff]   ;;  %v20322_v53 = vld [vmem:[#allocation2 + $0xef0] ss:$76 sps:$4 sm:$0xff]  }
 0x1a3   :  { %7120 = vmatprep.subr.bf16.mxu0 %v20243_v54  ;;  %7292 = vmatprep.subr.bf16.mxu1 %v20246_v55  ;;  %v20327_v54 = vld [vmem:[#allocation2 + $0xf84] ss:$76 sps:$4 sm:$0xff]   ;;  %v20330_v55 = vld [vmem:[#allocation2 + $0xf8c] ss:$76 sps:$4 sm:$0xff]  }
 0x1a6   :  { %7121 = vmatpush1.bf16.msra.mxu0 %v20241_v56  ;;  %7293 = vmatpush1.bf16.msra.mxu1 %v20244_v57  ;;  %v20325_v56 = vld [vmem:[#allocation2 + $0xf80] ss:$76 sps:$4 sm:$0xff]   ;;  %v20328_v57 = vld [vmem:[#allocation2 + $0xf88] ss:$76 sps:$4 sm:$0xff]  }
 0x1a7   :  { %7122 = vmatprep.subr.bf16.mxu0 %v20249_v58  ;;  %7294 = vmatprep.subr.bf16.mxu1 %v20252_v59  ;;  %v20333_v58 = vld [vmem:[#allocation2 + $0x101c] ss:$76 sps:$4 sm:$0xff]   ;;  %v20336_v59 = vld [vmem:[#allocation2 + $0x1024] ss:$76 sps:$4 sm:$0xff]  }
 0x1aa   :  { %7123 = vmatpush1.bf16.msra.mxu0 %v20247_v60  ;;  %7295 = vmatpush1.bf16.msra.mxu1 %v20250_v61  ;;  %v20331_v60 = vld [vmem:[#allocation2 + $0x1018] ss:$76 sps:$4 sm:$0xff]   ;;  %v20334_v61 = vld [vmem:[#allocation2 + $0x1020] ss:$76 sps:$4 sm:$0xff]  }
 0x1ab   :  { %7124 = vmatprep.subr.bf16.mxu0 %v20255_v62  ;;  %7296 = vmatprep.subr.bf16.mxu1 %v20258_v63  ;;  %v20339_v62 = vld [vmem:[#allocation2 + $0x10b4] ss:$76 sps:$4 sm:$0xff]   ;;  %v20342_v63 = vld [vmem:[#allocation2 + $0x10bc] ss:$76 sps:$4 sm:$0xff]  }
 0x1ae   :  { %7125 = vmatpush1.bf16.msra.mxu0 %v20253_v1  ;;  %7297 = vmatpush1.bf16.msra.mxu1 %v20256_v2  ;;  %v20337_v1 = vld [vmem:[#allocation2 + $0x10b0] ss:$76 sps:$4 sm:$0xff]   ;;  %v20340_v2 = vld [vmem:[#allocation2 + $0x10b8] ss:$76 sps:$4 sm:$0xff]  }
 0x1af   :  { %7126 = vmatprep.subr.bf16.mxu0 %v20261_v3  ;;  %7298 = vmatprep.subr.bf16.mxu1 %v20264_v4  ;;  %v20345_v3 = vld [vmem:[#allocation2 + $0x114c] ss:$76 sps:$4 sm:$0xff]   ;;  %v20348_v4 = vld [vmem:[#allocation2 + $0x1154] ss:$76 sps:$4 sm:$0xff]  }
 0x1b2   :  { %7127 = vmatpush1.bf16.msra.mxu0 %v20259_v5  ;;  %7299 = vmatpush1.bf16.msra.mxu1 %v20262_v6  ;;  %v20343_v5 = vld [vmem:[#allocation2 + $0x1148] ss:$76 sps:$4 sm:$0xff]   ;;  %v20346_v6 = vld [vmem:[#allocation2 + $0x1150] ss:$76 sps:$4 sm:$0xff]  }
 0x1b3   :  { %7139 = vmatprep.subr.bf16.mxu0 %v20267_v7  ;;  %7311 = vmatprep.subr.bf16.mxu1 %v20270_v8  ;;  %v20351_v7 = vld [vmem:[#allocation2 + $0x11e4] ss:$76 sps:$4 sm:$0xff]   ;;  %v20354_v8 = vld [vmem:[#allocation2 + $0x11ec] ss:$76 sps:$4 sm:$0xff]  }
 0x1b5   :  { %7129 = vmatmul.mubr.bf16.vlgmr.msra.gmra.mrb[4].mxu0 %v23276_v9  ;;  %7301 = vmatmul.mubr.bf16.vlgmr.msra.gmra.mrb[4].mxu1 %v23276_v9 }
 0x1b6   :  { %7140 = vmatpush1.bf16.msra.mxu0 %v20265_v10  ;;  %7312 = vmatpush1.bf16.msra.mxu1 %v20268_v11  ;;  %v20349_v10 = vld [vmem:[#allocation2 + $0x11e0] ss:$76 sps:$4 sm:$0xff]   ;;  %v20352_v11 = vld [vmem:[#allocation2 + $0x11e8] ss:$76 sps:$4 sm:$0xff]  }
 0x1b7   :  { %7141 = vmatprep.subr.bf16.mxu0 %v20273_v12  ;;  %7313 = vmatprep.subr.bf16.mxu1 %v20276_v13  ;;  %v20357_v12 = vld [vmem:[#allocation2 + $0x127c] ss:$76 sps:$4 sm:$0xff]   ;;  %v20360_v13 = vld [vmem:[#allocation2 + $0x1284] ss:$76 sps:$4 sm:$0xff]  }
 0x1b8   :  { %7171 = vmatprep.mubr.bf16.mxu0 %v23286_v36  ;;  %7343 = vmatprep.mubr.bf16.mxu1 %v23286_v36 }
 0x1ba   :  { %7142 = vmatpush1.bf16.msra.mxu0 %v20271_v14  ;;  %7314 = vmatpush1.bf16.msra.mxu1 %v20274_v15  ;;  %v20355_v14 = vld [vmem:[#allocation2 + $0x1278] ss:$76 sps:$4 sm:$0xff]   ;;  %v20358_v15 = vld [vmem:[#allocation2 + $0x1280] ss:$76 sps:$4 sm:$0xff]  }
 0x1bb   :  { %7143 = vmatprep.subr.bf16.mxu0 %v20279_v16  ;;  %7315 = vmatprep.subr.bf16.mxu1 %v20282_v18  ;;  %v20363_v16 = vld [vmem:[#allocation2 + $0x1314] ss:$76 sps:$4 sm:$0xff]   ;;  %v20366_v18 = vld [vmem:[#allocation2 + $0x131c] ss:$76 sps:$4 sm:$0xff]  }
 0x1be   :  { %7144 = vmatpush1.bf16.msra.mxu0 %v20277_v19  ;;  %7316 = vmatpush1.bf16.msra.mxu1 %v20280_v20  ;;  %v20361_v19 = vld [vmem:[#allocation2 + $0x1310] ss:$76 sps:$4 sm:$0xff]   ;;  %v20364_v20 = vld [vmem:[#allocation2 + $0x1318] ss:$76 sps:$4 sm:$0xff]  }
 0x1bf   :  { %7145 = vmatprep.subr.bf16.mxu0 %v20285_v21  ;;  %7317 = vmatprep.subr.bf16.mxu1 %v20288_v22  ;;  %v20369_v21 = vld [vmem:[#allocation2 + $0x13ac] ss:$76 sps:$4 sm:$0xff]   ;;  %v20372_v22 = vld [vmem:[#allocation2 + $0x13b4] ss:$76 sps:$4 sm:$0xff]  }
 0x1c2   :  { %7146 = vmatpush1.bf16.msra.mxu0 %v20283_v23  ;;  %7318 = vmatpush1.bf16.msra.mxu1 %v20286_v25  ;;  %v20367_v23 = vld [vmem:[#allocation2 + $0x13a8] ss:$76 sps:$4 sm:$0xff]   ;;  %v20370_v25 = vld [vmem:[#allocation2 + $0x13b0] ss:$76 sps:$4 sm:$0xff]  }
 0x1c3   :  { %7147 = vmatprep.subr.bf16.mxu0 %v20291_v27  ;;  %7319 = vmatprep.subr.bf16.mxu1 %v20294_v28  ;;  %v20375_v27 = vld [vmem:[#allocation2 + $0x1444] ss:$76 sps:$4 sm:$0xff]   ;;  %v20378_v28 = vld [vmem:[#allocation2 + $0x144c] ss:$76 sps:$4 sm:$0xff]  }
 0x1c6   :  { %7148 = vmatpush1.bf16.msra.mxu0 %v20289_v29  ;;  %7320 = vmatpush1.bf16.msra.mxu1 %v20292_v30  ;;  %v20373_v29 = vld [vmem:[#allocation2 + $0x1440] ss:$76 sps:$4 sm:$0xff]   ;;  %v20376_v30 = vld [vmem:[#allocation2 + $0x1448] ss:$76 sps:$4 sm:$0xff]  }
 0x1c7   :  { %7149 = vmatprep.subr.bf16.mxu0 %v20297_v31  ;;  %7321 = vmatprep.subr.bf16.mxu1 %v20300_v32  ;;  %v20381_v31 = vld [vmem:[#allocation2 + $0x14dc] ss:$76 sps:$4 sm:$0xff]   ;;  %v20384_v32 = vld [vmem:[#allocation2 + $0x14e4] ss:$76 sps:$4 sm:$0xff]  }
 0x1ca   :  { %7150 = vmatpush1.bf16.msra.mxu0 %v20295_v33  ;;  %7322 = vmatpush1.bf16.msra.mxu1 %v20298_v34  ;;  %v20379_v33 = vld [vmem:[#allocation2 + $0x14d8] ss:$76 sps:$4 sm:$0xff]   ;;  %v20382_v34 = vld [vmem:[#allocation2 + $0x14e0] ss:$76 sps:$4 sm:$0xff]  }
 0x1cb   :  { %7151 = vmatprep.subr.bf16.mxu0 %v20303_v37  ;;  %7323 = vmatprep.subr.bf16.mxu1 %v20306_v38  ;;  %v20387_v37 = vld [vmem:[#allocation2 + $0x1574] ss:$76 sps:$4 sm:$0xff]   ;;  %v20390_v38 = vld [vmem:[#allocation2 + $0x157c] ss:$76 sps:$4 sm:$0xff]  }
 0x1ce   :  { %7152 = vmatpush1.bf16.msra.mxu0 %v20301_v39  ;;  %7324 = vmatpush1.bf16.msra.mxu1 %v20304_v40  ;;  %v20385_v39 = vld [vmem:[#allocation2 + $0x1570] ss:$76 sps:$4 sm:$0xff]   ;;  %v20388_v40 = vld [vmem:[#allocation2 + $0x1578] ss:$76 sps:$4 sm:$0xff]  }
 0x1cf   :  { %7153 = vmatprep.subr.bf16.mxu0 %v20309_v41  ;;  %7325 = vmatprep.subr.bf16.mxu1 %v20312_v42  ;;  %v20393_v41 = vld [vmem:[#allocation2 + $0x160c] ss:$76 sps:$4 sm:$0xff]   ;;  %v20396_v42 = vld [vmem:[#allocation2 + $0x1614] ss:$76 sps:$4 sm:$0xff]  }
 0x1d2   :  { %7154 = vmatpush1.bf16.msra.mxu0 %v20307_v43  ;;  %7326 = vmatpush1.bf16.msra.mxu1 %v20310_v44  ;;  %v20391_v43 = vld [vmem:[#allocation2 + $0x1608] ss:$76 sps:$4 sm:$0xff]   ;;  %v20394_v44 = vld [vmem:[#allocation2 + $0x1610] ss:$76 sps:$4 sm:$0xff]  }
 0x1d3   :  { %7155 = vmatprep.subr.bf16.mxu0 %v20315_v45  ;;  %7327 = vmatprep.subr.bf16.mxu1 %v20318_v46  ;;  %v20399_v45 = vld [vmem:[#allocation2 + $0x16a4] ss:$76 sps:$4 sm:$0xff]   ;;  %v20402_v46 = vld [vmem:[#allocation2 + $0x16ac] ss:$76 sps:$4 sm:$0xff]  }
 0x1d6   :  { %7156 = vmatpush1.bf16.msra.mxu0 %v20313_v47  ;;  %7328 = vmatpush1.bf16.msra.mxu1 %v20316_v48  ;;  %v20397_v47 = vld [vmem:[#allocation2 + $0x16a0] ss:$76 sps:$4 sm:$0xff]   ;;  %v20400_v48 = vld [vmem:[#allocation2 + $0x16a8] ss:$76 sps:$4 sm:$0xff]  }
 0x1d7   :  { %7157 = vmatprep.subr.bf16.mxu0 %v20321_v49  ;;  %7329 = vmatprep.subr.bf16.mxu1 %v20324_v51  ;;  %v20405_v49 = vld [vmem:[#allocation2 + $0x173c] ss:$76 sps:$4 sm:$0xff]   ;;  %v20408_v51 = vld [vmem:[#allocation2 + $0x1744] ss:$76 sps:$4 sm:$0xff]  }
 0x1da   :  { %7158 = vmatpush1.bf16.msra.mxu0 %v20319_v52  ;;  %7330 = vmatpush1.bf16.msra.mxu1 %v20322_v53  ;;  %v20403_v52 = vld [vmem:[#allocation2 + $0x1738] ss:$76 sps:$4 sm:$0xff]   ;;  %v20406_v53 = vld [vmem:[#allocation2 + $0x1740] ss:$76 sps:$4 sm:$0xff]  }
 0x1db   :  { %7159 = vmatprep.subr.bf16.mxu0 %v20327_v54  ;;  %7331 = vmatprep.subr.bf16.mxu1 %v20330_v55  ;;  %v20411_v54 = vld [vmem:[#allocation2 + $0x17d4] ss:$76 sps:$4 sm:$0xff]   ;;  %v20414_v55 = vld [vmem:[#allocation2 + $0x17dc] ss:$76 sps:$4 sm:$0xff]  }
 0x1de   :  { %7160 = vmatpush1.bf16.msra.mxu0 %v20325_v56  ;;  %7332 = vmatpush1.bf16.msra.mxu1 %v20328_v57  ;;  %v20409_v56 = vld [vmem:[#allocation2 + $0x17d0] ss:$76 sps:$4 sm:$0xff]   ;;  %v20412_v57 = vld [vmem:[#allocation2 + $0x17d8] ss:$76 sps:$4 sm:$0xff]  }
 0x1df   :  { %7161 = vmatprep.subr.bf16.mxu0 %v20333_v58  ;;  %7333 = vmatprep.subr.bf16.mxu1 %v20336_v59  ;;  %v20417_v58 = vld [vmem:[#allocation2 + $0x186c] ss:$76 sps:$4 sm:$0xff]   ;;  %v20420_v59 = vld [vmem:[#allocation2 + $0x1874] ss:$76 sps:$4 sm:$0xff]  }
 0x1e2   :  { %7162 = vmatpush1.bf16.msra.mxu0 %v20331_v60  ;;  %7334 = vmatpush1.bf16.msra.mxu1 %v20334_v61  ;;  %v20415_v60 = vld [vmem:[#allocation2 + $0x1868] ss:$76 sps:$4 sm:$0xff]   ;;  %v20418_v61 = vld [vmem:[#allocation2 + $0x1870] ss:$76 sps:$4 sm:$0xff]  }
 0x1e3   :  { %7163 = vmatprep.subr.bf16.mxu0 %v20339_v62  ;;  %7335 = vmatprep.subr.bf16.mxu1 %v20342_v63  ;;  %v20423_v62 = vld [vmem:[#allocation2 + $0x1904] ss:$76 sps:$4 sm:$0xff]   ;;  %v20426_v63 = vld [vmem:[#allocation2 + $0x190c] ss:$76 sps:$4 sm:$0xff]  }
 0x1e6   :  { %7164 = vmatpush1.bf16.msra.mxu0 %v20337_v1  ;;  %7336 = vmatpush1.bf16.msra.mxu1 %v20340_v2  ;;  %v20421_v1 = vld [vmem:[#allocation2 + $0x1900] ss:$76 sps:$4 sm:$0xff]   ;;  %v20424_v2 = vld [vmem:[#allocation2 + $0x1908] ss:$76 sps:$4 sm:$0xff]  }
 0x1e7   :  { %7165 = vmatprep.subr.bf16.mxu0 %v20345_v3  ;;  %7337 = vmatprep.subr.bf16.mxu1 %v20348_v4  ;;  %v20429_v3 = vld [vmem:[#allocation2 + $0x199c] ss:$76 sps:$4 sm:$0xff]   ;;  %v20432_v4 = vld [vmem:[#allocation2 + $0x19a4] ss:$76 sps:$4 sm:$0xff]  }
 0x1ea   :  { %7166 = vmatpush1.bf16.msra.mxu0 %v20343_v5  ;;  %7338 = vmatpush1.bf16.msra.mxu1 %v20346_v6  ;;  %v20427_v5 = vld [vmem:[#allocation2 + $0x1998] ss:$76 sps:$4 sm:$0xff]   ;;  %v20430_v6 = vld [vmem:[#allocation2 + $0x19a0] ss:$76 sps:$4 sm:$0xff]  }
 0x1eb   :  { %7167 = vmatprep.subr.bf16.mxu0 %v20351_v7  ;;  %7339 = vmatprep.subr.bf16.mxu1 %v20354_v8  ;;  %v20435_v7 = vld [vmem:[#allocation2 + $0x1a34] ss:$76 sps:$4 sm:$0xff]   ;;  %v20438_v8 = vld [vmem:[#allocation2 + $0x1a3c] ss:$76 sps:$4 sm:$0xff]  }
 0x1ee   :  { %7168 = vmatpush1.bf16.msra.mxu0 %v20349_v10  ;;  %7340 = vmatpush1.bf16.msra.mxu1 %v20352_v11  ;;  %v20433_v10 = vld [vmem:[#allocation2 + $0x1a30] ss:$76 sps:$4 sm:$0xff]   ;;  %v20436_v11 = vld [vmem:[#allocation2 + $0x1a38] ss:$76 sps:$4 sm:$0xff]  }
 0x1ef   :  { %7169 = vmatprep.subr.bf16.mxu0 %v20357_v12  ;;  %7341 = vmatprep.subr.bf16.mxu1 %v20360_v13  ;;  %v20441_v12 = vld [vmem:[#allocation2 + $0x1acc] ss:$76 sps:$4 sm:$0xff]   ;;  %v20444_v13 = vld [vmem:[#allocation2 + $0x1ad4] ss:$76 sps:$4 sm:$0xff]  }
 0x1f2   :  { %7170 = vmatpush1.bf16.msra.mxu0 %v20355_v14  ;;  %7342 = vmatpush1.bf16.msra.mxu1 %v20358_v15  ;;  %v20439_v14 = vld [vmem:[#allocation2 + $0x1ac8] ss:$76 sps:$4 sm:$0xff]   ;;  %v20442_v15 = vld [vmem:[#allocation2 + $0x1ad0] ss:$76 sps:$4 sm:$0xff]  }
 0x1f3   :  { %7182 = vmatprep.subr.bf16.mxu0 %v20363_v16  ;;  %7354 = vmatprep.subr.bf16.mxu1 %v20366_v18  ;;  %v20447_v16 = vld [vmem:[#allocation2 + $0x1b64] ss:$76 sps:$4 sm:$0xff]   ;;  %v20450_v18 = vld [vmem:[#allocation2 + $0x1b6c] ss:$76 sps:$4 sm:$0xff]  }
 0x1f5   :  { %7172 = vmatmul.mubr.bf16.vlgmr.msra.gmra.mrb[4].mxu0 %v23296_v17  ;;  %7344 = vmatmul.mubr.bf16.vlgmr.msra.gmra.mrb[4].mxu1 %v23296_v17 }
 0x1f6   :  { %7183 = vmatpush1.bf16.msra.mxu0 %v20361_v19  ;;  %7355 = vmatpush1.bf16.msra.mxu1 %v20364_v20  ;;  %v20445_v19 = vld [vmem:[#allocation2 + $0x1b60] ss:$76 sps:$4 sm:$0xff]   ;;  %v20448_v20 = vld [vmem:[#allocation2 + $0x1b68] ss:$76 sps:$4 sm:$0xff]  }
 0x1f7   :  { %7184 = vmatprep.subr.bf16.mxu0 %v20369_v21  ;;  %7356 = vmatprep.subr.bf16.mxu1 %v20372_v22  ;;  %v20453_v21 = vld [vmem:[#allocation2 + $0x1bfc] ss:$76 sps:$4 sm:$0xff]   ;;  %v20456_v22 = vld [vmem:[#allocation2 + $0x1c04] ss:$76 sps:$4 sm:$0xff]  }
 0x1f8   :  { %7214 = vmatprep.mubr.bf16.mxu0 %v23306_v24  ;;  %7386 = vmatprep.mubr.bf16.mxu1 %v23306_v24 }
 0x1fa   :  { %7185 = vmatpush1.bf16.msra.mxu0 %v20367_v23  ;;  %7357 = vmatpush1.bf16.msra.mxu1 %v20370_v25  ;;  %v20451_v23 = vld [vmem:[#allocation2 + $0x1bf8] ss:$76 sps:$4 sm:$0xff]   ;;  %v20454_v25 = vld [vmem:[#allocation2 + $0x1c00] ss:$76 sps:$4 sm:$0xff]  }
 0x1fb   :  { %7186 = vmatprep.subr.bf16.mxu0 %v20375_v27  ;;  %7358 = vmatprep.subr.bf16.mxu1 %v20378_v28  ;;  %v20459_v27 = vld [vmem:[#allocation2 + $0x1c94] ss:$76 sps:$4 sm:$0xff]   ;;  %v20462_v28 = vld [vmem:[#allocation2 + $0x1c9c] ss:$76 sps:$4 sm:$0xff]  }
 0x1fe   :  { %7187 = vmatpush1.bf16.msra.mxu0 %v20373_v29  ;;  %7359 = vmatpush1.bf16.msra.mxu1 %v20376_v30  ;;  %v20457_v29 = vld [vmem:[#allocation2 + $0x1c90] ss:$76 sps:$4 sm:$0xff]   ;;  %v20460_v30 = vld [vmem:[#allocation2 + $0x1c98] ss:$76 sps:$4 sm:$0xff]  }
 0x1ff   :  { %7188 = vmatprep.subr.bf16.mxu0 %v20381_v31  ;;  %7360 = vmatprep.subr.bf16.mxu1 %v20384_v32  ;;  %v20465_v31 = vld [vmem:[#allocation2 + $0x1d2c] ss:$76 sps:$4 sm:$0xff]   ;;  %v20468_v32 = vld [vmem:[#allocation2 + $0x1d34] ss:$76 sps:$4 sm:$0xff]  }
 0x202   :  { %7189 = vmatpush1.bf16.msra.mxu0 %v20379_v33  ;;  %7361 = vmatpush1.bf16.msra.mxu1 %v20382_v34  ;;  %v20463_v33 = vld [vmem:[#allocation2 + $0x1d28] ss:$76 sps:$4 sm:$0xff]   ;;  %v20466_v34 = vld [vmem:[#allocation2 + $0x1d30] ss:$76 sps:$4 sm:$0xff]  }
 0x203   :  { %7190 = vmatprep.subr.bf16.mxu0 %v20387_v37  ;;  %7362 = vmatprep.subr.bf16.mxu1 %v20390_v38  ;;  %v20471_v37 = vld [vmem:[#allocation2 + $0x1dc4] ss:$76 sps:$4 sm:$0xff]   ;;  %v20474_v38 = vld [vmem:[#allocation2 + $0x1dcc] ss:$76 sps:$4 sm:$0xff]  }
 0x206   :  { %7191 = vmatpush1.bf16.msra.mxu0 %v20385_v39  ;;  %7363 = vmatpush1.bf16.msra.mxu1 %v20388_v40  ;;  %v1281_v39 = vlaneseq  ;;  %v20469_v40 = vld [vmem:[#allocation2 + $0x1dc0] ss:$76 sps:$4 sm:$0xff]  }
 0x207   :  { %7192 = vmatprep.subr.bf16.mxu0 %v20393_v41  ;;  %7364 = vmatprep.subr.bf16.mxu1 %v20396_v42  ;;  %v20472_v41 = vld [vmem:[#allocation2 + $0x1dc8] ss:$76 sps:$4 sm:$0xff]  }
 0x208   :  { %v20477_v42 = vld [vmem:[#allocation2 + $0x1e5c] ss:$76 sps:$4 sm:$0xff]  }
 0x20a   :  { %7193 = vmatpush1.bf16.msra.mxu0 %v20391_v43  ;;  %7365 = vmatpush1.bf16.msra.mxu1 %v20394_v44  ;;  %v20480_v43 = vld [vmem:[#allocation2 + $0x1e64] ss:$76 sps:$4 sm:$0xff]   ;;  %v23346_v44 = vshrl.u32 %v1281_v39, 7 }
 0x20b   :  { %7194 = vmatprep.subr.bf16.mxu0 %v20399_v45  ;;  %7366 = vmatprep.subr.bf16.mxu1 %v20402_v46  ;;  %v20475_v45 = vld [vmem:[#allocation2 + $0x1e58] ss:$76 sps:$4 sm:$0xff]   ;;  %v20478_v46 = vld [vmem:[#allocation2 + $0x1e60] ss:$76 sps:$4 sm:$0xff]  }
 0x20c   :  { %v20507_v39 = vld [vmem:[#allocation2 + $0x24] ss:$76 sps:$4 sm:$0xff]  }
 0x20e   :  { %7195 = vmatpush1.bf16.msra.mxu0 %v20397_v47  ;;  %7367 = vmatpush1.bf16.msra.mxu1 %v20400_v48  ;;  %v20483_v47 = vld [vmem:[#allocation2 + $0x1ef4] ss:$76 sps:$4 sm:$0xff]   ;;  %v20486_v48 = vld [vmem:[#allocation2 + $0x1efc] ss:$76 sps:$4 sm:$0xff]  }
 0x20f   :  { %7196 = vmatprep.subr.bf16.mxu0 %v20405_v49  ;;  %7368 = vmatprep.subr.bf16.mxu1 %v20408_v51  ;;  %v20481_v49 = vld [vmem:[#allocation2 + $0x1ef0] ss:$76 sps:$4 sm:$0xff]   ;;  %v23349_v51 = vsub.s32 0, %v23346_v44 }
 0x212   :  { %7197 = vmatpush1.bf16.msra.mxu0 %v20403_v52  ;;  %7369 = vmatpush1.bf16.msra.mxu1 %v20406_v53  ;;  %v23352_v52 = vsub.s32 2, %v23346_v44  ;;  %v20484_v53 = vld [vmem:[#allocation2 + $0x1ef8] ss:$76 sps:$4 sm:$0xff]  }
 0x213   :  { %7198 = vmatprep.subr.bf16.mxu0 %v20411_v54  ;;  %7370 = vmatprep.subr.bf16.mxu1 %v20414_v55  ;;  %v1275_v54 = vld [vmem:[#allocation4] sm:$0xff]  ;;  %v23355_v55 = vsub.s32 1, %v23346_v44 }
 0x216   :  { %7199 = vmatpush1.bf16.msra.mxu0 %v20409_v56  ;;  %7371 = vmatpush1.bf16.msra.mxu1 %v20412_v57  ;;  %v23358_v56 = vsub.s32 3, %v23346_v44  ;;  %v20489_v57 = vld [vmem:[#allocation2 + $0x1f8c] ss:$76 sps:$4 sm:$0xff]  }
 0x217   :  { %7200 = vmatprep.subr.bf16.mxu0 %v20417_v58  ;;  %7372 = vmatprep.subr.bf16.mxu1 %v20420_v59  ;;  %v20492_v58 = vld [vmem:[#allocation2 + $0x1f94] ss:$76 sps:$4 sm:$0xff]   ;;  %v1284_v59 = vrot.slane %v1275_v54, %v23349_v51 }
 0x21a   :  { %7201 = vmatpush1.bf16.msra.mxu0 %v20415_v60  ;;  %7373 = vmatpush1.bf16.msra.mxu1 %v20418_v61  ;;  %v1292_v60 = vrot.slane %v1275_v54, %v23352_v52  ;;  %v1288_v61 = vrot.slane %v1275_v54, %v23355_v55 }
 0x21b   :  { %7202 = vmatprep.subr.bf16.mxu0 %v20423_v62  ;;  %7374 = vmatprep.subr.bf16.mxu1 %v20426_v63  ;;  %v1296_v62 = vrot.slane %v1275_v54, %v23358_v56  ;;  %v20487_v63 = vld [vmem:[#allocation2 + $0x1f88] ss:$76 sps:$4 sm:$0xff]  }
 0x21c   :  { %v20522_v54 = vld [vmem:[#allocation2 + $0x15c] ss:$76 sps:$4 sm:$0xff]  }
 0x21e   :  { %7203 = vmatpush1.bf16.msra.mxu0 %v20421_v1  ;;  %7375 = vmatpush1.bf16.msra.mxu1 %v20424_v2  ;;  %v20490_v1 = vld [vmem:[#allocation2 + $0x1f90] ss:$76 sps:$4 sm:$0xff]  }
 0x21f   :  { %7204 = vmatprep.subr.bf16.mxu0 %v20429_v3  ;;  %7376 = vmatprep.subr.bf16.mxu1 %v20432_v4  ;;  %v20495_v2 = vld [vmem:[#allocation2 + $0x2024] ss:$76 sps:$4 sm:$0xff]   ;;  %v20498_v3 = vld [vmem:[#allocation2 + $0x202c] ss:$76 sps:$4 sm:$0xff]  }
 0x222   :  { %7205 = vmatpush1.bf16.msra.mxu0 %v20427_v5  ;;  %7377 = vmatpush1.bf16.msra.mxu1 %v20430_v6  ;;  %v20493_v6 = vld [vmem:[#allocation2 + $0x2020] ss:$76 sps:$4 sm:$0xff]  }
 0x223   :  { %7206 = vmatprep.subr.bf16.mxu0 %v20435_v7  ;;  %7378 = vmatprep.subr.bf16.mxu1 %v20438_v8 }
 0x226   :  { %7207 = vmatpush1.bf16.msra.mxu0 %v20433_v10  ;;  %7379 = vmatpush1.bf16.msra.mxu1 %v20436_v11 }
 0x227   :  { %7208 = vmatprep.subr.bf16.mxu0 %v20441_v12  ;;  %7380 = vmatprep.subr.bf16.mxu1 %v20444_v13 }
 0x22a   :  { %7209 = vmatpush1.bf16.msra.mxu0 %v20439_v14  ;;  %7381 = vmatpush1.bf16.msra.mxu1 %v20442_v15 }
 0x22b   :  { %7210 = vmatprep.subr.bf16.mxu0 %v20447_v16  ;;  %7382 = vmatprep.subr.bf16.mxu1 %v20450_v18  ;;  %v20496_v16 = vld [vmem:[#allocation2 + $0x2028] ss:$76 sps:$4 sm:$0xff]  }
 0x22c   :  { %v20501_v18 = vld [vmem:[#allocation2 + $0x20bc] ss:$76 sps:$4 sm:$0xff]  }
 0x22e   :  { %7211 = vmatpush1.bf16.msra.mxu0 %v20445_v19  ;;  %7383 = vmatpush1.bf16.msra.mxu1 %v20448_v20 }
 0x22f   :  { %7212 = vmatprep.subr.bf16.mxu0 %v20453_v21  ;;  %7384 = vmatprep.subr.bf16.mxu1 %v20456_v22 }
 0x232   :  { %7213 = vmatpush1.bf16.msra.mxu0 %v20451_v23  ;;  %7385 = vmatpush1.bf16.msra.mxu1 %v20454_v25 }
 0x233   :  { %7225 = vmatprep.subr.bf16.mxu0 %v20459_v27  ;;  %7397 = vmatprep.subr.bf16.mxu1 %v20462_v28  ;;  %v20504_v27 = vld [vmem:[#allocation2 + $0x20c4] ss:$76 sps:$4 sm:$0xff]  }
 0x235   :  { %7215 = vmatmul.mubr.bf16.vlgmr.msra.gmra.mrb[4].mxu0 %v23316_v26  ;;  %7387 = vmatmul.mubr.bf16.vlgmr.msra.gmra.mrb[4].mxu1 %v23316_v26 }
 0x236   :  { %7226 = vmatpush1.bf16.msra.mxu0 %v20457_v29  ;;  %7398 = vmatpush1.bf16.msra.mxu1 %v20460_v30 }
 0x237   :  { %7227 = vmatprep.subr.bf16.mxu0 %v20465_v31  ;;  %7399 = vmatprep.subr.bf16.mxu1 %v20468_v32 }
 0x238   :  { %7257 = vmatprep.mubr.bf16.mxu0 %v23104_v35  ;;  %7429 = vmatprep.mubr.bf16.mxu1 %v23104_v35 }
 0x23a   :  { %7228 = vmatpush1.bf16.msra.mxu0 %v20463_v33  ;;  %7400 = vmatpush1.bf16.msra.mxu1 %v20466_v34  ;;  %v20499_v34 = vld [vmem:[#allocation2 + $0x20b8] ss:$76 sps:$4 sm:$0xff]  }
 0x23b   :  { %7229 = vmatprep.subr.bf16.mxu0 %v20471_v37  ;;  %7401 = vmatprep.subr.bf16.mxu1 %v20474_v38  ;;  %v20502_v37 = vld [vmem:[#allocation2 + $0x20c0] ss:$76 sps:$4 sm:$0xff]  }
 0x23e   :  { %7230 = vmatpush1.bf16.msra.mxu0 %v20469_v40  ;;  %7402 = vmatpush1.bf16.msra.mxu1 %v20472_v41  ;;  %v20510_v40 = vld [vmem:[#allocation2 + $0x2c] ss:$76 sps:$4 sm:$0xff]  }
 0x23f   :  { %7231 = vmatprep.subr.bf16.mxu0 %v20477_v42  ;;  %7403 = vmatprep.subr.bf16.mxu1 %v20480_v43  ;;  %v20505_v42 = vld [vmem:[#allocation2 + $0x20] ss:$76 sps:$4 sm:$0xff]   ;;  %v20508_v43 = vld [vmem:[#allocation2 + $0x28] ss:$76 sps:$4 sm:$0xff]  }
 0x242   :  { %7232 = vmatpush1.bf16.msra.mxu0 %v20475_v45  ;;  %7404 = vmatpush1.bf16.msra.mxu1 %v20478_v46  ;;  %v20513_v45 = vld [vmem:[#allocation2 + $0xbc] ss:$76 sps:$4 sm:$0xff]   ;;  %v20516_v46 = vld [vmem:[#allocation2 + $0xc4] ss:$76 sps:$4 sm:$0xff]  }
 0x243   :  { %7233 = vmatprep.subr.bf16.mxu0 %v20483_v47  ;;  %7405 = vmatprep.subr.bf16.mxu1 %v20486_v48  ;;  %v20511_v47 = vld [vmem:[#allocation2 + $0xb8] ss:$76 sps:$4 sm:$0xff]   ;;  %v20514_v48 = vld [vmem:[#allocation2 + $0xc0] ss:$76 sps:$4 sm:$0xff]  }
 0x246   :  { %7234 = vmatpush1.bf16.msra.mxu0 %v20481_v49  ;;  %7406 = vmatpush1.bf16.msra.mxu1 %v20484_v53  ;;  %v20519_v53 = vld [vmem:[#allocation2 + $0x154] ss:$76 sps:$4 sm:$0xff]  }
 0x247   :  { %7235 = vmatprep.subr.bf16.mxu0 %v20489_v57  ;;  %7407 = vmatprep.subr.bf16.mxu1 %v20492_v58 }
 0x248   :  { %v6915_v4 = vpop.f32.mrb[0].mxu0  ;;  %v7087_v5 = vpop.f32.mrb[0].mxu1 }
 0x249   :  { %v19568_v7 = vadd.f32 %v6915_v4, %v1284_v59  ;;  %v19572_v8 = vadd.f32 %v7087_v5, %v1292_v60  ;;  %v6917_v10 = vpop.f32.mrb[1].mxu0  ;;  %v7089_v11 = vpop.f32.mrb[1].mxu1 }
 0x24a   :  { %v19569_v12 = vadd.f32 %v6917_v10, %v1288_v61  ;;  %v19573_v13 = vadd.f32 %v7089_v11, %v1296_v62  ;;  %v6919_v14 = vpop.f32.mrb[2].mxu0  ;;  %v7091_v15 = vpop.f32.mrb[2].mxu1  ;;  %7236 = vmatpush1.bf16.msra.mxu0 %v20487_v63  ;;  %7408 = vmatpush1.bf16.msra.mxu1 %v20490_v1 }
 0x24b   :  { %v8464_v19 = vmul.f32 0.5, %v19568_v7  ;;  %v8466_v20 = vmul.f32 0.5, %v19572_v8  ;;  %v19570_v21 = vadd.f32 %v6919_v14, %v1284_v59  ;;  %v19574_v22 = vadd.f32 %v7091_v15, %v1292_v60  ;;  %v6921_v23 = vpop.f32.mrb[3].mxu0  ;;  %v7093_v25 = vpop.f32.mrb[3].mxu1  ;;  %7237 = vmatprep.subr.bf16.mxu0 %v20495_v2  ;;  %7409 = vmatprep.subr.bf16.mxu1 %v20498_v3  ;;  %v20525_v2 = vld [vmem:[#allocation2 + $0x1ec] ss:$76 sps:$4 sm:$0xff]  }
 0x24c   :  { %v8465_v28 = vmul.f32 0.5, %v19569_v12  ;;  %v8467_v29 = vmul.f32 0.5, %v19573_v13  ;;  %v19571_v30 = vadd.f32 %v6921_v23, %v1288_v61  ;;  %v19575_v31 = vadd.f32 %v7093_v25, %v1296_v62  ;;  %v20517_v61 = vld [vmem:[#allocation2 + $0x150] ss:$76 sps:$4 sm:$0xff]   ;;  %v20520_v62 = vld [vmem:[#allocation2 + $0x158] ss:$76 sps:$4 sm:$0xff]  }
 0x24d   :  { %22785 = vtanh.f32 %v8464_v19  ;;  %v8483_v32 = vmul.f32 0.5, %v19570_v21  ;;  %v8485_v33 = vmul.f32 0.5, %v19574_v22  ;;  %v20528_v3 = vld [vmem:[#allocation2 + $0x1f4] ss:$76 sps:$4 sm:$0xff]   ;;  %v20526_v8 = vld [vmem:[#allocation2 + $0x1f0] ss:$76 sps:$4 sm:$0xff]  }
 0x24e   :  { %22787 = vtanh.f32 %v8466_v20  ;;  %7238 = vmatpush1.bf16.msra.mxu0 %v20493_v6  ;;  %7410 = vmatpush1.bf16.msra.mxu1 %v20496_v16  ;;  %v8484_v38 = vmul.f32 0.5, %v19571_v30  ;;  %v8486_v41 = vmul.f32 0.5, %v19575_v31  ;;  %v20523_v7 = vld [vmem:[#allocation2 + $0x1e8] ss:$76 sps:$4 sm:$0xff]   ;;  %v20534_v22 = vld [vmem:[#allocation2 + $0x28c] ss:$76 sps:$4 sm:$0xff]  }
 0x24f   :  { %22789 = vtanh.f32 %v8465_v28  ;;  %7239 = vmatprep.subr.bf16.mxu0 %v20501_v18  ;;  %7411 = vmatprep.subr.bf16.mxu1 %v20504_v27  ;;  %v20531_v18 = vld [vmem:[#allocation2 + $0x284] ss:$76 sps:$4 sm:$0xff]   ;;  %v20529_v31 = vld [vmem:[#allocation2 + $0x280] ss:$76 sps:$4 sm:$0xff]  }
 0x250   :  { %22791 = vtanh.f32 %v8467_v29 }
 0x251   :  { %22793 = vtanh.f32 %v8483_v32  ;;  %v20532_v32 = vld [vmem:[#allocation2 + $0x288] ss:$76 sps:$4 sm:$0xff]  }
 0x252   :  { %22795 = vtanh.f32 %v8485_v33  ;;  %7240 = vmatpush1.bf16.msra.mxu0 %v20499_v34  ;;  %7412 = vmatpush1.bf16.msra.mxu1 %v20502_v37  ;;  %v20537_v34 = vld [vmem:[#allocation2 + $0x31c] ss:$76 sps:$4 sm:$0xff]   ;;  %v20540_v37 = vld [vmem:[#allocation2 + $0x324] ss:$76 sps:$4 sm:$0xff]  }
 0x253   :  { %22797 = vtanh.f32 %v8484_v38  ;;  %7440 = vmatprep.subr.bf16.mxu0 %v20507_v39  ;;  %7612 = vmatprep.subr.bf16.mxu1 %v20510_v40  ;;  %v20535_v39 = vld [vmem:[#allocation2 + $0x318] ss:$76 sps:$4 sm:$0xff]   ;;  %v20538_v40 = vld [vmem:[#allocation2 + $0x320] ss:$76 sps:$4 sm:$0xff]  }
 0x254   :  { %22799 = vtanh.f32 %v8486_v41  ;;  %v20543_v41 = vld [vmem:[#allocation2 + $0x3b4] ss:$76 sps:$4 sm:$0xff]  }
 0x255   :  { %7258 = vmatmul.mubr.bf16.vlgmr.msra.gmra.mrb[4].mxu0 %v23328_v0  ;;  %7430 = vmatmul.mubr.bf16.vlgmr.msra.gmra.mrb[4].mxu1 %v23328_v0 }
 0x256   :  { %7441 = vmatpush1.bf16.msra.mxu0 %v20505_v42  ;;  %7613 = vmatpush1.bf16.msra.mxu1 %v20508_v43  ;;  %v20546_v42 = vld [vmem:[#allocation2 + $0x3bc] ss:$76 sps:$4 sm:$0xff]  }
 0x257   :  { %v22786_v49 = vpop.eup %22785  ;;  %7442 = vmatprep.subr.bf16.mxu0 %v20513_v45  ;;  %7614 = vmatprep.subr.bf16.mxu1 %v20516_v46  ;;  %v20541_v43 = vld [vmem:[#allocation2 + $0x3b0] ss:$76 sps:$4 sm:$0xff]   ;;  %v20544_v45 = vld [vmem:[#allocation2 + $0x3b8] ss:$76 sps:$4 sm:$0xff]  }
 0x258   :  { %v22788_v57 = vpop.eup %22787  ;;  %7472 = vmatprep.mubr.bf16.mxu0 %v23266_v50  ;;  %7644 = vmatprep.mubr.bf16.mxu1 %v23266_v50  ;;  %v8540_v60 = vmul.f32 0.5, %v22786_v49  ;;  %v20549_v46 = vld [vmem:[#allocation2 + $0x44c] ss:$76 sps:$4 sm:$0xff]   ;;  %v20550_v49 = vld [vmem:[#allocation2 + $0x450] ss:$76 sps:$4 sm:$0xff]  }
 0x259   :  { %v22790_v58 = vpop.eup %22789  ;;  %v8542_v1 = vmul.f32 0.5, %v22788_v57  ;;  %v20553_v57 = vld [vmem:[#allocation2 + $0x4e0] ss:$76 sps:$4 sm:$0xff]  }
 0x25a   :  { %v22792_v59 = vpop.eup %22791  ;;  %7443 = vmatpush1.bf16.msra.mxu0 %v20511_v47  ;;  %7615 = vmatpush1.bf16.msra.mxu1 %v20514_v48  ;;  %v8541_v5 = vmul.f32 0.5, %v22790_v58  ;;  %v8578_v14 = vadd.f32 0.5, %v8540_v60  ;;  %v20552_v47 = vld [vmem:[#allocation2 + $0x454] ss:$76 sps:$4 sm:$0xff]   ;;  %v20564_v60 = vld [vmem:[#allocation2 + $0x584] ss:$76 sps:$4 sm:$0xff]  }
 0x25b   :  { %v22794_v63 = vpop.eup %22793  ;;  %7444 = vmatprep.subr.bf16.mxu0 %v20519_v53  ;;  %7616 = vmatprep.subr.bf16.mxu1 %v20522_v54  ;;  %v8543_v11 = vmul.f32 0.5, %v22792_v59  ;;  %v8580_v19 = vadd.f32 0.5, %v8542_v1  ;;  %v20547_v48 = vld [vmem:[#allocation2 + $0x448] ss:$76 sps:$4 sm:$0xff]   ;;  %v20555_v53 = vld [vmem:[#allocation2 + $0x4e4] ss:$76 sps:$4 sm:$0xff]  }
 0x25c   :  { %v22796_v4 = vpop.eup %22795  ;;  %v8559_v6 = vmul.f32 0.5, %v22794_v63  ;;  %v8579_v23 = vadd.f32 0.5, %v8541_v5  ;;  %v20558_v54 = vld [vmem:[#allocation2 + $0x4ec] ss:$76 sps:$4 sm:$0xff]   ;;  %v20556_v58 = vld [vmem:[#allocation2 + $0x4e8] ss:$76 sps:$4 sm:$0xff]  }
 0x25d   :  { %v22798_v10 = vpop.eup %22797  ;;  %v8561_v12 = vmul.f32 0.5, %v22796_v4  ;;  %v8581_v28 = vadd.f32 0.5, %v8543_v11  ;;  %v20561_v59 = vld [vmem:[#allocation2 + $0x57c] ss:$76 sps:$4 sm:$0xff]   ;;  %v20567_v63 = vld [vmem:[#allocation2 + $0x614] ss:$76 sps:$4 sm:$0xff]  }
 0x25e   :  { %v22800_v13 = vpop.eup %22799  ;;  %v8597_v15 = vadd.f32 0.5, %v8559_v6  ;;  %v8560_v16 = vmul.f32 0.5, %v22798_v10  ;;  %7445 = vmatpush1.bf16.msra.mxu0 %v20517_v61  ;;  %7617 = vmatpush1.bf16.msra.mxu1 %v20520_v62  ;;  %v20559_v61 = vld [vmem:[#allocation2 + $0x578] ss:$76 sps:$4 sm:$0xff]   ;;  %v20562_v62 = vld [vmem:[#allocation2 + $0x580] ss:$76 sps:$4 sm:$0xff]  }
 0x25f   :  { %v8599_v20 = vadd.f32 0.5, %v8561_v12  ;;  %v8562_v21 = vmul.f32 0.5, %v22800_v13  ;;  %7446 = vmatprep.subr.bf16.mxu0 %v20525_v2  ;;  %7618 = vmatprep.subr.bf16.mxu1 %v20528_v3  ;;  %v20570_v1 = vld [vmem:[#allocation2 + $0x61c] ss:$76 sps:$4 sm:$0xff]   ;;  %v20568_v3 = vld [vmem:[#allocation2 + $0x618] ss:$76 sps:$4 sm:$0xff]  }
 0x260   :  { %v23368_v25 = vpack.c.bf16 %v8597_v15, %v8578_v14  ;;  %v8598_v27 = vadd.f32 0.5, %v8560_v16  ;;  %v20565_v2 = vld [vmem:[#allocation2 + $0x610] ss:$76 sps:$4 sm:$0xff]   ;;  %v20573_v4 = vld [vmem:[#allocation2 + $0x6ac] ss:$76 sps:$4 sm:$0xff]  }
 0x261   :  { %v23370_v29 = vpack.c.bf16 %v8599_v20, %v8580_v19  ;;  %v8600_v30 = vadd.f32 0.5, %v8562_v21  ;;  %v20576_v5 = vld [vmem:[#allocation2 + $0x6b4] ss:$76 sps:$4 sm:$0xff]   ;;  %v20582_v10 = vld [vmem:[#allocation2 + $0x74c] ss:$76 sps:$4 sm:$0xff]  }
 0x262   :  { %7447 = vmatpush1.bf16.msra.mxu0 %v20523_v7  ;;  %7619 = vmatpush1.bf16.msra.mxu1 %v20526_v8  ;;  %v23372_v33 = vpack.c.bf16 %v8598_v27, %v8579_v23  ;;  %v20571_v6 = vld [vmem:[#allocation2 + $0x6a8] ss:$76 sps:$4 sm:$0xff]   ;;  %v20574_v7 = vld [vmem:[#allocation2 + $0x6b0] ss:$76 sps:$4 sm:$0xff]   ;;  %v20577_v11 = vld [vmem:[#allocation2 + $0x740] ss:$76 sps:$4 sm:$0xff]  }
 0x263   :  { %7448 = vmatprep.subr.bf16.mxu0 %v20531_v18  ;;  %7620 = vmatprep.subr.bf16.mxu1 %v20534_v22  ;;  %v23374_v38 = vpack.c.bf16 %v8600_v30, %v8581_v28  ;;  %v20579_v8 = vld [vmem:[#allocation2 + $0x744] ss:$76 sps:$4 sm:$0xff]   ;;  %v20580_v12 = vld [vmem:[#allocation2 + $0x748] ss:$76 sps:$4 sm:$0xff]   ;;  %v20586_v16 = vld [vmem:[#allocation2 + $0x7e0] ss:$76 sps:$4 sm:$0xff]  }
 0x264   :  { %v20585_v13 = vld [vmem:[#allocation2 + $0x7dc] ss:$76 sps:$4 sm:$0xff]   ;;  %v20588_v14 = vld [vmem:[#allocation2 + $0x7e4] ss:$76 sps:$4 sm:$0xff]   ;;  %v20591_v18 = vld [vmem:[#allocation2 + $0x874] ss:$76 sps:$4 sm:$0xff]  }
 0x265   :  { %v20583_v15 = vld [vmem:[#allocation2 + $0x7d8] ss:$76 sps:$4 sm:$0xff]   ;;  %v20594_v19 = vld [vmem:[#allocation2 + $0x87c] ss:$76 sps:$4 sm:$0xff]   ;;  %v20600_v23 = vld [vmem:[#allocation2 + $0x914] ss:$76 sps:$4 sm:$0xff]  }
 0x266   :  { %7449 = vmatpush1.bf16.msra.mxu0 %v20529_v31  ;;  %7621 = vmatpush1.bf16.msra.mxu1 %v20532_v32  ;;  %v20589_v20 = vld [vmem:[#allocation2 + $0x870] ss:$76 sps:$4 sm:$0xff]   ;;  %v20592_v21 = vld [vmem:[#allocation2 + $0x878] ss:$76 sps:$4 sm:$0xff]   ;;  %v20595_v27 = vld [vmem:[#allocation2 + $0x908] ss:$76 sps:$4 sm:$0xff]  }
 0x267   :  { %7450 = vmatprep.subr.bf16.mxu0 %v20537_v34  ;;  %7622 = vmatprep.subr.bf16.mxu1 %v20540_v37  ;;  %v20597_v22 = vld [vmem:[#allocation2 + $0x90c] ss:$76 sps:$4 sm:$0xff]   ;;  %v20598_v28 = vld [vmem:[#allocation2 + $0x910] ss:$76 sps:$4 sm:$0xff]   ;;  %v20604_v34 = vld [vmem:[#allocation2 + $0x9a8] ss:$76 sps:$4 sm:$0xff]  }
 0x268   :  { %v20603_v30 = vld [vmem:[#allocation2 + $0x9a4] ss:$76 sps:$4 sm:$0xff]   ;;  %v20606_v31 = vld [vmem:[#allocation2 + $0x9ac] ss:$76 sps:$4 sm:$0xff]   ;;  %v20609_v37 = vld [vmem:[#allocation2 + $0xa3c] ss:$76 sps:$4 sm:$0xff]  }
 0x269   :  { %v20601_v32 = vld [vmem:[#allocation2 + $0x9a0] ss:$76 sps:$4 sm:$0xff]  }
 0x26a   :  { %7451 = vmatpush1.bf16.msra.mxu0 %v20535_v39  ;;  %7623 = vmatpush1.bf16.msra.mxu1 %v20538_v40  ;;  %v20612_v39 = vld [vmem:[#allocation2 + $0xa44] ss:$76 sps:$4 sm:$0xff]  }
 0x26b   :  { %7452 = vmatprep.subr.bf16.mxu0 %v20543_v41  ;;  %7624 = vmatprep.subr.bf16.mxu1 %v20546_v42  ;;  %v20607_v40 = vld [vmem:[#allocation2 + $0xa38] ss:$76 sps:$4 sm:$0xff]   ;;  %v20610_v41 = vld [vmem:[#allocation2 + $0xa40] ss:$76 sps:$4 sm:$0xff]  }
 0x26c   :  { %v20615_v42 = vld [vmem:[#allocation2 + $0xad4] ss:$76 sps:$4 sm:$0xff]  }
 0x26e   :  { %7453 = vmatpush1.bf16.msra.mxu0 %v20541_v43  ;;  %7625 = vmatpush1.bf16.msra.mxu1 %v20544_v45  ;;  %v20618_v43 = vld [vmem:[#allocation2 + $0xadc] ss:$76 sps:$4 sm:$0xff]  }
 0x26f   :  { %7454 = vmatprep.subr.bf16.mxu0 %v20549_v46  ;;  %7626 = vmatprep.subr.bf16.mxu1 %v20552_v47  ;;  %v20613_v45 = vld [vmem:[#allocation2 + $0xad0] ss:$76 sps:$4 sm:$0xff]   ;;  %v20616_v46 = vld [vmem:[#allocation2 + $0xad8] ss:$76 sps:$4 sm:$0xff]  }
 0x270   :  { %v20621_v47 = vld [vmem:[#allocation2 + $0xb6c] ss:$76 sps:$4 sm:$0xff]  }
 0x272   :  { %7455 = vmatpush1.bf16.msra.mxu0 %v20547_v48  ;;  %7627 = vmatpush1.bf16.msra.mxu1 %v20550_v49  ;;  %v20624_v48 = vld [vmem:[#allocation2 + $0xb74] ss:$76 sps:$4 sm:$0xff]  }
 0x273   :  { %7456 = vmatprep.subr.bf16.mxu0 %v20555_v53  ;;  %7628 = vmatprep.subr.bf16.mxu1 %v20558_v54  ;;  %v20619_v49 = vld [vmem:[#allocation2 + $0xb68] ss:$76 sps:$4 sm:$0xff]   ;;  %v20622_v53 = vld [vmem:[#allocation2 + $0xb70] ss:$76 sps:$4 sm:$0xff]  }
 0x274   :  { %v20627_v54 = vld [vmem:[#allocation2 + $0xc04] ss:$76 sps:$4 sm:$0xff]  }
 0x276   :  { %7457 = vmatpush1.bf16.msra.mxu0 %v20553_v57  ;;  %7629 = vmatpush1.bf16.msra.mxu1 %v20556_v58  ;;  %v20630_v57 = vld [vmem:[#allocation2 + $0xc0c] ss:$76 sps:$4 sm:$0xff]  }
 0x277   :  { %7458 = vmatprep.subr.bf16.mxu0 %v20561_v59  ;;  %7630 = vmatprep.subr.bf16.mxu1 %v20564_v60  ;;  %v20625_v58 = vld [vmem:[#allocation2 + $0xc00] ss:$76 sps:$4 sm:$0xff]   ;;  %v20628_v59 = vld [vmem:[#allocation2 + $0xc08] ss:$76 sps:$4 sm:$0xff]  }
 0x278   :  { %v20633_v60 = vld [vmem:[#allocation2 + $0xc9c] ss:$76 sps:$4 sm:$0xff]  }
 0x27a   :  { %7459 = vmatpush1.bf16.msra.mxu0 %v20559_v61  ;;  %7631 = vmatpush1.bf16.msra.mxu1 %v20562_v62  ;;  %v20636_v61 = vld [vmem:[#allocation2 + $0xca4] ss:$76 sps:$4 sm:$0xff]  }
 0x27b   :  { %7460 = vmatprep.subr.bf16.mxu0 %v20567_v63  ;;  %7632 = vmatprep.subr.bf16.mxu1 %v20570_v1  ;;  %v20631_v62 = vld [vmem:[#allocation2 + $0xc98] ss:$76 sps:$4 sm:$0xff]   ;;  %v20634_v63 = vld [vmem:[#allocation2 + $0xca0] ss:$76 sps:$4 sm:$0xff]  }
 0x27c   :  { %v20639_v1 = vld [vmem:[#allocation2 + $0xd34] ss:$76 sps:$4 sm:$0xff]  }
 0x27e   :  { %7461 = vmatpush1.bf16.msra.mxu0 %v20565_v2  ;;  %7633 = vmatpush1.bf16.msra.mxu1 %v20568_v3  ;;  %v20642_v2 = vld [vmem:[#allocation2 + $0xd3c] ss:$76 sps:$4 sm:$0xff]  }
 0x27f   :  { %7462 = vmatprep.subr.bf16.mxu0 %v20573_v4  ;;  %7634 = vmatprep.subr.bf16.mxu1 %v20576_v5  ;;  %v20637_v3 = vld [vmem:[#allocation2 + $0xd30] ss:$76 sps:$4 sm:$0xff]   ;;  %v20640_v4 = vld [vmem:[#allocation2 + $0xd38] ss:$76 sps:$4 sm:$0xff]  }
 0x280   :  { %v20645_v5 = vld [vmem:[#allocation2 + $0xdcc] ss:$76 sps:$4 sm:$0xff]  }
 0x282   :  { %7463 = vmatpush1.bf16.msra.mxu0 %v20571_v6  ;;  %7635 = vmatpush1.bf16.msra.mxu1 %v20574_v7  ;;  %v20648_v6 = vld [vmem:[#allocation2 + $0xdd4] ss:$76 sps:$4 sm:$0xff]  }
 0x283   :  { %7464 = vmatprep.subr.bf16.mxu0 %v20579_v8  ;;  %7636 = vmatprep.subr.bf16.mxu1 %v20582_v10  ;;  %v20643_v7 = vld [vmem:[#allocation2 + $0xdc8] ss:$76 sps:$4 sm:$0xff]   ;;  %v20646_v8 = vld [vmem:[#allocation2 + $0xdd0] ss:$76 sps:$4 sm:$0xff]  }
 0x284   :  { %v20651_v10 = vld [vmem:[#allocation2 + $0xe64] ss:$76 sps:$4 sm:$0xff]  }
 0x286   :  { %7465 = vmatpush1.bf16.msra.mxu0 %v20577_v11  ;;  %7637 = vmatpush1.bf16.msra.mxu1 %v20580_v12  ;;  %v20654_v11 = vld [vmem:[#allocation2 + $0xe6c] ss:$76 sps:$4 sm:$0xff]  }
 0x287   :  { %7466 = vmatprep.subr.bf16.mxu0 %v20585_v13  ;;  %7638 = vmatprep.subr.bf16.mxu1 %v20588_v14  ;;  %v20649_v12 = vld [vmem:[#allocation2 + $0xe60] ss:$76 sps:$4 sm:$0xff]   ;;  %v20652_v13 = vld [vmem:[#allocation2 + $0xe68] ss:$76 sps:$4 sm:$0xff]  }
 0x288   :  { %v20657_v14 = vld [vmem:[#allocation2 + $0xefc] ss:$76 sps:$4 sm:$0xff]  }
 0x28a   :  { %7467 = vmatpush1.bf16.msra.mxu0 %v20583_v15  ;;  %7639 = vmatpush1.bf16.msra.mxu1 %v20586_v16  ;;  %v20660_v15 = vld [vmem:[#allocation2 + $0xf04] ss:$76 sps:$4 sm:$0xff]  }
 0x28b   :  { %7468 = vmatprep.subr.bf16.mxu0 %v20591_v18  ;;  %7640 = vmatprep.subr.bf16.mxu1 %v20594_v19  ;;  %v20655_v16 = vld [vmem:[#allocation2 + $0xef8] ss:$76 sps:$4 sm:$0xff]   ;;  %v20658_v18 = vld [vmem:[#allocation2 + $0xf00] ss:$76 sps:$4 sm:$0xff]  }
 0x28c   :  { %v20663_v19 = vld [vmem:[#allocation2 + $0xf94] ss:$76 sps:$4 sm:$0xff]  }
 0x28e   :  { %7469 = vmatpush1.bf16.msra.mxu0 %v20589_v20  ;;  %7641 = vmatpush1.bf16.msra.mxu1 %v20592_v21  ;;  %v20666_v20 = vld [vmem:[#allocation2 + $0xf9c] ss:$76 sps:$4 sm:$0xff]  }
 0x28f   :  { %7470 = vmatprep.subr.bf16.mxu0 %v20597_v22  ;;  %7642 = vmatprep.subr.bf16.mxu1 %v20600_v23  ;;  %v20661_v21 = vld [vmem:[#allocation2 + $0xf90] ss:$76 sps:$4 sm:$0xff]   ;;  %v20664_v22 = vld [vmem:[#allocation2 + $0xf98] ss:$76 sps:$4 sm:$0xff]  }
 0x290   :  { %v20669_v23 = vld [vmem:[#allocation2 + $0x102c] ss:$76 sps:$4 sm:$0xff]  }
 0x292   :  { %7471 = vmatpush1.bf16.msra.mxu0 %v20595_v27  ;;  %7643 = vmatpush1.bf16.msra.mxu1 %v20598_v28  ;;  %v20672_v27 = vld [vmem:[#allocation2 + $0x1034] ss:$76 sps:$4 sm:$0xff]  }
 0x293   :  { %7483 = vmatprep.subr.bf16.mxu0 %v20603_v30  ;;  %7655 = vmatprep.subr.bf16.mxu1 %v20606_v31  ;;  %v20667_v28 = vld [vmem:[#allocation2 + $0x1028] ss:$76 sps:$4 sm:$0xff]   ;;  %v20670_v30 = vld [vmem:[#allocation2 + $0x1030] ss:$76 sps:$4 sm:$0xff]  }
 0x294   :  { %v20675_v31 = vld [vmem:[#allocation2 + $0x10c4] ss:$76 sps:$4 sm:$0xff]  }
 0x295   :  { %7473 = vmatmul.mubr.bf16.vlgmr.msra.gmra.mrb[8].mxu0 %v23276_v9  ;;  %7645 = vmatmul.mubr.bf16.vlgmr.msra.gmra.mrb[8].mxu1 %v23276_v9 }
 0x296   :  { %7484 = vmatpush1.bf16.msra.mxu0 %v20601_v32  ;;  %7656 = vmatpush1.bf16.msra.mxu1 %v20604_v34  ;;  %v20678_v32 = vld [vmem:[#allocation2 + $0x10cc] ss:$76 sps:$4 sm:$0xff]  }
 0x297   :  { %7485 = vmatprep.subr.bf16.mxu0 %v20609_v37  ;;  %7657 = vmatprep.subr.bf16.mxu1 %v20612_v39  ;;  %v20673_v34 = vld [vmem:[#allocation2 + $0x10c0] ss:$76 sps:$4 sm:$0xff]   ;;  %v20676_v37 = vld [vmem:[#allocation2 + $0x10c8] ss:$76 sps:$4 sm:$0xff]  }
 0x298   :  { %7515 = vmatprep.mubr.bf16.mxu0 %v23286_v36  ;;  %7687 = vmatprep.mubr.bf16.mxu1 %v23286_v36  ;;  %v20681_v39 = vld [vmem:[#allocation2 + $0x115c] ss:$76 sps:$4 sm:$0xff]  }
 0x29a   :  { %7486 = vmatpush1.bf16.msra.mxu0 %v20607_v40  ;;  %7658 = vmatpush1.bf16.msra.mxu1 %v20610_v41  ;;  %v20684_v40 = vld [vmem:[#allocation2 + $0x1164] ss:$76 sps:$4 sm:$0xff]  }
 0x29b   :  { %7487 = vmatprep.subr.bf16.mxu0 %v20615_v42  ;;  %7659 = vmatprep.subr.bf16.mxu1 %v20618_v43  ;;  %v20679_v41 = vld [vmem:[#allocation2 + $0x1158] ss:$76 sps:$4 sm:$0xff]   ;;  %v20682_v42 = vld [vmem:[#allocation2 + $0x1160] ss:$76 sps:$4 sm:$0xff]  }
 0x29c   :  { %v20687_v43 = vld [vmem:[#allocation2 + $0x11f4] ss:$76 sps:$4 sm:$0xff]  }
 0x29e   :  { %7488 = vmatpush1.bf16.msra.mxu0 %v20613_v45  ;;  %7660 = vmatpush1.bf16.msra.mxu1 %v20616_v46  ;;  %v20690_v45 = vld [vmem:[#allocation2 + $0x11fc] ss:$76 sps:$4 sm:$0xff]  }
 0x29f   :  { %7489 = vmatprep.subr.bf16.mxu0 %v20621_v47  ;;  %7661 = vmatprep.subr.bf16.mxu1 %v20624_v48  ;;  %v20685_v46 = vld [vmem:[#allocation2 + $0x11f0] ss:$76 sps:$4 sm:$0xff]   ;;  %v20688_v47 = vld [vmem:[#allocation2 + $0x11f8] ss:$76 sps:$4 sm:$0xff]  }
 0x2a0   :  { %v20693_v48 = vld [vmem:[#allocation2 + $0x128c] ss:$76 sps:$4 sm:$0xff]  }
 0x2a2   :  { %7490 = vmatpush1.bf16.msra.mxu0 %v20619_v49  ;;  %7662 = vmatpush1.bf16.msra.mxu1 %v20622_v53  ;;  %v20696_v49 = vld [vmem:[#allocation2 + $0x1294] ss:$76 sps:$4 sm:$0xff]  }
 0x2a3   :  { %7491 = vmatprep.subr.bf16.mxu0 %v20627_v54  ;;  %7663 = vmatprep.subr.bf16.mxu1 %v20630_v57  ;;  %v20691_v53 = vld [vmem:[#allocation2 + $0x1288] ss:$76 sps:$4 sm:$0xff]   ;;  %v20694_v54 = vld [vmem:[#allocation2 + $0x1290] ss:$76 sps:$4 sm:$0xff]  }
 0x2a4   :  { %v20699_v57 = vld [vmem:[#allocation2 + $0x1324] ss:$76 sps:$4 sm:$0xff]  }
 0x2a6   :  { %7492 = vmatpush1.bf16.msra.mxu0 %v20625_v58  ;;  %7664 = vmatpush1.bf16.msra.mxu1 %v20628_v59  ;;  %v20702_v58 = vld [vmem:[#allocation2 + $0x132c] ss:$76 sps:$4 sm:$0xff]  }
 0x2a7   :  { %7493 = vmatprep.subr.bf16.mxu0 %v20633_v60  ;;  %7665 = vmatprep.subr.bf16.mxu1 %v20636_v61  ;;  %v20697_v59 = vld [vmem:[#allocation2 + $0x1320] ss:$76 sps:$4 sm:$0xff]   ;;  %v20700_v60 = vld [vmem:[#allocation2 + $0x1328] ss:$76 sps:$4 sm:$0xff]  }
 0x2a8   :  { %v20705_v61 = vld [vmem:[#allocation2 + $0x13bc] ss:$76 sps:$4 sm:$0xff]  }
 0x2aa   :  { %7494 = vmatpush1.bf16.msra.mxu0 %v20631_v62  ;;  %7666 = vmatpush1.bf16.msra.mxu1 %v20634_v63  ;;  %v20708_v62 = vld [vmem:[#allocation2 + $0x13c4] ss:$76 sps:$4 sm:$0xff]  }
 0x2ab   :  { %7495 = vmatprep.subr.bf16.mxu0 %v20639_v1  ;;  %7667 = vmatprep.subr.bf16.mxu1 %v20642_v2  ;;  %v20703_v63 = vld [vmem:[#allocation2 + $0x13b8] ss:$76 sps:$4 sm:$0xff]   ;;  %v20706_v1 = vld [vmem:[#allocation2 + $0x13c0] ss:$76 sps:$4 sm:$0xff]  }
 0x2ac   :  { %v20711_v2 = vld [vmem:[#allocation2 + $0x1454] ss:$76 sps:$4 sm:$0xff]  }
 0x2ae   :  { %7496 = vmatpush1.bf16.msra.mxu0 %v20637_v3  ;;  %7668 = vmatpush1.bf16.msra.mxu1 %v20640_v4  ;;  %v20714_v3 = vld [vmem:[#allocation2 + $0x145c] ss:$76 sps:$4 sm:$0xff]  }
 0x2af   :  { %7497 = vmatprep.subr.bf16.mxu0 %v20645_v5  ;;  %7669 = vmatprep.subr.bf16.mxu1 %v20648_v6  ;;  %v20709_v4 = vld [vmem:[#allocation2 + $0x1450] ss:$76 sps:$4 sm:$0xff]   ;;  %v20712_v5 = vld [vmem:[#allocation2 + $0x1458] ss:$76 sps:$4 sm:$0xff]  }
 0x2b0   :  { %v20717_v6 = vld [vmem:[#allocation2 + $0x14ec] ss:$76 sps:$4 sm:$0xff]  }
 0x2b2   :  { %7498 = vmatpush1.bf16.msra.mxu0 %v20643_v7  ;;  %7670 = vmatpush1.bf16.msra.mxu1 %v20646_v8  ;;  %v20720_v7 = vld [vmem:[#allocation2 + $0x14f4] ss:$76 sps:$4 sm:$0xff]  }
 0x2b3   :  { %7499 = vmatprep.subr.bf16.mxu0 %v20651_v10  ;;  %7671 = vmatprep.subr.bf16.mxu1 %v20654_v11  ;;  %v20715_v8 = vld [vmem:[#allocation2 + $0x14e8] ss:$76 sps:$4 sm:$0xff]   ;;  %v20718_v10 = vld [vmem:[#allocation2 + $0x14f0] ss:$76 sps:$4 sm:$0xff]  }
 0x2b4   :  { %v20723_v11 = vld [vmem:[#allocation2 + $0x1584] ss:$76 sps:$4 sm:$0xff]  }
 0x2b6   :  { %7500 = vmatpush1.bf16.msra.mxu0 %v20649_v12  ;;  %7672 = vmatpush1.bf16.msra.mxu1 %v20652_v13  ;;  %v20726_v12 = vld [vmem:[#allocation2 + $0x158c] ss:$76 sps:$4 sm:$0xff]  }
 0x2b7   :  { %7501 = vmatprep.subr.bf16.mxu0 %v20657_v14  ;;  %7673 = vmatprep.subr.bf16.mxu1 %v20660_v15  ;;  %v20721_v13 = vld [vmem:[#allocation2 + $0x1580] ss:$76 sps:$4 sm:$0xff]   ;;  %v20724_v14 = vld [vmem:[#allocation2 + $0x1588] ss:$76 sps:$4 sm:$0xff]  }
 0x2b8   :  { %v20729_v15 = vld [vmem:[#allocation2 + $0x161c] ss:$76 sps:$4 sm:$0xff]  }
 0x2ba   :  { %7502 = vmatpush1.bf16.msra.mxu0 %v20655_v16  ;;  %7674 = vmatpush1.bf16.msra.mxu1 %v20658_v18  ;;  %v20732_v16 = vld [vmem:[#allocation2 + $0x1624] ss:$76 sps:$4 sm:$0xff]  }
 0x2bb   :  { %7503 = vmatprep.subr.bf16.mxu0 %v20663_v19  ;;  %7675 = vmatprep.subr.bf16.mxu1 %v20666_v20  ;;  %v20727_v18 = vld [vmem:[#allocation2 + $0x1618] ss:$76 sps:$4 sm:$0xff]   ;;  %v20730_v19 = vld [vmem:[#allocation2 + $0x1620] ss:$76 sps:$4 sm:$0xff]  }
 0x2bc   :  { %v20735_v20 = vld [vmem:[#allocation2 + $0x16b4] ss:$76 sps:$4 sm:$0xff]  }
 0x2be   :  { %7504 = vmatpush1.bf16.msra.mxu0 %v20661_v21  ;;  %7676 = vmatpush1.bf16.msra.mxu1 %v20664_v22  ;;  %v20738_v21 = vld [vmem:[#allocation2 + $0x16bc] ss:$76 sps:$4 sm:$0xff]  }
 0x2bf   :  { %7505 = vmatprep.subr.bf16.mxu0 %v20669_v23  ;;  %7677 = vmatprep.subr.bf16.mxu1 %v20672_v27  ;;  %v20733_v22 = vld [vmem:[#allocation2 + $0x16b0] ss:$76 sps:$4 sm:$0xff]   ;;  %v20736_v23 = vld [vmem:[#allocation2 + $0x16b8] ss:$76 sps:$4 sm:$0xff]  }
 0x2c0   :  { %v20741_v27 = vld [vmem:[#allocation2 + $0x174c] ss:$76 sps:$4 sm:$0xff]  }
 0x2c2   :  { %7506 = vmatpush1.bf16.msra.mxu0 %v20667_v28  ;;  %7678 = vmatpush1.bf16.msra.mxu1 %v20670_v30  ;;  %v20744_v28 = vld [vmem:[#allocation2 + $0x1754] ss:$76 sps:$4 sm:$0xff]  }
 0x2c3   :  { %7507 = vmatprep.subr.bf16.mxu0 %v20675_v31  ;;  %7679 = vmatprep.subr.bf16.mxu1 %v20678_v32  ;;  %v20739_v30 = vld [vmem:[#allocation2 + $0x1748] ss:$76 sps:$4 sm:$0xff]   ;;  %v20742_v31 = vld [vmem:[#allocation2 + $0x1750] ss:$76 sps:$4 sm:$0xff]  }
 0x2c4   :  { %v20747_v32 = vld [vmem:[#allocation2 + $0x17e4] ss:$76 sps:$4 sm:$0xff]  }
 0x2c6   :  { %7508 = vmatpush1.bf16.msra.mxu0 %v20673_v34  ;;  %7680 = vmatpush1.bf16.msra.mxu1 %v20676_v37  ;;  %v20750_v34 = vld [vmem:[#allocation2 + $0x17ec] ss:$76 sps:$4 sm:$0xff]  }
 0x2c7   :  { %7509 = vmatprep.subr.bf16.mxu0 %v20681_v39  ;;  %7681 = vmatprep.subr.bf16.mxu1 %v20684_v40  ;;  %v20745_v37 = vld [vmem:[#allocation2 + $0x17e0] ss:$76 sps:$4 sm:$0xff]   ;;  %v20748_v39 = vld [vmem:[#allocation2 + $0x17e8] ss:$76 sps:$4 sm:$0xff]  }
 0x2c8   :  { %v20753_v40 = vld [vmem:[#allocation2 + $0x187c] ss:$76 sps:$4 sm:$0xff]  }
 0x2ca   :  { %7510 = vmatpush1.bf16.msra.mxu0 %v20679_v41  ;;  %7682 = vmatpush1.bf16.msra.mxu1 %v20682_v42  ;;  %v20756_v41 = vld [vmem:[#allocation2 + $0x1884] ss:$76 sps:$4 sm:$0xff]  }
 0x2cb   :  { %7511 = vmatprep.subr.bf16.mxu0 %v20687_v43  ;;  %7683 = vmatprep.subr.bf16.mxu1 %v20690_v45  ;;  %v20751_v42 = vld [vmem:[#allocation2 + $0x1878] ss:$76 sps:$4 sm:$0xff]   ;;  %v20754_v43 = vld [vmem:[#allocation2 + $0x1880] ss:$76 sps:$4 sm:$0xff]  }
 0x2cc   :  { %v20759_v45 = vld [vmem:[#allocation2 + $0x1914] ss:$76 sps:$4 sm:$0xff]  }
 0x2ce   :  { %7512 = vmatpush1.bf16.msra.mxu0 %v20685_v46  ;;  %7684 = vmatpush1.bf16.msra.mxu1 %v20688_v47  ;;  %v20762_v46 = vld [vmem:[#allocation2 + $0x191c] ss:$76 sps:$4 sm:$0xff]  }
 0x2cf   :  { %7513 = vmatprep.subr.bf16.mxu0 %v20693_v48  ;;  %7685 = vmatprep.subr.bf16.mxu1 %v20696_v49  ;;  %v20757_v47 = vld [vmem:[#allocation2 + $0x1910] ss:$76 sps:$4 sm:$0xff]   ;;  %v20760_v48 = vld [vmem:[#allocation2 + $0x1918] ss:$76 sps:$4 sm:$0xff]  }
 0x2d0   :  { %v20765_v49 = vld [vmem:[#allocation2 + $0x19ac] ss:$76 sps:$4 sm:$0xff]  }
 0x2d2   :  { %7514 = vmatpush1.bf16.msra.mxu0 %v20691_v53  ;;  %7686 = vmatpush1.bf16.msra.mxu1 %v20694_v54  ;;  %v20768_v53 = vld [vmem:[#allocation2 + $0x19b4] ss:$76 sps:$4 sm:$0xff]  }
 0x2d3   :  { %7526 = vmatprep.subr.bf16.mxu0 %v20699_v57  ;;  %7698 = vmatprep.subr.bf16.mxu1 %v20702_v58  ;;  %v20763_v54 = vld [vmem:[#allocation2 + $0x19a8] ss:$76 sps:$4 sm:$0xff]   ;;  %v20766_v57 = vld [vmem:[#allocation2 + $0x19b0] ss:$76 sps:$4 sm:$0xff]  }
 0x2d4   :  { %v20771_v58 = vld [vmem:[#allocation2 + $0x1a44] ss:$76 sps:$4 sm:$0xff]  }
 0x2d5   :  { %7516 = vmatmul.mubr.bf16.vlgmr.msra.gmra.mrb[8].mxu0 %v23296_v17  ;;  %7688 = vmatmul.mubr.bf16.vlgmr.msra.gmra.mrb[8].mxu1 %v23296_v17 }
 0x2d6   :  { %7527 = vmatpush1.bf16.msra.mxu0 %v20697_v59  ;;  %7699 = vmatpush1.bf16.msra.mxu1 %v20700_v60  ;;  %v20774_v59 = vld [vmem:[#allocation2 + $0x1a4c] ss:$76 sps:$4 sm:$0xff]  }
 0x2d7   :  { %7528 = vmatprep.subr.bf16.mxu0 %v20705_v61  ;;  %7700 = vmatprep.subr.bf16.mxu1 %v20708_v62  ;;  %v20769_v60 = vld [vmem:[#allocation2 + $0x1a40] ss:$76 sps:$4 sm:$0xff]   ;;  %v20772_v61 = vld [vmem:[#allocation2 + $0x1a48] ss:$76 sps:$4 sm:$0xff]  }
 0x2d8   :  { %7558 = vmatprep.mubr.bf16.mxu0 %v23306_v24  ;;  %7730 = vmatprep.mubr.bf16.mxu1 %v23306_v24  ;;  %v20777_v62 = vld [vmem:[#allocation2 + $0x1adc] ss:$76 sps:$4 sm:$0xff]  }
 0x2da   :  { %7529 = vmatpush1.bf16.msra.mxu0 %v20703_v63  ;;  %7701 = vmatpush1.bf16.msra.mxu1 %v20706_v1  ;;  %v20780_v63 = vld [vmem:[#allocation2 + $0x1ae4] ss:$76 sps:$4 sm:$0xff]  }
 0x2db   :  { %7530 = vmatprep.subr.bf16.mxu0 %v20711_v2  ;;  %7702 = vmatprep.subr.bf16.mxu1 %v20714_v3  ;;  %v20775_v1 = vld [vmem:[#allocation2 + $0x1ad8] ss:$76 sps:$4 sm:$0xff]   ;;  %v20778_v2 = vld [vmem:[#allocation2 + $0x1ae0] ss:$76 sps:$4 sm:$0xff]  }
 0x2dc   :  { %v20783_v3 = vld [vmem:[#allocation2 + $0x1b74] ss:$76 sps:$4 sm:$0xff]  }
 0x2de   :  { %7531 = vmatpush1.bf16.msra.mxu0 %v20709_v4  ;;  %7703 = vmatpush1.bf16.msra.mxu1 %v20712_v5  ;;  %v20786_v4 = vld [vmem:[#allocation2 + $0x1b7c] ss:$76 sps:$4 sm:$0xff]  }
 0x2df   :  { %7532 = vmatprep.subr.bf16.mxu0 %v20717_v6  ;;  %7704 = vmatprep.subr.bf16.mxu1 %v20720_v7  ;;  %v20781_v5 = vld [vmem:[#allocation2 + $0x1b70] ss:$76 sps:$4 sm:$0xff]   ;;  %v20784_v6 = vld [vmem:[#allocation2 + $0x1b78] ss:$76 sps:$4 sm:$0xff]  }
 0x2e0   :  { %v20789_v7 = vld [vmem:[#allocation2 + $0x1c0c] ss:$76 sps:$4 sm:$0xff]  }
 0x2e2   :  { %7533 = vmatpush1.bf16.msra.mxu0 %v20715_v8  ;;  %7705 = vmatpush1.bf16.msra.mxu1 %v20718_v10  ;;  %v20792_v8 = vld [vmem:[#allocation2 + $0x1c14] ss:$76 sps:$4 sm:$0xff]  }
 0x2e3   :  { %7534 = vmatprep.subr.bf16.mxu0 %v20723_v11  ;;  %7706 = vmatprep.subr.bf16.mxu1 %v20726_v12  ;;  %v20787_v10 = vld [vmem:[#allocation2 + $0x1c08] ss:$76 sps:$4 sm:$0xff]   ;;  %v20790_v11 = vld [vmem:[#allocation2 + $0x1c10] ss:$76 sps:$4 sm:$0xff]  }
 0x2e4   :  { %v20795_v12 = vld [vmem:[#allocation2 + $0x1ca4] ss:$76 sps:$4 sm:$0xff]  }
 0x2e6   :  { %7535 = vmatpush1.bf16.msra.mxu0 %v20721_v13  ;;  %7707 = vmatpush1.bf16.msra.mxu1 %v20724_v14  ;;  %v20798_v13 = vld [vmem:[#allocation2 + $0x1cac] ss:$76 sps:$4 sm:$0xff]  }
 0x2e7   :  { %7536 = vmatprep.subr.bf16.mxu0 %v20729_v15  ;;  %7708 = vmatprep.subr.bf16.mxu1 %v20732_v16  ;;  %v20793_v14 = vld [vmem:[#allocation2 + $0x1ca0] ss:$76 sps:$4 sm:$0xff]   ;;  %v20796_v15 = vld [vmem:[#allocation2 + $0x1ca8] ss:$76 sps:$4 sm:$0xff]  }
 0x2e8   :  { %v20801_v16 = vld [vmem:[#allocation2 + $0x1d3c] ss:$76 sps:$4 sm:$0xff]  }
 0x2ea   :  { %7537 = vmatpush1.bf16.msra.mxu0 %v20727_v18  ;;  %7709 = vmatpush1.bf16.msra.mxu1 %v20730_v19  ;;  %v20804_v18 = vld [vmem:[#allocation2 + $0x1d44] ss:$76 sps:$4 sm:$0xff]  }
 0x2eb   :  { %7538 = vmatprep.subr.bf16.mxu0 %v20735_v20  ;;  %7710 = vmatprep.subr.bf16.mxu1 %v20738_v21  ;;  %v20799_v19 = vld [vmem:[#allocation2 + $0x1d38] ss:$76 sps:$4 sm:$0xff]   ;;  %v20802_v20 = vld [vmem:[#allocation2 + $0x1d40] ss:$76 sps:$4 sm:$0xff]  }
 0x2ec   :  { %v20807_v21 = vld [vmem:[#allocation2 + $0x1dd4] ss:$76 sps:$4 sm:$0xff]  }
 0x2ee   :  { %7539 = vmatpush1.bf16.msra.mxu0 %v20733_v22  ;;  %7711 = vmatpush1.bf16.msra.mxu1 %v20736_v23  ;;  %v20810_v22 = vld [vmem:[#allocation2 + $0x1ddc] ss:$76 sps:$4 sm:$0xff]  }
 0x2ef   :  { %7540 = vmatprep.subr.bf16.mxu0 %v20741_v27  ;;  %7712 = vmatprep.subr.bf16.mxu1 %v20744_v28  ;;  %v20805_v23 = vld [vmem:[#allocation2 + $0x1dd0] ss:$76 sps:$4 sm:$0xff]   ;;  %v20808_v27 = vld [vmem:[#allocation2 + $0x1dd8] ss:$76 sps:$4 sm:$0xff]  }
 0x2f0   :  { %v20813_v28 = vld [vmem:[#allocation2 + $0x1e6c] ss:$76 sps:$4 sm:$0xff]  }
 0x2f2   :  { %7541 = vmatpush1.bf16.msra.mxu0 %v20739_v30  ;;  %7713 = vmatpush1.bf16.msra.mxu1 %v20742_v31  ;;  %v20816_v30 = vld [vmem:[#allocation2 + $0x1e74] ss:$76 sps:$4 sm:$0xff]  }
 0x2f3   :  { %7542 = vmatprep.subr.bf16.mxu0 %v20747_v32  ;;  %7714 = vmatprep.subr.bf16.mxu1 %v20750_v34  ;;  %v20811_v31 = vld [vmem:[#allocation2 + $0x1e68] ss:$76 sps:$4 sm:$0xff]   ;;  %v20814_v32 = vld [vmem:[#allocation2 + $0x1e70] ss:$76 sps:$4 sm:$0xff]  }
 0x2f4   :  { %v20819_v34 = vld [vmem:[#allocation2 + $0x1f04] ss:$76 sps:$4 sm:$0xff]  }
 0x2f6   :  { %7543 = vmatpush1.bf16.msra.mxu0 %v20745_v37  ;;  %7715 = vmatpush1.bf16.msra.mxu1 %v20748_v39  ;;  %v20822_v37 = vld [vmem:[#allocation2 + $0x1f0c] ss:$76 sps:$4 sm:$0xff]  }
 0x2f7   :  { %7544 = vmatprep.subr.bf16.mxu0 %v20753_v40  ;;  %7716 = vmatprep.subr.bf16.mxu1 %v20756_v41  ;;  %v20817_v39 = vld [vmem:[#allocation2 + $0x1f00] ss:$76 sps:$4 sm:$0xff]   ;;  %v23389_v40 = vsub.s32 4, %v23346_v44  ;;  %v1307_v41 = vsub.s32 6, %v23346_v44 }
 0x2fa   :  { %7545 = vmatpush1.bf16.msra.mxu0 %v20751_v42  ;;  %7717 = vmatpush1.bf16.msra.mxu1 %v20754_v43  ;;  %v20820_v42 = vld [vmem:[#allocation2 + $0x1f08] ss:$76 sps:$4 sm:$0xff]   ;;  %v1303_v43 = vsub.s32 5, %v23346_v44 }
 0x2fb   :  { %7546 = vmatprep.subr.bf16.mxu0 %v20759_v45  ;;  %7718 = vmatprep.subr.bf16.mxu1 %v20762_v46  ;;  %v1311_v45 = vsub.s32 7, %v23346_v44  ;;  %v20825_v46 = vld [vmem:[#allocation2 + $0x1f9c] ss:$76 sps:$4 sm:$0xff]  }
 0x2fe   :  { %7547 = vmatpush1.bf16.msra.mxu0 %v20757_v47  ;;  %7719 = vmatpush1.bf16.msra.mxu1 %v20760_v48  ;;  %v20828_v47 = vld [vmem:[#allocation2 + $0x1fa4] ss:$76 sps:$4 sm:$0xff]  }
 0x2ff   :  { %7548 = vmatprep.subr.bf16.mxu0 %v20765_v49  ;;  %7720 = vmatprep.subr.bf16.mxu1 %v20768_v53  ;;  %v22901_v48 = vld [vmem:[#allocation4] sm:$0xff] }
 0x300   :  { %v1300_v49 = vrot.slane %v22901_v48, %v23389_v40  ;;  %v1308_v53 = vrot.slane %v22901_v48, %v1307_v41 }
 0x302   :  { %7549 = vmatpush1.bf16.msra.mxu0 %v20763_v54  ;;  %7721 = vmatpush1.bf16.msra.mxu1 %v20766_v57  ;;  %v1304_v54 = vrot.slane %v22901_v48, %v1303_v43  ;;  %v1312_v57 = vrot.slane %v22901_v48, %v1311_v45  ;;  %v20849_v48 = vld [vmem:[#allocation2 + $0xcc] ss:$76 sps:$4 sm:$0xff]  }
 0x303   :  { %7550 = vmatprep.subr.bf16.mxu0 %v20771_v58  ;;  %7722 = vmatprep.subr.bf16.mxu1 %v20774_v59  ;;  %v20823_v58 = vld [vmem:[#allocation2 + $0x1f98] ss:$76 sps:$4 sm:$0xff]   ;;  %v20826_v59 = vld [vmem:[#allocation2 + $0x1fa0] ss:$76 sps:$4 sm:$0xff]  }
 0x306   :  { %7551 = vmatpush1.bf16.msra.mxu0 %v20769_v60  ;;  %7723 = vmatpush1.bf16.msra.mxu1 %v20772_v61  ;;  %v20831_v60 = vld [vmem:[#allocation2 + $0x2034] ss:$76 sps:$4 sm:$0xff]   ;;  %v20834_v61 = vld [vmem:[#allocation2 + $0x203c] ss:$76 sps:$4 sm:$0xff]  }
 0x307   :  { %7552 = vmatprep.subr.bf16.mxu0 %v20777_v62  ;;  %7724 = vmatprep.subr.bf16.mxu1 %v20780_v63 }
 0x30a   :  { %7553 = vmatpush1.bf16.msra.mxu0 %v20775_v1  ;;  %7725 = vmatpush1.bf16.msra.mxu1 %v20778_v2  ;;  %v20829_v1 = vld [vmem:[#allocation2 + $0x2030] ss:$76 sps:$4 sm:$0xff]  }
 0x30b   :  { %7554 = vmatprep.subr.bf16.mxu0 %v20783_v3  ;;  %7726 = vmatprep.subr.bf16.mxu1 %v20786_v4 }
 0x30e   :  { %7555 = vmatpush1.bf16.msra.mxu0 %v20781_v5  ;;  %7727 = vmatpush1.bf16.msra.mxu1 %v20784_v6 }
 0x30f   :  { %7556 = vmatprep.subr.bf16.mxu0 %v20789_v7  ;;  %7728 = vmatprep.subr.bf16.mxu1 %v20792_v8 }
 0x312   :  { %7557 = vmatpush1.bf16.msra.mxu0 %v20787_v10  ;;  %7729 = vmatpush1.bf16.msra.mxu1 %v20790_v11  ;;  %v20832_v11 = vld [vmem:[#allocation2 + $0x2038] ss:$76 sps:$4 sm:$0xff]  }
 0x313   :  { %7569 = vmatprep.subr.bf16.mxu0 %v20795_v12  ;;  %7741 = vmatprep.subr.bf16.mxu1 %v20798_v13  ;;  %v20837_v12 = vld [vmem:[#allocation2 + $0x20cc] ss:$76 sps:$4 sm:$0xff]  }
 0x315   :  { %7559 = vmatmul.mubr.bf16.vlgmr.msra.gmra.mrb[8].mxu0 %v23316_v26  ;;  %7731 = vmatmul.mubr.bf16.vlgmr.msra.gmra.mrb[8].mxu1 %v23316_v26 }
 0x316   :  { %7570 = vmatpush1.bf16.msra.mxu0 %v20793_v14  ;;  %7742 = vmatpush1.bf16.msra.mxu1 %v20796_v15 }
 0x317   :  { %7571 = vmatprep.subr.bf16.mxu0 %v20801_v16  ;;  %7743 = vmatprep.subr.bf16.mxu1 %v20804_v18 }
 0x318   :  { %7601 = vmatprep.mubr.bf16.mxu0 %v23104_v35  ;;  %7773 = vmatprep.mubr.bf16.mxu1 %v23104_v35 }
 0x31a   :  { %7572 = vmatpush1.bf16.msra.mxu0 %v20799_v19  ;;  %7744 = vmatpush1.bf16.msra.mxu1 %v20802_v20  ;;  %v20840_v20 = vld [vmem:[#allocation2 + $0x20d4] ss:$76 sps:$4 sm:$0xff]  }
 0x31b   :  { %7573 = vmatprep.subr.bf16.mxu0 %v20807_v21  ;;  %7745 = vmatprep.subr.bf16.mxu1 %v20810_v22 }
 0x31e   :  { %7574 = vmatpush1.bf16.msra.mxu0 %v20805_v23  ;;  %7746 = vmatpush1.bf16.msra.mxu1 %v20808_v27 }
 0x31f   :  { %7575 = vmatprep.subr.bf16.mxu0 %v20813_v28  ;;  %7747 = vmatprep.subr.bf16.mxu1 %v20816_v30 }
 0x322   :  { %7576 = vmatpush1.bf16.msra.mxu0 %v20811_v31  ;;  %7748 = vmatpush1.bf16.msra.mxu1 %v20814_v32  ;;  %v20835_v31 = vld [vmem:[#allocation2 + $0x20c8] ss:$76 sps:$4 sm:$0xff]   ;;  %v20838_v32 = vld [vmem:[#allocation2 + $0x20d0] ss:$76 sps:$4 sm:$0xff]  }
 0x323   :  { %7577 = vmatprep.subr.bf16.mxu0 %v20819_v34  ;;  %7749 = vmatprep.subr.bf16.mxu1 %v20822_v37  ;;  %v20843_v37 = vld [vmem:[#allocation2 + $0x34] ss:$76 sps:$4 sm:$0xff]  }
 0x326   :  { %7578 = vmatpush1.bf16.msra.mxu0 %v20817_v39  ;;  %7750 = vmatpush1.bf16.msra.mxu1 %v20820_v42  ;;  %v20846_v39 = vld [vmem:[#allocation2 + $0x3c] ss:$76 sps:$4 sm:$0xff]  }
 0x327   :  { %7579 = vmatprep.subr.bf16.mxu0 %v20825_v46  ;;  %7751 = vmatprep.subr.bf16.mxu1 %v20828_v47  ;;  %v20841_v46 = vld [vmem:[#allocation2 + $0x30] ss:$76 sps:$4 sm:$0xff]   ;;  %v20844_v47 = vld [vmem:[#allocation2 + $0x38] ss:$76 sps:$4 sm:$0xff]  }
 0x328   :  { %v7259_v62 = vpop.f32.mrb[4].mxu0  ;;  %v7431_v63 = vpop.f32.mrb[4].mxu1 }
 0x329   :  { %v19576_v2 = vadd.f32 %v7259_v62, %v1300_v49  ;;  %v19580_v3 = vadd.f32 %v7431_v63, %v1308_v53  ;;  %v7261_v4 = vpop.f32.mrb[5].mxu0  ;;  %v7433_v5 = vpop.f32.mrb[5].mxu1 }
 0x32a   :  { %v19577_v6 = vadd.f32 %v7261_v4, %v1304_v54  ;;  %v19581_v7 = vadd.f32 %v7433_v5, %v1312_v57  ;;  %v7263_v8 = vpop.f32.mrb[6].mxu0  ;;  %v7435_v10 = vpop.f32.mrb[6].mxu1  ;;  %7580 = vmatpush1.bf16.msra.mxu0 %v20823_v58  ;;  %7752 = vmatpush1.bf16.msra.mxu1 %v20826_v59  ;;  %v20855_v58 = vld [vmem:[#allocation2 + $0x164] ss:$76 sps:$4 sm:$0xff]   ;;  %v20858_v59 = vld [vmem:[#allocation2 + $0x16c] ss:$76 sps:$4 sm:$0xff]  }
 0x32b   :  { %v8468_v13 = vmul.f32 0.5, %v19576_v2  ;;  %v8470_v14 = vmul.f32 0.5, %v19580_v3  ;;  %v19578_v15 = vadd.f32 %v7263_v8, %v1300_v49  ;;  %v19582_v16 = vadd.f32 %v7435_v10, %v1308_v53  ;;  %v7265_v18 = vpop.f32.mrb[7].mxu0  ;;  %v7437_v19 = vpop.f32.mrb[7].mxu1  ;;  %7581 = vmatprep.subr.bf16.mxu0 %v20831_v60  ;;  %7753 = vmatprep.subr.bf16.mxu1 %v20834_v61  ;;  %v20852_v49 = vld [vmem:[#allocation2 + $0xd4] ss:$76 sps:$4 sm:$0xff]  }
 0x32c   :  { %v8469_v21 = vmul.f32 0.5, %v19577_v6  ;;  %v8471_v22 = vmul.f32 0.5, %v19581_v7  ;;  %v19579_v23 = vadd.f32 %v7265_v18, %v1304_v54  ;;  %v19583_v27 = vadd.f32 %v7437_v19, %v1312_v57  ;;  %v20847_v53 = vld [vmem:[#allocation2 + $0xc8] ss:$76 sps:$4 sm:$0xff]   ;;  %v20850_v54 = vld [vmem:[#allocation2 + $0xd0] ss:$76 sps:$4 sm:$0xff]  }
 0x32d   :  { %22801 = vtanh.f32 %v8468_v13  ;;  %v8487_v28 = vmul.f32 0.5, %v19578_v15  ;;  %v8489_v30 = vmul.f32 0.5, %v19582_v16  ;;  %v20856_v2 = vld [vmem:[#allocation2 + $0x168] ss:$76 sps:$4 sm:$0xff]   ;;  %v20864_v6 = vld [vmem:[#allocation2 + $0x204] ss:$76 sps:$4 sm:$0xff]  }
 0x32e   :  { %22803 = vtanh.f32 %v8470_v14  ;;  %7582 = vmatpush1.bf16.msra.mxu0 %v20829_v1  ;;  %7754 = vmatpush1.bf16.msra.mxu1 %v20832_v11  ;;  %v8488_v34 = vmul.f32 0.5, %v19579_v23  ;;  %v8490_v42 = vmul.f32 0.5, %v19583_v27  ;;  %v20853_v1 = vld [vmem:[#allocation2 + $0x160] ss:$76 sps:$4 sm:$0xff]   ;;  %v20861_v5 = vld [vmem:[#allocation2 + $0x1fc] ss:$76 sps:$4 sm:$0xff]  }
 0x32f   :  { %22805 = vtanh.f32 %v8469_v21  ;;  %7583 = vmatprep.subr.bf16.mxu0 %v20837_v12  ;;  %7755 = vmatprep.subr.bf16.mxu1 %v20840_v20  ;;  %v20859_v11 = vld [vmem:[#allocation2 + $0x1f8] ss:$76 sps:$4 sm:$0xff]   ;;  %v20862_v12 = vld [vmem:[#allocation2 + $0x200] ss:$76 sps:$4 sm:$0xff]  }
 0x330   :  { %22807 = vtanh.f32 %v8471_v22  ;;  %v20867_v21 = vld [vmem:[#allocation2 + $0x294] ss:$76 sps:$4 sm:$0xff]  }
 0x331   :  { %22809 = vtanh.f32 %v8487_v28  ;;  %v20870_v28 = vld [vmem:[#allocation2 + $0x29c] ss:$76 sps:$4 sm:$0xff]  }
 0x332   :  { %22811 = vtanh.f32 %v8489_v30  ;;  %7584 = vmatpush1.bf16.msra.mxu0 %v20835_v31  ;;  %7756 = vmatpush1.bf16.msra.mxu1 %v20838_v32 }
 0x333   :  { %22813 = vtanh.f32 %v8488_v34  ;;  %7784 = vmatprep.subr.bf16.mxu0 %v20843_v37  ;;  %7956 = vmatprep.subr.bf16.mxu1 %v20846_v39 }
 0x334   :  { %22815 = vtanh.f32 %v8490_v42  ;;  %v20865_v42 = vld [vmem:[#allocation2 + $0x290] ss:$76 sps:$4 sm:$0xff]  }
 0x335   :  { %7602 = vmatmul.mubr.bf16.vlgmr.msra.gmra.mrb[8].mxu0 %v23328_v0  ;;  %7774 = vmatmul.mubr.bf16.vlgmr.msra.gmra.mrb[8].mxu1 %v23328_v0 }
 0x336   :  { %7785 = vmatpush1.bf16.msra.mxu0 %v20841_v46  ;;  %7957 = vmatpush1.bf16.msra.mxu1 %v20844_v47  ;;  %v20868_v46 = vld [vmem:[#allocation2 + $0x298] ss:$76 sps:$4 sm:$0xff]  }
 0x337   :  { %v22802_v57 = vpop.eup %22801  ;;  %7786 = vmatprep.subr.bf16.mxu0 %v20849_v48  ;;  %7958 = vmatprep.subr.bf16.mxu1 %v20852_v49  ;;  %v20873_v48 = vld [vmem:[#allocation2 + $0x32c] ss:$76 sps:$4 sm:$0xff]   ;;  %v20876_v49 = vld [vmem:[#allocation2 + $0x334] ss:$76 sps:$4 sm:$0xff]  }
 0x338   :  { %v22804_v60 = vpop.eup %22803  ;;  %7816 = vmatprep.mubr.bf16.mxu0 %v23266_v50  ;;  %7988 = vmatprep.mubr.bf16.mxu1 %v23266_v50  ;;  %v8544_v63 = vmul.f32 0.5, %v22802_v57  ;;  %v20874_v57 = vld [vmem:[#allocation2 + $0x330] ss:$76 sps:$4 sm:$0xff]  }
 0x339   :  { %v22806_v61 = vpop.eup %22805  ;;  %v8546_v4 = vmul.f32 0.5, %v22804_v60  ;;  %v20877_v60 = vld [vmem:[#allocation2 + $0x3c0] ss:$76 sps:$4 sm:$0xff]  }
 0x33a   :  { %v22808_v62 = vpop.eup %22807  ;;  %7787 = vmatpush1.bf16.msra.mxu0 %v20847_v53  ;;  %7959 = vmatpush1.bf16.msra.mxu1 %v20850_v54  ;;  %v8545_v8 = vmul.f32 0.5, %v22806_v61  ;;  %v8582_v18 = vadd.f32 0.5, %v8544_v63  ;;  %v20871_v54 = vld [vmem:[#allocation2 + $0x328] ss:$76 sps:$4 sm:$0xff]   ;;  %v20888_v63 = vld [vmem:[#allocation2 + $0x464] ss:$76 sps:$4 sm:$0xff]  }
 0x33b   :  { %v22810_v3 = vpop.eup %22809  ;;  %7788 = vmatprep.subr.bf16.mxu0 %v20855_v58  ;;  %7960 = vmatprep.subr.bf16.mxu1 %v20858_v59  ;;  %v8547_v14 = vmul.f32 0.5, %v22808_v62  ;;  %v8584_v22 = vadd.f32 0.5, %v8546_v4  ;;  %v20879_v58 = vld [vmem:[#allocation2 + $0x3c4] ss:$76 sps:$4 sm:$0xff]   ;;  %v20882_v59 = vld [vmem:[#allocation2 + $0x3cc] ss:$76 sps:$4 sm:$0xff]  }
 0x33c   :  { %v22812_v7 = vpop.eup %22811  ;;  %v8563_v10 = vmul.f32 0.5, %v22810_v3  ;;  %v8583_v30 = vadd.f32 0.5, %v8545_v8  ;;  %v20880_v61 = vld [vmem:[#allocation2 + $0x3c8] ss:$76 sps:$4 sm:$0xff]  }
 0x33d   :  { %v22814_v13 = vpop.eup %22813  ;;  %v8565_v15 = vmul.f32 0.5, %v22812_v7  ;;  %v8585_v34 = vadd.f32 0.5, %v8547_v14  ;;  %v20885_v62 = vld [vmem:[#allocation2 + $0x45c] ss:$76 sps:$4 sm:$0xff]   ;;  %v20891_v3 = vld [vmem:[#allocation2 + $0x4f4] ss:$76 sps:$4 sm:$0xff]  }
 0x33e   :  { %v22816_v16 = vpop.eup %22815  ;;  %v8601_v19 = vadd.f32 0.5, %v8563_v10  ;;  %v8564_v20 = vmul.f32 0.5, %v22814_v13  ;;  %7789 = vmatpush1.bf16.msra.mxu0 %v20853_v1  ;;  %7961 = vmatpush1.bf16.msra.mxu1 %v20856_v2  ;;  %v20883_v1 = vld [vmem:[#allocation2 + $0x458] ss:$76 sps:$4 sm:$0xff]   ;;  %v20886_v2 = vld [vmem:[#allocation2 + $0x460] ss:$76 sps:$4 sm:$0xff]  }
 0x33f   :  { %v8603_v23 = vadd.f32 0.5, %v8565_v15  ;;  %v8566_v27 = vmul.f32 0.5, %v22816_v16  ;;  %7790 = vmatprep.subr.bf16.mxu0 %v20861_v5  ;;  %7962 = vmatprep.subr.bf16.mxu1 %v20864_v6  ;;  %v20894_v4 = vld [vmem:[#allocation2 + $0x4fc] ss:$76 sps:$4 sm:$0xff]   ;;  %v20892_v6 = vld [vmem:[#allocation2 + $0x4f8] ss:$76 sps:$4 sm:$0xff]  }
 0x340   :  { %v23405_v31 = vpack.c.bf16 %v8601_v19, %v8582_v18  ;;  %v8602_v32 = vadd.f32 0.5, %v8564_v20  ;;  %v20889_v5 = vld [vmem:[#allocation2 + $0x4f0] ss:$76 sps:$4 sm:$0xff]   ;;  %v20897_v7 = vld [vmem:[#allocation2 + $0x58c] ss:$76 sps:$4 sm:$0xff]  }
 0x341   :  { %v23407_v37 = vpack.c.bf16 %v8603_v23, %v8584_v22  ;;  %v8604_v39 = vadd.f32 0.5, %v8566_v27  ;;  %v20900_v8 = vld [vmem:[#allocation2 + $0x594] ss:$76 sps:$4 sm:$0xff]   ;;  %v20906_v13 = vld [vmem:[#allocation2 + $0x62c] ss:$76 sps:$4 sm:$0xff]  }
 0x342   :  { %7791 = vmatpush1.bf16.msra.mxu0 %v20859_v11  ;;  %7963 = vmatpush1.bf16.msra.mxu1 %v20862_v12  ;;  %v23409_v47 = vpack.c.bf16 %v8602_v32, %v8583_v30  ;;  %v20895_v10 = vld [vmem:[#allocation2 + $0x588] ss:$76 sps:$4 sm:$0xff]   ;;  %v20898_v11 = vld [vmem:[#allocation2 + $0x590] ss:$76 sps:$4 sm:$0xff]   ;;  %v20901_v14 = vld [vmem:[#allocation2 + $0x620] ss:$76 sps:$4 sm:$0xff]  }
 0x343   :  { %7792 = vmatprep.subr.bf16.mxu0 %v20867_v21  ;;  %7964 = vmatprep.subr.bf16.mxu1 %v20870_v28  ;;  %v23411_v53 = vpack.c.bf16 %v8604_v39, %v8585_v34  ;;  %v20903_v12 = vld [vmem:[#allocation2 + $0x624] ss:$76 sps:$4 sm:$0xff]   ;;  %v20904_v15 = vld [vmem:[#allocation2 + $0x628] ss:$76 sps:$4 sm:$0xff]   ;;  %v20910_v20 = vld [vmem:[#allocation2 + $0x6c0] ss:$76 sps:$4 sm:$0xff]  }
 0x344   :  { %v20909_v16 = vld [vmem:[#allocation2 + $0x6bc] ss:$76 sps:$4 sm:$0xff]   ;;  %v20912_v18 = vld [vmem:[#allocation2 + $0x6c4] ss:$76 sps:$4 sm:$0xff]   ;;  %v20915_v21 = vld [vmem:[#allocation2 + $0x754] ss:$76 sps:$4 sm:$0xff]  }
 0x345   :  { %v20907_v19 = vld [vmem:[#allocation2 + $0x6b8] ss:$76 sps:$4 sm:$0xff]   ;;  %v20918_v22 = vld [vmem:[#allocation2 + $0x75c] ss:$76 sps:$4 sm:$0xff]   ;;  %v20924_v30 = vld [vmem:[#allocation2 + $0x7f4] ss:$76 sps:$4 sm:$0xff]  }
 0x346   :  { %7793 = vmatpush1.bf16.msra.mxu0 %v20865_v42  ;;  %7965 = vmatpush1.bf16.msra.mxu1 %v20868_v46  ;;  %v20913_v23 = vld [vmem:[#allocation2 + $0x750] ss:$76 sps:$4 sm:$0xff]   ;;  %v20916_v27 = vld [vmem:[#allocation2 + $0x758] ss:$76 sps:$4 sm:$0xff]   ;;  %v20919_v32 = vld [vmem:[#allocation2 + $0x7e8] ss:$76 sps:$4 sm:$0xff]  }
 0x347   :  { %7794 = vmatprep.subr.bf16.mxu0 %v20873_v48  ;;  %7966 = vmatprep.subr.bf16.mxu1 %v20876_v49  ;;  %v20921_v28 = vld [vmem:[#allocation2 + $0x7ec] ss:$76 sps:$4 sm:$0xff]   ;;  %v20922_v34 = vld [vmem:[#allocation2 + $0x7f0] ss:$76 sps:$4 sm:$0xff]   ;;  %v20928_v48 = vld [vmem:[#allocation2 + $0x888] ss:$76 sps:$4 sm:$0xff]  }
 0x348   :  { %v20927_v39 = vld [vmem:[#allocation2 + $0x884] ss:$76 sps:$4 sm:$0xff]   ;;  %v20930_v42 = vld [vmem:[#allocation2 + $0x88c] ss:$76 sps:$4 sm:$0xff]   ;;  %v20933_v49 = vld [vmem:[#allocation2 + $0x91c] ss:$76 sps:$4 sm:$0xff]  }
 0x349   :  { %v20925_v46 = vld [vmem:[#allocation2 + $0x880] ss:$76 sps:$4 sm:$0xff]  }
 0x34a   :  { %7795 = vmatpush1.bf16.msra.mxu0 %v20871_v54  ;;  %7967 = vmatpush1.bf16.msra.mxu1 %v20874_v57  ;;  %v20936_v54 = vld [vmem:[#allocation2 + $0x924] ss:$76 sps:$4 sm:$0xff]  }
 0x34b   :  { %7796 = vmatprep.subr.bf16.mxu0 %v20879_v58  ;;  %7968 = vmatprep.subr.bf16.mxu1 %v20882_v59  ;;  %v20931_v57 = vld [vmem:[#allocation2 + $0x918] ss:$76 sps:$4 sm:$0xff]   ;;  %v20934_v58 = vld [vmem:[#allocation2 + $0x920] ss:$76 sps:$4 sm:$0xff]  }
 0x34c   :  { %v20939_v59 = vld [vmem:[#allocation2 + $0x9b4] ss:$76 sps:$4 sm:$0xff]  }
 0x34e   :  { %7797 = vmatpush1.bf16.msra.mxu0 %v20877_v60  ;;  %7969 = vmatpush1.bf16.msra.mxu1 %v20880_v61  ;;  %v20942_v60 = vld [vmem:[#allocation2 + $0x9bc] ss:$76 sps:$4 sm:$0xff]  }
 0x34f   :  { %7798 = vmatprep.subr.bf16.mxu0 %v20885_v62  ;;  %7970 = vmatprep.subr.bf16.mxu1 %v20888_v63  ;;  %v20937_v61 = vld [vmem:[#allocation2 + $0x9b0] ss:$76 sps:$4 sm:$0xff]   ;;  %v20940_v62 = vld [vmem:[#allocation2 + $0x9b8] ss:$76 sps:$4 sm:$0xff]  }
 0x350   :  { %v20945_v63 = vld [vmem:[#allocation2 + $0xa4c] ss:$76 sps:$4 sm:$0xff]  }
 0x352   :  { %7799 = vmatpush1.bf16.msra.mxu0 %v20883_v1  ;;  %7971 = vmatpush1.bf16.msra.mxu1 %v20886_v2  ;;  %v20948_v1 = vld [vmem:[#allocation2 + $0xa54] ss:$76 sps:$4 sm:$0xff]  }
 0x353   :  { %7800 = vmatprep.subr.bf16.mxu0 %v20891_v3  ;;  %7972 = vmatprep.subr.bf16.mxu1 %v20894_v4  ;;  %v20943_v2 = vld [vmem:[#allocation2 + $0xa48] ss:$76 sps:$4 sm:$0xff]   ;;  %v20946_v3 = vld [vmem:[#allocation2 + $0xa50] ss:$76 sps:$4 sm:$0xff]  }
 0x354   :  { %v20951_v4 = vld [vmem:[#allocation2 + $0xae4] ss:$76 sps:$4 sm:$0xff]  }
 0x356   :  { %7801 = vmatpush1.bf16.msra.mxu0 %v20889_v5  ;;  %7973 = vmatpush1.bf16.msra.mxu1 %v20892_v6  ;;  %v20954_v5 = vld [vmem:[#allocation2 + $0xaec] ss:$76 sps:$4 sm:$0xff]  }
 0x357   :  { %7802 = vmatprep.subr.bf16.mxu0 %v20897_v7  ;;  %7974 = vmatprep.subr.bf16.mxu1 %v20900_v8  ;;  %v20949_v6 = vld [vmem:[#allocation2 + $0xae0] ss:$76 sps:$4 sm:$0xff]   ;;  %v20952_v7 = vld [vmem:[#allocation2 + $0xae8] ss:$76 sps:$4 sm:$0xff]  }
 0x358   :  { %v20957_v8 = vld [vmem:[#allocation2 + $0xb7c] ss:$76 sps:$4 sm:$0xff]  }
 0x35a   :  { %7803 = vmatpush1.bf16.msra.mxu0 %v20895_v10  ;;  %7975 = vmatpush1.bf16.msra.mxu1 %v20898_v11  ;;  %v20960_v10 = vld [vmem:[#allocation2 + $0xb84] ss:$76 sps:$4 sm:$0xff]  }
 0x35b   :  { %7804 = vmatprep.subr.bf16.mxu0 %v20903_v12  ;;  %7976 = vmatprep.subr.bf16.mxu1 %v20906_v13  ;;  %v20955_v11 = vld [vmem:[#allocation2 + $0xb78] ss:$76 sps:$4 sm:$0xff]   ;;  %v20958_v12 = vld [vmem:[#allocation2 + $0xb80] ss:$76 sps:$4 sm:$0xff]  }
 0x35c   :  { %v20963_v13 = vld [vmem:[#allocation2 + $0xc14] ss:$76 sps:$4 sm:$0xff]  }
 0x35e   :  { %7805 = vmatpush1.bf16.msra.mxu0 %v20901_v14  ;;  %7977 = vmatpush1.bf16.msra.mxu1 %v20904_v15  ;;  %v20966_v14 = vld [vmem:[#allocation2 + $0xc1c] ss:$76 sps:$4 sm:$0xff]  }
 0x35f   :  { %7806 = vmatprep.subr.bf16.mxu0 %v20909_v16  ;;  %7978 = vmatprep.subr.bf16.mxu1 %v20912_v18  ;;  %v20961_v15 = vld [vmem:[#allocation2 + $0xc10] ss:$76 sps:$4 sm:$0xff]   ;;  %v20964_v16 = vld [vmem:[#allocation2 + $0xc18] ss:$76 sps:$4 sm:$0xff]  }
 0x360   :  { %v20969_v18 = vld [vmem:[#allocation2 + $0xcac] ss:$76 sps:$4 sm:$0xff]  }
 0x362   :  { %7807 = vmatpush1.bf16.msra.mxu0 %v20907_v19  ;;  %7979 = vmatpush1.bf16.msra.mxu1 %v20910_v20  ;;  %v20972_v19 = vld [vmem:[#allocation2 + $0xcb4] ss:$76 sps:$4 sm:$0xff]  }
 0x363   :  { %7808 = vmatprep.subr.bf16.mxu0 %v20915_v21  ;;  %7980 = vmatprep.subr.bf16.mxu1 %v20918_v22  ;;  %v20967_v20 = vld [vmem:[#allocation2 + $0xca8] ss:$76 sps:$4 sm:$0xff]   ;;  %v20970_v21 = vld [vmem:[#allocation2 + $0xcb0] ss:$76 sps:$4 sm:$0xff]  }
 0x364   :  { %v20975_v22 = vld [vmem:[#allocation2 + $0xd44] ss:$76 sps:$4 sm:$0xff]  }
 0x366   :  { %7809 = vmatpush1.bf16.msra.mxu0 %v20913_v23  ;;  %7981 = vmatpush1.bf16.msra.mxu1 %v20916_v27  ;;  %v20978_v23 = vld [vmem:[#allocation2 + $0xd4c] ss:$76 sps:$4 sm:$0xff]  }
 0x367   :  { %7810 = vmatprep.subr.bf16.mxu0 %v20921_v28  ;;  %7982 = vmatprep.subr.bf16.mxu1 %v20924_v30  ;;  %v20973_v27 = vld [vmem:[#allocation2 + $0xd40] ss:$76 sps:$4 sm:$0xff]   ;;  %v20976_v28 = vld [vmem:[#allocation2 + $0xd48] ss:$76 sps:$4 sm:$0xff]  }
 0x368   :  { %v20981_v30 = vld [vmem:[#allocation2 + $0xddc] ss:$76 sps:$4 sm:$0xff]  }
 0x36a   :  { %7811 = vmatpush1.bf16.msra.mxu0 %v20919_v32  ;;  %7983 = vmatpush1.bf16.msra.mxu1 %v20922_v34  ;;  %v20984_v32 = vld [vmem:[#allocation2 + $0xde4] ss:$76 sps:$4 sm:$0xff]  }
 0x36b   :  { %7812 = vmatprep.subr.bf16.mxu0 %v20927_v39  ;;  %7984 = vmatprep.subr.bf16.mxu1 %v20930_v42  ;;  %v20979_v34 = vld [vmem:[#allocation2 + $0xdd8] ss:$76 sps:$4 sm:$0xff]   ;;  %v20982_v39 = vld [vmem:[#allocation2 + $0xde0] ss:$76 sps:$4 sm:$0xff]  }
 0x36c   :  { %v20987_v42 = vld [vmem:[#allocation2 + $0xe74] ss:$76 sps:$4 sm:$0xff]  }
 0x36e   :  { %7813 = vmatpush1.bf16.msra.mxu0 %v20925_v46  ;;  %7985 = vmatpush1.bf16.msra.mxu1 %v20928_v48  ;;  %v20990_v46 = vld [vmem:[#allocation2 + $0xe7c] ss:$76 sps:$4 sm:$0xff]  }
 0x36f   :  { %7814 = vmatprep.subr.bf16.mxu0 %v20933_v49  ;;  %7986 = vmatprep.subr.bf16.mxu1 %v20936_v54  ;;  %v20985_v48 = vld [vmem:[#allocation2 + $0xe70] ss:$76 sps:$4 sm:$0xff]   ;;  %v20988_v49 = vld [vmem:[#allocation2 + $0xe78] ss:$76 sps:$4 sm:$0xff]  }
 0x370   :  { %v20993_v54 = vld [vmem:[#allocation2 + $0xf0c] ss:$76 sps:$4 sm:$0xff]  }
 0x372   :  { %7815 = vmatpush1.bf16.msra.mxu0 %v20931_v57  ;;  %7987 = vmatpush1.bf16.msra.mxu1 %v20934_v58  ;;  %v20996_v57 = vld [vmem:[#allocation2 + $0xf14] ss:$76 sps:$4 sm:$0xff]  }
 0x373   :  { %7827 = vmatprep.subr.bf16.mxu0 %v20939_v59  ;;  %7999 = vmatprep.subr.bf16.mxu1 %v20942_v60  ;;  %v20991_v58 = vld [vmem:[#allocation2 + $0xf08] ss:$76 sps:$4 sm:$0xff]   ;;  %v20994_v59 = vld [vmem:[#allocation2 + $0xf10] ss:$76 sps:$4 sm:$0xff]  }
 0x374   :  { %v20999_v60 = vld [vmem:[#allocation2 + $0xfa4] ss:$76 sps:$4 sm:$0xff]  }
 0x375   :  { %7817 = vmatmul.mubr.bf16.vlgmr.msra.gmra.mrb[12].mxu0 %v23276_v9  ;;  %7989 = vmatmul.mubr.bf16.vlgmr.msra.gmra.mrb[12].mxu1 %v23276_v9 }
 0x376   :  { %7828 = vmatpush1.bf16.msra.mxu0 %v20937_v61  ;;  %8000 = vmatpush1.bf16.msra.mxu1 %v20940_v62  ;;  %v21002_v61 = vld [vmem:[#allocation2 + $0xfac] ss:$76 sps:$4 sm:$0xff]  }
 0x377   :  { %7829 = vmatprep.subr.bf16.mxu0 %v20945_v63  ;;  %8001 = vmatprep.subr.bf16.mxu1 %v20948_v1  ;;  %v20997_v62 = vld [vmem:[#allocation2 + $0xfa0] ss:$76 sps:$4 sm:$0xff]   ;;  %v21000_v63 = vld [vmem:[#allocation2 + $0xfa8] ss:$76 sps:$4 sm:$0xff]  }
 0x378   :  { %7859 = vmatprep.mubr.bf16.mxu0 %v23286_v36  ;;  %8031 = vmatprep.mubr.bf16.mxu1 %v23286_v36  ;;  %v21005_v1 = vld [vmem:[#allocation2 + $0x103c] ss:$76 sps:$4 sm:$0xff]  }
 0x37a   :  { %7830 = vmatpush1.bf16.msra.mxu0 %v20943_v2  ;;  %8002 = vmatpush1.bf16.msra.mxu1 %v20946_v3  ;;  %v21008_v2 = vld [vmem:[#allocation2 + $0x1044] ss:$76 sps:$4 sm:$0xff]  }
 0x37b   :  { %7831 = vmatprep.subr.bf16.mxu0 %v20951_v4  ;;  %8003 = vmatprep.subr.bf16.mxu1 %v20954_v5  ;;  %v21003_v3 = vld [vmem:[#allocation2 + $0x1038] ss:$76 sps:$4 sm:$0xff]   ;;  %v21006_v4 = vld [vmem:[#allocation2 + $0x1040] ss:$76 sps:$4 sm:$0xff]  }
 0x37c   :  { %v21011_v5 = vld [vmem:[#allocation2 + $0x10d4] ss:$76 sps:$4 sm:$0xff]  }
 0x37e   :  { %7832 = vmatpush1.bf16.msra.mxu0 %v20949_v6  ;;  %8004 = vmatpush1.bf16.msra.mxu1 %v20952_v7  ;;  %v21014_v6 = vld [vmem:[#allocation2 + $0x10dc] ss:$76 sps:$4 sm:$0xff]  }
 0x37f   :  { %7833 = vmatprep.subr.bf16.mxu0 %v20957_v8  ;;  %8005 = vmatprep.subr.bf16.mxu1 %v20960_v10  ;;  %v21009_v7 = vld [vmem:[#allocation2 + $0x10d0] ss:$76 sps:$4 sm:$0xff]   ;;  %v21012_v8 = vld [vmem:[#allocation2 + $0x10d8] ss:$76 sps:$4 sm:$0xff]  }
 0x380   :  { %v21017_v10 = vld [vmem:[#allocation2 + $0x116c] ss:$76 sps:$4 sm:$0xff]  }
 0x382   :  { %7834 = vmatpush1.bf16.msra.mxu0 %v20955_v11  ;;  %8006 = vmatpush1.bf16.msra.mxu1 %v20958_v12  ;;  %v21020_v11 = vld [vmem:[#allocation2 + $0x1174] ss:$76 sps:$4 sm:$0xff]  }
 0x383   :  { %7835 = vmatprep.subr.bf16.mxu0 %v20963_v13  ;;  %8007 = vmatprep.subr.bf16.mxu1 %v20966_v14  ;;  %v21015_v12 = vld [vmem:[#allocation2 + $0x1168] ss:$76 sps:$4 sm:$0xff]   ;;  %v21018_v13 = vld [vmem:[#allocation2 + $0x1170] ss:$76 sps:$4 sm:$0xff]  }
 0x384   :  { %v21023_v14 = vld [vmem:[#allocation2 + $0x1204] ss:$76 sps:$4 sm:$0xff]  }
 0x386   :  { %7836 = vmatpush1.bf16.msra.mxu0 %v20961_v15  ;;  %8008 = vmatpush1.bf16.msra.mxu1 %v20964_v16  ;;  %v21026_v15 = vld [vmem:[#allocation2 + $0x120c] ss:$76 sps:$4 sm:$0xff]  }
 0x387   :  { %7837 = vmatprep.subr.bf16.mxu0 %v20969_v18  ;;  %8009 = vmatprep.subr.bf16.mxu1 %v20972_v19  ;;  %v21021_v16 = vld [vmem:[#allocation2 + $0x1200] ss:$76 sps:$4 sm:$0xff]   ;;  %v21024_v18 = vld [vmem:[#allocation2 + $0x1208] ss:$76 sps:$4 sm:$0xff]  }
 0x388   :  { %v21029_v19 = vld [vmem:[#allocation2 + $0x129c] ss:$76 sps:$4 sm:$0xff]  }
 0x38a   :  { %7838 = vmatpush1.bf16.msra.mxu0 %v20967_v20  ;;  %8010 = vmatpush1.bf16.msra.mxu1 %v20970_v21  ;;  %v21032_v20 = vld [vmem:[#allocation2 + $0x12a4] ss:$76 sps:$4 sm:$0xff]  }
 0x38b   :  { %7839 = vmatprep.subr.bf16.mxu0 %v20975_v22  ;;  %8011 = vmatprep.subr.bf16.mxu1 %v20978_v23  ;;  %v21027_v21 = vld [vmem:[#allocation2 + $0x1298] ss:$76 sps:$4 sm:$0xff]   ;;  %v21030_v22 = vld [vmem:[#allocation2 + $0x12a0] ss:$76 sps:$4 sm:$0xff]  }
 0x38c   :  { %v21035_v23 = vld [vmem:[#allocation2 + $0x1334] ss:$76 sps:$4 sm:$0xff]  }
 0x38e   :  { %7840 = vmatpush1.bf16.msra.mxu0 %v20973_v27  ;;  %8012 = vmatpush1.bf16.msra.mxu1 %v20976_v28  ;;  %v21038_v27 = vld [vmem:[#allocation2 + $0x133c] ss:$76 sps:$4 sm:$0xff]  }
 0x38f   :  { %7841 = vmatprep.subr.bf16.mxu0 %v20981_v30  ;;  %8013 = vmatprep.subr.bf16.mxu1 %v20984_v32  ;;  %v21033_v28 = vld [vmem:[#allocation2 + $0x1330] ss:$76 sps:$4 sm:$0xff]   ;;  %v21036_v30 = vld [vmem:[#allocation2 + $0x1338] ss:$76 sps:$4 sm:$0xff]  }
 0x390   :  { %v21041_v32 = vld [vmem:[#allocation2 + $0x13cc] ss:$76 sps:$4 sm:$0xff]  }
 0x392   :  { %7842 = vmatpush1.bf16.msra.mxu0 %v20979_v34  ;;  %8014 = vmatpush1.bf16.msra.mxu1 %v20982_v39  ;;  %v21044_v34 = vld [vmem:[#allocation2 + $0x13d4] ss:$76 sps:$4 sm:$0xff]  }
 0x393   :  { %7843 = vmatprep.subr.bf16.mxu0 %v20987_v42  ;;  %8015 = vmatprep.subr.bf16.mxu1 %v20990_v46  ;;  %v21039_v39 = vld [vmem:[#allocation2 + $0x13c8] ss:$76 sps:$4 sm:$0xff]   ;;  %v21042_v42 = vld [vmem:[#allocation2 + $0x13d0] ss:$76 sps:$4 sm:$0xff]  }
 0x394   :  { %v21047_v46 = vld [vmem:[#allocation2 + $0x1464] ss:$76 sps:$4 sm:$0xff]  }
 0x396   :  { %7844 = vmatpush1.bf16.msra.mxu0 %v20985_v48  ;;  %8016 = vmatpush1.bf16.msra.mxu1 %v20988_v49  ;;  %v21050_v48 = vld [vmem:[#allocation2 + $0x146c] ss:$76 sps:$4 sm:$0xff]  }
 0x397   :  { %7845 = vmatprep.subr.bf16.mxu0 %v20993_v54  ;;  %8017 = vmatprep.subr.bf16.mxu1 %v20996_v57  ;;  %v21045_v49 = vld [vmem:[#allocation2 + $0x1460] ss:$76 sps:$4 sm:$0xff]   ;;  %v21048_v54 = vld [vmem:[#allocation2 + $0x1468] ss:$76 sps:$4 sm:$0xff]  }
 0x398   :  { %v21053_v57 = vld [vmem:[#allocation2 + $0x14fc] ss:$76 sps:$4 sm:$0xff]  }
 0x39a   :  { %7846 = vmatpush1.bf16.msra.mxu0 %v20991_v58  ;;  %8018 = vmatpush1.bf16.msra.mxu1 %v20994_v59  ;;  %v21056_v58 = vld [vmem:[#allocation2 + $0x1504] ss:$76 sps:$4 sm:$0xff]  }
 0x39b   :  { %7847 = vmatprep.subr.bf16.mxu0 %v20999_v60  ;;  %8019 = vmatprep.subr.bf16.mxu1 %v21002_v61  ;;  %v21051_v59 = vld [vmem:[#allocation2 + $0x14f8] ss:$76 sps:$4 sm:$0xff]   ;;  %v21054_v60 = vld [vmem:[#allocation2 + $0x1500] ss:$76 sps:$4 sm:$0xff]  }
 0x39c   :  { %v21059_v61 = vld [vmem:[#allocation2 + $0x1594] ss:$76 sps:$4 sm:$0xff]  }
 0x39e   :  { %7848 = vmatpush1.bf16.msra.mxu0 %v20997_v62  ;;  %8020 = vmatpush1.bf16.msra.mxu1 %v21000_v63  ;;  %v21062_v62 = vld [vmem:[#allocation2 + $0x159c] ss:$76 sps:$4 sm:$0xff]  }
 0x39f   :  { %7849 = vmatprep.subr.bf16.mxu0 %v21005_v1  ;;  %8021 = vmatprep.subr.bf16.mxu1 %v21008_v2  ;;  %v21057_v63 = vld [vmem:[#allocation2 + $0x1590] ss:$76 sps:$4 sm:$0xff]   ;;  %v21060_v1 = vld [vmem:[#allocation2 + $0x1598] ss:$76 sps:$4 sm:$0xff]  }
 0x3a0   :  { %v21065_v2 = vld [vmem:[#allocation2 + $0x162c] ss:$76 sps:$4 sm:$0xff]  }
 0x3a2   :  { %7850 = vmatpush1.bf16.msra.mxu0 %v21003_v3  ;;  %8022 = vmatpush1.bf16.msra.mxu1 %v21006_v4  ;;  %v21068_v3 = vld [vmem:[#allocation2 + $0x1634] ss:$76 sps:$4 sm:$0xff]  }
 0x3a3   :  { %7851 = vmatprep.subr.bf16.mxu0 %v21011_v5  ;;  %8023 = vmatprep.subr.bf16.mxu1 %v21014_v6  ;;  %v21063_v4 = vld [vmem:[#allocation2 + $0x1628] ss:$76 sps:$4 sm:$0xff]   ;;  %v21066_v5 = vld [vmem:[#allocation2 + $0x1630] ss:$76 sps:$4 sm:$0xff]  }
 0x3a4   :  { %v21071_v6 = vld [vmem:[#allocation2 + $0x16c4] ss:$76 sps:$4 sm:$0xff]  }
 0x3a6   :  { %7852 = vmatpush1.bf16.msra.mxu0 %v21009_v7  ;;  %8024 = vmatpush1.bf16.msra.mxu1 %v21012_v8  ;;  %v21074_v7 = vld [vmem:[#allocation2 + $0x16cc] ss:$76 sps:$4 sm:$0xff]  }
 0x3a7   :  { %7853 = vmatprep.subr.bf16.mxu0 %v21017_v10  ;;  %8025 = vmatprep.subr.bf16.mxu1 %v21020_v11  ;;  %v21069_v8 = vld [vmem:[#allocation2 + $0x16c0] ss:$76 sps:$4 sm:$0xff]   ;;  %v21072_v10 = vld [vmem:[#allocation2 + $0x16c8] ss:$76 sps:$4 sm:$0xff]  }
 0x3a8   :  { %v21077_v11 = vld [vmem:[#allocation2 + $0x175c] ss:$76 sps:$4 sm:$0xff]  }
 0x3aa   :  { %7854 = vmatpush1.bf16.msra.mxu0 %v21015_v12  ;;  %8026 = vmatpush1.bf16.msra.mxu1 %v21018_v13  ;;  %v21080_v12 = vld [vmem:[#allocation2 + $0x1764] ss:$76 sps:$4 sm:$0xff]  }
 0x3ab   :  { %7855 = vmatprep.subr.bf16.mxu0 %v21023_v14  ;;  %8027 = vmatprep.subr.bf16.mxu1 %v21026_v15  ;;  %v21075_v13 = vld [vmem:[#allocation2 + $0x1758] ss:$76 sps:$4 sm:$0xff]   ;;  %v21078_v14 = vld [vmem:[#allocation2 + $0x1760] ss:$76 sps:$4 sm:$0xff]  }
 0x3ac   :  { %v21083_v15 = vld [vmem:[#allocation2 + $0x17f4] ss:$76 sps:$4 sm:$0xff]  }
 0x3ae   :  { %7856 = vmatpush1.bf16.msra.mxu0 %v21021_v16  ;;  %8028 = vmatpush1.bf16.msra.mxu1 %v21024_v18  ;;  %v21086_v16 = vld [vmem:[#allocation2 + $0x17fc] ss:$76 sps:$4 sm:$0xff]  }
 0x3af   :  { %7857 = vmatprep.subr.bf16.mxu0 %v21029_v19  ;;  %8029 = vmatprep.subr.bf16.mxu1 %v21032_v20  ;;  %v21081_v18 = vld [vmem:[#allocation2 + $0x17f0] ss:$76 sps:$4 sm:$0xff]   ;;  %v21084_v19 = vld [vmem:[#allocation2 + $0x17f8] ss:$76 sps:$4 sm:$0xff]  }
 0x3b0   :  { %v21089_v20 = vld [vmem:[#allocation2 + $0x188c] ss:$76 sps:$4 sm:$0xff]  }
 0x3b2   :  { %7858 = vmatpush1.bf16.msra.mxu0 %v21027_v21  ;;  %8030 = vmatpush1.bf16.msra.mxu1 %v21030_v22  ;;  %v21092_v21 = vld [vmem:[#allocation2 + $0x1894] ss:$76 sps:$4 sm:$0xff]  }
 0x3b3   :  { %7870 = vmatprep.subr.bf16.mxu0 %v21035_v23  ;;  %8042 = vmatprep.subr.bf16.mxu1 %v21038_v27  ;;  %v21087_v22 = vld [vmem:[#allocation2 + $0x1888] ss:$76 sps:$4 sm:$0xff]   ;;  %v21090_v23 = vld [vmem:[#allocation2 + $0x1890] ss:$76 sps:$4 sm:$0xff]  }
 0x3b4   :  { %v21095_v27 = vld [vmem:[#allocation2 + $0x1924] ss:$76 sps:$4 sm:$0xff]  }
 0x3b5   :  { %7860 = vmatmul.mubr.bf16.vlgmr.msra.gmra.mrb[12].mxu0 %v23296_v17  ;;  %8032 = vmatmul.mubr.bf16.vlgmr.msra.gmra.mrb[12].mxu1 %v23296_v17 }
 0x3b6   :  { %7871 = vmatpush1.bf16.msra.mxu0 %v21033_v28  ;;  %8043 = vmatpush1.bf16.msra.mxu1 %v21036_v30  ;;  %v21098_v28 = vld [vmem:[#allocation2 + $0x192c] ss:$76 sps:$4 sm:$0xff]  }
 0x3b7   :  { %7872 = vmatprep.subr.bf16.mxu0 %v21041_v32  ;;  %8044 = vmatprep.subr.bf16.mxu1 %v21044_v34  ;;  %v21093_v30 = vld [vmem:[#allocation2 + $0x1920] ss:$76 sps:$4 sm:$0xff]   ;;  %v21096_v32 = vld [vmem:[#allocation2 + $0x1928] ss:$76 sps:$4 sm:$0xff]  }
 0x3b8   :  { %7902 = vmatprep.mubr.bf16.mxu0 %v23306_v24  ;;  %8074 = vmatprep.mubr.bf16.mxu1 %v23306_v24  ;;  %v21101_v34 = vld [vmem:[#allocation2 + $0x19bc] ss:$76 sps:$4 sm:$0xff]  }
 0x3ba   :  { %7873 = vmatpush1.bf16.msra.mxu0 %v21039_v39  ;;  %8045 = vmatpush1.bf16.msra.mxu1 %v21042_v42  ;;  %v21104_v39 = vld [vmem:[#allocation2 + $0x19c4] ss:$76 sps:$4 sm:$0xff]  }
 0x3bb   :  { %7874 = vmatprep.subr.bf16.mxu0 %v21047_v46  ;;  %8046 = vmatprep.subr.bf16.mxu1 %v21050_v48  ;;  %v21099_v42 = vld [vmem:[#allocation2 + $0x19b8] ss:$76 sps:$4 sm:$0xff]   ;;  %v21102_v46 = vld [vmem:[#allocation2 + $0x19c0] ss:$76 sps:$4 sm:$0xff]  }
 0x3bc   :  { %v21107_v48 = vld [vmem:[#allocation2 + $0x1a54] ss:$76 sps:$4 sm:$0xff]  }
 0x3be   :  { %7875 = vmatpush1.bf16.msra.mxu0 %v21045_v49  ;;  %8047 = vmatpush1.bf16.msra.mxu1 %v21048_v54  ;;  %v21110_v49 = vld [vmem:[#allocation2 + $0x1a5c] ss:$76 sps:$4 sm:$0xff]  }
 0x3bf   :  { %7876 = vmatprep.subr.bf16.mxu0 %v21053_v57  ;;  %8048 = vmatprep.subr.bf16.mxu1 %v21056_v58  ;;  %v21105_v54 = vld [vmem:[#allocation2 + $0x1a50] ss:$76 sps:$4 sm:$0xff]   ;;  %v21108_v57 = vld [vmem:[#allocation2 + $0x1a58] ss:$76 sps:$4 sm:$0xff]  }
 0x3c0   :  { %v21113_v58 = vld [vmem:[#allocation2 + $0x1aec] ss:$76 sps:$4 sm:$0xff]  }
 0x3c2   :  { %7877 = vmatpush1.bf16.msra.mxu0 %v21051_v59  ;;  %8049 = vmatpush1.bf16.msra.mxu1 %v21054_v60  ;;  %v21116_v59 = vld [vmem:[#allocation2 + $0x1af4] ss:$76 sps:$4 sm:$0xff]  }
 0x3c3   :  { %7878 = vmatprep.subr.bf16.mxu0 %v21059_v61  ;;  %8050 = vmatprep.subr.bf16.mxu1 %v21062_v62  ;;  %v21111_v60 = vld [vmem:[#allocation2 + $0x1ae8] ss:$76 sps:$4 sm:$0xff]   ;;  %v21114_v61 = vld [vmem:[#allocation2 + $0x1af0] ss:$76 sps:$4 sm:$0xff]  }
 0x3c4   :  { %v21119_v62 = vld [vmem:[#allocation2 + $0x1b84] ss:$76 sps:$4 sm:$0xff]  }
 0x3c6   :  { %7879 = vmatpush1.bf16.msra.mxu0 %v21057_v63  ;;  %8051 = vmatpush1.bf16.msra.mxu1 %v21060_v1  ;;  %v21122_v63 = vld [vmem:[#allocation2 + $0x1b8c] ss:$76 sps:$4 sm:$0xff]  }
 0x3c7   :  { %7880 = vmatprep.subr.bf16.mxu0 %v21065_v2  ;;  %8052 = vmatprep.subr.bf16.mxu1 %v21068_v3  ;;  %v21117_v1 = vld [vmem:[#allocation2 + $0x1b80] ss:$76 sps:$4 sm:$0xff]   ;;  %v21120_v2 = vld [vmem:[#allocation2 + $0x1b88] ss:$76 sps:$4 sm:$0xff]  }
 0x3c8   :  { %v21125_v3 = vld [vmem:[#allocation2 + $0x1c1c] ss:$76 sps:$4 sm:$0xff]  }
 0x3ca   :  { %7881 = vmatpush1.bf16.msra.mxu0 %v21063_v4  ;;  %8053 = vmatpush1.bf16.msra.mxu1 %v21066_v5  ;;  %v21128_v4 = vld [vmem:[#allocation2 + $0x1c24] ss:$76 sps:$4 sm:$0xff]  }
 0x3cb   :  { %7882 = vmatprep.subr.bf16.mxu0 %v21071_v6  ;;  %8054 = vmatprep.subr.bf16.mxu1 %v21074_v7  ;;  %v21123_v5 = vld [vmem:[#allocation2 + $0x1c18] ss:$76 sps:$4 sm:$0xff]   ;;  %v21126_v6 = vld [vmem:[#allocation2 + $0x1c20] ss:$76 sps:$4 sm:$0xff]  }
 0x3cc   :  { %v21131_v7 = vld [vmem:[#allocation2 + $0x1cb4] ss:$76 sps:$4 sm:$0xff]  }
 0x3ce   :  { %7883 = vmatpush1.bf16.msra.mxu0 %v21069_v8  ;;  %8055 = vmatpush1.bf16.msra.mxu1 %v21072_v10  ;;  %v21134_v8 = vld [vmem:[#allocation2 + $0x1cbc] ss:$76 sps:$4 sm:$0xff]  }
 0x3cf   :  { %7884 = vmatprep.subr.bf16.mxu0 %v21077_v11  ;;  %8056 = vmatprep.subr.bf16.mxu1 %v21080_v12  ;;  %v21129_v10 = vld [vmem:[#allocation2 + $0x1cb0] ss:$76 sps:$4 sm:$0xff]   ;;  %v21132_v11 = vld [vmem:[#allocation2 + $0x1cb8] ss:$76 sps:$4 sm:$0xff]  }
 0x3d0   :  { %v21137_v12 = vld [vmem:[#allocation2 + $0x1d4c] ss:$76 sps:$4 sm:$0xff]  }
 0x3d2   :  { %7885 = vmatpush1.bf16.msra.mxu0 %v21075_v13  ;;  %8057 = vmatpush1.bf16.msra.mxu1 %v21078_v14  ;;  %v21140_v13 = vld [vmem:[#allocation2 + $0x1d54] ss:$76 sps:$4 sm:$0xff]  }
 0x3d3   :  { %7886 = vmatprep.subr.bf16.mxu0 %v21083_v15  ;;  %8058 = vmatprep.subr.bf16.mxu1 %v21086_v16  ;;  %v21135_v14 = vld [vmem:[#allocation2 + $0x1d48] ss:$76 sps:$4 sm:$0xff]   ;;  %v21138_v15 = vld [vmem:[#allocation2 + $0x1d50] ss:$76 sps:$4 sm:$0xff]  }
 0x3d4   :  { %v21143_v16 = vld [vmem:[#allocation2 + $0x1de4] ss:$76 sps:$4 sm:$0xff]  }
 0x3d6   :  { %7887 = vmatpush1.bf16.msra.mxu0 %v21081_v18  ;;  %8059 = vmatpush1.bf16.msra.mxu1 %v21084_v19  ;;  %v21146_v18 = vld [vmem:[#allocation2 + $0x1dec] ss:$76 sps:$4 sm:$0xff]  }
 0x3d7   :  { %7888 = vmatprep.subr.bf16.mxu0 %v21089_v20  ;;  %8060 = vmatprep.subr.bf16.mxu1 %v21092_v21  ;;  %v21141_v19 = vld [vmem:[#allocation2 + $0x1de0] ss:$76 sps:$4 sm:$0xff]   ;;  %v21144_v20 = vld [vmem:[#allocation2 + $0x1de8] ss:$76 sps:$4 sm:$0xff]  }
 0x3d8   :  { %v21149_v21 = vld [vmem:[#allocation2 + $0x1e7c] ss:$76 sps:$4 sm:$0xff]  }
 0x3da   :  { %7889 = vmatpush1.bf16.msra.mxu0 %v21087_v22  ;;  %8061 = vmatpush1.bf16.msra.mxu1 %v21090_v23  ;;  %v21152_v22 = vld [vmem:[#allocation2 + $0x1e84] ss:$76 sps:$4 sm:$0xff]  }
 0x3db   :  { %7890 = vmatprep.subr.bf16.mxu0 %v21095_v27  ;;  %8062 = vmatprep.subr.bf16.mxu1 %v21098_v28  ;;  %v21147_v23 = vld [vmem:[#allocation2 + $0x1e78] ss:$76 sps:$4 sm:$0xff]   ;;  %v21150_v27 = vld [vmem:[#allocation2 + $0x1e80] ss:$76 sps:$4 sm:$0xff]  }
 0x3dc   :  { %v21155_v28 = vld [vmem:[#allocation2 + $0x1f14] ss:$76 sps:$4 sm:$0xff]  }
 0x3de   :  { %7891 = vmatpush1.bf16.msra.mxu0 %v21093_v30  ;;  %8063 = vmatpush1.bf16.msra.mxu1 %v21096_v32  ;;  %v21158_v30 = vld [vmem:[#allocation2 + $0x1f1c] ss:$76 sps:$4 sm:$0xff]  }
 0x3df   :  { %7892 = vmatprep.subr.bf16.mxu0 %v21101_v34  ;;  %8064 = vmatprep.subr.bf16.mxu1 %v21104_v39  ;;  %v21153_v32 = vld [vmem:[#allocation2 + $0x1f10] ss:$76 sps:$4 sm:$0xff]   ;;  %v21156_v34 = vld [vmem:[#allocation2 + $0x1f18] ss:$76 sps:$4 sm:$0xff]   ;;  %v1276_v39 = vld [vmem:[#allocation4 + $0x8] sm:$0xff] }
 0x3e2   :  { %7893 = vmatpush1.bf16.msra.mxu0 %v21099_v42  ;;  %8065 = vmatpush1.bf16.msra.mxu1 %v21102_v46  ;;  %v21161_v42 = vld [vmem:[#allocation2 + $0x1fac] ss:$76 sps:$4 sm:$0xff]   ;;  %v21164_v46 = vld [vmem:[#allocation2 + $0x1fb4] ss:$76 sps:$4 sm:$0xff]  }
 0x3e3   :  { %7894 = vmatprep.subr.bf16.mxu0 %v21107_v48  ;;  %8066 = vmatprep.subr.bf16.mxu1 %v21110_v49  ;;  %v21159_v48 = vld [vmem:[#allocation2 + $0x1fa8] ss:$76 sps:$4 sm:$0xff]   ;;  %v1316_v49 = vrot.slane %v1276_v39, %v23349_v51 }
 0x3e6   :  { %7895 = vmatpush1.bf16.msra.mxu0 %v21105_v54  ;;  %8067 = vmatpush1.bf16.msra.mxu1 %v21108_v57  ;;  %v1324_v54 = vrot.slane %v1276_v39, %v23352_v52  ;;  %v1320_v57 = vrot.slane %v1276_v39, %v23355_v55 }
 0x3e7   :  { %7896 = vmatprep.subr.bf16.mxu0 %v21113_v58  ;;  %8068 = vmatprep.subr.bf16.mxu1 %v21116_v59  ;;  %v1328_v58 = vrot.slane %v1276_v39, %v23358_v56  ;;  %v21162_v59 = vld [vmem:[#allocation2 + $0x1fb0] ss:$76 sps:$4 sm:$0xff]  }
 0x3e8   :  { %v21179_v39 = vld [vmem:[#allocation2 + $0x44] ss:$76 sps:$4 sm:$0xff]  }
 0x3ea   :  { %7897 = vmatpush1.bf16.msra.mxu0 %v21111_v60  ;;  %8069 = vmatpush1.bf16.msra.mxu1 %v21114_v61  ;;  %v21167_v60 = vld [vmem:[#allocation2 + $0x2044] ss:$76 sps:$4 sm:$0xff]   ;;  %v21170_v61 = vld [vmem:[#allocation2 + $0x204c] ss:$76 sps:$4 sm:$0xff]  }
 0x3eb   :  { %7898 = vmatprep.subr.bf16.mxu0 %v21119_v62  ;;  %8070 = vmatprep.subr.bf16.mxu1 %v21122_v63 }
 0x3ee   :  { %7899 = vmatpush1.bf16.msra.mxu0 %v21117_v1  ;;  %8071 = vmatpush1.bf16.msra.mxu1 %v21120_v2  ;;  %v21165_v1 = vld [vmem:[#allocation2 + $0x2040] ss:$76 sps:$4 sm:$0xff]  }
 0x3ef   :  { %7900 = vmatprep.subr.bf16.mxu0 %v21125_v3  ;;  %8072 = vmatprep.subr.bf16.mxu1 %v21128_v4 }
 0x3f2   :  { %7901 = vmatpush1.bf16.msra.mxu0 %v21123_v5  ;;  %8073 = vmatpush1.bf16.msra.mxu1 %v21126_v6 }
 0x3f3   :  { %7913 = vmatprep.subr.bf16.mxu0 %v21131_v7  ;;  %8085 = vmatprep.subr.bf16.mxu1 %v21134_v8 }
 0x3f5   :  { %7903 = vmatmul.mubr.bf16.vlgmr.msra.gmra.mrb[12].mxu0 %v23316_v26  ;;  %8075 = vmatmul.mubr.bf16.vlgmr.msra.gmra.mrb[12].mxu1 %v23316_v26 }
 0x3f6   :  { %7914 = vmatpush1.bf16.msra.mxu0 %v21129_v10  ;;  %8086 = vmatpush1.bf16.msra.mxu1 %v21132_v11  ;;  %v21168_v11 = vld [vmem:[#allocation2 + $0x2048] ss:$76 sps:$4 sm:$0xff]  }
 0x3f7   :  { %7915 = vmatprep.subr.bf16.mxu0 %v21137_v12  ;;  %8087 = vmatprep.subr.bf16.mxu1 %v21140_v13  ;;  %v21173_v12 = vld [vmem:[#allocation2 + $0x20dc] ss:$76 sps:$4 sm:$0xff]  }
 0x3f8   :  { %7945 = vmatprep.mubr.bf16.mxu0 %v23104_v35  ;;  %8117 = vmatprep.mubr.bf16.mxu1 %v23104_v35 }
 0x3fa   :  { %7916 = vmatpush1.bf16.msra.mxu0 %v21135_v14  ;;  %8088 = vmatpush1.bf16.msra.mxu1 %v21138_v15 }
 0x3fb   :  { %7917 = vmatprep.subr.bf16.mxu0 %v21143_v16  ;;  %8089 = vmatprep.subr.bf16.mxu1 %v21146_v18 }
 0x3fe   :  { %7918 = vmatpush1.bf16.msra.mxu0 %v21141_v19  ;;  %8090 = vmatpush1.bf16.msra.mxu1 %v21144_v20  ;;  %v21176_v20 = vld [vmem:[#allocation2 + $0x20e4] ss:$76 sps:$4 sm:$0xff]  }
 0x3ff   :  { %7919 = vmatprep.subr.bf16.mxu0 %v21149_v21  ;;  %8091 = vmatprep.subr.bf16.mxu1 %v21152_v22 }
 0x402   :  { %7920 = vmatpush1.bf16.msra.mxu0 %v21147_v23  ;;  %8092 = vmatpush1.bf16.msra.mxu1 %v21150_v27 }
 0x403   :  { %7921 = vmatprep.subr.bf16.mxu0 %v21155_v28  ;;  %8093 = vmatprep.subr.bf16.mxu1 %v21158_v30  ;;  %v21171_v28 = vld [vmem:[#allocation2 + $0x20d8] ss:$76 sps:$4 sm:$0xff]  }
 0x406   :  { %7922 = vmatpush1.bf16.msra.mxu0 %v21153_v32  ;;  %8094 = vmatpush1.bf16.msra.mxu1 %v21156_v34  ;;  %v21174_v34 = vld [vmem:[#allocation2 + $0x20e0] ss:$76 sps:$4 sm:$0xff]  }
 0x407   :  { %7923 = vmatprep.subr.bf16.mxu0 %v21161_v42  ;;  %8095 = vmatprep.subr.bf16.mxu1 %v21164_v46  ;;  %v21180_v46 = vld [vmem:[#allocation2 + $0x508] ss:$76 sps:$4 sm:$0xff]  }
 0x408   :  { %v7603_v62 = vpop.f32.mrb[8].mxu0  ;;  %v7775_v63 = vpop.f32.mrb[8].mxu1 }
 0x409   :  { %v19584_v2 = vadd.f32 %v7603_v62, %v1316_v49  ;;  %v19588_v3 = vadd.f32 %v7775_v63, %v1324_v54  ;;  %v7605_v4 = vpop.f32.mrb[9].mxu0  ;;  %v7777_v5 = vpop.f32.mrb[9].mxu1  ;;  %v21189_v62 = vld [vmem:[#allocation2 + $0x174] ss:$76 sps:$4 sm:$0xff]   ;;  %v21190_v63 = vld [vmem:[#allocation2 + $0x638] ss:$76 sps:$4 sm:$0xff]  }
 0x40a   :  { %v19585_v6 = vadd.f32 %v7605_v4, %v1320_v57  ;;  %v19589_v7 = vadd.f32 %v7777_v5, %v1328_v58  ;;  %v7607_v8 = vpop.f32.mrb[10].mxu0  ;;  %v7779_v10 = vpop.f32.mrb[10].mxu1  ;;  %7924 = vmatpush1.bf16.msra.mxu0 %v21159_v48  ;;  %8096 = vmatpush1.bf16.msra.mxu1 %v21162_v59  ;;  %v21182_v59 = vld [vmem:[#allocation2 + $0xd8] ss:$76 sps:$4 sm:$0xff]   ;;  %v21187_v5 = vld [vmem:[#allocation2 + $0x170] ss:$76 sps:$4 sm:$0xff]  }
 0x40b   :  { %v8472_v13 = vmul.f32 0.5, %v19584_v2  ;;  %v8474_v14 = vmul.f32 0.5, %v19588_v3  ;;  %v19586_v15 = vadd.f32 %v7607_v8, %v1316_v49  ;;  %v19590_v16 = vadd.f32 %v7779_v10, %v1324_v54  ;;  %v7609_v18 = vpop.f32.mrb[11].mxu0  ;;  %v7781_v19 = vpop.f32.mrb[11].mxu1  ;;  %7925 = vmatprep.subr.bf16.mxu0 %v21167_v60  ;;  %8097 = vmatprep.subr.bf16.mxu1 %v21170_v61  ;;  %v21177_v49 = vld [vmem:[#allocation2 + $0x40] ss:$76 sps:$4 sm:$0xff]  }
 0x40c   :  { %v8473_v21 = vmul.f32 0.5, %v19585_v6  ;;  %v8475_v22 = vmul.f32 0.5, %v19589_v7  ;;  %v19587_v23 = vadd.f32 %v7609_v18, %v1320_v57  ;;  %v19591_v27 = vadd.f32 %v7781_v19, %v1328_v58  ;;  %v21181_v54 = vld [vmem:[#allocation2 + $0x48] ss:$76 sps:$4 sm:$0xff]   ;;  %v21185_v58 = vld [vmem:[#allocation2 + $0x5a0] ss:$76 sps:$4 sm:$0xff]  }
 0x40d   :  { %22817 = vtanh.f32 %v8472_v13  ;;  %v8491_v30 = vmul.f32 0.5, %v19586_v15  ;;  %v8493_v32 = vmul.f32 0.5, %v19590_v16  ;;  %v21184_v57 = vld [vmem:[#allocation2 + $0xdc] ss:$76 sps:$4 sm:$0xff]   ;;  %v21186_v60 = vld [vmem:[#allocation2 + $0xe0] ss:$76 sps:$4 sm:$0xff]  }
 0x40e   :  { %22819 = vtanh.f32 %v8474_v14  ;;  %7926 = vmatpush1.bf16.msra.mxu0 %v21165_v1  ;;  %8098 = vmatpush1.bf16.msra.mxu1 %v21168_v11  ;;  %v8492_v42 = vmul.f32 0.5, %v19587_v23  ;;  %v8494_v48 = vmul.f32 0.5, %v19591_v27  ;;  %v21191_v6 = vld [vmem:[#allocation2 + $0x178] ss:$76 sps:$4 sm:$0xff]   ;;  %v21195_v11 = vld [vmem:[#allocation2 + $0x6d0] ss:$76 sps:$4 sm:$0xff]  }
 0x40f   :  { %22821 = vtanh.f32 %v8473_v21  ;;  %7927 = vmatprep.subr.bf16.mxu0 %v21173_v12  ;;  %8099 = vmatprep.subr.bf16.mxu1 %v21176_v20  ;;  %v21194_v10 = vld [vmem:[#allocation2 + $0x20c] ss:$76 sps:$4 sm:$0xff]   ;;  %v21192_v15 = vld [vmem:[#allocation2 + $0x208] ss:$76 sps:$4 sm:$0xff]   ;;  %v21196_v16 = vld [vmem:[#allocation2 + $0x210] ss:$76 sps:$4 sm:$0xff]  }
 0x410   :  { %22823 = vtanh.f32 %v8475_v22  ;;  %v21199_v27 = vld [vmem:[#allocation2 + $0x2a4] ss:$76 sps:$4 sm:$0xff]  }
 0x411   :  { %22825 = vtanh.f32 %v8491_v30 }
 0x412   :  { %22827 = vtanh.f32 %v8493_v32  ;;  %7928 = vmatpush1.bf16.msra.mxu0 %v21171_v28  ;;  %8100 = vmatpush1.bf16.msra.mxu1 %v21174_v34  ;;  %v21200_v34 = vld [vmem:[#allocation2 + $0x768] ss:$76 sps:$4 sm:$0xff]  }
 0x413   :  { %22829 = vtanh.f32 %v8492_v42  ;;  %8128 = vmatprep.subr.bf16.mxu0 %v21179_v39  ;;  %19100 = vmatprep.subr.bf16.mxu1 %v21180_v46 }
 0x414   :  { %22831 = vtanh.f32 %v8494_v48 }
 0x415   :  { %7946 = vmatmul.mubr.bf16.vlgmr.msra.gmra.mrb[12].mxu0 %v23328_v0  ;;  %8118 = vmatmul.mubr.bf16.vlgmr.msra.gmra.mrb[12].mxu1 %v23328_v0 }
 0x416   :  { %8129 = vmatpush1.bf16.msra.mxu0 %v21177_v49  ;;  %19101 = vmatpush3.bf16.msra.mxu1 %v21181_v54 }
 0x417   :  { %v22818_v61 = vpop.eup %22817  ;;  %8130 = vmatprep.subr.bf16.mxu0 %v21184_v57  ;;  %19102 = vmatprep.subr.bf16.mxu1 %v21185_v58  ;;  %v21197_v57 = vld [vmem:[#allocation2 + $0x2a0] ss:$76 sps:$4 sm:$0xff]   ;;  %v21201_v58 = vld [vmem:[#allocation2 + $0x2a8] ss:$76 sps:$4 sm:$0xff]  }
 0x418   :  { %v22820_v1 = vpop.eup %22819  ;;  %8332 = vmatprep.mubr.bf16.mxu1 %v23266_v50  ;;  %8160 = vmatprep.mubr.bf16.mxu0 %v23266_v50  ;;  %v8548_v4 = vmul.f32 0.5, %v22818_v61  ;;  %v21205_v61 = vld [vmem:[#allocation2 + $0x800] ss:$76 sps:$4 sm:$0xff]  }
 0x419   :  { %v22822_v2 = vpop.eup %22821  ;;  %v8550_v8 = vmul.f32 0.5, %v22820_v1  ;;  %v21206_v1 = vld [vmem:[#allocation2 + $0x340] ss:$76 sps:$4 sm:$0xff]  }
 0x41a   :  { %v22824_v3 = vpop.eup %22823  ;;  %8131 = vmatpush1.bf16.msra.mxu0 %v21182_v59  ;;  %19103 = vmatpush3.bf16.msra.mxu1 %v21186_v60  ;;  %v8549_v13 = vmul.f32 0.5, %v22822_v2  ;;  %v8586_v21 = vadd.f32 0.5, %v8548_v4  ;;  %v21204_v60 = vld [vmem:[#allocation2 + $0x33c] ss:$76 sps:$4 sm:$0xff]   ;;  %v21209_v2 = vld [vmem:[#allocation2 + $0x3d4] ss:$76 sps:$4 sm:$0xff]  }
 0x41b   :  { %v22826_v7 = vpop.eup %22825  ;;  %8132 = vmatprep.subr.bf16.mxu0 %v21189_v62  ;;  %19104 = vmatprep.subr.bf16.mxu1 %v21190_v63  ;;  %v8551_v50 = vmul.f32 0.5, %v22824_v3  ;;  %v8588_v28 = vadd.f32 0.5, %v8550_v8  ;;  %v21202_v63 = vld [vmem:[#allocation2 + $0x338] ss:$76 sps:$4 sm:$0xff]   ;;  %v21207_v4 = vld [vmem:[#allocation2 + $0x3d0] ss:$76 sps:$4 sm:$0xff]  }
 0x41c   :  { %v22828_v12 = vpop.eup %22827  ;;  %v8567_v14 = vmul.f32 0.5, %v22826_v7  ;;  %v8587_v39 = vadd.f32 0.5, %v8549_v13  ;;  %v21210_v3 = vld [vmem:[#allocation2 + $0x898] ss:$76 sps:$4 sm:$0xff]   ;;  %v21215_v7 = vld [vmem:[#allocation2 + $0x930] ss:$76 sps:$4 sm:$0xff]  }
 0x41d   :  { %v22830_v18 = vpop.eup %22829  ;;  %v8569_v19 = vmul.f32 0.5, %v22828_v12  ;;  %v8589_v48 = vadd.f32 0.5, %v8551_v50  ;;  %v21212_v8 = vld [vmem:[#allocation2 + $0x468] ss:$76 sps:$4 sm:$0xff]   ;;  %v21217_v13 = vld [vmem:[#allocation2 + $0x500] ss:$76 sps:$4 sm:$0xff]  }
 0x41e   :  { %v22832_v20 = vpop.eup %22831  ;;  %v8605_v22 = vadd.f32 0.5, %v8567_v14  ;;  %v8568_v23 = vmul.f32 0.5, %v22830_v18  ;;  %8133 = vmatpush1.bf16.msra.mxu0 %v21187_v5  ;;  %19105 = vmatpush3.bf16.msra.mxu1 %v21191_v6  ;;  %v21211_v5 = vld [vmem:[#allocation2 + $0x3d8] ss:$76 sps:$4 sm:$0xff]   ;;  %v21220_v12 = vld [vmem:[#allocation2 + $0xe88] ss:$76 sps:$4 sm:$0xff]  }
 0x41f   :  { %v8607_v30 = vadd.f32 0.5, %v8569_v19  ;;  %v8570_v32 = vmul.f32 0.5, %v22832_v20  ;;  %8134 = vmatprep.subr.bf16.mxu0 %v21194_v10  ;;  %19106 = vmatprep.subr.bf16.mxu1 %v21195_v11  ;;  %v21214_v6 = vld [vmem:[#allocation2 + $0x46c] ss:$76 sps:$4 sm:$0xff]   ;;  %v21216_v10 = vld [vmem:[#allocation2 + $0x470] ss:$76 sps:$4 sm:$0xff]  }
 0x420   :  { %v23433_v42 = vpack.c.bf16 %v8605_v22, %v8586_v21  ;;  %v8606_v46 = vadd.f32 0.5, %v8568_v23  ;;  %v21219_v11 = vld [vmem:[#allocation2 + $0x504] ss:$76 sps:$4 sm:$0xff]   ;;  %v21221_v14 = vld [vmem:[#allocation2 + $0x9c8] ss:$76 sps:$4 sm:$0xff]  }
 0x421   :  { %v23435_v49 = vpack.c.bf16 %v8607_v30, %v8588_v28  ;;  %v8608_v54 = vadd.f32 0.5, %v8570_v32  ;;  %v21222_v18 = vld [vmem:[#allocation2 + $0x598] ss:$76 sps:$4 sm:$0xff]   ;;  %v21226_v50 = vld [vmem:[#allocation2 + $0xa60] ss:$76 sps:$4 sm:$0xff]  }
 0x422   :  { %8135 = vmatpush1.bf16.msra.mxu0 %v21192_v15  ;;  %19107 = vmatpush3.bf16.msra.mxu1 %v21196_v16  ;;  %v23437_v59 = vpack.c.bf16 %v8606_v46, %v8587_v39  ;;  %v21224_v15 = vld [vmem:[#allocation2 + $0x59c] ss:$76 sps:$4 sm:$0xff]   ;;  %v21225_v16 = vld [vmem:[#allocation2 + $0xf20] ss:$76 sps:$4 sm:$0xff]   ;;  %v21230_v20 = vld [vmem:[#allocation2 + $0xfb8] ss:$76 sps:$4 sm:$0xff]  }
 0x423   :  { %8136 = vmatprep.subr.bf16.mxu0 %v21199_v27  ;;  %19108 = vmatprep.subr.bf16.mxu1 %v21200_v34  ;;  %v23439_v62 = vpack.c.bf16 %v8608_v54, %v8589_v48  ;;  %v21229_v19 = vld [vmem:[#allocation2 + $0x634] ss:$76 sps:$4 sm:$0xff]   ;;  %v21227_v21 = vld [vmem:[#allocation2 + $0x630] ss:$76 sps:$4 sm:$0xff]   ;;  %v21231_v22 = vld [vmem:[#allocation2 + $0xaf8] ss:$76 sps:$4 sm:$0xff]  }
 0x424   :  { %v21234_v23 = vld [vmem:[#allocation2 + $0x6cc] ss:$76 sps:$4 sm:$0xff]   ;;  %v21235_v27 = vld [vmem:[#allocation2 + $0x1050] ss:$76 sps:$4 sm:$0xff]   ;;  %v21232_v28 = vld [vmem:[#allocation2 + $0x6c8] ss:$76 sps:$4 sm:$0xff]  }
 0x425   :  { %v21236_v30 = vld [vmem:[#allocation2 + $0xb90] ss:$76 sps:$4 sm:$0xff]   ;;  %v21240_v34 = vld [vmem:[#allocation2 + $0x10e8] ss:$76 sps:$4 sm:$0xff]   ;;  %v21237_v39 = vld [vmem:[#allocation2 + $0x760] ss:$76 sps:$4 sm:$0xff]  }
 0x426   :  { %8137 = vmatpush1.bf16.msra.mxu0 %v21197_v57  ;;  %19109 = vmatpush3.bf16.msra.mxu1 %v21201_v58  ;;  %v21239_v32 = vld [vmem:[#allocation2 + $0x764] ss:$76 sps:$4 sm:$0xff]   ;;  %v21241_v46 = vld [vmem:[#allocation2 + $0xc28] ss:$76 sps:$4 sm:$0xff]   ;;  %v21245_v54 = vld [vmem:[#allocation2 + $0x1180] ss:$76 sps:$4 sm:$0xff]  }
 0x427   :  { %8138 = vmatprep.subr.bf16.mxu0 %v21204_v60  ;;  %19110 = vmatprep.subr.bf16.mxu1 %v21205_v61  ;;  %v21244_v48 = vld [vmem:[#allocation2 + $0x7fc] ss:$76 sps:$4 sm:$0xff]   ;;  %v21242_v57 = vld [vmem:[#allocation2 + $0x7f8] ss:$76 sps:$4 sm:$0xff]   ;;  %v21246_v58 = vld [vmem:[#allocation2 + $0xcc0] ss:$76 sps:$4 sm:$0xff]  }
 0x428   :  { %v21249_v60 = vld [vmem:[#allocation2 + $0x894] ss:$76 sps:$4 sm:$0xff]   ;;  %v21250_v61 = vld [vmem:[#allocation2 + $0x1218] ss:$76 sps:$4 sm:$0xff]  }
 0x42a   :  { %8139 = vmatpush1.bf16.msra.mxu0 %v21202_v63  ;;  %19111 = vmatpush3.bf16.msra.mxu1 %v21206_v1  ;;  %v21247_v63 = vld [vmem:[#allocation2 + $0x890] ss:$76 sps:$4 sm:$0xff]   ;;  %v21251_v1 = vld [vmem:[#allocation2 + $0xd58] ss:$76 sps:$4 sm:$0xff]  }
 0x42b   :  { %8140 = vmatprep.subr.bf16.mxu0 %v21209_v2  ;;  %19112 = vmatprep.subr.bf16.mxu1 %v21210_v3  ;;  %v21254_v2 = vld [vmem:[#allocation2 + $0x92c] ss:$76 sps:$4 sm:$0xff]   ;;  %v21255_v3 = vld [vmem:[#allocation2 + $0x12b0] ss:$76 sps:$4 sm:$0xff]  }
 0x42e   :  { %8141 = vmatpush1.bf16.msra.mxu0 %v21207_v4  ;;  %19113 = vmatpush3.bf16.msra.mxu1 %v21211_v5  ;;  %v21252_v4 = vld [vmem:[#allocation2 + $0x928] ss:$76 sps:$4 sm:$0xff]   ;;  %v21256_v5 = vld [vmem:[#allocation2 + $0xdf0] ss:$76 sps:$4 sm:$0xff]  }
 0x42f   :  { %8142 = vmatprep.subr.bf16.mxu0 %v21214_v6  ;;  %19114 = vmatprep.subr.bf16.mxu1 %v21215_v7  ;;  %v21259_v6 = vld [vmem:[#allocation2 + $0x9c4] ss:$76 sps:$4 sm:$0xff]   ;;  %v21260_v7 = vld [vmem:[#allocation2 + $0x1808] ss:$76 sps:$4 sm:$0xff]  }
 0x432   :  { %8143 = vmatpush1.bf16.msra.mxu0 %v21212_v8  ;;  %19115 = vmatpush3.bf16.msra.mxu1 %v21216_v10  ;;  %v21257_v8 = vld [vmem:[#allocation2 + $0x9c0] ss:$76 sps:$4 sm:$0xff]   ;;  %v21261_v10 = vld [vmem:[#allocation2 + $0x1348] ss:$76 sps:$4 sm:$0xff]  }
 0x433   :  { %8144 = vmatprep.subr.bf16.mxu0 %v21219_v11  ;;  %19122 = vmatprep.subr.bf16.mxu1 %v21220_v12  ;;  %v21264_v11 = vld [vmem:[#allocation2 + $0xa5c] ss:$76 sps:$4 sm:$0xff]   ;;  %v21265_v12 = vld [vmem:[#allocation2 + $0x18a0] ss:$76 sps:$4 sm:$0xff]  }
 0x435   :  { %8333 = vmatmul.mubr.bf16.vlgmr.msra.gmra.mrb[16].mxu1 %v23276_v9 }
 0x436   :  { %8145 = vmatpush1.bf16.msra.mxu0 %v21217_v13  ;;  %19123 = vmatpush3.bf16.msra.mxu1 %v21221_v14  ;;  %v21262_v13 = vld [vmem:[#allocation2 + $0xa58] ss:$76 sps:$4 sm:$0xff]   ;;  %v21266_v14 = vld [vmem:[#allocation2 + $0x13e0] ss:$76 sps:$4 sm:$0xff]  }
 0x437   :  { %8146 = vmatprep.subr.bf16.mxu0 %v21224_v15  ;;  %19124 = vmatprep.subr.bf16.mxu1 %v21225_v16  ;;  %v21269_v15 = vld [vmem:[#allocation2 + $0xaf4] ss:$76 sps:$4 sm:$0xff]   ;;  %v21270_v16 = vld [vmem:[#allocation2 + $0x1938] ss:$76 sps:$4 sm:$0xff]  }
 0x438   :  { %8373 = vmatprep.mubr.bf16.mxu1 %v23286_v36 }
 0x43a   :  { %8147 = vmatpush1.bf16.msra.mxu0 %v21222_v18  ;;  %19125 = vmatpush3.bf16.msra.mxu1 %v21226_v50  ;;  %v21267_v18 = vld [vmem:[#allocation2 + $0xaf0] ss:$76 sps:$4 sm:$0xff]   ;;  %v21271_v50 = vld [vmem:[#allocation2 + $0x1478] ss:$76 sps:$4 sm:$0xff]  }
 0x43b   :  { %8148 = vmatprep.subr.bf16.mxu0 %v21229_v19  ;;  %19126 = vmatprep.subr.bf16.mxu1 %v21230_v20  ;;  %v21274_v19 = vld [vmem:[#allocation2 + $0xb8c] ss:$76 sps:$4 sm:$0xff]   ;;  %v21272_v20 = vld [vmem:[#allocation2 + $0xb88] ss:$76 sps:$4 sm:$0xff]  }
 0x43e   :  { %8149 = vmatpush1.bf16.msra.mxu0 %v21227_v21  ;;  %19127 = vmatpush3.bf16.msra.mxu1 %v21231_v22  ;;  %v21276_v21 = vld [vmem:[#allocation2 + $0x1510] ss:$76 sps:$4 sm:$0xff]  }
 0x43f   :  { %8150 = vmatprep.subr.bf16.mxu0 %v21234_v23  ;;  %19128 = vmatprep.subr.bf16.mxu1 %v21235_v27  ;;  %v21279_v22 = vld [vmem:[#allocation2 + $0xc24] ss:$76 sps:$4 sm:$0xff]   ;;  %v21280_v23 = vld [vmem:[#allocation2 + $0x1a68] ss:$76 sps:$4 sm:$0xff]   ;;  %v21277_v27 = vld [vmem:[#allocation2 + $0xc20] ss:$76 sps:$4 sm:$0xff]  }
 0x442   :  { %8151 = vmatpush1.bf16.msra.mxu0 %v21232_v28  ;;  %19129 = vmatpush3.bf16.msra.mxu1 %v21236_v30  ;;  %v21284_v28 = vld [vmem:[#allocation2 + $0xcbc] ss:$76 sps:$4 sm:$0xff]   ;;  %v21285_v30 = vld [vmem:[#allocation2 + $0x1b00] ss:$76 sps:$4 sm:$0xff]  }
 0x443   :  { %8152 = vmatprep.subr.bf16.mxu0 %v21239_v32  ;;  %19130 = vmatprep.subr.bf16.mxu1 %v21240_v34  ;;  %v21282_v32 = vld [vmem:[#allocation2 + $0xcb8] ss:$76 sps:$4 sm:$0xff]   ;;  %v21286_v34 = vld [vmem:[#allocation2 + $0x1640] ss:$76 sps:$4 sm:$0xff]  }
 0x446   :  { %8153 = vmatpush1.bf16.msra.mxu0 %v21237_v39  ;;  %19131 = vmatpush3.bf16.msra.mxu1 %v21241_v46  ;;  %v21289_v39 = vld [vmem:[#allocation2 + $0xd54] ss:$76 sps:$4 sm:$0xff]   ;;  %v21290_v46 = vld [vmem:[#allocation2 + $0x1b98] ss:$76 sps:$4 sm:$0xff]  }
 0x447   :  { %8154 = vmatprep.subr.bf16.mxu0 %v21244_v48  ;;  %19132 = vmatprep.subr.bf16.mxu1 %v21245_v54  ;;  %v21287_v48 = vld [vmem:[#allocation2 + $0xd50] ss:$76 sps:$4 sm:$0xff]   ;;  %v21291_v54 = vld [vmem:[#allocation2 + $0x16d8] ss:$76 sps:$4 sm:$0xff]  }
 0x44a   :  { %8155 = vmatpush1.bf16.msra.mxu0 %v21242_v57  ;;  %19133 = vmatpush3.bf16.msra.mxu1 %v21246_v58  ;;  %v21294_v57 = vld [vmem:[#allocation2 + $0xdec] ss:$76 sps:$4 sm:$0xff]   ;;  %v21295_v58 = vld [vmem:[#allocation2 + $0x1c30] ss:$76 sps:$4 sm:$0xff]  }
 0x44b   :  { %8156 = vmatprep.subr.bf16.mxu0 %v21249_v60  ;;  %19134 = vmatprep.subr.bf16.mxu1 %v21250_v61  ;;  %v21292_v60 = vld [vmem:[#allocation2 + $0xde8] ss:$76 sps:$4 sm:$0xff]   ;;  %v21296_v61 = vld [vmem:[#allocation2 + $0x1770] ss:$76 sps:$4 sm:$0xff]  }
 0x44e   :  { %8157 = vmatpush1.bf16.msra.mxu0 %v21247_v63  ;;  %19135 = vmatpush3.bf16.msra.mxu1 %v21251_v1  ;;  %v21299_v63 = vld [vmem:[#allocation2 + $0xe84] ss:$76 sps:$4 sm:$0xff]   ;;  %v21297_v1 = vld [vmem:[#allocation2 + $0xe80] ss:$76 sps:$4 sm:$0xff]  }
 0x44f   :  { %8158 = vmatprep.subr.bf16.mxu0 %v21254_v2  ;;  %19136 = vmatprep.subr.bf16.mxu1 %v21255_v3  ;;  %v21300_v2 = vld [vmem:[#allocation2 + $0x1cc8] ss:$76 sps:$4 sm:$0xff]   ;;  %v23105_v3 = vmov 0.0  }
 0x452   :  { %8159 = vmatpush1.bf16.msra.mxu0 %v21252_v4  ;;  %19137 = vmatpush3.bf16.msra.mxu1 %v21256_v5  ;;  %v21303_v4 = vld [vmem:[#allocation2 + $0xf1c] ss:$76 sps:$4 sm:$0xff]   ;;  %v21301_v5 = vld [vmem:[#allocation2 + $0xf18] ss:$76 sps:$4 sm:$0xff]  }
 0x453   :  { %8171 = vmatprep.subr.bf16.mxu0 %v21259_v6  ;;  %19144 = vmatprep.subr.bf16.mxu1 %v21260_v7  ;;  %v21304_v6 = vld [vmem:[#allocation2 + $0x1d60] ss:$76 sps:$4 sm:$0xff]  }
 0x454   :  { %v21307_v7 = vld [vmem:[#allocation2 + $0xfb4] ss:$76 sps:$4 sm:$0xff]  }
 0x455   :  { %8374 = vmatmul.mubr.bf16.vlgmr.msra.gmra.mrb[20].mxu1 %v23296_v17  ;;  %8161 = vmatmul.mubr.bf16.vlgmr.msra.gmra.mrb[16].mxu0 %v23276_v9  ;;  %v21275_v9 = vld [vmem:[#allocation2 + $0x19d0] ss:$76 sps:$4 sm:$0xff]  }
 0x456   :  { %8172 = vmatpush1.bf16.msra.mxu0 %v21257_v8  ;;  %19145 = vmatpush3.bf16.msra.mxu1 %v21261_v10  ;;  %v21305_v8 = vld [vmem:[#allocation2 + $0xfb0] ss:$76 sps:$4 sm:$0xff]   ;;  %v21308_v10 = vld [vmem:[#allocation2 + $0x1df8] ss:$76 sps:$4 sm:$0xff]  }
 0x457   :  { %8173 = vmatprep.subr.bf16.mxu0 %v21264_v11  ;;  %19146 = vmatprep.subr.bf16.mxu1 %v21265_v12  ;;  %v21311_v11 = vld [vmem:[#allocation2 + $0x104c] ss:$76 sps:$4 sm:$0xff]   ;;  %v21309_v12 = vld [vmem:[#allocation2 + $0x1048] ss:$76 sps:$4 sm:$0xff]  }
 0x458   :  { %8414 = vmatprep.mubr.bf16.mxu1 %v23306_v24  ;;  %8203 = vmatprep.mubr.bf16.mxu0 %v23286_v36  ;;  %v21281_v36 = vld [vmem:[#allocation2 + $0x15a8] ss:$76 sps:$4 sm:$0xff]  }
 0x45a   :  { %8174 = vmatpush1.bf16.msra.mxu0 %v21262_v13  ;;  %19147 = vmatpush3.bf16.msra.mxu1 %v21266_v14  ;;  %v21312_v13 = vld [vmem:[#allocation2 + $0x1e90] ss:$76 sps:$4 sm:$0xff]  }
 0x45b   :  { %8175 = vmatprep.subr.bf16.mxu0 %v21269_v15  ;;  %19148 = vmatprep.subr.bf16.mxu1 %v21270_v16  ;;  %v21315_v14 = vld [vmem:[#allocation2 + $0x10e4] ss:$76 sps:$4 sm:$0xff]   ;;  %v21313_v15 = vld [vmem:[#allocation2 + $0x10e0] ss:$76 sps:$4 sm:$0xff]   ;;  %v21316_v16 = vld [vmem:[#allocation2 + $0x1f28] ss:$76 sps:$4 sm:$0xff]  }
 0x45e   :  { %8176 = vmatpush1.bf16.msra.mxu0 %v21267_v18  ;;  %19149 = vmatpush3.bf16.msra.mxu1 %v21271_v50  ;;  %v21319_v18 = vld [vmem:[#allocation2 + $0x117c] ss:$76 sps:$4 sm:$0xff]   ;;  %v21317_v50 = vld [vmem:[#allocation2 + $0x1178] ss:$76 sps:$4 sm:$0xff]  }
 0x45f   :  { %8177 = vmatprep.subr.bf16.mxu0 %v21274_v19  ;;  %19150 = vmatprep.subr.bf16.mxu1 %v21275_v9  ;;  %v21320_v19 = vld [vmem:[#allocation2 + $0x1fc0] ss:$76 sps:$4 sm:$0xff]  }
 0x460   :  { %v21323_v9 = vld [vmem:[#allocation2 + $0x1214] ss:$76 sps:$4 sm:$0xff]  }
 0x462   :  { %8178 = vmatpush1.bf16.msra.mxu0 %v21272_v20  ;;  %19151 = vmatpush3.bf16.msra.mxu1 %v21276_v21  ;;  %v21321_v20 = vld [vmem:[#allocation2 + $0x1210] ss:$76 sps:$4 sm:$0xff]   ;;  %v21324_v21 = vld [vmem:[#allocation2 + $0x2058] ss:$76 sps:$4 sm:$0xff]  }
 0x463   :  { %8179 = vmatprep.subr.bf16.mxu0 %v21279_v22  ;;  %19152 = vmatprep.subr.bf16.mxu1 %v21280_v23  ;;  %v21327_v22 = vld [vmem:[#allocation2 + $0x12ac] ss:$76 sps:$4 sm:$0xff]   ;;  %v21325_v23 = vld [vmem:[#allocation2 + $0x12a8] ss:$76 sps:$4 sm:$0xff]  }
 0x466   :  { %8180 = vmatpush1.bf16.msra.mxu0 %v21277_v27  ;;  %19153 = vmatpush3.bf16.msra.mxu1 %v21281_v36  ;;  %v21328_v27 = vld [vmem:[#allocation2 + $0x20f0] ss:$76 sps:$4 sm:$0xff]  }
 0x467   :  { %8181 = vmatprep.subr.bf16.mxu0 %v21284_v28  ;;  %19154 = vmatprep.subr.bf16.mxu1 %v21285_v30  ;;  %v21331_v36 = vld [vmem:[#allocation2 + $0x1344] ss:$76 sps:$4 sm:$0xff]   ;;  %v21334_v28 = vld [vmem:[#allocation6 + $0x4] ss:$20 sps:$4 sm:$0xff]  }
 0x468   :  { %v21329_v30 = vld [vmem:[#allocation2 + $0x1340] ss:$76 sps:$4 sm:$0xff]  }
 0x46a   :  { %8182 = vmatpush1.bf16.msra.mxu0 %v21282_v32  ;;  %19155 = vmatpush3.bf16.msra.mxu1 %v21286_v34  ;;  %v21332_v32 = vld [vmem:[#allocation6] ss:$20 sps:$4 sm:$0xff]  }
 0x46b   :  { %8183 = vmatprep.subr.bf16.mxu0 %v21289_v39  ;;  %19156 = vmatprep.subr.bf16.mxu1 %v21290_v46  ;;  %v21337_v34 = vld [vmem:[#allocation2 + $0x13dc] ss:$76 sps:$4 sm:$0xff]   ;;  %v21340_v39 = vld [vmem:[#allocation6 + $0x2c] ss:$20 sps:$4 sm:$0xff]   ;;  %v21335_v46 = vld [vmem:[#allocation2 + $0x13d8] ss:$76 sps:$4 sm:$0xff]  }
 0x46e   :  { %8184 = vmatpush1.bf16.msra.mxu0 %v21287_v48  ;;  %19157 = vmatpush3.bf16.msra.mxu1 %v21291_v54  ;;  %v21338_v48 = vld [vmem:[#allocation6 + $0x28] ss:$20 sps:$4 sm:$0xff]   ;;  %v21343_v54 = vld [vmem:[#allocation2 + $0x1474] ss:$76 sps:$4 sm:$0xff]  }
 0x46f   :  { %8185 = vmatprep.subr.bf16.mxu0 %v21294_v57  ;;  %19158 = vmatprep.subr.bf16.mxu1 %v21295_v58  ;;  %v21346_v57 = vld [vmem:[#allocation6 + $0x54] ss:$20 sps:$4 sm:$0xff]  }
 0x470   :  { %v21341_v58 = vld [vmem:[#allocation2 + $0x1470] ss:$76 sps:$4 sm:$0xff]  }
 0x472   :  { %8186 = vmatpush1.bf16.msra.mxu0 %v21292_v60  ;;  %19159 = vmatpush3.bf16.msra.mxu1 %v21296_v61  ;;  %v21344_v60 = vld [vmem:[#allocation6 + $0x50] ss:$20 sps:$4 sm:$0xff]  }
 0x473   :  { %8187 = vmatprep.subr.bf16.mxu0 %v21299_v63  ;;  %19488 = vmatprep.subr.bf16.mxu1 %v23105_v3  ;;  %v21349_v61 = vld [vmem:[#allocation2 + $0x150c] ss:$76 sps:$4 sm:$0xff]   ;;  %v21347_v63 = vld [vmem:[#allocation2 + $0x1508] ss:$76 sps:$4 sm:$0xff]  }
 0x475   :  { %8415 = vmatmul.mubr.bf16.vlgmr.msra.gmra.mrb[24].mxu1 %v23316_v26 }
 0x476   :  { %8188 = vmatpush1.bf16.msra.mxu0 %v21297_v1  ;;  %19489 = vmatpush3.bf16.msra.mxu1 %v21300_v2  ;;  %v21350_v1 = vld [vmem:[#allocation6 + $0x78] ss:$20 sps:$4 sm:$0xff]   ;;  %v21355_v2 = vld [vmem:[#allocation2 + $0x15a4] ss:$76 sps:$4 sm:$0xff]  }
 0x477   :  { %8189 = vmatprep.subr.bf16.mxu0 %v21303_v4  ;;  %19490 = vmatprep.subr.bf16.mxu1 %v23105_v3  ;;  %v21358_v4 = vld [vmem:[#allocation6 + $0xa4] ss:$20 sps:$4 sm:$0xff]  }
 0x478   :  { %19504 = vmatprep.mubr.msk.bf16.mxu1 %vm23106_vm0, %v23105_v3 }
 0x47a   :  { %8190 = vmatpush1.bf16.msra.mxu0 %v21301_v5  ;;  %19491 = vmatpush3.bf16.msra.mxu1 %v21304_v6  ;;  %v21353_v5 = vld [vmem:[#allocation2 + $0x15a0] ss:$76 sps:$4 sm:$0xff]   ;;  %v21356_v6 = vld [vmem:[#allocation6 + $0xa0] ss:$20 sps:$4 sm:$0xff]  }
 0x47b   :  { %8191 = vmatprep.subr.bf16.mxu0 %v21307_v7  ;;  %19492 = vmatprep.subr.bf16.mxu1 %v23105_v3  ;;  %v21364_v7 = vld [vmem:[#allocation6 + $0xcc] ss:$20 sps:$4 sm:$0xff]  }
 0x47e   :  { %8192 = vmatpush1.bf16.msra.mxu0 %v21305_v8  ;;  %19493 = vmatpush3.bf16.msra.mxu1 %v21308_v10  ;;  %v21359_v8 = vld [vmem:[#allocation2 + $0x1638] ss:$76 sps:$4 sm:$0xff]   ;;  %v21362_v10 = vld [vmem:[#allocation6 + $0xc8] ss:$20 sps:$4 sm:$0xff]  }
 0x47f   :  { %8193 = vmatprep.subr.bf16.mxu0 %v21311_v11  ;;  %19494 = vmatprep.subr.bf16.mxu1 %v23105_v3  ;;  %v21367_v11 = vld [vmem:[#allocation2 + $0x16d4] ss:$76 sps:$4 sm:$0xff]  }
 0x482   :  { %8194 = vmatpush1.bf16.msra.mxu0 %v21309_v12  ;;  %19495 = vmatpush3.bf16.msra.mxu1 %v21312_v13  ;;  %v21370_v12 = vld [vmem:[#allocation6 + $0xf4] ss:$20 sps:$4 sm:$0xff]  }
 0x483   :  { %8195 = vmatprep.subr.bf16.mxu0 %v21315_v14  ;;  %19496 = vmatprep.subr.bf16.mxu1 %v23105_v3  ;;  %v21365_v13 = vld [vmem:[#allocation2 + $0x16d0] ss:$76 sps:$4 sm:$0xff]   ;;  %v21368_v14 = vld [vmem:[#allocation6 + $0xf0] ss:$20 sps:$4 sm:$0xff]  }
 0x486   :  { %8196 = vmatpush1.bf16.msra.mxu0 %v21313_v15  ;;  %19497 = vmatpush3.bf16.msra.mxu1 %v21316_v16  ;;  %v21373_v15 = vld [vmem:[#allocation2 + $0x176c] ss:$76 sps:$4 sm:$0xff]   ;;  %v21376_v16 = vld [vmem:[#allocation6 + $0x11c] ss:$20 sps:$4 sm:$0xff]  }
 0x487   :  { %8197 = vmatprep.subr.bf16.mxu0 %v21319_v18  ;;  %19498 = vmatprep.subr.bf16.mxu1 %v23105_v3  ;;  %v21371_v18 = vld [vmem:[#allocation2 + $0x1768] ss:$76 sps:$4 sm:$0xff]  }
 0x48a   :  { %8198 = vmatpush1.bf16.msra.mxu0 %v21317_v50  ;;  %19499 = vmatpush3.bf16.msra.mxu1 %v21320_v19  ;;  %v21374_v50 = vld [vmem:[#allocation6 + $0x118] ss:$20 sps:$4 sm:$0xff]   ;;  %v21379_v19 = vld [vmem:[#allocation2 + $0x1804] ss:$76 sps:$4 sm:$0xff]  }
 0x48b   :  { %8199 = vmatprep.subr.bf16.mxu0 %v21323_v9  ;;  %19500 = vmatprep.subr.bf16.mxu1 %v23105_v3  ;;  %v21382_v9 = vld [vmem:[#allocation6 + $0x144] ss:$20 sps:$4 sm:$0xff]  }
 0x48e   :  { %8200 = vmatpush1.bf16.msra.mxu0 %v21321_v20  ;;  %19501 = vmatpush3.bf16.msra.mxu1 %v21324_v21  ;;  %v21377_v20 = vld [vmem:[#allocation2 + $0x1800] ss:$76 sps:$4 sm:$0xff]   ;;  %v21380_v21 = vld [vmem:[#allocation6 + $0x140] ss:$20 sps:$4 sm:$0xff]  }
 0x48f   :  { %8201 = vmatprep.subr.bf16.mxu0 %v21327_v22  ;;  %19502 = vmatprep.subr.bf16.mxu1 %v23105_v3  ;;  %v21385_v22 = vld [vmem:[#allocation2 + $0x189c] ss:$76 sps:$4 sm:$0xff]  }
 0x492   :  { %8202 = vmatpush1.bf16.msra.mxu0 %v21325_v23  ;;  %19503 = vmatpush3.bf16.msra.mxu1 %v21328_v27  ;;  %v21388_v23 = vld [vmem:[#allocation6 + $0x16c] ss:$20 sps:$4 sm:$0xff]   ;;  %v21383_v27 = vld [vmem:[#allocation2 + $0x1898] ss:$76 sps:$4 sm:$0xff]  }
 0x493   :  { %8214 = vmatprep.subr.bf16.mxu0 %v21331_v36  ;;  %13526 = vmatprep.subr.bf16.mxu1 %v21334_v28  ;;  %v21386_v36 = vld [vmem:[#allocation6 + $0x168] ss:$20 sps:$4 sm:$0xff]   ;;  %v21391_v28 = vld [vmem:[#allocation2 + $0x1934] ss:$76 sps:$4 sm:$0xff]  }
 0x495   :  { %19505 = vmatmul.mubr.bf16.vlgmr.msra.gmra.mrb[28].mxu1 %v23328_v0  ;;  %8204 = vmatmul.mubr.bf16.vlgmr.msra.gmra.mrb[16].mxu0 %v23296_v17  ;;  %v21352_v17 = vld [vmem:[#allocation6 + $0x7c] ss:$20 sps:$4 sm:$0xff]  }
 0x496   :  { %8215 = vmatpush1.bf16.msra.mxu0 %v21329_v30  ;;  %13527 = vmatpush1.bf16.msra.mxu1 %v21332_v32  ;;  %v21394_v30 = vld [vmem:[#allocation6 + $0x194] ss:$20 sps:$4 sm:$0xff]  }
 0x497   :  { %13558 = vmatprep.mubr.bf16.mxu1 %v23372_v33  ;;  %8216 = vmatprep.subr.bf16.mxu0 %v21337_v34  ;;  %v21389_v32 = vld [vmem:[#allocation2 + $0x1930] ss:$76 sps:$4 sm:$0xff]   ;;  %v21392_v34 = vld [vmem:[#allocation6 + $0x190] ss:$20 sps:$4 sm:$0xff]  }
 0x498   :  { %13528 = vmatprep.subr.bf16.mxu1 %v21340_v39  ;;  %8246 = vmatprep.mubr.bf16.mxu0 %v23306_v24  ;;  %v21361_v24 = vld [vmem:[#allocation2 + $0x163c] ss:$76 sps:$4 sm:$0xff]   ;;  %v21397_v39 = vld [vmem:[#allocation2 + $0x19cc] ss:$76 sps:$4 sm:$0xff]  }
 0x49a   :  { %8217 = vmatpush1.bf16.msra.mxu0 %v21335_v46  ;;  %13529 = vmatpush1.bf16.msra.mxu1 %v21338_v48  ;;  %v21400_v46 = vld [vmem:[#allocation6 + $0x1bc] ss:$20 sps:$4 sm:$0xff]   ;;  %v21395_v48 = vld [vmem:[#allocation2 + $0x19c8] ss:$76 sps:$4 sm:$0xff]  }
 0x49b   :  { %8218 = vmatprep.subr.bf16.mxu0 %v21343_v54  ;;  %13530 = vmatprep.subr.bf16.mxu1 %v21346_v57  ;;  %v21398_v54 = vld [vmem:[#allocation6 + $0x1b8] ss:$20 sps:$4 sm:$0xff]   ;;  %v21403_v57 = vld [vmem:[#allocation2 + $0x1a64] ss:$76 sps:$4 sm:$0xff]  }
 0x49e   :  { %8219 = vmatpush1.bf16.msra.mxu0 %v21341_v58  ;;  %13531 = vmatpush1.bf16.msra.mxu1 %v21344_v60  ;;  %v21406_v58 = vld [vmem:[#allocation6 + $0x1e4] ss:$20 sps:$4 sm:$0xff]  }
 0x49f   :  { %8220 = vmatprep.subr.bf16.mxu0 %v21349_v61  ;;  %13532 = vmatprep.subr.bf16.mxu1 %v21352_v17  ;;  %v21401_v60 = vld [vmem:[#allocation2 + $0x1a60] ss:$76 sps:$4 sm:$0xff]   ;;  %v21404_v61 = vld [vmem:[#allocation6 + $0x1e0] ss:$20 sps:$4 sm:$0xff]  }
 0x4a0   :  { %v21409_v17 = vld [vmem:[#allocation2 + $0x1afc] ss:$76 sps:$4 sm:$0xff]  }
 0x4a2   :  { %8221 = vmatpush1.bf16.msra.mxu0 %v21347_v63  ;;  %13533 = vmatpush1.bf16.msra.mxu1 %v21350_v1  ;;  %v21412_v63 = vld [vmem:[#allocation6 + $0x20c] ss:$20 sps:$4 sm:$0xff]   ;;  %v21407_v1 = vld [vmem:[#allocation2 + $0x1af8] ss:$76 sps:$4 sm:$0xff]  }
 0x4a3   :  { %8222 = vmatprep.subr.bf16.mxu0 %v21355_v2  ;;  %13534 = vmatprep.subr.bf16.mxu1 %v21358_v4  ;;  %v21410_v2 = vld [vmem:[#allocation6 + $0x208] ss:$20 sps:$4 sm:$0xff]   ;;  %v21415_v4 = vld [vmem:[#allocation2 + $0x1b94] ss:$76 sps:$4 sm:$0xff]  }
 0x4a6   :  { %8223 = vmatpush1.bf16.msra.mxu0 %v21353_v5  ;;  %13535 = vmatpush1.bf16.msra.mxu1 %v21356_v6  ;;  %v21418_v5 = vld [vmem:[#allocation6 + $0x234] ss:$20 sps:$4 sm:$0xff]  }
 0x4a7   :  { %8224 = vmatprep.subr.bf16.mxu0 %v21361_v24  ;;  %13536 = vmatprep.subr.bf16.mxu1 %v21364_v7  ;;  %v21413_v6 = vld [vmem:[#allocation2 + $0x1b90] ss:$76 sps:$4 sm:$0xff]   ;;  %v21416_v24 = vld [vmem:[#allocation6 + $0x230] ss:$20 sps:$4 sm:$0xff]  }
 0x4a8   :  { %v21421_v7 = vld [vmem:[#allocation2 + $0x1c2c] ss:$76 sps:$4 sm:$0xff]  }
 0x4aa   :  { %8225 = vmatpush1.bf16.msra.mxu0 %v21359_v8  ;;  %13537 = vmatpush1.bf16.msra.mxu1 %v21362_v10  ;;  %v21424_v8 = vld [vmem:[#allocation6 + $0x25c] ss:$20 sps:$4 sm:$0xff]   ;;  %v21419_v10 = vld [vmem:[#allocation2 + $0x1c28] ss:$76 sps:$4 sm:$0xff]  }
 0x4ab   :  { %8226 = vmatprep.subr.bf16.mxu0 %v21367_v11  ;;  %13538 = vmatprep.subr.bf16.mxu1 %v21370_v12  ;;  %v21422_v11 = vld [vmem:[#allocation6 + $0x258] ss:$20 sps:$4 sm:$0xff]   ;;  %v21427_v12 = vld [vmem:[#allocation2 + $0x1cc4] ss:$76 sps:$4 sm:$0xff]  }
 0x4ae   :  { %8227 = vmatpush1.bf16.msra.mxu0 %v21365_v13  ;;  %13539 = vmatpush1.bf16.msra.mxu1 %v21368_v14  ;;  %v21430_v13 = vld [vmem:[#allocation6 + $0x284] ss:$20 sps:$4 sm:$0xff]  }
 0x4af   :  { %8228 = vmatprep.subr.bf16.mxu0 %v21373_v15  ;;  %13540 = vmatprep.subr.bf16.mxu1 %v21376_v16  ;;  %v21425_v14 = vld [vmem:[#allocation2 + $0x1cc0] ss:$76 sps:$4 sm:$0xff]   ;;  %v21428_v15 = vld [vmem:[#allocation6 + $0x280] ss:$20 sps:$4 sm:$0xff]  }
 0x4b0   :  { %v21433_v16 = vld [vmem:[#allocation2 + $0x1d5c] ss:$76 sps:$4 sm:$0xff]  }
 0x4b2   :  { %8229 = vmatpush1.bf16.msra.mxu0 %v21371_v18  ;;  %13541 = vmatpush1.bf16.msra.mxu1 %v21374_v50  ;;  %v21436_v18 = vld [vmem:[#allocation6 + $0x2ac] ss:$20 sps:$4 sm:$0xff]   ;;  %v21431_v50 = vld [vmem:[#allocation2 + $0x1d58] ss:$76 sps:$4 sm:$0xff]  }
 0x4b3   :  { %8230 = vmatprep.subr.bf16.mxu0 %v21379_v19  ;;  %13542 = vmatprep.subr.bf16.mxu1 %v21382_v9  ;;  %v21434_v19 = vld [vmem:[#allocation6 + $0x2a8] ss:$20 sps:$4 sm:$0xff]   ;;  %v21439_v9 = vld [vmem:[#allocation2 + $0x1df4] ss:$76 sps:$4 sm:$0xff]  }
 0x4b6   :  { %8231 = vmatpush1.bf16.msra.mxu0 %v21377_v20  ;;  %13543 = vmatpush1.bf16.msra.mxu1 %v21380_v21  ;;  %v21442_v20 = vld [vmem:[#allocation6 + $0x2d4] ss:$20 sps:$4 sm:$0xff]  }
 0x4b7   :  { %8232 = vmatprep.subr.bf16.mxu0 %v21385_v22  ;;  %13544 = vmatprep.subr.bf16.mxu1 %v21388_v23  ;;  %v21437_v21 = vld [vmem:[#allocation2 + $0x1df0] ss:$76 sps:$4 sm:$0xff]   ;;  %v21440_v22 = vld [vmem:[#allocation6 + $0x2d0] ss:$20 sps:$4 sm:$0xff]  }
 0x4b8   :  { %v21445_v23 = vld [vmem:[#allocation2 + $0x1e8c] ss:$76 sps:$4 sm:$0xff]  }
 0x4ba   :  { %8233 = vmatpush1.bf16.msra.mxu0 %v21383_v27  ;;  %13545 = vmatpush1.bf16.msra.mxu1 %v21386_v36  ;;  %v21443_v27 = vld [vmem:[#allocation2 + $0x1e88] ss:$76 sps:$4 sm:$0xff]   ;;  %v21446_v36 = vld [vmem:[#allocation6 + $0x2f8] ss:$20 sps:$4 sm:$0xff]  }
 0x4bb   :  { %8234 = vmatprep.subr.bf16.mxu0 %v21391_v28  ;;  %13546 = vmatprep.subr.bf16.mxu1 %v21394_v30  ;;  %v21451_v28 = vld [vmem:[#allocation2 + $0x1f24] ss:$76 sps:$4 sm:$0xff]   ;;  %v21454_v30 = vld [vmem:[#allocation6 + $0x324] ss:$20 sps:$4 sm:$0xff]  }
 0x4be   :  { %8235 = vmatpush1.bf16.msra.mxu0 %v21389_v32  ;;  %13547 = vmatpush1.bf16.msra.mxu1 %v21392_v34  ;;  %v21449_v32 = vld [vmem:[#allocation2 + $0x1f20] ss:$76 sps:$4 sm:$0xff]   ;;  %v21452_v34 = vld [vmem:[#allocation6 + $0x320] ss:$20 sps:$4 sm:$0xff]  }
 0x4bf   :  { %8236 = vmatprep.subr.bf16.mxu0 %v21397_v39  ;;  %13548 = vmatprep.subr.bf16.mxu1 %v21400_v46  ;;  %v21457_v39 = vld [vmem:[#allocation2 + $0x1fbc] ss:$76 sps:$4 sm:$0xff]   ;;  %v21460_v46 = vld [vmem:[#allocation6 + $0x34c] ss:$20 sps:$4 sm:$0xff]  }
 0x4c2   :  { %8237 = vmatpush1.bf16.msra.mxu0 %v21395_v48  ;;  %13549 = vmatpush1.bf16.msra.mxu1 %v21398_v54  ;;  %v21455_v48 = vld [vmem:[#allocation2 + $0x1fb8] ss:$76 sps:$4 sm:$0xff]   ;;  %v21458_v54 = vld [vmem:[#allocation6 + $0x348] ss:$20 sps:$4 sm:$0xff]  }
 0x4c3   :  { %8238 = vmatprep.subr.bf16.mxu0 %v21403_v57  ;;  %13550 = vmatprep.subr.bf16.mxu1 %v21406_v58  ;;  %v22902_v57 = vld [vmem:[#allocation4 + $0x8] sm:$0xff] }
 0x4c4   :  { %v1332_v58 = vrot.slane %v22902_v57, %v23389_v40 }
 0x4c6   :  { %8239 = vmatpush1.bf16.msra.mxu0 %v21401_v60  ;;  %13551 = vmatpush1.bf16.msra.mxu1 %v21404_v61  ;;  %v1340_v60 = vrot.slane %v22902_v57, %v1307_v41  ;;  %v21463_v61 = vld [vmem:[#allocation2 + $0x2054] ss:$76 sps:$4 sm:$0xff]  }
 0x4c7   :  { %8240 = vmatprep.subr.bf16.mxu0 %v21409_v17  ;;  %13552 = vmatprep.subr.bf16.mxu1 %v21412_v63  ;;  %v21466_v17 = vld [vmem:[#allocation6 + $0x374] ss:$20 sps:$4 sm:$0xff]   ;;  %v1336_v63 = vrot.slane %v22902_v57, %v1303_v43 }
 0x4ca   :  { %8241 = vmatpush1.bf16.msra.mxu0 %v21407_v1  ;;  %13553 = vmatpush1.bf16.msra.mxu1 %v21410_v2  ;;  %v1344_v1 = vrot.slane %v22902_v57, %v1311_v45  ;;  %v21482_v57 = vld [vmem:[#allocation6 + $0x30] ss:$20 sps:$4 sm:$0xff]  }
 0x4cb   :  { %8242 = vmatprep.subr.bf16.mxu0 %v21415_v4  ;;  %13554 = vmatprep.subr.bf16.mxu1 %v21418_v5  ;;  %v21461_v5 = vld [vmem:[#allocation2 + $0x2050] ss:$76 sps:$4 sm:$0xff]  }
 0x4ce   :  { %8243 = vmatpush1.bf16.msra.mxu0 %v21413_v6  ;;  %13555 = vmatpush1.bf16.msra.mxu1 %v21416_v24  ;;  %v21464_v6 = vld [vmem:[#allocation6 + $0x370] ss:$20 sps:$4 sm:$0xff]  }
 0x4cf   :  { %8244 = vmatprep.subr.bf16.mxu0 %v21421_v7  ;;  %13556 = vmatprep.subr.bf16.mxu1 %v21424_v8 }
 0x4d2   :  { %8245 = vmatpush1.bf16.msra.mxu0 %v21419_v10  ;;  %13557 = vmatpush1.bf16.msra.mxu1 %v21422_v11  ;;  %v21469_v10 = vld [vmem:[#allocation2 + $0x20ec] ss:$76 sps:$4 sm:$0xff]  }
 0x4d3   :  { %8257 = vmatprep.subr.bf16.mxu0 %v21427_v12  ;;  %13569 = vmatprep.subr.bf16.mxu1 %v21430_v13 }
 0x4d5   :  { %13559 = vmatmul.mubr.bf16.vlgmr.msra.gmra.mrb[32].mxu1 %v23368_v25  ;;  %8247 = vmatmul.mubr.bf16.vlgmr.msra.gmra.mrb[16].mxu0 %v23316_v26  ;;  %v21448_v26 = vld [vmem:[#allocation6 + $0x2fc] ss:$20 sps:$4 sm:$0xff]  }
 0x4d6   :  { %8258 = vmatpush1.bf16.msra.mxu0 %v21425_v14  ;;  %13570 = vmatpush1.bf16.msra.mxu1 %v21428_v15 }
 0x4d7   :  { %13601 = vmatprep.mubr.bf16.mxu1 %v23374_v38  ;;  %8259 = vmatprep.subr.bf16.mxu0 %v21433_v16 }
 0x4d8   :  { %13571 = vmatprep.subr.bf16.mxu1 %v21436_v18  ;;  %8289 = vmatprep.mubr.bf16.mxu0 %v23104_v35 }
 0x4da   :  { %8260 = vmatpush1.bf16.msra.mxu0 %v21431_v50  ;;  %13572 = vmatpush1.bf16.msra.mxu1 %v21434_v19  ;;  %v21472_v50 = vld [vmem:[#allocation6 + $0x39c] ss:$20 sps:$4 sm:$0xff]  }
 0x4db   :  { %8261 = vmatprep.subr.bf16.mxu0 %v21439_v9  ;;  %13573 = vmatprep.subr.bf16.mxu1 %v21442_v20 }
 0x4de   :  { %8262 = vmatpush1.bf16.msra.mxu0 %v21437_v21  ;;  %13574 = vmatpush1.bf16.msra.mxu1 %v21440_v22  ;;  %v21467_v22 = vld [vmem:[#allocation2 + $0x20e8] ss:$76 sps:$4 sm:$0xff]  }
 0x4df   :  { %8263 = vmatprep.subr.bf16.mxu0 %v21445_v23  ;;  %13575 = vmatprep.subr.bf16.mxu1 %v21448_v26  ;;  %v21470_v26 = vld [vmem:[#allocation6 + $0x398] ss:$20 sps:$4 sm:$0xff]  }
 0x4e2   :  { %8264 = vmatpush1.bf16.msra.mxu0 %v21443_v27  ;;  %13576 = vmatpush1.bf16.msra.mxu1 %v21446_v36 }
 0x4e3   :  { %8265 = vmatprep.subr.bf16.mxu0 %v21451_v28  ;;  %13577 = vmatprep.subr.bf16.mxu1 %v21454_v30  ;;  %v21475_v28 = vld [vmem:[#allocation6 + $0x3c4] ss:$20 sps:$4 sm:$0xff]   ;;  %v21478_v30 = vld [vmem:[#allocation6 + $0xc] ss:$20 sps:$4 sm:$0xff]  }
 0x4e6   :  { %8266 = vmatpush1.bf16.msra.mxu0 %v21449_v32  ;;  %13578 = vmatpush1.bf16.msra.mxu1 %v21452_v34  ;;  %v21473_v34 = vld [vmem:[#allocation6 + $0x3c0] ss:$20 sps:$4 sm:$0xff]  }
 0x4e7   :  { %8267 = vmatprep.subr.bf16.mxu0 %v21457_v39  ;;  %13579 = vmatprep.subr.bf16.mxu1 %v21460_v46  ;;  %v21476_v39 = vld [vmem:[#allocation6 + $0x8] ss:$20 sps:$4 sm:$0xff]   ;;  %v21481_v46 = vld [vmem:[#allocation6 + $0x3ec] ss:$20 sps:$4 sm:$0xff]  }
 0x4e8   :  { %v7947_v2 = vpop.f32.mrb[12].mxu0  ;;  %v8119_v4 = vpop.f32.mrb[12].mxu1 }
 0x4e9   :  { %v19592_v24 = vadd.f32 %v7947_v2, %v1332_v58  ;;  %v19596_v7 = vadd.f32 %v8119_v4, %v1340_v60  ;;  %v7949_v8 = vpop.f32.mrb[13].mxu0  ;;  %v8121_v41 = vpop.f32.mrb[13].mxu1 }
 0x4ea   :  { %v19593_v11 = vadd.f32 %v7949_v8, %v1336_v63  ;;  %v19597_v12 = vadd.f32 %v8121_v41, %v1344_v1  ;;  %v7951_v13 = vpop.f32.mrb[14].mxu0  ;;  %v8123_v14 = vpop.f32.mrb[14].mxu1  ;;  %8268 = vmatpush1.bf16.msra.mxu0 %v21455_v48  ;;  %13580 = vmatpush1.bf16.msra.mxu1 %v21458_v54  ;;  %v21484_v48 = vld [vmem:[#allocation6 + $0x34] ss:$20 sps:$4 sm:$0xff]  }
 0x4eb   :  { %v8476_v43 = vmul.f32 0.5, %v19592_v24  ;;  %v8478_v44 = vmul.f32 0.5, %v19596_v7  ;;  %v19594_v45 = vadd.f32 %v7951_v13, %v1332_v58  ;;  %v19598_v15 = vadd.f32 %v8123_v14, %v1340_v60  ;;  %v7953_v16 = vpop.f32.mrb[15].mxu0  ;;  %v8125_v18 = vpop.f32.mrb[15].mxu1  ;;  %8269 = vmatprep.subr.bf16.mxu0 %v21463_v61  ;;  %13581 = vmatprep.subr.bf16.mxu1 %v21466_v17  ;;  %v21479_v54 = vld [vmem:[#allocation6 + $0x3e8] ss:$20 sps:$4 sm:$0xff]  }
 0x4ec   :  { %v8477_v19 = vmul.f32 0.5, %v19593_v11  ;;  %v8479_v9 = vmul.f32 0.5, %v19597_v12  ;;  %v19595_v20 = vadd.f32 %v7953_v16, %v1336_v63  ;;  %v19599_v21 = vadd.f32 %v8125_v18, %v1344_v1  ;;  %v21487_v60 = vld [vmem:[#allocation6 + $0x414] ss:$20 sps:$4 sm:$0xff]   ;;  %v21490_v61 = vld [vmem:[#allocation6 + $0x5c] ss:$20 sps:$4 sm:$0xff]  }
 0x4ed   :  { %22833 = vtanh.f32 %v8476_v43  ;;  %v8495_v23 = vmul.f32 0.5, %v19594_v45  ;;  %v8497_v27 = vmul.f32 0.5, %v19598_v15  ;;  %v21485_v63 = vld [vmem:[#allocation6 + $0x410] ss:$20 sps:$4 sm:$0xff]   ;;  %v21488_v1 = vld [vmem:[#allocation6 + $0x58] ss:$20 sps:$4 sm:$0xff]  }
 0x4ee   :  { %22835 = vtanh.f32 %v8478_v44  ;;  %8270 = vmatpush1.bf16.msra.mxu0 %v21461_v5  ;;  %13582 = vmatpush1.bf16.msra.mxu1 %v21464_v6  ;;  %v8496_v36 = vmul.f32 0.5, %v19595_v20  ;;  %v8498_v32 = vmul.f32 0.5, %v19599_v21  ;;  %v21496_v7 = vld [vmem:[#allocation6 + $0x84] ss:$20 sps:$4 sm:$0xff]   ;;  %v21494_v12 = vld [vmem:[#allocation6 + $0x80] ss:$20 sps:$4 sm:$0xff]  }
 0x4ef   :  { %22837 = vtanh.f32 %v8477_v19  ;;  %8271 = vmatprep.subr.bf16.mxu0 %v21469_v10  ;;  %13583 = vmatprep.subr.bf16.mxu1 %v21472_v50  ;;  %v21491_v11 = vld [vmem:[#allocation6 + $0x438] ss:$20 sps:$4 sm:$0xff]  }
 0x4f0   :  { %22839 = vtanh.f32 %v8479_v9  ;;  %v21499_v18 = vld [vmem:[#allocation6 + $0x464] ss:$20 sps:$4 sm:$0xff]   ;;  %v21502_v20 = vld [vmem:[#allocation6 + $0xac] ss:$20 sps:$4 sm:$0xff]  }
 0x4f1   :  { %22841 = vtanh.f32 %v8495_v23 }
 0x4f2   :  { %22843 = vtanh.f32 %v8497_v27  ;;  %8272 = vmatpush1.bf16.msra.mxu0 %v21467_v22  ;;  %13584 = vmatpush1.bf16.msra.mxu1 %v21470_v26  ;;  %v21497_v26 = vld [vmem:[#allocation6 + $0x460] ss:$20 sps:$4 sm:$0xff]  }
 0x4f3   :  { %22845 = vtanh.f32 %v8496_v36  ;;  %13585 = vmatprep.subr.bf16.mxu1 %v21475_v28  ;;  %13956 = vmatprep.subr.bf16.mxu0 %v21478_v30  ;;  %v21500_v30 = vld [vmem:[#allocation6 + $0xa8] ss:$20 sps:$4 sm:$0xff]  }
 0x4f4   :  { %22847 = vtanh.f32 %v8498_v32 }
 0x4f5   :  { %8290 = vmatmul.mubr.bf16.vlgmr.msra.gmra.mrb[16].mxu0 %v23328_v0  ;;  %v21493_v0 = vld [vmem:[#allocation6 + $0x43c] ss:$20 sps:$4 sm:$0xff]  }
 0x4f6   :  { %13586 = vmatpush1.bf16.msra.mxu1 %v21473_v34  ;;  %13957 = vmatpush1.bf16.msra.mxu0 %v21476_v39  ;;  %v21505_v34 = vld [vmem:[#allocation6 + $0x48c] ss:$20 sps:$4 sm:$0xff]   ;;  %v21508_v39 = vld [vmem:[#allocation6 + $0xd4] ss:$20 sps:$4 sm:$0xff]  }
 0x4f7   :  { %v22834_v58 = vpop.eup %22833  ;;  %13988 = vmatprep.mubr.bf16.mxu0 %v23372_v33  ;;  %13587 = vmatprep.subr.bf16.mxu1 %v21481_v46 }
 0x4f8   :  { %v22836_v17 = vpop.eup %22835  ;;  %13958 = vmatprep.subr.bf16.mxu0 %v21484_v48  ;;  %v8552_v5 = vmul.f32 0.5, %v22834_v58  ;;  %v21503_v48 = vld [vmem:[#allocation6 + $0x488] ss:$20 sps:$4 sm:$0xff]  }
 0x4f9   :  { %v22838_v2 = vpop.eup %22837  ;;  %v8554_v24 = vmul.f32 0.5, %v22836_v17  ;;  %v21514_v58 = vld [vmem:[#allocation6 + $0xfc] ss:$20 sps:$4 sm:$0xff]  }
 0x4fa   :  { %v22840_v4 = vpop.eup %22839  ;;  %13588 = vmatpush1.bf16.msra.mxu1 %v21479_v54  ;;  %13959 = vmatpush1.bf16.msra.mxu0 %v21482_v57  ;;  %v8553_v41 = vmul.f32 0.5, %v22838_v2  ;;  %v8590_v45 = vadd.f32 0.5, %v8552_v5  ;;  %v21506_v54 = vld [vmem:[#allocation6 + $0xd0] ss:$20 sps:$4 sm:$0xff]   ;;  %v21511_v57 = vld [vmem:[#allocation6 + $0x4b4] ss:$20 sps:$4 sm:$0xff]  }
 0x4fb   :  { %v22842_v6 = vpop.eup %22841  ;;  %13589 = vmatprep.subr.bf16.mxu1 %v21487_v60  ;;  %13960 = vmatprep.subr.bf16.mxu0 %v21490_v61  ;;  %v8555_v14 = vmul.f32 0.5, %v22840_v4  ;;  %v8592_v50 = vadd.f32 0.5, %v8554_v24  ;;  %v21509_v60 = vld [vmem:[#allocation6 + $0x4b0] ss:$20 sps:$4 sm:$0xff]   ;;  %v21512_v61 = vld [vmem:[#allocation6 + $0xf8] ss:$20 sps:$4 sm:$0xff]  }
 0x4fc   :  { %v22844_v8 = vpop.eup %22843  ;;  %v8571_v10 = vmul.f32 0.5, %v22842_v6  ;;  %v8591_v21 = vadd.f32 0.5, %v8553_v41  ;;  %v21517_v4 = vld [vmem:[#allocation6 + $0x4dc] ss:$20 sps:$4 sm:$0xff]   ;;  %v21520_v5 = vld [vmem:[#allocation6 + $0x124] ss:$20 sps:$4 sm:$0xff]  }
 0x4fd   :  { %v22846_v13 = vpop.eup %22845  ;;  %v8573_v43 = vmul.f32 0.5, %v22844_v8  ;;  %v8593_v27 = vadd.f32 0.5, %v8555_v14  ;;  %v21515_v24 = vld [vmem:[#allocation6 + $0x4d8] ss:$20 sps:$4 sm:$0xff]   ;;  %v21527_v14 = vld [vmem:[#allocation6 + $0x528] ss:$20 sps:$4 sm:$0xff]  }
 0x4fe   :  { %v22848_v44 = vpop.eup %22847  ;;  %v8609_v15 = vadd.f32 0.5, %v8571_v10  ;;  %v8572_v16 = vmul.f32 0.5, %v22846_v13  ;;  %13590 = vmatpush1.bf16.msra.mxu1 %v21485_v63  ;;  %13961 = vmatpush1.bf16.msra.mxu0 %v21488_v1  ;;  %v21523_v8 = vld [vmem:[#allocation6 + $0x504] ss:$20 sps:$4 sm:$0xff]   ;;  %v21526_v41 = vld [vmem:[#allocation6 + $0x14c] ss:$20 sps:$4 sm:$0xff]  }
 0x4ff   :  { %v8611_v19 = vadd.f32 0.5, %v8573_v43  ;;  %v8574_v9 = vmul.f32 0.5, %v22848_v44  ;;  %13591 = vmatprep.subr.bf16.mxu1 %v21493_v0  ;;  %13962 = vmatprep.subr.bf16.mxu0 %v21496_v7  ;;  %v21518_v0 = vld [vmem:[#allocation6 + $0x120] ss:$20 sps:$4 sm:$0xff]   ;;  %v21530_v43 = vld [vmem:[#allocation6 + $0x170] ss:$20 sps:$4 sm:$0xff]  }
 0x500   :  { %v23475_v22 = vpack.c.bf16 %v8609_v15, %v8590_v45  ;;  %v8610_v23 = vadd.f32 0.5, %v8572_v16  ;;  %v21521_v10 = vld [vmem:[#allocation6 + $0x500] ss:$20 sps:$4 sm:$0xff]   ;;  %v21533_v45 = vld [vmem:[#allocation6 + $0x550] ss:$20 sps:$4 sm:$0xff]  }
 0x501   :  { %v23477_v36 = vpack.c.bf16 %v8611_v19, %v8592_v50  ;;  %v8612_v28 = vadd.f32 0.5, %v8574_v9  ;;  %v21532_v13 = vld [vmem:[#allocation6 + $0x174] ss:$20 sps:$4 sm:$0xff]   ;;  %v21538_v15 = vld [vmem:[#allocation6 + $0x19c] ss:$20 sps:$4 sm:$0xff]  }
 0x502   :  { %13592 = vmatpush1.bf16.msra.mxu1 %v21491_v11  ;;  %13963 = vmatpush1.bf16.msra.mxu0 %v21494_v12  ;;  %v23479_v32 = vpack.c.bf16 %v8610_v23, %v8591_v21  ;;  %v21524_v11 = vld [vmem:[#allocation6 + $0x148] ss:$20 sps:$4 sm:$0xff]   ;;  %v21529_v12 = vld [vmem:[#allocation6 + $0x52c] ss:$20 sps:$4 sm:$0xff]   ;;  %v21544_v19 = vld [vmem:[#allocation6 + $0x1c4] ss:$20 sps:$4 sm:$0xff]  }
 0x503   :  { %13593 = vmatprep.subr.bf16.mxu1 %v21499_v18  ;;  %13964 = vmatprep.subr.bf16.mxu0 %v21502_v20  ;;  %v23481_v46 = vpack.c.bf16 %v8612_v28, %v8593_v27  ;;  %v21535_v44 = vld [vmem:[#allocation6 + $0x554] ss:$20 sps:$4 sm:$0xff]   ;;  %v21536_v16 = vld [vmem:[#allocation6 + $0x198] ss:$20 sps:$4 sm:$0xff]   ;;  %v21541_v18 = vld [vmem:[#allocation6 + $0x57c] ss:$20 sps:$4 sm:$0xff]  }
 0x504   :  { %v21539_v50 = vld [vmem:[#allocation6 + $0x578] ss:$20 sps:$4 sm:$0xff]   ;;  %v21542_v9 = vld [vmem:[#allocation6 + $0x1c0] ss:$20 sps:$4 sm:$0xff]   ;;  %v21548_v27 = vld [vmem:[#allocation6 + $0x1e8] ss:$20 sps:$4 sm:$0xff]  }
 0x505   :  { %v21547_v20 = vld [vmem:[#allocation6 + $0x5a4] ss:$20 sps:$4 sm:$0xff]   ;;  %v21545_v21 = vld [vmem:[#allocation6 + $0x5a0] ss:$20 sps:$4 sm:$0xff]  }
 0x506   :  { %13594 = vmatpush1.bf16.msra.mxu1 %v21497_v26  ;;  %13965 = vmatpush1.bf16.msra.mxu0 %v21500_v30  ;;  %v21550_v23 = vld [vmem:[#allocation6 + $0x1ec] ss:$20 sps:$4 sm:$0xff]   ;;  %v1277_v26 = vld [vmem:[#allocation4 + $0x10] sm:$0x7]  ;;  %v21556_v30 = vld [vmem:[#allocation6 + $0x214] ss:$20 sps:$4 sm:$0xff]  }
 0x507   :  { %13595 = vmatprep.subr.bf16.mxu1 %v21505_v34  ;;  %13966 = vmatprep.subr.bf16.mxu0 %v21508_v39  ;;  %v21553_v28 = vld [vmem:[#allocation6 + $0x5cc] ss:$20 sps:$4 sm:$0xff]   ;;  %v21551_v34 = vld [vmem:[#allocation6 + $0x5c8] ss:$20 sps:$4 sm:$0xff]   ;;  %v1356_v39 = vrot.slane %v1277_v26, %v23352_v52  ;;  %v21595_v26 = vld [vmem:[#allocation6 + $0x6e4] ss:$20 sps:$4 sm:$0xff]  }
 0x508   :  { %v19116_v17 = vpop.f32.mrb[16].mxu1 }
 0x509   :  { %v19117_v63 = vpop.f32.mrb[17].mxu1 }
 0x50a   :  { %13596 = vmatpush1.bf16.msra.mxu1 %v21503_v48  ;;  %13967 = vmatpush1.bf16.msra.mxu0 %v21506_v54  ;;  %v23483_v1 = vadd.f32 %v19117_v63, %v19116_v17  ;;  %v19119_v2 = vpop.f32.mrb[18].mxu1  ;;  %v21554_v48 = vld [vmem:[#allocation6 + $0x210] ss:$20 sps:$4 sm:$0xff]   ;;  %v21559_v54 = vld [vmem:[#allocation6 + $0x5f4] ss:$20 sps:$4 sm:$0xff]  }
 0x50b   :  { %13597 = vmatprep.subr.bf16.mxu1 %v21511_v57  ;;  %13968 = vmatprep.subr.bf16.mxu0 %v21514_v58  ;;  %v19120_v6 = vpop.f32.mrb[19].mxu1  ;;  %v21557_v58 = vld [vmem:[#allocation6 + $0x5f0] ss:$20 sps:$4 sm:$0xff]  }
 0x50c   :  { %v23485_v7 = vadd.f32 %v19120_v6, %v19119_v2  ;;  %v8335_v17 = vadd.f32 %v23483_v1, %v1356_v39  ;;  %v21565_v6 = vld [vmem:[#allocation6 + $0x61c] ss:$20 sps:$4 sm:$0xff]   ;;  %v21566_v1 = vld [vmem:[#allocation6 + $0x260] ss:$20 sps:$4 sm:$0xff]  }
 0x50e   :  { %13598 = vmatpush1.bf16.msra.mxu1 %v21509_v60  ;;  %13969 = vmatpush1.bf16.msra.mxu0 %v21512_v61  ;;  %v21562_v60 = vld [vmem:[#allocation6 + $0x23c] ss:$20 sps:$4 sm:$0xff]  }
 0x50f   :  { %13599 = vmatprep.subr.bf16.mxu1 %v21517_v4  ;;  %13970 = vmatprep.subr.bf16.mxu0 %v21520_v5  ;;  %v21560_v5 = vld [vmem:[#allocation6 + $0x238] ss:$20 sps:$4 sm:$0xff]  }
 0x512   :  { %13600 = vmatpush1.bf16.msra.mxu1 %v21515_v24  ;;  %13971 = vmatpush1.bf16.msra.mxu0 %v21518_v0  ;;  %v8338_v24 = vadd.f32 %v23485_v7, %v1356_v39  ;;  %v21577_v7 = vld [vmem:[#allocation6 + $0x66c] ss:$20 sps:$4 sm:$0xff]   ;;  %v21599_v39 = vld [vmem:[#allocation6 + $0x708] ss:$20 sps:$4 sm:$0xff]  }
 0x513   :  { %13612 = vmatprep.subr.bf16.mxu1 %v21523_v8  ;;  %13972 = vmatprep.subr.bf16.mxu0 %v21526_v41  ;;  %v21563_v41 = vld [vmem:[#allocation6 + $0x618] ss:$20 sps:$4 sm:$0xff]  }
 0x515   :  { %13602 = vmatmul.mubr.bf16.vlgmr.msra.gmra.mrb[32].mxu1 %v23370_v29 }
 0x516   :  { %13613 = vmatpush1.bf16.msra.mxu1 %v21521_v10  ;;  %13644 = vmatprep.mubr.bf16.mxu1 %v23409_v47  ;;  %v21568_v10 = vld [vmem:[#allocation6 + $0x264] ss:$20 sps:$4 sm:$0xff]  }
 0x517   :  { %13973 = vmatpush1.bf16.msra.mxu0 %v21524_v11  ;;  %13614 = vmatprep.subr.bf16.mxu1 %v21529_v12  ;;  %v21571_v12 = vld [vmem:[#allocation6 + $0x644] ss:$20 sps:$4 sm:$0xff]  }
 0x518   :  { %13974 = vmatprep.subr.bf16.mxu0 %v21532_v13  ;;  %v21569_v13 = vld [vmem:[#allocation6 + $0x640] ss:$20 sps:$4 sm:$0xff]  }
 0x51a   :  { %13615 = vmatpush1.bf16.msra.mxu1 %v21527_v14  ;;  %v21574_v14 = vld [vmem:[#allocation6 + $0x28c] ss:$20 sps:$4 sm:$0xff]  }
 0x51b   :  { %13975 = vmatpush1.bf16.msra.mxu0 %v21530_v43  ;;  %13616 = vmatprep.subr.bf16.mxu1 %v21535_v44  ;;  %v21572_v43 = vld [vmem:[#allocation6 + $0x288] ss:$20 sps:$4 sm:$0xff]  }
 0x51c   :  { %13976 = vmatprep.subr.bf16.mxu0 %v21538_v15  ;;  %v21580_v44 = vld [vmem:[#allocation6 + $0x2b4] ss:$20 sps:$4 sm:$0xff]   ;;  %v21578_v15 = vld [vmem:[#allocation6 + $0x2b0] ss:$20 sps:$4 sm:$0xff]  }
 0x51e   :  { %13617 = vmatpush1.bf16.msra.mxu1 %v21533_v45  ;;  %v21575_v45 = vld [vmem:[#allocation6 + $0x668] ss:$20 sps:$4 sm:$0xff]  }
 0x51f   :  { %13977 = vmatpush1.bf16.msra.mxu0 %v21536_v16  ;;  %13618 = vmatprep.subr.bf16.mxu1 %v21541_v18  ;;  %v21583_v16 = vld [vmem:[#allocation6 + $0x694] ss:$20 sps:$4 sm:$0xff]   ;;  %v21581_v18 = vld [vmem:[#allocation6 + $0x690] ss:$20 sps:$4 sm:$0xff]  }
 0x520   :  { %13978 = vmatprep.subr.bf16.mxu0 %v21544_v19  ;;  %v21584_v19 = vld [vmem:[#allocation6 + $0x2d8] ss:$20 sps:$4 sm:$0xff]  }
 0x522   :  { %13619 = vmatpush1.bf16.msra.mxu1 %v21539_v50  ;;  %v21586_v50 = vld [vmem:[#allocation6 + $0x2dc] ss:$20 sps:$4 sm:$0xff]  }
 0x523   :  { %13979 = vmatpush1.bf16.msra.mxu0 %v21542_v9  ;;  %13620 = vmatprep.subr.bf16.mxu1 %v21547_v20  ;;  %v21589_v9 = vld [vmem:[#allocation6 + $0x6bc] ss:$20 sps:$4 sm:$0xff]   ;;  %v21587_v20 = vld [vmem:[#allocation6 + $0x6b8] ss:$20 sps:$4 sm:$0xff]  }
 0x524   :  { %13980 = vmatprep.subr.bf16.mxu0 %v21550_v23  ;;  %v21590_v23 = vld [vmem:[#allocation6 + $0x300] ss:$20 sps:$4 sm:$0xff]  }
 0x526   :  { %13621 = vmatpush1.bf16.msra.mxu1 %v21545_v21  ;;  %v21592_v21 = vld [vmem:[#allocation6 + $0x304] ss:$20 sps:$4 sm:$0xff]  }
 0x527   :  { %13981 = vmatpush1.bf16.msra.mxu0 %v21548_v27  ;;  %13622 = vmatprep.subr.bf16.mxu1 %v21553_v28  ;;  %v21593_v27 = vld [vmem:[#allocation6 + $0x6e0] ss:$20 sps:$4 sm:$0xff]  }
 0x528   :  { %v19138_v57 = vpop.f32.mrb[20].mxu1  ;;  %13982 = vmatprep.subr.bf16.mxu0 %v21556_v30  ;;  %v21598_v28 = vld [vmem:[#allocation6 + $0x32c] ss:$20 sps:$4 sm:$0xff]   ;;  %v21596_v30 = vld [vmem:[#allocation6 + $0x328] ss:$20 sps:$4 sm:$0xff]  }
 0x529   :  { %v19139_v61 = vpop.f32.mrb[21].mxu1 }
 0x52a   :  { %v19140_v63 = vadd.f32 %v19139_v61, %v19138_v57  ;;  %v19141_v2 = vpop.f32.mrb[22].mxu1  ;;  %13623 = vmatpush1.bf16.msra.mxu1 %v21551_v34  ;;  %v21601_v34 = vld [vmem:[#allocation6 + $0x70c] ss:$20 sps:$4 sm:$0xff]   ;;  %v21607_v57 = vld [vmem:[#allocation6 + $0x734] ss:$20 sps:$4 sm:$0xff]  }
 0x52b   :  { %13983 = vmatpush1.bf16.msra.mxu0 %v21554_v48  ;;  %v19142_v4 = vpop.f32.mrb[23].mxu1  ;;  %13624 = vmatprep.subr.bf16.mxu1 %v21559_v54  ;;  %v21604_v48 = vld [vmem:[#allocation6 + $0x354] ss:$20 sps:$4 sm:$0xff]   ;;  %v21602_v54 = vld [vmem:[#allocation6 + $0x350] ss:$20 sps:$4 sm:$0xff]  }
 0x52c   :  { %v23492_v0 = vadd.f32 %v19140_v63, %v8335_v17  ;;  %v19143_v8 = vadd.f32 %v19142_v4, %v19141_v2  ;;  %13984 = vmatprep.subr.bf16.mxu0 %v21562_v60  ;;  %v21605_v61 = vld [vmem:[#allocation6 + $0x730] ss:$20 sps:$4 sm:$0xff]  }
 0x52e   :  { %v23494_v11 = vadd.f32 %v19143_v8, %v8338_v24  ;;  %13625 = vmatpush1.bf16.msra.mxu1 %v21557_v58  ;;  %v21610_v58 = vld [vmem:[#allocation6 + $0x37c] ss:$20 sps:$4 sm:$0xff]   ;;  %v21611_v8 = vld [vmem:[#allocation6 + $0x758] ss:$20 sps:$4 sm:$0xff]  }
 0x52f   :  { %13985 = vmatpush1.bf16.msra.mxu0 %v21560_v5  ;;  %13626 = vmatprep.subr.bf16.mxu1 %v21565_v6  ;;  %v21608_v5 = vld [vmem:[#allocation6 + $0x378] ss:$20 sps:$4 sm:$0xff]   ;;  %v21613_v6 = vld [vmem:[#allocation6 + $0x75c] ss:$20 sps:$4 sm:$0xff]  }
 0x530   :  { %13986 = vmatprep.subr.bf16.mxu0 %v21568_v10 }
 0x532   :  { %13627 = vmatpush1.bf16.msra.mxu1 %v21563_v41  ;;  %v21616_v41 = vld [vmem:[#allocation6 + $0x3a4] ss:$20 sps:$4 sm:$0xff]  }
 0x533   :  { %13987 = vmatpush1.bf16.msra.mxu0 %v21566_v1  ;;  %13628 = vmatprep.subr.bf16.mxu1 %v21571_v12  ;;  %v21614_v12 = vld [vmem:[#allocation6 + $0x3a0] ss:$20 sps:$4 sm:$0xff]  }
 0x534   :  { %13999 = vmatprep.subr.bf16.mxu0 %v21574_v14  ;;  %v21617_v14 = vld [vmem:[#allocation6 + $0x780] ss:$20 sps:$4 sm:$0xff]  }
 0x536   :  { %13989 = vmatmul.mubr.bf16.vlgmr.msra.gmra.mrb[20].mxu0 %v23368_v25  ;;  %13629 = vmatpush1.bf16.msra.mxu1 %v21569_v13  ;;  %v21619_v13 = vld [vmem:[#allocation6 + $0x784] ss:$20 sps:$4 sm:$0xff]  }
 0x537   :  { %14000 = vmatpush1.bf16.msra.mxu0 %v21572_v43  ;;  %14031 = vmatprep.mubr.bf16.mxu0 %v23374_v38  ;;  %v21622_v43 = vld [vmem:[#allocation6 + $0x3cc] ss:$20 sps:$4 sm:$0xff]  }
 0x538   :  { %13630 = vmatprep.subr.bf16.mxu1 %v21577_v7  ;;  %14001 = vmatprep.subr.bf16.mxu0 %v21580_v44  ;;  %v21620_v7 = vld [vmem:[#allocation6 + $0x3c8] ss:$20 sps:$4 sm:$0xff]   ;;  %v21625_v44 = vld [vmem:[#allocation6 + $0x7ac] ss:$20 sps:$4 sm:$0xff]  }
 0x53a   :  { %13631 = vmatpush1.bf16.msra.mxu1 %v21575_v45  ;;  %v21623_v45 = vld [vmem:[#allocation6 + $0x7a8] ss:$20 sps:$4 sm:$0xff]  }
 0x53b   :  { %14002 = vmatpush1.bf16.msra.mxu0 %v21578_v15  ;;  %13632 = vmatprep.subr.bf16.mxu1 %v21583_v16  ;;  %v21628_v15 = vld [vmem:[#allocation6 + $0x3f4] ss:$20 sps:$4 sm:$0xff]   ;;  %v21629_v16 = vld [vmem:[#allocation6 + $0x7d0] ss:$20 sps:$4 sm:$0xff]  }
 0x53c   :  { %14003 = vmatprep.subr.bf16.mxu0 %v21586_v50  ;;  %v21632_v50 = vld [vmem:[#allocation6 + $0x418] ss:$20 sps:$4 sm:$0xff]  }
 0x53e   :  { %13633 = vmatpush1.bf16.msra.mxu1 %v21581_v18  ;;  %v21634_v18 = vld [vmem:[#allocation6 + $0x41c] ss:$20 sps:$4 sm:$0xff]  }
 0x53f   :  { %14004 = vmatpush1.bf16.msra.mxu0 %v21584_v19  ;;  %13634 = vmatprep.subr.bf16.mxu1 %v21589_v9  ;;  %v21637_v19 = vld [vmem:[#allocation6 + $0x7fc] ss:$20 sps:$4 sm:$0xff]   ;;  %v21640_v9 = vld [vmem:[#allocation6 + $0x444] ss:$20 sps:$4 sm:$0xff]  }
 0x540   :  { %14005 = vmatprep.subr.bf16.mxu0 %v21592_v21  ;;  %v21638_v21 = vld [vmem:[#allocation6 + $0x440] ss:$20 sps:$4 sm:$0xff]  }
 0x542   :  { %13635 = vmatpush1.bf16.msra.mxu1 %v21587_v20  ;;  %v21635_v20 = vld [vmem:[#allocation6 + $0x7f8] ss:$20 sps:$4 sm:$0xff]  }
 0x543   :  { %14006 = vmatpush1.bf16.msra.mxu0 %v21590_v23  ;;  %13636 = vmatprep.subr.bf16.mxu1 %v21595_v26  ;;  %v21643_v23 = vld [vmem:[#allocation6 + $0x824] ss:$20 sps:$4 sm:$0xff]   ;;  %v21641_v26 = vld [vmem:[#allocation6 + $0x820] ss:$20 sps:$4 sm:$0xff]  }
 0x544   :  { %14007 = vmatprep.subr.bf16.mxu0 %v21598_v28  ;;  %v21644_v28 = vld [vmem:[#allocation6 + $0x468] ss:$20 sps:$4 sm:$0xff]  }
 0x546   :  { %13637 = vmatpush1.bf16.msra.mxu1 %v21593_v27  ;;  %v21646_v27 = vld [vmem:[#allocation6 + $0x46c] ss:$20 sps:$4 sm:$0xff]  }
 0x547   :  { %14008 = vmatpush1.bf16.msra.mxu0 %v21596_v30  ;;  %13638 = vmatprep.subr.bf16.mxu1 %v21601_v34  ;;  %v21649_v30 = vld [vmem:[#allocation6 + $0x84c] ss:$20 sps:$4 sm:$0xff]   ;;  %v21647_v34 = vld [vmem:[#allocation6 + $0x848] ss:$20 sps:$4 sm:$0xff]  }
 0x548   :  { %v19160_v60 = vpop.f32.mrb[24].mxu1  ;;  %14009 = vmatprep.subr.bf16.mxu0 %v21604_v48  ;;  %v21650_v48 = vld [vmem:[#allocation6 + $0x490] ss:$20 sps:$4 sm:$0xff]  }
 0x549   :  { %v19161_v17 = vpop.f32.mrb[25].mxu1 }
 0x54a   :  { %v19162_v63 = vadd.f32 %v19161_v17, %v19160_v60  ;;  %v19163_v2 = vpop.f32.mrb[26].mxu1  ;;  %13639 = vmatpush1.bf16.msra.mxu1 %v21599_v39  ;;  %v21652_v39 = vld [vmem:[#allocation6 + $0x494] ss:$20 sps:$4 sm:$0xff]   ;;  %v21653_v60 = vld [vmem:[#allocation6 + $0x870] ss:$20 sps:$4 sm:$0xff]  }
 0x54b   :  { %14010 = vmatpush1.bf16.msra.mxu0 %v21602_v54  ;;  %v19164_v4 = vpop.f32.mrb[27].mxu1  ;;  %13640 = vmatprep.subr.bf16.mxu1 %v21607_v57  ;;  %v21655_v54 = vld [vmem:[#allocation6 + $0x874] ss:$20 sps:$4 sm:$0xff]   ;;  %v21658_v57 = vld [vmem:[#allocation6 + $0x4bc] ss:$20 sps:$4 sm:$0xff]  }
 0x54c   :  { %v19165_v24 = vadd.f32 %v19164_v4, %v19163_v2  ;;  %14011 = vmatprep.subr.bf16.mxu0 %v21610_v58  ;;  %v8417_v10 = vadd.f32 %v19162_v63, %v23492_v0  ;;  %v21626_v0 = vld [vmem:[#allocation6 + $0x3f0] ss:$20 sps:$4 sm:$0xff]  }
 0x54e   :  { %13641 = vmatpush1.bf16.msra.mxu1 %v21605_v61  ;;  %v23500_v1 = vadd.f32 %v19165_v24, %v23494_v11  ;;  %v21631_v11 = vld [vmem:[#allocation6 + $0x7d4] ss:$20 sps:$4 sm:$0xff]  }
 0x54f   :  { %14012 = vmatpush1.bf16.msra.mxu0 %v21608_v5  ;;  %13642 = vmatprep.subr.bf16.mxu1 %v21613_v6  ;;  %v21656_v5 = vld [vmem:[#allocation6 + $0x4b8] ss:$20 sps:$4 sm:$0xff]   ;;  %v21661_v6 = vld [vmem:[#allocation6 + $0x89c] ss:$20 sps:$4 sm:$0xff]  }
 0x550   :  { %14013 = vmatprep.subr.bf16.mxu0 %v21616_v41  ;;  %v21664_v41 = vld [vmem:[#allocation6 + $0x4e4] ss:$20 sps:$4 sm:$0xff]  }
 0x552   :  { %13643 = vmatpush1.bf16.msra.mxu1 %v21611_v8  ;;  %v21659_v8 = vld [vmem:[#allocation6 + $0x898] ss:$20 sps:$4 sm:$0xff]  }
 0x553   :  { %14014 = vmatpush1.bf16.msra.mxu0 %v21614_v12  ;;  %13655 = vmatprep.subr.bf16.mxu1 %v21619_v13  ;;  %v21667_v13 = vld [vmem:[#allocation6 + $0x8c4] ss:$20 sps:$4 sm:$0xff]  }
 0x554   :  { %14015 = vmatprep.subr.bf16.mxu0 %v21622_v43  ;;  %v21665_v43 = vld [vmem:[#allocation6 + $0x8c0] ss:$20 sps:$4 sm:$0xff]  }
 0x555   :  { %13645 = vmatmul.mubr.bf16.vlgmr.msra.gmra.mrb[32].mxu1 %v23405_v31 }
 0x556   :  { %13656 = vmatpush1.bf16.msra.mxu1 %v21617_v14  ;;  %13687 = vmatprep.mubr.bf16.mxu1 %v23411_v53  ;;  %v21670_v14 = vld [vmem:[#allocation6 + $0x50c] ss:$20 sps:$4 sm:$0xff]  }
 0x557   :  { %14016 = vmatpush1.bf16.msra.mxu0 %v21620_v7  ;;  %13657 = vmatprep.subr.bf16.mxu1 %v21625_v44  ;;  %v21673_v7 = vld [vmem:[#allocation6 + $0x8ec] ss:$20 sps:$4 sm:$0xff]   ;;  %v21676_v44 = vld [vmem:[#allocation6 + $0x534] ss:$20 sps:$4 sm:$0xff]  }
 0x558   :  { %14017 = vmatprep.subr.bf16.mxu0 %v21628_v15 }
 0x55a   :  { %13658 = vmatpush1.bf16.msra.mxu1 %v21623_v45  ;;  %v21671_v45 = vld [vmem:[#allocation6 + $0x8e8] ss:$20 sps:$4 sm:$0xff]  }
 0x55b   :  { %14018 = vmatpush1.bf16.msra.mxu0 %v21626_v0  ;;  %13659 = vmatprep.subr.bf16.mxu1 %v21631_v11  ;;  %v21674_v0 = vld [vmem:[#allocation6 + $0x530] ss:$20 sps:$4 sm:$0xff]   ;;  %v21679_v11 = vld [vmem:[#allocation6 + $0x914] ss:$20 sps:$4 sm:$0xff]  }
 0x55c   :  { %14019 = vmatprep.subr.bf16.mxu0 %v21634_v18  ;;  %v21677_v18 = vld [vmem:[#allocation6 + $0x910] ss:$20 sps:$4 sm:$0xff]  }
 0x55e   :  { %13660 = vmatpush1.bf16.msra.mxu1 %v21629_v16 }
 0x55f   :  { %14020 = vmatpush1.bf16.msra.mxu0 %v21632_v50  ;;  %13661 = vmatprep.subr.bf16.mxu1 %v21637_v19  ;;  %v21682_v50 = vld [vmem:[#allocation6 + $0x55c] ss:$20 sps:$4 sm:$0xff]  }
 0x560   :  { %14021 = vmatprep.subr.bf16.mxu0 %v21640_v9 }
 0x562   :  { %13662 = vmatpush1.bf16.msra.mxu1 %v21635_v20  ;;  %v21680_v20 = vld [vmem:[#allocation6 + $0x558] ss:$20 sps:$4 sm:$0xff]  }
 0x563   :  { %14022 = vmatpush1.bf16.msra.mxu0 %v21638_v21  ;;  %13663 = vmatprep.subr.bf16.mxu1 %v21643_v23  ;;  %v21685_v21 = vld [vmem:[#allocation6 + $0x93c] ss:$20 sps:$4 sm:$0xff]  }
 0x564   :  { %14023 = vmatprep.subr.bf16.mxu0 %v21646_v27  ;;  %v21683_v27 = vld [vmem:[#allocation6 + $0x938] ss:$20 sps:$4 sm:$0xff]  }
 0x566   :  { %13664 = vmatpush1.bf16.msra.mxu1 %v21641_v26 }
 0x567   :  { %14024 = vmatpush1.bf16.msra.mxu0 %v21644_v28  ;;  %13665 = vmatprep.subr.bf16.mxu1 %v21649_v30  ;;  %v21688_v28 = vld [vmem:[#allocation6 + $0x584] ss:$20 sps:$4 sm:$0xff]  }
 0x568   :  { %v8457_v58 = vpop.f32.mrb[28].mxu1  ;;  %14025 = vmatprep.subr.bf16.mxu0 %v21652_v39  ;;  %v21691_v39 = vld [vmem:[#allocation6 + $0x964] ss:$20 sps:$4 sm:$0xff]  }
 0x569   :  { %v8458_v61 = vadd.f32 %v8457_v58, %v8417_v10  ;;  %v19506_v17 = vpop.f32.mrb[29].mxu1  ;;  %v21662_v10 = vld [vmem:[#allocation6 + $0x4e0] ss:$20 sps:$4 sm:$0xff]  }
 0x56a   :  { %v8460_v63 = vpop.f32.mrb[30].mxu1  ;;  %13666 = vmatpush1.bf16.msra.mxu1 %v21647_v34  ;;  %v21686_v34 = vld [vmem:[#allocation6 + $0x580] ss:$20 sps:$4 sm:$0xff]   ;;  %v21698_v17 = vld [vmem:[#allocation6 + $0x5d0] ss:$20 sps:$4 sm:$0xff]  }
 0x56b   :  { %v8482_v2 = vmul.f32 0.5, %v8458_v61  ;;  %v8461_v4 = vadd.f32 %v8460_v63, %v23500_v1  ;;  %14026 = vmatpush1.bf16.msra.mxu0 %v21650_v48  ;;  %13667 = vmatprep.subr.bf16.mxu1 %v21655_v54  ;;  %v19507_v24 = vpop.f32.mrb[31].mxu1  ;;  %v21668_v1 = vld [vmem:[#allocation6 + $0x508] ss:$20 sps:$4 sm:$0xff]   ;;  %v21689_v48 = vld [vmem:[#allocation6 + $0x960] ss:$20 sps:$4 sm:$0xff]  }
 0x56c   :  { %14027 = vmatprep.subr.bf16.mxu0 %v21658_v57  ;;  %v21694_v54 = vld [vmem:[#allocation6 + $0x5ac] ss:$20 sps:$4 sm:$0xff]   ;;  %v21692_v57 = vld [vmem:[#allocation6 + $0x5a8] ss:$20 sps:$4 sm:$0xff]   ;;  %v21712_v24 = vld [vmem:[#allocation6 + $0x624] ss:$20 sps:$4 sm:$0xff]  }
 0x56d   :  { %22849 = vtanh.f32 %v8482_v2  ;;  %v8501_v12 = vmul.f32 0.5, %v8461_v4  ;;  %v21697_v58 = vld [vmem:[#allocation6 + $0x98c] ss:$20 sps:$4 sm:$0xff]   ;;  %v21695_v61 = vld [vmem:[#allocation6 + $0x988] ss:$20 sps:$4 sm:$0xff]  }
 0x56e   :  { %13668 = vmatpush1.bf16.msra.mxu1 %v21653_v60  ;;  %v21700_v60 = vld [vmem:[#allocation6 + $0x5d4] ss:$20 sps:$4 sm:$0xff]   ;;  %v21706_v2 = vld [vmem:[#allocation6 + $0x5fc] ss:$20 sps:$4 sm:$0xff]  }
 0x56f   :  { %22851 = vtanh.f32 %v8501_v12  ;;  %14028 = vmatpush1.bf16.msra.mxu0 %v21656_v5  ;;  %13669 = vmatprep.subr.bf16.mxu1 %v21661_v6  ;;  %v21703_v63 = vld [vmem:[#allocation6 + $0x9b4] ss:$20 sps:$4 sm:$0xff]   ;;  %v21701_v4 = vld [vmem:[#allocation6 + $0x9b0] ss:$20 sps:$4 sm:$0xff]   ;;  %v21704_v5 = vld [vmem:[#allocation6 + $0x5f8] ss:$20 sps:$4 sm:$0xff]  }
 0x570   :  { %14029 = vmatprep.subr.bf16.mxu0 %v21664_v41  ;;  %v21709_v6 = vld [vmem:[#allocation6 + $0x9dc] ss:$20 sps:$4 sm:$0xff]   ;;  %v21710_v41 = vld [vmem:[#allocation6 + $0x620] ss:$20 sps:$4 sm:$0xff]   ;;  %v21715_v12 = vld [vmem:[#allocation6 + $0xa04] ss:$20 sps:$4 sm:$0xff]  }
 0x572   :  { %13670 = vmatpush1.bf16.msra.mxu1 %v21659_v8  ;;  %v21707_v8 = vld [vmem:[#allocation6 + $0x9d8] ss:$20 sps:$4 sm:$0xff]  }
 0x573   :  { %14030 = vmatpush1.bf16.msra.mxu0 %v21662_v10  ;;  %13671 = vmatprep.subr.bf16.mxu1 %v21667_v13  ;;  %v21718_v10 = vld [vmem:[#allocation6 + $0x64c] ss:$20 sps:$4 sm:$0xff]  }
 0x574   :  { %14042 = vmatprep.subr.bf16.mxu0 %v21670_v14  ;;  %v21713_v13 = vld [vmem:[#allocation6 + $0xa00] ss:$20 sps:$4 sm:$0xff]   ;;  %v21716_v14 = vld [vmem:[#allocation6 + $0x648] ss:$20 sps:$4 sm:$0xff]  }
 0x576   :  { %14032 = vmatmul.mubr.bf16.vlgmr.msra.gmra.mrb[20].mxu0 %v23370_v29  ;;  %13672 = vmatpush1.bf16.msra.mxu1 %v21665_v43  ;;  %v21721_v43 = vld [vmem:[#allocation6 + $0xa2c] ss:$20 sps:$4 sm:$0xff]  }
 0x577   :  { %v22850_v15 = vpop.eup %22849  ;;  %14043 = vmatpush1.bf16.msra.mxu0 %v21668_v1  ;;  %14074 = vmatprep.mubr.bf16.mxu0 %v23409_v47  ;;  %v21724_v1 = vld [vmem:[#allocation6 + $0x674] ss:$20 sps:$4 sm:$0xff]  }
 0x578   :  { %v8558_v16 = vmul.f32 0.5, %v22850_v15  ;;  %13673 = vmatprep.subr.bf16.mxu1 %v21673_v7  ;;  %14044 = vmatprep.subr.bf16.mxu0 %v21676_v44  ;;  %v21719_v7 = vld [vmem:[#allocation6 + $0xa28] ss:$20 sps:$4 sm:$0xff]   ;;  %v21722_v44 = vld [vmem:[#allocation6 + $0x670] ss:$20 sps:$4 sm:$0xff]  }
 0x579   :  { %v22852_v19 = vpop.eup %22851  ;;  %v21730_v15 = vld [vmem:[#allocation6 + $0x69c] ss:$20 sps:$4 sm:$0xff]  }
 0x57a   :  { %v8577_v9 = vmul.f32 0.5, %v22852_v19  ;;  %13674 = vmatpush1.bf16.msra.mxu1 %v21671_v45  ;;  %v8596_v23 = vadd.f32 0.5, %v8558_v16  ;;  %v21727_v45 = vld [vmem:[#allocation6 + $0xa54] ss:$20 sps:$4 sm:$0xff]   ;;  %v21733_v16 = vld [vmem:[#allocation6 + $0xa7c] ss:$20 sps:$4 sm:$0xff]  }
 0x57b   :  { %14045 = vmatpush1.bf16.msra.mxu0 %v21674_v0  ;;  %13675 = vmatprep.subr.bf16.mxu1 %v21679_v11  ;;  %v21725_v0 = vld [vmem:[#allocation6 + $0xa50] ss:$20 sps:$4 sm:$0xff]   ;;  %v21728_v11 = vld [vmem:[#allocation6 + $0x698] ss:$20 sps:$4 sm:$0xff]   ;;  %v21734_v19 = vld [vmem:[#allocation6 + $0x6c0] ss:$20 sps:$4 sm:$0xff]  }
 0x57c   :  { %v8615_v26 = vadd.f32 0.5, %v8577_v9  ;;  %14046 = vmatprep.subr.bf16.mxu0 %v21682_v50  ;;  %v21731_v50 = vld [vmem:[#allocation6 + $0xa78] ss:$20 sps:$4 sm:$0xff]  }
 0x57d   :  { %v21739_v9 = vld [vmem:[#allocation6 + $0xaa4] ss:$20 sps:$4 sm:$0xff]  }
 0x57e   :  { %v23507_v30 = vpack.c.bf16 %v8615_v26, %v8596_v23  ;;  %13676 = vmatpush1.bf16.msra.mxu1 %v21677_v18  ;;  %v21736_v18 = vld [vmem:[#allocation6 + $0x6c4] ss:$20 sps:$4 sm:$0xff]   ;;  %v21740_v23 = vld [vmem:[#allocation6 + $0x6e8] ss:$20 sps:$4 sm:$0xff]   ;;  %v21745_v26 = vld [vmem:[#allocation6 + $0xacc] ss:$20 sps:$4 sm:$0xff]  }
 0x57f   :  { %14047 = vmatpush1.bf16.msra.mxu0 %v21680_v20  ;;  %13677 = vmatprep.subr.bf16.mxu1 %v21685_v21  ;;  %v21742_v20 = vld [vmem:[#allocation6 + $0x6ec] ss:$20 sps:$4 sm:$0xff]  }
 0x580   :  { %14048 = vmatprep.subr.bf16.mxu0 %v21688_v28  ;;  %v21737_v21 = vld [vmem:[#allocation6 + $0xaa0] ss:$20 sps:$4 sm:$0xff]   ;;  %v21743_v28 = vld [vmem:[#allocation6 + $0xac8] ss:$20 sps:$4 sm:$0xff]  }
 0x582   :  { %13678 = vmatpush1.bf16.msra.mxu1 %v21683_v27  ;;  %v21748_v27 = vld [vmem:[#allocation6 + $0x714] ss:$20 sps:$4 sm:$0xff]  }
 0x583   :  { %14049 = vmatpush1.bf16.msra.mxu0 %v21686_v34  ;;  %13679 = vmatprep.subr.bf16.mxu1 %v21691_v39  ;;  %v21746_v34 = vld [vmem:[#allocation6 + $0x710] ss:$20 sps:$4 sm:$0xff]   ;;  %v21751_v39 = vld [vmem:[#allocation6 + $0xaf4] ss:$20 sps:$4 sm:$0xff]  }
 0x584   :  { %14050 = vmatprep.subr.bf16.mxu0 %v21694_v54  ;;  %v21749_v54 = vld [vmem:[#allocation6 + $0xaf0] ss:$20 sps:$4 sm:$0xff]  }
 0x586   :  { %13680 = vmatpush1.bf16.msra.mxu1 %v21689_v48  ;;  %v21754_v48 = vld [vmem:[#allocation6 + $0x73c] ss:$20 sps:$4 sm:$0xff]  }
 0x587   :  { %14051 = vmatpush1.bf16.msra.mxu0 %v21692_v57  ;;  %13681 = vmatprep.subr.bf16.mxu1 %v21697_v58  ;;  %v21752_v57 = vld [vmem:[#allocation6 + $0x738] ss:$20 sps:$4 sm:$0xff]   ;;  %v21757_v58 = vld [vmem:[#allocation6 + $0xb1c] ss:$20 sps:$4 sm:$0xff]  }
 0x588   :  { %14052 = vmatprep.subr.bf16.mxu0 %v21700_v60  ;;  %v21760_v60 = vld [vmem:[#allocation6 + $0x764] ss:$20 sps:$4 sm:$0xff]  }
 0x58a   :  { %13682 = vmatpush1.bf16.msra.mxu1 %v21695_v61  ;;  %v21755_v61 = vld [vmem:[#allocation6 + $0xb18] ss:$20 sps:$4 sm:$0xff]  }
 0x58b   :  { %14053 = vmatpush1.bf16.msra.mxu0 %v21698_v17  ;;  %13683 = vmatprep.subr.bf16.mxu1 %v21703_v63  ;;  %v21758_v17 = vld [vmem:[#allocation6 + $0x760] ss:$20 sps:$4 sm:$0xff]   ;;  %v21763_v63 = vld [vmem:[#allocation6 + $0xb44] ss:$20 sps:$4 sm:$0xff]  }
 0x58c   :  { %14054 = vmatprep.subr.bf16.mxu0 %v21706_v2  ;;  %v21766_v2 = vld [vmem:[#allocation6 + $0x78c] ss:$20 sps:$4 sm:$0xff]  }
 0x58e   :  { %13684 = vmatpush1.bf16.msra.mxu1 %v21701_v4  ;;  %v21761_v4 = vld [vmem:[#allocation6 + $0xb40] ss:$20 sps:$4 sm:$0xff]  }
 0x58f   :  { %14055 = vmatpush1.bf16.msra.mxu0 %v21704_v5  ;;  %13685 = vmatprep.subr.bf16.mxu1 %v21709_v6  ;;  %v21764_v5 = vld [vmem:[#allocation6 + $0x788] ss:$20 sps:$4 sm:$0xff]   ;;  %v21769_v6 = vld [vmem:[#allocation6 + $0xb6c] ss:$20 sps:$4 sm:$0xff]  }
 0x590   :  { %14056 = vmatprep.subr.bf16.mxu0 %v21712_v24  ;;  %v21772_v24 = vld [vmem:[#allocation6 + $0x7b4] ss:$20 sps:$4 sm:$0xff]  }
 0x592   :  { %13686 = vmatpush1.bf16.msra.mxu1 %v21707_v8  ;;  %v21767_v8 = vld [vmem:[#allocation6 + $0xb68] ss:$20 sps:$4 sm:$0xff]  }
 0x593   :  { %14057 = vmatpush1.bf16.msra.mxu0 %v21710_v41  ;;  %13698 = vmatprep.subr.bf16.mxu1 %v21715_v12  ;;  %v21770_v41 = vld [vmem:[#allocation6 + $0x7b0] ss:$20 sps:$4 sm:$0xff]   ;;  %v21775_v12 = vld [vmem:[#allocation6 + $0xb94] ss:$20 sps:$4 sm:$0xff]  }
 0x594   :  { %14058 = vmatprep.subr.bf16.mxu0 %v21718_v10  ;;  %v21778_v10 = vld [vmem:[#allocation6 + $0x7dc] ss:$20 sps:$4 sm:$0xff]  }
 0x595   :  { %13688 = vmatmul.mubr.bf16.vlgmr.msra.gmra.mrb[32].mxu1 %v23407_v37 }
 0x596   :  { %13699 = vmatpush1.bf16.msra.mxu1 %v21713_v13  ;;  %13730 = vmatprep.mubr.bf16.mxu1 %v23437_v59  ;;  %v21773_v13 = vld [vmem:[#allocation6 + $0xb90] ss:$20 sps:$4 sm:$0xff]  }
 0x597   :  { %14059 = vmatpush1.bf16.msra.mxu0 %v21716_v14  ;;  %13700 = vmatprep.subr.bf16.mxu1 %v21721_v43  ;;  %v21776_v14 = vld [vmem:[#allocation6 + $0x7d8] ss:$20 sps:$4 sm:$0xff]   ;;  %v21781_v43 = vld [vmem:[#allocation6 + $0xbbc] ss:$20 sps:$4 sm:$0xff]  }
 0x598   :  { %14060 = vmatprep.subr.bf16.mxu0 %v21724_v1  ;;  %v21784_v1 = vld [vmem:[#allocation6 + $0x804] ss:$20 sps:$4 sm:$0xff]  }
 0x59a   :  { %13701 = vmatpush1.bf16.msra.mxu1 %v21719_v7  ;;  %v21779_v7 = vld [vmem:[#allocation6 + $0xbb8] ss:$20 sps:$4 sm:$0xff]  }
 0x59b   :  { %14061 = vmatpush1.bf16.msra.mxu0 %v21722_v44  ;;  %13702 = vmatprep.subr.bf16.mxu1 %v21727_v45  ;;  %v21782_v44 = vld [vmem:[#allocation6 + $0x800] ss:$20 sps:$4 sm:$0xff]   ;;  %v21787_v45 = vld [vmem:[#allocation6 + $0xbe4] ss:$20 sps:$4 sm:$0xff]  }
 0x59c   :  { %14062 = vmatprep.subr.bf16.mxu0 %v21730_v15  ;;  %v21790_v15 = vld [vmem:[#allocation6 + $0x82c] ss:$20 sps:$4 sm:$0xff]  }
 0x59e   :  { %13703 = vmatpush1.bf16.msra.mxu1 %v21725_v0  ;;  %v21785_v0 = vld [vmem:[#allocation6 + $0xbe0] ss:$20 sps:$4 sm:$0xff]  }
 0x59f   :  { %14063 = vmatpush1.bf16.msra.mxu0 %v21728_v11  ;;  %13704 = vmatprep.subr.bf16.mxu1 %v21733_v16  ;;  %v21788_v11 = vld [vmem:[#allocation6 + $0x828] ss:$20 sps:$4 sm:$0xff]   ;;  %v21793_v16 = vld [vmem:[#allocation6 + $0xc0c] ss:$20 sps:$4 sm:$0xff]  }
 0x5a0   :  { %14064 = vmatprep.subr.bf16.mxu0 %v21736_v18  ;;  %v21796_v18 = vld [vmem:[#allocation6 + $0x854] ss:$20 sps:$4 sm:$0xff]  }
 0x5a2   :  { %13705 = vmatpush1.bf16.msra.mxu1 %v21731_v50  ;;  %v22903_v50 = vld [vmem:[#allocation4 + $0x10] sm:$0x7] }
 0x5a3   :  { %14065 = vmatpush1.bf16.msra.mxu0 %v21734_v19  ;;  %13706 = vmatprep.subr.bf16.mxu1 %v21739_v9  ;;  %v1348_v19 = vrot.slane %v22903_v50, %v23349_v51  ;;  %v1352_v9 = vrot.slane %v22903_v50, %v23355_v55 }
 0x5a4   :  { %14066 = vmatprep.subr.bf16.mxu0 %v21742_v20  ;;  %v21791_v20 = vld [vmem:[#allocation6 + $0xc08] ss:$20 sps:$4 sm:$0xff]  }
 0x5a6   :  { %13707 = vmatpush1.bf16.msra.mxu1 %v21737_v21  ;;  %v21794_v21 = vld [vmem:[#allocation6 + $0x850] ss:$20 sps:$4 sm:$0xff]  }
 0x5a7   :  { %14067 = vmatpush1.bf16.msra.mxu0 %v21740_v23  ;;  %13708 = vmatprep.subr.bf16.mxu1 %v21745_v26  ;;  %v21799_v23 = vld [vmem:[#allocation6 + $0xc34] ss:$20 sps:$4 sm:$0xff]  }
 0x5a8   :  { %14068 = vmatprep.subr.bf16.mxu0 %v21748_v27  ;;  %v21802_v27 = vld [vmem:[#allocation6 + $0x87c] ss:$20 sps:$4 sm:$0xff]  }
 0x5aa   :  { %13709 = vmatpush1.bf16.msra.mxu1 %v21743_v28 }
 0x5ab   :  { %14069 = vmatpush1.bf16.msra.mxu0 %v21746_v34  ;;  %13710 = vmatprep.subr.bf16.mxu1 %v21751_v39 }
 0x5ac   :  { %14070 = vmatprep.subr.bf16.mxu0 %v21754_v48 }
 0x5ae   :  { %13711 = vmatpush1.bf16.msra.mxu1 %v21749_v54  ;;  %v21797_v54 = vld [vmem:[#allocation6 + $0xc30] ss:$20 sps:$4 sm:$0xff]  }
 0x5af   :  { %14071 = vmatpush1.bf16.msra.mxu0 %v21752_v57  ;;  %13712 = vmatprep.subr.bf16.mxu1 %v21757_v58 }
 0x5b0   :  { %14072 = vmatprep.subr.bf16.mxu0 %v21760_v60 }
 0x5b2   :  { %13713 = vmatpush1.bf16.msra.mxu1 %v21755_v61  ;;  %v21800_v61 = vld [vmem:[#allocation6 + $0x878] ss:$20 sps:$4 sm:$0xff]  }
 0x5b3   :  { %14073 = vmatpush1.bf16.msra.mxu0 %v21758_v17  ;;  %13714 = vmatprep.subr.bf16.mxu1 %v21763_v63  ;;  %v21805_v17 = vld [vmem:[#allocation6 + $0xc5c] ss:$20 sps:$4 sm:$0xff]  }
 0x5b4   :  { %14085 = vmatprep.subr.bf16.mxu0 %v21766_v2 }
 0x5b6   :  { %14075 = vmatmul.mubr.bf16.vlgmr.msra.gmra.mrb[20].mxu0 %v23405_v31  ;;  %13715 = vmatpush1.bf16.msra.mxu1 %v21761_v4  ;;  %v21808_v4 = vld [vmem:[#allocation6 + $0x8a4] ss:$20 sps:$4 sm:$0xff]  }
 0x5b7   :  { %14086 = vmatpush1.bf16.msra.mxu0 %v21764_v5  ;;  %14117 = vmatprep.mubr.bf16.mxu0 %v23411_v53 }
 0x5b8   :  { %13716 = vmatprep.subr.bf16.mxu1 %v21769_v6  ;;  %14087 = vmatprep.subr.bf16.mxu0 %v21772_v24  ;;  %v21803_v24 = vld [vmem:[#allocation6 + $0xc58] ss:$20 sps:$4 sm:$0xff]  }
 0x5ba   :  { %13717 = vmatpush1.bf16.msra.mxu1 %v21767_v8  ;;  %v21806_v8 = vld [vmem:[#allocation6 + $0x8a0] ss:$20 sps:$4 sm:$0xff]  }
 0x5bb   :  { %14088 = vmatpush1.bf16.msra.mxu0 %v21770_v41  ;;  %13718 = vmatprep.subr.bf16.mxu1 %v21775_v12  ;;  %v21811_v41 = vld [vmem:[#allocation6 + $0xc84] ss:$20 sps:$4 sm:$0xff]   ;;  %v21814_v12 = vld [vmem:[#allocation6 + $0x8cc] ss:$20 sps:$4 sm:$0xff]  }
 0x5bc   :  { %14089 = vmatprep.subr.bf16.mxu0 %v21778_v10  ;;  %v21809_v10 = vld [vmem:[#allocation6 + $0xc80] ss:$20 sps:$4 sm:$0xff]  }
 0x5be   :  { %13719 = vmatpush1.bf16.msra.mxu1 %v21773_v13  ;;  %v21812_v13 = vld [vmem:[#allocation6 + $0x8c8] ss:$20 sps:$4 sm:$0xff]  }
 0x5bf   :  { %14090 = vmatpush1.bf16.msra.mxu0 %v21776_v14  ;;  %13720 = vmatprep.subr.bf16.mxu1 %v21781_v43  ;;  %v21817_v14 = vld [vmem:[#allocation6 + $0xcac] ss:$20 sps:$4 sm:$0xff]   ;;  %v21820_v43 = vld [vmem:[#allocation6 + $0x8f4] ss:$20 sps:$4 sm:$0xff]  }
 0x5c0   :  { %14091 = vmatprep.subr.bf16.mxu0 %v21784_v1  ;;  %v21815_v1 = vld [vmem:[#allocation6 + $0xca8] ss:$20 sps:$4 sm:$0xff]  }
 0x5c2   :  { %13721 = vmatpush1.bf16.msra.mxu1 %v21779_v7 }
 0x5c3   :  { %14092 = vmatpush1.bf16.msra.mxu0 %v21782_v44  ;;  %13722 = vmatprep.subr.bf16.mxu1 %v21787_v45  ;;  %v21818_v44 = vld [vmem:[#allocation6 + $0x8f0] ss:$20 sps:$4 sm:$0xff]   ;;  %v21823_v45 = vld [vmem:[#allocation6 + $0xcd4] ss:$20 sps:$4 sm:$0xff]  }
 0x5c4   :  { %14093 = vmatprep.subr.bf16.mxu0 %v21790_v15 }
 0x5c6   :  { %13723 = vmatpush1.bf16.msra.mxu1 %v21785_v0 }
 0x5c7   :  { %14094 = vmatpush1.bf16.msra.mxu0 %v21788_v11  ;;  %13724 = vmatprep.subr.bf16.mxu1 %v21793_v16  ;;  %v21826_v11 = vld [vmem:[#allocation6 + $0x91c] ss:$20 sps:$4 sm:$0xff]  }
 0x5c8   :  { %v8291_v26 = vpop.f32.mrb[16].mxu0  ;;  %14095 = vmatprep.subr.bf16.mxu0 %v21796_v18 }
 0x5c9   :  { %v19600_v28 = vadd.f32 %v8291_v26, %v1348_v19  ;;  %v8293_v34 = vpop.f32.mrb[17].mxu0 }
 0x5ca   :  { %v19601_v39 = vadd.f32 %v8293_v34, %v1352_v9  ;;  %v8295_v48 = vpop.f32.mrb[18].mxu0  ;;  %13725 = vmatpush1.bf16.msra.mxu1 %v21791_v20 }
 0x5cb   :  { %v8480_v57 = vmul.f32 0.5, %v19600_v28  ;;  %v19602_v58 = vadd.f32 %v8295_v48, %v1348_v19  ;;  %14096 = vmatpush1.bf16.msra.mxu0 %v21794_v21  ;;  %v8297_v60 = vpop.f32.mrb[19].mxu0  ;;  %13726 = vmatprep.subr.bf16.mxu1 %v21799_v23  ;;  %v21824_v21 = vld [vmem:[#allocation6 + $0x918] ss:$20 sps:$4 sm:$0xff]   ;;  %v21829_v23 = vld [vmem:[#allocation6 + $0xcfc] ss:$20 sps:$4 sm:$0xff]  }
 0x5cc   :  { %v8481_v63 = vmul.f32 0.5, %v19601_v39  ;;  %v19603_v2 = vadd.f32 %v8297_v60, %v1352_v9  ;;  %14097 = vmatprep.subr.bf16.mxu0 %v21802_v27  ;;  %v21821_v9 = vld [vmem:[#allocation6 + $0xcd0] ss:$20 sps:$4 sm:$0xff]  }
 0x5cd   :  { %22853 = vtanh.f32 %v8480_v57  ;;  %v8499_v5 = vmul.f32 0.5, %v19602_v58  ;;  %v21832_v28 = vld [vmem:[#allocation6 + $0x944] ss:$20 sps:$4 sm:$0xff]   ;;  %v21830_v57 = vld [vmem:[#allocation6 + $0x940] ss:$20 sps:$4 sm:$0xff]  }
 0x5ce   :  { %22855 = vtanh.f32 %v8481_v63  ;;  %v8500_v6 = vmul.f32 0.5, %v19603_v2  ;;  %13727 = vmatpush1.bf16.msra.mxu1 %v21797_v54  ;;  %v21827_v54 = vld [vmem:[#allocation6 + $0xcf8] ss:$20 sps:$4 sm:$0xff]   ;;  %v21836_v63 = vld [vmem:[#allocation6 + $0x968] ss:$20 sps:$4 sm:$0xff]  }
 0x5cf   :  { %22857 = vtanh.f32 %v8499_v5  ;;  %14098 = vmatpush1.bf16.msra.mxu0 %v21800_v61  ;;  %13728 = vmatprep.subr.bf16.mxu1 %v21805_v17  ;;  %v21835_v58 = vld [vmem:[#allocation6 + $0xd24] ss:$20 sps:$4 sm:$0xff]   ;;  %v21838_v61 = vld [vmem:[#allocation6 + $0x96c] ss:$20 sps:$4 sm:$0xff]   ;;  %v21839_v5 = vld [vmem:[#allocation6 + $0xd48] ss:$20 sps:$4 sm:$0xff]  }
 0x5d0   :  { %22859 = vtanh.f32 %v8500_v6  ;;  %14099 = vmatprep.subr.bf16.mxu0 %v21808_v4  ;;  %v21833_v17 = vld [vmem:[#allocation6 + $0xd20] ss:$20 sps:$4 sm:$0xff]   ;;  %v21842_v6 = vld [vmem:[#allocation6 + $0x990] ss:$20 sps:$4 sm:$0xff]  }
 0x5d1   :  { %v21841_v2 = vld [vmem:[#allocation6 + $0xd4c] ss:$20 sps:$4 sm:$0xff]   ;;  %v21844_v4 = vld [vmem:[#allocation6 + $0x994] ss:$20 sps:$4 sm:$0xff]  }
 0x5d2   :  { %13729 = vmatpush1.bf16.msra.mxu1 %v21803_v24  ;;  %v21847_v24 = vld [vmem:[#allocation6 + $0xd74] ss:$20 sps:$4 sm:$0xff]  }
 0x5d3   :  { %14100 = vmatpush1.bf16.msra.mxu0 %v21806_v8  ;;  %13741 = vmatprep.subr.bf16.mxu1 %v21811_v41  ;;  %v21850_v8 = vld [vmem:[#allocation6 + $0x9bc] ss:$20 sps:$4 sm:$0xff]  }
 0x5d4   :  { %14101 = vmatprep.subr.bf16.mxu0 %v21814_v12  ;;  %v21845_v41 = vld [vmem:[#allocation6 + $0xd70] ss:$20 sps:$4 sm:$0xff]   ;;  %v21848_v12 = vld [vmem:[#allocation6 + $0x9b8] ss:$20 sps:$4 sm:$0xff]  }
 0x5d5   :  { %13731 = vmatmul.mubr.bf16.vlgmr.msra.gmra.mrb[32].mxu1 %v23433_v42 }
 0x5d6   :  { %13742 = vmatpush1.bf16.msra.mxu1 %v21809_v10  ;;  %13773 = vmatprep.mubr.bf16.mxu1 %v23439_v62  ;;  %v21853_v10 = vld [vmem:[#allocation6 + $0xd9c] ss:$20 sps:$4 sm:$0xff]  }
 0x5d7   :  { %v22854_v7 = vpop.eup %22853  ;;  %14102 = vmatpush1.bf16.msra.mxu0 %v21812_v13  ;;  %13743 = vmatprep.subr.bf16.mxu1 %v21817_v14  ;;  %v21856_v13 = vld [vmem:[#allocation6 + $0x9e4] ss:$20 sps:$4 sm:$0xff]  }
 0x5d8   :  { %v22856_v15 = vpop.eup %22855  ;;  %v8556_v0 = vmul.f32 0.5, %v22854_v7  ;;  %14103 = vmatprep.subr.bf16.mxu0 %v21820_v43  ;;  %v21851_v14 = vld [vmem:[#allocation6 + $0xd98] ss:$20 sps:$4 sm:$0xff]   ;;  %v21854_v43 = vld [vmem:[#allocation6 + $0x9e0] ss:$20 sps:$4 sm:$0xff]  }
 0x5d9   :  { %v22858_v16 = vpop.eup %22857  ;;  %v8557_v18 = vmul.f32 0.5, %v22856_v15  ;;  %v21862_v7 = vld [vmem:[#allocation6 + $0xa0c] ss:$20 sps:$4 sm:$0xff]  }
 0x5da   :  { %v22860_v50 = vpop.eup %22859  ;;  %v8575_v19 = vmul.f32 0.5, %v22858_v16  ;;  %13744 = vmatpush1.bf16.msra.mxu1 %v21815_v1  ;;  %v8594_v26 = vadd.f32 0.5, %v8556_v0  ;;  %v21859_v1 = vld [vmem:[#allocation6 + $0xdc4] ss:$20 sps:$4 sm:$0xff]   ;;  %v21865_v15 = vld [vmem:[#allocation6 + $0xdec] ss:$20 sps:$4 sm:$0xff]  }
 0x5db   :  { %v8576_v20 = vmul.f32 0.5, %v22860_v50  ;;  %14104 = vmatpush1.bf16.msra.mxu0 %v21818_v44  ;;  %13745 = vmatprep.subr.bf16.mxu1 %v21823_v45  ;;  %v8595_v34 = vadd.f32 0.5, %v8557_v18  ;;  %v21857_v44 = vld [vmem:[#allocation6 + $0xdc0] ss:$20 sps:$4 sm:$0xff]   ;;  %v21860_v45 = vld [vmem:[#allocation6 + $0xa08] ss:$20 sps:$4 sm:$0xff]  }
 0x5dc   :  { %v8613_v27 = vadd.f32 0.5, %v8575_v19  ;;  %14105 = vmatprep.subr.bf16.mxu0 %v21826_v11  ;;  %v21868_v0 = vld [vmem:[#allocation6 + $0xa34] ss:$20 sps:$4 sm:$0xff]   ;;  %v21866_v16 = vld [vmem:[#allocation6 + $0xa30] ss:$20 sps:$4 sm:$0xff]  }
 0x5dd   :  { %v8614_v39 = vadd.f32 0.5, %v8576_v20  ;;  %v21863_v11 = vld [vmem:[#allocation6 + $0xde8] ss:$20 sps:$4 sm:$0xff]   ;;  %v21869_v19 = vld [vmem:[#allocation6 + $0xe10] ss:$20 sps:$4 sm:$0xff]  }
 0x5de   :  { %v23517_v48 = vpack.c.bf16 %v8613_v27, %v8594_v26  ;;  %13746 = vmatpush1.bf16.msra.mxu1 %v21821_v9  ;;  %v21871_v18 = vld [vmem:[#allocation6 + $0xe14] ss:$20 sps:$4 sm:$0xff]   ;;  %v21874_v50 = vld [vmem:[#allocation6 + $0xa5c] ss:$20 sps:$4 sm:$0xff]   ;;  %v21872_v9 = vld [vmem:[#allocation6 + $0xa58] ss:$20 sps:$4 sm:$0xff]  }
 0x5df   :  { %14106 = vmatpush1.bf16.msra.mxu0 %v21824_v21  ;;  %13747 = vmatprep.subr.bf16.mxu1 %v21829_v23  ;;  %v23519_v60 = vpack.c.bf16 %v8614_v39, %v8595_v34  ;;  %v21877_v20 = vld [vmem:[#allocation6 + $0xe3c] ss:$20 sps:$4 sm:$0xff]   ;;  %v21880_v21 = vld [vmem:[#allocation6 + $0xa84] ss:$20 sps:$4 sm:$0xff]   ;;  %v21878_v26 = vld [vmem:[#allocation6 + $0xa80] ss:$20 sps:$4 sm:$0xff]  }
 0x5e0   :  { %14107 = vmatprep.subr.bf16.mxu0 %v21832_v28  ;;  %v21875_v23 = vld [vmem:[#allocation6 + $0xe38] ss:$20 sps:$4 sm:$0xff]   ;;  %v21881_v34 = vld [vmem:[#allocation6 + $0xe60] ss:$20 sps:$4 sm:$0xff]   ;;  %v21884_v39 = vld [vmem:[#allocation6 + $0xaa8] ss:$20 sps:$4 sm:$0xff]  }
 0x5e1   :  { %v21883_v27 = vld [vmem:[#allocation6 + $0xe64] ss:$20 sps:$4 sm:$0xff]   ;;  %v21886_v28 = vld [vmem:[#allocation6 + $0xaac] ss:$20 sps:$4 sm:$0xff]  }
 0x5e2   :  { %13748 = vmatpush1.bf16.msra.mxu1 %v21827_v54  ;;  %v21889_v54 = vld [vmem:[#allocation6 + $0xe8c] ss:$20 sps:$4 sm:$0xff]  }
 0x5e3   :  { %14108 = vmatpush1.bf16.msra.mxu0 %v21830_v57  ;;  %13749 = vmatprep.subr.bf16.mxu1 %v21835_v58  ;;  %v21892_v57 = vld [vmem:[#allocation6 + $0xad4] ss:$20 sps:$4 sm:$0xff]  }
 0x5e4   :  { %14109 = vmatprep.subr.bf16.mxu0 %v21838_v61  ;;  %v21887_v58 = vld [vmem:[#allocation6 + $0xe88] ss:$20 sps:$4 sm:$0xff]   ;;  %v21890_v61 = vld [vmem:[#allocation6 + $0xad0] ss:$20 sps:$4 sm:$0xff]  }
 0x5e6   :  { %13750 = vmatpush1.bf16.msra.mxu1 %v21833_v17  ;;  %v21895_v17 = vld [vmem:[#allocation6 + $0xeb4] ss:$20 sps:$4 sm:$0xff]  }
 0x5e7   :  { %14110 = vmatpush1.bf16.msra.mxu0 %v21836_v63  ;;  %13751 = vmatprep.subr.bf16.mxu1 %v21841_v2  ;;  %v21898_v63 = vld [vmem:[#allocation6 + $0xafc] ss:$20 sps:$4 sm:$0xff]  }
 0x5e8   :  { %14111 = vmatprep.subr.bf16.mxu0 %v21844_v4  ;;  %v21893_v2 = vld [vmem:[#allocation6 + $0xeb0] ss:$20 sps:$4 sm:$0xff]   ;;  %v21896_v4 = vld [vmem:[#allocation6 + $0xaf8] ss:$20 sps:$4 sm:$0xff]  }
 0x5ea   :  { %13752 = vmatpush1.bf16.msra.mxu1 %v21839_v5  ;;  %v21901_v5 = vld [vmem:[#allocation6 + $0xedc] ss:$20 sps:$4 sm:$0xff]  }
 0x5eb   :  { %14112 = vmatpush1.bf16.msra.mxu0 %v21842_v6  ;;  %13753 = vmatprep.subr.bf16.mxu1 %v21847_v24  ;;  %v21904_v6 = vld [vmem:[#allocation6 + $0xb24] ss:$20 sps:$4 sm:$0xff]  }
 0x5ec   :  { %14113 = vmatprep.subr.bf16.mxu0 %v21850_v8  ;;  %v21899_v24 = vld [vmem:[#allocation6 + $0xed8] ss:$20 sps:$4 sm:$0xff]   ;;  %v21902_v8 = vld [vmem:[#allocation6 + $0xb20] ss:$20 sps:$4 sm:$0xff]  }
 0x5ee   :  { %13754 = vmatpush1.bf16.msra.mxu1 %v21845_v41  ;;  %v21907_v41 = vld [vmem:[#allocation6 + $0xf04] ss:$20 sps:$4 sm:$0xff]  }
 0x5ef   :  { %14114 = vmatpush1.bf16.msra.mxu0 %v21848_v12  ;;  %13755 = vmatprep.subr.bf16.mxu1 %v21853_v10  ;;  %v21910_v12 = vld [vmem:[#allocation6 + $0xb4c] ss:$20 sps:$4 sm:$0xff]  }
 0x5f0   :  { %14115 = vmatprep.subr.bf16.mxu0 %v21856_v13  ;;  %v21905_v10 = vld [vmem:[#allocation6 + $0xf00] ss:$20 sps:$4 sm:$0xff]   ;;  %v21908_v13 = vld [vmem:[#allocation6 + $0xb48] ss:$20 sps:$4 sm:$0xff]  }
 0x5f2   :  { %13756 = vmatpush1.bf16.msra.mxu1 %v21851_v14  ;;  %v21913_v14 = vld [vmem:[#allocation6 + $0xf2c] ss:$20 sps:$4 sm:$0xff]  }
 0x5f3   :  { %14116 = vmatpush1.bf16.msra.mxu0 %v21854_v43  ;;  %13757 = vmatprep.subr.bf16.mxu1 %v21859_v1  ;;  %v21916_v43 = vld [vmem:[#allocation6 + $0xb74] ss:$20 sps:$4 sm:$0xff]  }
 0x5f4   :  { %14128 = vmatprep.subr.bf16.mxu0 %v21862_v7  ;;  %v21911_v1 = vld [vmem:[#allocation6 + $0xf28] ss:$20 sps:$4 sm:$0xff]   ;;  %v21914_v7 = vld [vmem:[#allocation6 + $0xb70] ss:$20 sps:$4 sm:$0xff]  }
 0x5f6   :  { %14118 = vmatmul.mubr.bf16.vlgmr.msra.gmra.mrb[20].mxu0 %v23407_v37  ;;  %13758 = vmatpush1.bf16.msra.mxu1 %v21857_v44  ;;  %v21919_v44 = vld [vmem:[#allocation6 + $0xf54] ss:$20 sps:$4 sm:$0xff]  }
 0x5f7   :  { %14129 = vmatpush1.bf16.msra.mxu0 %v21860_v45  ;;  %14160 = vmatprep.mubr.bf16.mxu0 %v23437_v59  ;;  %v21922_v45 = vld [vmem:[#allocation6 + $0xb9c] ss:$20 sps:$4 sm:$0xff]  }
 0x5f8   :  { %13759 = vmatprep.subr.bf16.mxu1 %v21865_v15  ;;  %14130 = vmatprep.subr.bf16.mxu0 %v21868_v0  ;;  %v21917_v15 = vld [vmem:[#allocation6 + $0xf50] ss:$20 sps:$4 sm:$0xff]   ;;  %v21920_v0 = vld [vmem:[#allocation6 + $0xb98] ss:$20 sps:$4 sm:$0xff]  }
 0x5fa   :  { %13760 = vmatpush1.bf16.msra.mxu1 %v21863_v11  ;;  %v21925_v11 = vld [vmem:[#allocation6 + $0xf7c] ss:$20 sps:$4 sm:$0xff]  }
 0x5fb   :  { %14131 = vmatpush1.bf16.msra.mxu0 %v21866_v16  ;;  %13761 = vmatprep.subr.bf16.mxu1 %v21871_v18  ;;  %v21928_v16 = vld [vmem:[#allocation6 + $0xbc4] ss:$20 sps:$4 sm:$0xff]  }
 0x5fc   :  { %14132 = vmatprep.subr.bf16.mxu0 %v21874_v50  ;;  %v21923_v18 = vld [vmem:[#allocation6 + $0xf78] ss:$20 sps:$4 sm:$0xff]   ;;  %v21926_v50 = vld [vmem:[#allocation6 + $0xbc0] ss:$20 sps:$4 sm:$0xff]  }
 0x5fe   :  { %13762 = vmatpush1.bf16.msra.mxu1 %v21869_v19  ;;  %v21931_v19 = vld [vmem:[#allocation6 + $0xfa4] ss:$20 sps:$4 sm:$0xff]  }
 0x5ff   :  { %14133 = vmatpush1.bf16.msra.mxu0 %v21872_v9  ;;  %13763 = vmatprep.subr.bf16.mxu1 %v21877_v20  ;;  %v21934_v9 = vld [vmem:[#allocation6 + $0xbec] ss:$20 sps:$4 sm:$0xff]  }
 0x600   :  { %14134 = vmatprep.subr.bf16.mxu0 %v21880_v21  ;;  %v21929_v20 = vld [vmem:[#allocation6 + $0xfa0] ss:$20 sps:$4 sm:$0xff]   ;;  %v21932_v21 = vld [vmem:[#allocation6 + $0xbe8] ss:$20 sps:$4 sm:$0xff]  }
 0x602   :  { %13764 = vmatpush1.bf16.msra.mxu1 %v21875_v23  ;;  %v21937_v23 = vld [vmem:[#allocation6 + $0xfcc] ss:$20 sps:$4 sm:$0xff]  }
 0x603   :  { %14135 = vmatpush1.bf16.msra.mxu0 %v21878_v26  ;;  %13765 = vmatprep.subr.bf16.mxu1 %v21883_v27  ;;  %v21940_v26 = vld [vmem:[#allocation6 + $0xc14] ss:$20 sps:$4 sm:$0xff]  }
 0x604   :  { %14136 = vmatprep.subr.bf16.mxu0 %v21886_v28  ;;  %v21935_v27 = vld [vmem:[#allocation6 + $0xfc8] ss:$20 sps:$4 sm:$0xff]   ;;  %v21938_v28 = vld [vmem:[#allocation6 + $0xc10] ss:$20 sps:$4 sm:$0xff]  }
 0x606   :  { %13766 = vmatpush1.bf16.msra.mxu1 %v21881_v34  ;;  %v21943_v34 = vld [vmem:[#allocation6 + $0xff4] ss:$20 sps:$4 sm:$0xff]  }
 0x607   :  { %14137 = vmatpush1.bf16.msra.mxu0 %v21884_v39  ;;  %13767 = vmatprep.subr.bf16.mxu1 %v21889_v54  ;;  %v21946_v39 = vld [vmem:[#allocation6 + $0xc3c] ss:$20 sps:$4 sm:$0xff]  }
 0x608   :  { %14138 = vmatprep.subr.bf16.mxu0 %v21892_v57  ;;  %v21941_v54 = vld [vmem:[#allocation6 + $0xff0] ss:$20 sps:$4 sm:$0xff]   ;;  %v21944_v57 = vld [vmem:[#allocation6 + $0xc38] ss:$20 sps:$4 sm:$0xff]  }
 0x60a   :  { %13768 = vmatpush1.bf16.msra.mxu1 %v21887_v58  ;;  %v21949_v58 = vld [vmem:[#allocation6 + $0x101c] ss:$20 sps:$4 sm:$0xff]  }
 0x60b   :  { %14139 = vmatpush1.bf16.msra.mxu0 %v21890_v61  ;;  %13769 = vmatprep.subr.bf16.mxu1 %v21895_v17  ;;  %v21952_v61 = vld [vmem:[#allocation6 + $0xc64] ss:$20 sps:$4 sm:$0xff]  }
 0x60c   :  { %14140 = vmatprep.subr.bf16.mxu0 %v21898_v63  ;;  %v21947_v17 = vld [vmem:[#allocation6 + $0x1018] ss:$20 sps:$4 sm:$0xff]   ;;  %v21950_v63 = vld [vmem:[#allocation6 + $0xc60] ss:$20 sps:$4 sm:$0xff]  }
 0x60e   :  { %13770 = vmatpush1.bf16.msra.mxu1 %v21893_v2  ;;  %v21955_v2 = vld [vmem:[#allocation6 + $0x1044] ss:$20 sps:$4 sm:$0xff]  }
 0x60f   :  { %14141 = vmatpush1.bf16.msra.mxu0 %v21896_v4  ;;  %13771 = vmatprep.subr.bf16.mxu1 %v21901_v5  ;;  %v21958_v4 = vld [vmem:[#allocation6 + $0xc8c] ss:$20 sps:$4 sm:$0xff]  }
 0x610   :  { %14142 = vmatprep.subr.bf16.mxu0 %v21904_v6  ;;  %v21953_v5 = vld [vmem:[#allocation6 + $0x1040] ss:$20 sps:$4 sm:$0xff]   ;;  %v21956_v6 = vld [vmem:[#allocation6 + $0xc88] ss:$20 sps:$4 sm:$0xff]  }
 0x612   :  { %13772 = vmatpush1.bf16.msra.mxu1 %v21899_v24  ;;  %v21961_v24 = vld [vmem:[#allocation6 + $0x106c] ss:$20 sps:$4 sm:$0xff]  }
 0x613   :  { %14143 = vmatpush1.bf16.msra.mxu0 %v21902_v8  ;;  %13784 = vmatprep.subr.bf16.mxu1 %v21907_v41  ;;  %v21964_v8 = vld [vmem:[#allocation6 + $0xcb4] ss:$20 sps:$4 sm:$0xff]  }
 0x614   :  { %14144 = vmatprep.subr.bf16.mxu0 %v21910_v12  ;;  %v21959_v41 = vld [vmem:[#allocation6 + $0x1068] ss:$20 sps:$4 sm:$0xff]   ;;  %v21962_v12 = vld [vmem:[#allocation6 + $0xcb0] ss:$20 sps:$4 sm:$0xff]  }
 0x615   :  { %13774 = vmatmul.mubr.bf16.vlgmr.msra.gmra.mrb[32].mxu1 %v23435_v49 }
 0x616   :  { %13785 = vmatpush1.bf16.msra.mxu1 %v21905_v10  ;;  %13816 = vmatprep.mubr.bf16.mxu1 %v23479_v32  ;;  %v21967_v10 = vld [vmem:[#allocation6 + $0x1094] ss:$20 sps:$4 sm:$0xff]  }
 0x617   :  { %14145 = vmatpush1.bf16.msra.mxu0 %v21908_v13  ;;  %13786 = vmatprep.subr.bf16.mxu1 %v21913_v14  ;;  %v21970_v13 = vld [vmem:[#allocation6 + $0xcdc] ss:$20 sps:$4 sm:$0xff]  }
 0x618   :  { %14146 = vmatprep.subr.bf16.mxu0 %v21916_v43  ;;  %v21965_v14 = vld [vmem:[#allocation6 + $0x1090] ss:$20 sps:$4 sm:$0xff]   ;;  %v21968_v43 = vld [vmem:[#allocation6 + $0xcd8] ss:$20 sps:$4 sm:$0xff]  }
 0x61a   :  { %13787 = vmatpush1.bf16.msra.mxu1 %v21911_v1  ;;  %v21973_v1 = vld [vmem:[#allocation6 + $0x10bc] ss:$20 sps:$4 sm:$0xff]  }
 0x61b   :  { %14147 = vmatpush1.bf16.msra.mxu0 %v21914_v7  ;;  %13788 = vmatprep.subr.bf16.mxu1 %v21919_v44  ;;  %v21976_v7 = vld [vmem:[#allocation6 + $0xd04] ss:$20 sps:$4 sm:$0xff]  }
 0x61c   :  { %14148 = vmatprep.subr.bf16.mxu0 %v21922_v45  ;;  %v21971_v44 = vld [vmem:[#allocation6 + $0x10b8] ss:$20 sps:$4 sm:$0xff]   ;;  %v21974_v45 = vld [vmem:[#allocation6 + $0xd00] ss:$20 sps:$4 sm:$0xff]  }
 0x61e   :  { %13789 = vmatpush1.bf16.msra.mxu1 %v21917_v15  ;;  %v21979_v15 = vld [vmem:[#allocation6 + $0x10e4] ss:$20 sps:$4 sm:$0xff]  }
 0x61f   :  { %14149 = vmatpush1.bf16.msra.mxu0 %v21920_v0  ;;  %13790 = vmatprep.subr.bf16.mxu1 %v21925_v11  ;;  %v21982_v0 = vld [vmem:[#allocation6 + $0xd2c] ss:$20 sps:$4 sm:$0xff]  }
 0x620   :  { %14150 = vmatprep.subr.bf16.mxu0 %v21928_v16  ;;  %v21977_v11 = vld [vmem:[#allocation6 + $0x10e0] ss:$20 sps:$4 sm:$0xff]   ;;  %v21980_v16 = vld [vmem:[#allocation6 + $0xd28] ss:$20 sps:$4 sm:$0xff]  }
 0x622   :  { %13791 = vmatpush1.bf16.msra.mxu1 %v21923_v18  ;;  %v21985_v18 = vld [vmem:[#allocation6 + $0x110c] ss:$20 sps:$4 sm:$0xff]  }
 0x623   :  { %14151 = vmatpush1.bf16.msra.mxu0 %v21926_v50  ;;  %13792 = vmatprep.subr.bf16.mxu1 %v21931_v19  ;;  %v21988_v50 = vld [vmem:[#allocation6 + $0xd54] ss:$20 sps:$4 sm:$0xff]  }
 0x624   :  { %14152 = vmatprep.subr.bf16.mxu0 %v21934_v9  ;;  %v21983_v19 = vld [vmem:[#allocation6 + $0x1108] ss:$20 sps:$4 sm:$0xff]   ;;  %v21986_v9 = vld [vmem:[#allocation6 + $0xd50] ss:$20 sps:$4 sm:$0xff]  }
 0x626   :  { %13793 = vmatpush1.bf16.msra.mxu1 %v21929_v20  ;;  %v21991_v20 = vld [vmem:[#allocation6 + $0x1134] ss:$20 sps:$4 sm:$0xff]  }
 0x627   :  { %14153 = vmatpush1.bf16.msra.mxu0 %v21932_v21  ;;  %13794 = vmatprep.subr.bf16.mxu1 %v21937_v23  ;;  %v21994_v21 = vld [vmem:[#allocation6 + $0xd7c] ss:$20 sps:$4 sm:$0xff]  }
 0x628   :  { %14154 = vmatprep.subr.bf16.mxu0 %v21940_v26  ;;  %v21989_v23 = vld [vmem:[#allocation6 + $0x1130] ss:$20 sps:$4 sm:$0xff]   ;;  %v21992_v26 = vld [vmem:[#allocation6 + $0xd78] ss:$20 sps:$4 sm:$0xff]  }
 0x62a   :  { %13795 = vmatpush1.bf16.msra.mxu1 %v21935_v27  ;;  %v21997_v27 = vld [vmem:[#allocation6 + $0x115c] ss:$20 sps:$4 sm:$0xff]  }
 0x62b   :  { %14155 = vmatpush1.bf16.msra.mxu0 %v21938_v28  ;;  %13796 = vmatprep.subr.bf16.mxu1 %v21943_v34  ;;  %v22000_v28 = vld [vmem:[#allocation6 + $0xda4] ss:$20 sps:$4 sm:$0xff]  }
 0x62c   :  { %14156 = vmatprep.subr.bf16.mxu0 %v21946_v39  ;;  %v21995_v34 = vld [vmem:[#allocation6 + $0x1158] ss:$20 sps:$4 sm:$0xff]   ;;  %v21998_v39 = vld [vmem:[#allocation6 + $0xda0] ss:$20 sps:$4 sm:$0xff]  }
 0x62e   :  { %13797 = vmatpush1.bf16.msra.mxu1 %v21941_v54  ;;  %v22003_v54 = vld [vmem:[#allocation6 + $0x1184] ss:$20 sps:$4 sm:$0xff]  }
 0x62f   :  { %14157 = vmatpush1.bf16.msra.mxu0 %v21944_v57  ;;  %13798 = vmatprep.subr.bf16.mxu1 %v21949_v58  ;;  %v22006_v57 = vld [vmem:[#allocation6 + $0xdcc] ss:$20 sps:$4 sm:$0xff]  }
 0x630   :  { %14158 = vmatprep.subr.bf16.mxu0 %v21952_v61  ;;  %v22001_v58 = vld [vmem:[#allocation6 + $0x1180] ss:$20 sps:$4 sm:$0xff]   ;;  %v22004_v61 = vld [vmem:[#allocation6 + $0xdc8] ss:$20 sps:$4 sm:$0xff]  }
 0x632   :  { %13799 = vmatpush1.bf16.msra.mxu1 %v21947_v17  ;;  %v22009_v17 = vld [vmem:[#allocation6 + $0x11ac] ss:$20 sps:$4 sm:$0xff]  }
 0x633   :  { %14159 = vmatpush1.bf16.msra.mxu0 %v21950_v63  ;;  %13800 = vmatprep.subr.bf16.mxu1 %v21955_v2  ;;  %v22012_v63 = vld [vmem:[#allocation6 + $0xdf4] ss:$20 sps:$4 sm:$0xff]  }
 0x634   :  { %14171 = vmatprep.subr.bf16.mxu0 %v21958_v4  ;;  %v22007_v2 = vld [vmem:[#allocation6 + $0x11a8] ss:$20 sps:$4 sm:$0xff]   ;;  %v22010_v4 = vld [vmem:[#allocation6 + $0xdf0] ss:$20 sps:$4 sm:$0xff]  }
 0x636   :  { %14161 = vmatmul.mubr.bf16.vlgmr.msra.gmra.mrb[20].mxu0 %v23433_v42  ;;  %13801 = vmatpush1.bf16.msra.mxu1 %v21953_v5  ;;  %v22015_v5 = vld [vmem:[#allocation6 + $0x11d4] ss:$20 sps:$4 sm:$0xff]  }
 0x637   :  { %14172 = vmatpush1.bf16.msra.mxu0 %v21956_v6  ;;  %14203 = vmatprep.mubr.bf16.mxu0 %v23439_v62  ;;  %v22018_v6 = vld [vmem:[#allocation6 + $0xe1c] ss:$20 sps:$4 sm:$0xff]  }
 0x638   :  { %13802 = vmatprep.subr.bf16.mxu1 %v21961_v24  ;;  %14173 = vmatprep.subr.bf16.mxu0 %v21964_v8  ;;  %v22013_v24 = vld [vmem:[#allocation6 + $0x11d0] ss:$20 sps:$4 sm:$0xff]   ;;  %v22016_v8 = vld [vmem:[#allocation6 + $0xe18] ss:$20 sps:$4 sm:$0xff]  }
 0x63a   :  { %13803 = vmatpush1.bf16.msra.mxu1 %v21959_v41  ;;  %v22021_v41 = vld [vmem:[#allocation6 + $0x11fc] ss:$20 sps:$4 sm:$0xff]  }
 0x63b   :  { %14174 = vmatpush1.bf16.msra.mxu0 %v21962_v12  ;;  %13804 = vmatprep.subr.bf16.mxu1 %v21967_v10  ;;  %v22024_v12 = vld [vmem:[#allocation6 + $0xe44] ss:$20 sps:$4 sm:$0xff]  }
 0x63c   :  { %14175 = vmatprep.subr.bf16.mxu0 %v21970_v13  ;;  %v22019_v10 = vld [vmem:[#allocation6 + $0x11f8] ss:$20 sps:$4 sm:$0xff]   ;;  %v22022_v13 = vld [vmem:[#allocation6 + $0xe40] ss:$20 sps:$4 sm:$0xff]  }
 0x63e   :  { %13805 = vmatpush1.bf16.msra.mxu1 %v21965_v14  ;;  %v22027_v14 = vld [vmem:[#allocation6 + $0x1224] ss:$20 sps:$4 sm:$0xff]  }
 0x63f   :  { %14176 = vmatpush1.bf16.msra.mxu0 %v21968_v43  ;;  %13806 = vmatprep.subr.bf16.mxu1 %v21973_v1  ;;  %v22030_v43 = vld [vmem:[#allocation6 + $0xe6c] ss:$20 sps:$4 sm:$0xff]  }
 0x640   :  { %14177 = vmatprep.subr.bf16.mxu0 %v21976_v7  ;;  %v22025_v1 = vld [vmem:[#allocation6 + $0x1220] ss:$20 sps:$4 sm:$0xff]   ;;  %v22028_v7 = vld [vmem:[#allocation6 + $0xe68] ss:$20 sps:$4 sm:$0xff]  }
 0x642   :  { %13807 = vmatpush1.bf16.msra.mxu1 %v21971_v44  ;;  %v22033_v44 = vld [vmem:[#allocation6 + $0x124c] ss:$20 sps:$4 sm:$0xff]  }
 0x643   :  { %14178 = vmatpush1.bf16.msra.mxu0 %v21974_v45  ;;  %13808 = vmatprep.subr.bf16.mxu1 %v21979_v15  ;;  %v22036_v45 = vld [vmem:[#allocation6 + $0xe94] ss:$20 sps:$4 sm:$0xff]  }
 0x644   :  { %14179 = vmatprep.subr.bf16.mxu0 %v21982_v0  ;;  %v22031_v15 = vld [vmem:[#allocation6 + $0x1248] ss:$20 sps:$4 sm:$0xff]   ;;  %v22034_v0 = vld [vmem:[#allocation6 + $0xe90] ss:$20 sps:$4 sm:$0xff]  }
 0x646   :  { %13809 = vmatpush1.bf16.msra.mxu1 %v21977_v11  ;;  %v22039_v11 = vld [vmem:[#allocation6 + $0x1274] ss:$20 sps:$4 sm:$0xff]  }
 0x647   :  { %14180 = vmatpush1.bf16.msra.mxu0 %v21980_v16  ;;  %13810 = vmatprep.subr.bf16.mxu1 %v21985_v18  ;;  %v22042_v16 = vld [vmem:[#allocation6 + $0xebc] ss:$20 sps:$4 sm:$0xff]  }
 0x648   :  { %14181 = vmatprep.subr.bf16.mxu0 %v21988_v50  ;;  %v22037_v18 = vld [vmem:[#allocation6 + $0x1270] ss:$20 sps:$4 sm:$0xff]   ;;  %v22040_v50 = vld [vmem:[#allocation6 + $0xeb8] ss:$20 sps:$4 sm:$0xff]  }
 0x64a   :  { %13811 = vmatpush1.bf16.msra.mxu1 %v21983_v19  ;;  %v22045_v19 = vld [vmem:[#allocation6 + $0x129c] ss:$20 sps:$4 sm:$0xff]  }
 0x64b   :  { %14182 = vmatpush1.bf16.msra.mxu0 %v21986_v9  ;;  %13812 = vmatprep.subr.bf16.mxu1 %v21991_v20  ;;  %v22048_v9 = vld [vmem:[#allocation6 + $0xee4] ss:$20 sps:$4 sm:$0xff]  }
 0x64c   :  { %14183 = vmatprep.subr.bf16.mxu0 %v21994_v21  ;;  %v22043_v20 = vld [vmem:[#allocation6 + $0x1298] ss:$20 sps:$4 sm:$0xff]   ;;  %v22046_v21 = vld [vmem:[#allocation6 + $0xee0] ss:$20 sps:$4 sm:$0xff]  }
 0x64e   :  { %13813 = vmatpush1.bf16.msra.mxu1 %v21989_v23  ;;  %v22051_v23 = vld [vmem:[#allocation6 + $0x12c4] ss:$20 sps:$4 sm:$0xff]  }
 0x64f   :  { %14184 = vmatpush1.bf16.msra.mxu0 %v21992_v26  ;;  %13814 = vmatprep.subr.bf16.mxu1 %v21997_v27  ;;  %v22054_v26 = vld [vmem:[#allocation6 + $0xf0c] ss:$20 sps:$4 sm:$0xff]  }
 0x650   :  { %14185 = vmatprep.subr.bf16.mxu0 %v22000_v28  ;;  %v22049_v27 = vld [vmem:[#allocation6 + $0x12c0] ss:$20 sps:$4 sm:$0xff]   ;;  %v22052_v28 = vld [vmem:[#allocation6 + $0xf08] ss:$20 sps:$4 sm:$0xff]  }
 0x652   :  { %13815 = vmatpush1.bf16.msra.mxu1 %v21995_v34  ;;  %v22057_v34 = vld [vmem:[#allocation6 + $0x12ec] ss:$20 sps:$4 sm:$0xff]  }
 0x653   :  { %14186 = vmatpush1.bf16.msra.mxu0 %v21998_v39  ;;  %13827 = vmatprep.subr.bf16.mxu1 %v22003_v54  ;;  %v22060_v39 = vld [vmem:[#allocation6 + $0xf34] ss:$20 sps:$4 sm:$0xff]  }
 0x654   :  { %14187 = vmatprep.subr.bf16.mxu0 %v22006_v57  ;;  %v22055_v54 = vld [vmem:[#allocation6 + $0x12e8] ss:$20 sps:$4 sm:$0xff]   ;;  %v22058_v57 = vld [vmem:[#allocation6 + $0xf30] ss:$20 sps:$4 sm:$0xff]  }
 0x655   :  { %13817 = vmatmul.mubr.bf16.vlgmr.msra.gmra.mrb[32].mxu1 %v23475_v22 }
 0x656   :  { %13828 = vmatpush1.bf16.msra.mxu1 %v22001_v58  ;;  %13859 = vmatprep.mubr.bf16.mxu1 %v23481_v46  ;;  %v22063_v58 = vld [vmem:[#allocation6 + $0x1314] ss:$20 sps:$4 sm:$0xff]  }
 0x657   :  { %14188 = vmatpush1.bf16.msra.mxu0 %v22004_v61  ;;  %13829 = vmatprep.subr.bf16.mxu1 %v22009_v17  ;;  %v22066_v61 = vld [vmem:[#allocation6 + $0xf5c] ss:$20 sps:$4 sm:$0xff]  }
 0x658   :  { %14189 = vmatprep.subr.bf16.mxu0 %v22012_v63  ;;  %v22061_v17 = vld [vmem:[#allocation6 + $0x1310] ss:$20 sps:$4 sm:$0xff]   ;;  %v22064_v63 = vld [vmem:[#allocation6 + $0xf58] ss:$20 sps:$4 sm:$0xff]  }
 0x65a   :  { %13830 = vmatpush1.bf16.msra.mxu1 %v22007_v2  ;;  %v22069_v2 = vld [vmem:[#allocation6 + $0x133c] ss:$20 sps:$4 sm:$0xff]  }
 0x65b   :  { %14190 = vmatpush1.bf16.msra.mxu0 %v22010_v4  ;;  %13831 = vmatprep.subr.bf16.mxu1 %v22015_v5  ;;  %v22072_v4 = vld [vmem:[#allocation6 + $0xf84] ss:$20 sps:$4 sm:$0xff]  }
 0x65c   :  { %14191 = vmatprep.subr.bf16.mxu0 %v22018_v6  ;;  %v22067_v5 = vld [vmem:[#allocation6 + $0x1338] ss:$20 sps:$4 sm:$0xff]   ;;  %v22070_v6 = vld [vmem:[#allocation6 + $0xf80] ss:$20 sps:$4 sm:$0xff]  }
 0x65e   :  { %13832 = vmatpush1.bf16.msra.mxu1 %v22013_v24  ;;  %v22075_v24 = vld [vmem:[#allocation6 + $0x1364] ss:$20 sps:$4 sm:$0xff]  }
 0x65f   :  { %14192 = vmatpush1.bf16.msra.mxu0 %v22016_v8  ;;  %13833 = vmatprep.subr.bf16.mxu1 %v22021_v41  ;;  %v22078_v8 = vld [vmem:[#allocation6 + $0xfac] ss:$20 sps:$4 sm:$0xff]  }
 0x660   :  { %14193 = vmatprep.subr.bf16.mxu0 %v22024_v12  ;;  %v22073_v41 = vld [vmem:[#allocation6 + $0x1360] ss:$20 sps:$4 sm:$0xff]   ;;  %v22076_v12 = vld [vmem:[#allocation6 + $0xfa8] ss:$20 sps:$4 sm:$0xff]  }
 0x662   :  { %13834 = vmatpush1.bf16.msra.mxu1 %v22019_v10  ;;  %v22081_v10 = vld [vmem:[#allocation6 + $0x138c] ss:$20 sps:$4 sm:$0xff]  }
 0x663   :  { %14194 = vmatpush1.bf16.msra.mxu0 %v22022_v13  ;;  %13835 = vmatprep.subr.bf16.mxu1 %v22027_v14  ;;  %v22084_v13 = vld [vmem:[#allocation6 + $0xfd4] ss:$20 sps:$4 sm:$0xff]  }
 0x664   :  { %14195 = vmatprep.subr.bf16.mxu0 %v22030_v43  ;;  %v22079_v14 = vld [vmem:[#allocation6 + $0x1388] ss:$20 sps:$4 sm:$0xff]   ;;  %v22082_v43 = vld [vmem:[#allocation6 + $0xfd0] ss:$20 sps:$4 sm:$0xff]  }
 0x666   :  { %13836 = vmatpush1.bf16.msra.mxu1 %v22025_v1  ;;  %v22087_v1 = vld [vmem:[#allocation6 + $0x13b4] ss:$20 sps:$4 sm:$0xff]  }
 0x667   :  { %14196 = vmatpush1.bf16.msra.mxu0 %v22028_v7  ;;  %13837 = vmatprep.subr.bf16.mxu1 %v22033_v44  ;;  %v22090_v7 = vld [vmem:[#allocation6 + $0xffc] ss:$20 sps:$4 sm:$0xff]  }
 0x668   :  { %14197 = vmatprep.subr.bf16.mxu0 %v22036_v45  ;;  %v22085_v44 = vld [vmem:[#allocation6 + $0x13b0] ss:$20 sps:$4 sm:$0xff]   ;;  %v22088_v45 = vld [vmem:[#allocation6 + $0xff8] ss:$20 sps:$4 sm:$0xff]  }
 0x66a   :  { %13838 = vmatpush1.bf16.msra.mxu1 %v22031_v15  ;;  %v22093_v15 = vld [vmem:[#allocation6 + $0x13dc] ss:$20 sps:$4 sm:$0xff]  }
 0x66b   :  { %14198 = vmatpush1.bf16.msra.mxu0 %v22034_v0  ;;  %13839 = vmatprep.subr.bf16.mxu1 %v22039_v11  ;;  %v22096_v0 = vld [vmem:[#allocation6 + $0x1024] ss:$20 sps:$4 sm:$0xff]  }
 0x66c   :  { %14199 = vmatprep.subr.bf16.mxu0 %v22042_v16  ;;  %v22091_v11 = vld [vmem:[#allocation6 + $0x13d8] ss:$20 sps:$4 sm:$0xff]   ;;  %v22094_v16 = vld [vmem:[#allocation6 + $0x1020] ss:$20 sps:$4 sm:$0xff]  }
 0x66e   :  { %13840 = vmatpush1.bf16.msra.mxu1 %v22037_v18  ;;  %v22099_v18 = vld [vmem:[#allocation6 + $0x1404] ss:$20 sps:$4 sm:$0xff]  }
 0x66f   :  { %14200 = vmatpush1.bf16.msra.mxu0 %v22040_v50  ;;  %13841 = vmatprep.subr.bf16.mxu1 %v22045_v19  ;;  %v22102_v50 = vld [vmem:[#allocation6 + $0x104c] ss:$20 sps:$4 sm:$0xff]  }
 0x670   :  { %14201 = vmatprep.subr.bf16.mxu0 %v22048_v9  ;;  %v22097_v19 = vld [vmem:[#allocation6 + $0x1400] ss:$20 sps:$4 sm:$0xff]   ;;  %v22100_v9 = vld [vmem:[#allocation6 + $0x1048] ss:$20 sps:$4 sm:$0xff]  }
 0x672   :  { %13842 = vmatpush1.bf16.msra.mxu1 %v22043_v20  ;;  %v22105_v20 = vld [vmem:[#allocation6 + $0x142c] ss:$20 sps:$4 sm:$0xff]  }
 0x673   :  { %14202 = vmatpush1.bf16.msra.mxu0 %v22046_v21  ;;  %13843 = vmatprep.subr.bf16.mxu1 %v22051_v23  ;;  %v22108_v21 = vld [vmem:[#allocation6 + $0x1074] ss:$20 sps:$4 sm:$0xff]  }
 0x674   :  { %14214 = vmatprep.subr.bf16.mxu0 %v22054_v26  ;;  %v22103_v23 = vld [vmem:[#allocation6 + $0x1428] ss:$20 sps:$4 sm:$0xff]   ;;  %v22106_v26 = vld [vmem:[#allocation6 + $0x1070] ss:$20 sps:$4 sm:$0xff]  }
 0x676   :  { %14204 = vmatmul.mubr.bf16.vlgmr.msra.gmra.mrb[20].mxu0 %v23435_v49  ;;  %13844 = vmatpush1.bf16.msra.mxu1 %v22049_v27  ;;  %v22111_v27 = vld [vmem:[#allocation6 + $0x1454] ss:$20 sps:$4 sm:$0xff]  }
 0x677   :  { %14215 = vmatpush1.bf16.msra.mxu0 %v22052_v28  ;;  %14246 = vmatprep.mubr.bf16.mxu0 %v23479_v32  ;;  %v22114_v28 = vld [vmem:[#allocation6 + $0x109c] ss:$20 sps:$4 sm:$0xff]  }
 0x678   :  { %13845 = vmatprep.subr.bf16.mxu1 %v22057_v34  ;;  %14216 = vmatprep.subr.bf16.mxu0 %v22060_v39  ;;  %v22109_v34 = vld [vmem:[#allocation6 + $0x1450] ss:$20 sps:$4 sm:$0xff]   ;;  %v22112_v39 = vld [vmem:[#allocation6 + $0x1098] ss:$20 sps:$4 sm:$0xff]  }
 0x67a   :  { %13846 = vmatpush1.bf16.msra.mxu1 %v22055_v54  ;;  %v22117_v54 = vld [vmem:[#allocation6 + $0x147c] ss:$20 sps:$4 sm:$0xff]  }
 0x67b   :  { %14217 = vmatpush1.bf16.msra.mxu0 %v22058_v57  ;;  %13847 = vmatprep.subr.bf16.mxu1 %v22063_v58  ;;  %v22120_v57 = vld [vmem:[#allocation6 + $0x10c4] ss:$20 sps:$4 sm:$0xff]  }
 0x67c   :  { %14218 = vmatprep.subr.bf16.mxu0 %v22066_v61  ;;  %v22115_v58 = vld [vmem:[#allocation6 + $0x1478] ss:$20 sps:$4 sm:$0xff]   ;;  %v22118_v61 = vld [vmem:[#allocation6 + $0x10c0] ss:$20 sps:$4 sm:$0xff]  }
 0x67e   :  { %13848 = vmatpush1.bf16.msra.mxu1 %v22061_v17  ;;  %v22123_v17 = vld [vmem:[#allocation6 + $0x14a4] ss:$20 sps:$4 sm:$0xff]  }
 0x67f   :  { %14219 = vmatpush1.bf16.msra.mxu0 %v22064_v63  ;;  %13849 = vmatprep.subr.bf16.mxu1 %v22069_v2  ;;  %v22126_v63 = vld [vmem:[#allocation6 + $0x10ec] ss:$20 sps:$4 sm:$0xff]  }
 0x680   :  { %14220 = vmatprep.subr.bf16.mxu0 %v22072_v4  ;;  %v22121_v2 = vld [vmem:[#allocation6 + $0x14a0] ss:$20 sps:$4 sm:$0xff]   ;;  %v22124_v4 = vld [vmem:[#allocation6 + $0x10e8] ss:$20 sps:$4 sm:$0xff]  }
 0x682   :  { %13850 = vmatpush1.bf16.msra.mxu1 %v22067_v5  ;;  %v22129_v5 = vld [vmem:[#allocation6 + $0x14cc] ss:$20 sps:$4 sm:$0xff]  }
 0x683   :  { %14221 = vmatpush1.bf16.msra.mxu0 %v22070_v6  ;;  %13851 = vmatprep.subr.bf16.mxu1 %v22075_v24  ;;  %v22132_v6 = vld [vmem:[#allocation6 + $0x1114] ss:$20 sps:$4 sm:$0xff]  }
 0x684   :  { %14222 = vmatprep.subr.bf16.mxu0 %v22078_v8  ;;  %v22127_v24 = vld [vmem:[#allocation6 + $0x14c8] ss:$20 sps:$4 sm:$0xff]   ;;  %v22130_v8 = vld [vmem:[#allocation6 + $0x1110] ss:$20 sps:$4 sm:$0xff]  }
 0x686   :  { %13852 = vmatpush1.bf16.msra.mxu1 %v22073_v41  ;;  %v22135_v41 = vld [vmem:[#allocation6 + $0x14f4] ss:$20 sps:$4 sm:$0xff]  }
 0x687   :  { %14223 = vmatpush1.bf16.msra.mxu0 %v22076_v12  ;;  %13853 = vmatprep.subr.bf16.mxu1 %v22081_v10  ;;  %v22138_v12 = vld [vmem:[#allocation6 + $0x113c] ss:$20 sps:$4 sm:$0xff]  }
 0x688   :  { %14224 = vmatprep.subr.bf16.mxu0 %v22084_v13  ;;  %v22133_v10 = vld [vmem:[#allocation6 + $0x14f0] ss:$20 sps:$4 sm:$0xff]   ;;  %v22136_v13 = vld [vmem:[#allocation6 + $0x1138] ss:$20 sps:$4 sm:$0xff]  }
 0x68a   :  { %13854 = vmatpush1.bf16.msra.mxu1 %v22079_v14  ;;  %v22141_v14 = vld [vmem:[#allocation6 + $0x151c] ss:$20 sps:$4 sm:$0xff]  }
 0x68b   :  { %14225 = vmatpush1.bf16.msra.mxu0 %v22082_v43  ;;  %13855 = vmatprep.subr.bf16.mxu1 %v22087_v1  ;;  %v22144_v43 = vld [vmem:[#allocation6 + $0x1164] ss:$20 sps:$4 sm:$0xff]  }
 0x68c   :  { %14226 = vmatprep.subr.bf16.mxu0 %v22090_v7  ;;  %v22139_v1 = vld [vmem:[#allocation6 + $0x1518] ss:$20 sps:$4 sm:$0xff]   ;;  %v22142_v7 = vld [vmem:[#allocation6 + $0x1160] ss:$20 sps:$4 sm:$0xff]  }
 0x68e   :  { %13856 = vmatpush1.bf16.msra.mxu1 %v22085_v44  ;;  %v22147_v44 = vld [vmem:[#allocation6 + $0x1544] ss:$20 sps:$4 sm:$0xff]  }
 0x68f   :  { %14227 = vmatpush1.bf16.msra.mxu0 %v22088_v45  ;;  %13857 = vmatprep.subr.bf16.mxu1 %v22093_v15  ;;  %v22150_v45 = vld [vmem:[#allocation6 + $0x118c] ss:$20 sps:$4 sm:$0xff]  }
 0x690   :  { %14228 = vmatprep.subr.bf16.mxu0 %v22096_v0  ;;  %v22145_v15 = vld [vmem:[#allocation6 + $0x1540] ss:$20 sps:$4 sm:$0xff]   ;;  %v22148_v0 = vld [vmem:[#allocation6 + $0x1188] ss:$20 sps:$4 sm:$0xff]  }
 0x692   :  { %13858 = vmatpush1.bf16.msra.mxu1 %v22091_v11  ;;  %v22153_v11 = vld [vmem:[#allocation6 + $0x156c] ss:$20 sps:$4 sm:$0xff]  }
 0x693   :  { %14229 = vmatpush1.bf16.msra.mxu0 %v22094_v16  ;;  %13870 = vmatprep.subr.bf16.mxu1 %v22099_v18  ;;  %v22156_v16 = vld [vmem:[#allocation6 + $0x11b4] ss:$20 sps:$4 sm:$0xff]  }
 0x694   :  { %14230 = vmatprep.subr.bf16.mxu0 %v22102_v50  ;;  %v22151_v18 = vld [vmem:[#allocation6 + $0x1568] ss:$20 sps:$4 sm:$0xff]   ;;  %v22154_v50 = vld [vmem:[#allocation6 + $0x11b0] ss:$20 sps:$4 sm:$0xff]  }
 0x695   :  { %13860 = vmatmul.mubr.bf16.vlgmr.msra.gmra.mrb[32].mxu1 %v23477_v36 }
 0x696   :  { %13871 = vmatpush1.bf16.msra.mxu1 %v22097_v19  ;;  %13902 = vmatprep.mubr.bf16.mxu1 %v23519_v60  ;;  %v22159_v19 = vld [vmem:[#allocation6 + $0x1594] ss:$20 sps:$4 sm:$0xff]  }
 0x697   :  { %14231 = vmatpush1.bf16.msra.mxu0 %v22100_v9  ;;  %13872 = vmatprep.subr.bf16.mxu1 %v22105_v20  ;;  %v22162_v9 = vld [vmem:[#allocation6 + $0x11dc] ss:$20 sps:$4 sm:$0xff]  }
 0x698   :  { %14232 = vmatprep.subr.bf16.mxu0 %v22108_v21  ;;  %v22157_v20 = vld [vmem:[#allocation6 + $0x1590] ss:$20 sps:$4 sm:$0xff]   ;;  %v22160_v21 = vld [vmem:[#allocation6 + $0x11d8] ss:$20 sps:$4 sm:$0xff]  }
 0x69a   :  { %13873 = vmatpush1.bf16.msra.mxu1 %v22103_v23  ;;  %v22165_v23 = vld [vmem:[#allocation6 + $0x15bc] ss:$20 sps:$4 sm:$0xff]  }
 0x69b   :  { %14233 = vmatpush1.bf16.msra.mxu0 %v22106_v26  ;;  %13874 = vmatprep.subr.bf16.mxu1 %v22111_v27  ;;  %v22168_v26 = vld [vmem:[#allocation6 + $0x1204] ss:$20 sps:$4 sm:$0xff]  }
 0x69c   :  { %14234 = vmatprep.subr.bf16.mxu0 %v22114_v28  ;;  %v22163_v27 = vld [vmem:[#allocation6 + $0x15b8] ss:$20 sps:$4 sm:$0xff]   ;;  %v22166_v28 = vld [vmem:[#allocation6 + $0x1200] ss:$20 sps:$4 sm:$0xff]  }
 0x69e   :  { %13875 = vmatpush1.bf16.msra.mxu1 %v22109_v34  ;;  %v22171_v34 = vld [vmem:[#allocation6 + $0x15e4] ss:$20 sps:$4 sm:$0xff]  }
 0x69f   :  { %14235 = vmatpush1.bf16.msra.mxu0 %v22112_v39  ;;  %13876 = vmatprep.subr.bf16.mxu1 %v22117_v54  ;;  %v22174_v39 = vld [vmem:[#allocation6 + $0x122c] ss:$20 sps:$4 sm:$0xff]  }
 0x6a0   :  { %14236 = vmatprep.subr.bf16.mxu0 %v22120_v57  ;;  %v22169_v54 = vld [vmem:[#allocation6 + $0x15e0] ss:$20 sps:$4 sm:$0xff]   ;;  %v22172_v57 = vld [vmem:[#allocation6 + $0x1228] ss:$20 sps:$4 sm:$0xff]  }
 0x6a2   :  { %13877 = vmatpush1.bf16.msra.mxu1 %v22115_v58  ;;  %v22177_v58 = vld [vmem:[#allocation6 + $0x160c] ss:$20 sps:$4 sm:$0xff]  }
 0x6a3   :  { %14237 = vmatpush1.bf16.msra.mxu0 %v22118_v61  ;;  %13878 = vmatprep.subr.bf16.mxu1 %v22123_v17  ;;  %v22180_v61 = vld [vmem:[#allocation6 + $0x1254] ss:$20 sps:$4 sm:$0xff]  }
 0x6a4   :  { %14238 = vmatprep.subr.bf16.mxu0 %v22126_v63  ;;  %v22175_v17 = vld [vmem:[#allocation6 + $0x1608] ss:$20 sps:$4 sm:$0xff]   ;;  %v22178_v63 = vld [vmem:[#allocation6 + $0x1250] ss:$20 sps:$4 sm:$0xff]  }
 0x6a6   :  { %13879 = vmatpush1.bf16.msra.mxu1 %v22121_v2  ;;  %v22183_v2 = vld [vmem:[#allocation6 + $0x1634] ss:$20 sps:$4 sm:$0xff]  }
 0x6a7   :  { %14239 = vmatpush1.bf16.msra.mxu0 %v22124_v4  ;;  %13880 = vmatprep.subr.bf16.mxu1 %v22129_v5  ;;  %v22186_v4 = vld [vmem:[#allocation6 + $0x127c] ss:$20 sps:$4 sm:$0xff]  }
 0x6a8   :  { %14240 = vmatprep.subr.bf16.mxu0 %v22132_v6  ;;  %v22181_v5 = vld [vmem:[#allocation6 + $0x1630] ss:$20 sps:$4 sm:$0xff]   ;;  %v22184_v6 = vld [vmem:[#allocation6 + $0x1278] ss:$20 sps:$4 sm:$0xff]  }
 0x6aa   :  { %13881 = vmatpush1.bf16.msra.mxu1 %v22127_v24  ;;  %v22189_v24 = vld [vmem:[#allocation6 + $0x165c] ss:$20 sps:$4 sm:$0xff]  }
 0x6ab   :  { %14241 = vmatpush1.bf16.msra.mxu0 %v22130_v8  ;;  %13882 = vmatprep.subr.bf16.mxu1 %v22135_v41  ;;  %v22192_v8 = vld [vmem:[#allocation6 + $0x12a4] ss:$20 sps:$4 sm:$0xff]  }
 0x6ac   :  { %14242 = vmatprep.subr.bf16.mxu0 %v22138_v12  ;;  %v22187_v41 = vld [vmem:[#allocation6 + $0x1658] ss:$20 sps:$4 sm:$0xff]   ;;  %v22190_v12 = vld [vmem:[#allocation6 + $0x12a0] ss:$20 sps:$4 sm:$0xff]  }
 0x6ae   :  { %13883 = vmatpush1.bf16.msra.mxu1 %v22133_v10  ;;  %v22195_v10 = vld [vmem:[#allocation6 + $0x1684] ss:$20 sps:$4 sm:$0xff]  }
 0x6af   :  { %14243 = vmatpush1.bf16.msra.mxu0 %v22136_v13  ;;  %13884 = vmatprep.subr.bf16.mxu1 %v22141_v14  ;;  %v22198_v13 = vld [vmem:[#allocation6 + $0x12cc] ss:$20 sps:$4 sm:$0xff]  }
 0x6b0   :  { %14244 = vmatprep.subr.bf16.mxu0 %v22144_v43  ;;  %v22193_v14 = vld [vmem:[#allocation6 + $0x1680] ss:$20 sps:$4 sm:$0xff]   ;;  %v22196_v43 = vld [vmem:[#allocation6 + $0x12c8] ss:$20 sps:$4 sm:$0xff]  }
 0x6b2   :  { %13885 = vmatpush1.bf16.msra.mxu1 %v22139_v1  ;;  %v22201_v1 = vld [vmem:[#allocation6 + $0x16ac] ss:$20 sps:$4 sm:$0xff]  }
 0x6b3   :  { %14245 = vmatpush1.bf16.msra.mxu0 %v22142_v7  ;;  %13886 = vmatprep.subr.bf16.mxu1 %v22147_v44  ;;  %v22204_v7 = vld [vmem:[#allocation6 + $0x12f4] ss:$20 sps:$4 sm:$0xff]  }
 0x6b4   :  { %14257 = vmatprep.subr.bf16.mxu0 %v22150_v45  ;;  %v22199_v44 = vld [vmem:[#allocation6 + $0x16a8] ss:$20 sps:$4 sm:$0xff]   ;;  %v22202_v45 = vld [vmem:[#allocation6 + $0x12f0] ss:$20 sps:$4 sm:$0xff]  }
 0x6b6   :  { %14247 = vmatmul.mubr.bf16.vlgmr.msra.gmra.mrb[20].mxu0 %v23475_v22  ;;  %13887 = vmatpush1.bf16.msra.mxu1 %v22145_v15  ;;  %v22207_v15 = vld [vmem:[#allocation6 + $0x16d4] ss:$20 sps:$4 sm:$0xff]  }
 0x6b7   :  { %14258 = vmatpush1.bf16.msra.mxu0 %v22148_v0  ;;  %14289 = vmatprep.mubr.bf16.mxu0 %v23481_v46  ;;  %v22210_v0 = vld [vmem:[#allocation6 + $0x131c] ss:$20 sps:$4 sm:$0xff]  }
 0x6b8   :  { %13888 = vmatprep.subr.bf16.mxu1 %v22153_v11  ;;  %14259 = vmatprep.subr.bf16.mxu0 %v22156_v16  ;;  %v22205_v11 = vld [vmem:[#allocation6 + $0x16d0] ss:$20 sps:$4 sm:$0xff]   ;;  %v22208_v16 = vld [vmem:[#allocation6 + $0x1318] ss:$20 sps:$4 sm:$0xff]  }
 0x6ba   :  { %13889 = vmatpush1.bf16.msra.mxu1 %v22151_v18  ;;  %v22213_v18 = vld [vmem:[#allocation6 + $0x16fc] ss:$20 sps:$4 sm:$0xff]  }
 0x6bb   :  { %14260 = vmatpush1.bf16.msra.mxu0 %v22154_v50  ;;  %13890 = vmatprep.subr.bf16.mxu1 %v22159_v19  ;;  %v22216_v50 = vld [vmem:[#allocation6 + $0x1344] ss:$20 sps:$4 sm:$0xff]  }
 0x6bc   :  { %14261 = vmatprep.subr.bf16.mxu0 %v22162_v9  ;;  %v22211_v19 = vld [vmem:[#allocation6 + $0x16f8] ss:$20 sps:$4 sm:$0xff]   ;;  %v22214_v9 = vld [vmem:[#allocation6 + $0x1340] ss:$20 sps:$4 sm:$0xff]  }
 0x6be   :  { %13891 = vmatpush1.bf16.msra.mxu1 %v22157_v20  ;;  %v22219_v20 = vld [vmem:[#allocation6 + $0x1724] ss:$20 sps:$4 sm:$0xff]  }
 0x6bf   :  { %14262 = vmatpush1.bf16.msra.mxu0 %v22160_v21  ;;  %13892 = vmatprep.subr.bf16.mxu1 %v22165_v23  ;;  %v22222_v21 = vld [vmem:[#allocation6 + $0x136c] ss:$20 sps:$4 sm:$0xff]  }
 0x6c0   :  { %14263 = vmatprep.subr.bf16.mxu0 %v22168_v26  ;;  %v22217_v23 = vld [vmem:[#allocation6 + $0x1720] ss:$20 sps:$4 sm:$0xff]   ;;  %v22220_v26 = vld [vmem:[#allocation6 + $0x1368] ss:$20 sps:$4 sm:$0xff]  }
 0x6c2   :  { %13893 = vmatpush1.bf16.msra.mxu1 %v22163_v27  ;;  %v22225_v27 = vld [vmem:[#allocation6 + $0x174c] ss:$20 sps:$4 sm:$0xff]  }
 0x6c3   :  { %14264 = vmatpush1.bf16.msra.mxu0 %v22166_v28  ;;  %13894 = vmatprep.subr.bf16.mxu1 %v22171_v34  ;;  %v22228_v28 = vld [vmem:[#allocation6 + $0x1394] ss:$20 sps:$4 sm:$0xff]  }
 0x6c4   :  { %14265 = vmatprep.subr.bf16.mxu0 %v22174_v39  ;;  %v22223_v34 = vld [vmem:[#allocation6 + $0x1748] ss:$20 sps:$4 sm:$0xff]   ;;  %v22226_v39 = vld [vmem:[#allocation6 + $0x1390] ss:$20 sps:$4 sm:$0xff]  }
 0x6c6   :  { %13895 = vmatpush1.bf16.msra.mxu1 %v22169_v54  ;;  %v22231_v54 = vld [vmem:[#allocation6 + $0x1774] ss:$20 sps:$4 sm:$0xff]  }
 0x6c7   :  { %14266 = vmatpush1.bf16.msra.mxu0 %v22172_v57  ;;  %13896 = vmatprep.subr.bf16.mxu1 %v22177_v58  ;;  %v22234_v57 = vld [vmem:[#allocation6 + $0x13bc] ss:$20 sps:$4 sm:$0xff]  }
 0x6c8   :  { %14267 = vmatprep.subr.bf16.mxu0 %v22180_v61  ;;  %v22229_v58 = vld [vmem:[#allocation6 + $0x1770] ss:$20 sps:$4 sm:$0xff]   ;;  %v22232_v61 = vld [vmem:[#allocation6 + $0x13b8] ss:$20 sps:$4 sm:$0xff]  }
 0x6ca   :  { %13897 = vmatpush1.bf16.msra.mxu1 %v22175_v17  ;;  %v22237_v17 = vld [vmem:[#allocation6 + $0x179c] ss:$20 sps:$4 sm:$0xff]  }
 0x6cb   :  { %14268 = vmatpush1.bf16.msra.mxu0 %v22178_v63  ;;  %13898 = vmatprep.subr.bf16.mxu1 %v22183_v2  ;;  %v22240_v63 = vld [vmem:[#allocation6 + $0x13e4] ss:$20 sps:$4 sm:$0xff]  }
 0x6cc   :  { %14269 = vmatprep.subr.bf16.mxu0 %v22186_v4  ;;  %v22235_v2 = vld [vmem:[#allocation6 + $0x1798] ss:$20 sps:$4 sm:$0xff]   ;;  %v22238_v4 = vld [vmem:[#allocation6 + $0x13e0] ss:$20 sps:$4 sm:$0xff]  }
 0x6ce   :  { %13899 = vmatpush1.bf16.msra.mxu1 %v22181_v5  ;;  %v22244_v5 = vld [vmem:[#allocation6 + $0x150] ss:$20 sps:$4 sm:$0xff]  }
 0x6cf   :  { %14270 = vmatpush1.bf16.msra.mxu0 %v22184_v6  ;;  %13900 = vmatprep.subr.bf16.mxu1 %v22189_v24  ;;  %v22243_v6 = vld [vmem:[#allocation6 + $0x140c] ss:$20 sps:$4 sm:$0xff]   ;;  %v22245_v24 = vld [vmem:[#allocation6 + $0x10] ss:$20 sps:$4 sm:$0xff]  }
 0x6d0   :  { %14271 = vmatprep.subr.bf16.mxu0 %v22192_v8  ;;  %v22241_v8 = vld [vmem:[#allocation6 + $0x1408] ss:$20 sps:$4 sm:$0xff]  }
 0x6d2   :  { %13901 = vmatpush1.bf16.msra.mxu1 %v22187_v41  ;;  %v22248_v41 = vld [vmem:[#allocation6 + $0x1434] ss:$20 sps:$4 sm:$0xff]  }
 0x6d3   :  { %14272 = vmatpush1.bf16.msra.mxu0 %v22190_v12  ;;  %13913 = vmatprep.subr.bf16.mxu1 %v22195_v10  ;;  %v22249_v12 = vld [vmem:[#allocation6 + $0x178] ss:$20 sps:$4 sm:$0xff]  }
 0x6d4   :  { %14273 = vmatprep.subr.bf16.mxu0 %v22198_v13  ;;  %v22250_v10 = vld [vmem:[#allocation6 + $0x38] ss:$20 sps:$4 sm:$0xff]   ;;  %v22246_v13 = vld [vmem:[#allocation6 + $0x1430] ss:$20 sps:$4 sm:$0xff]  }
 0x6d5   :  { %13903 = vmatmul.mubr.bf16.vlgmr.msra.gmra.mrb[32].mxu1 %v23517_v48 }
 0x6d6   :  { %13914 = vmatpush1.bf16.msra.mxu1 %v22193_v14  ;;  %13945 = vmatprep.mubr.bf16.mxu1 %v23104_v35  ;;  %v22254_v14 = vld [vmem:[#allocation6 + $0x1a0] ss:$20 sps:$4 sm:$0xff]  }
 0x6d7   :  { %14274 = vmatpush1.bf16.msra.mxu0 %v22196_v43  ;;  %13915 = vmatprep.subr.bf16.mxu1 %v22201_v1  ;;  %v22253_v43 = vld [vmem:[#allocation6 + $0x145c] ss:$20 sps:$4 sm:$0xff]   ;;  %v22255_v1 = vld [vmem:[#allocation6 + $0x60] ss:$20 sps:$4 sm:$0xff]  }
 0x6d8   :  { %14275 = vmatprep.subr.bf16.mxu0 %v22204_v7  ;;  %v22251_v7 = vld [vmem:[#allocation6 + $0x1458] ss:$20 sps:$4 sm:$0xff]  }
 0x6da   :  { %13916 = vmatpush1.bf16.msra.mxu1 %v22199_v44  ;;  %v22259_v44 = vld [vmem:[#allocation6 + $0x1c8] ss:$20 sps:$4 sm:$0xff]  }
 0x6db   :  { %14276 = vmatpush1.bf16.msra.mxu0 %v22202_v45  ;;  %13917 = vmatprep.subr.bf16.mxu1 %v22207_v15  ;;  %v22258_v45 = vld [vmem:[#allocation6 + $0x1484] ss:$20 sps:$4 sm:$0xff]   ;;  %v22260_v15 = vld [vmem:[#allocation6 + $0x88] ss:$20 sps:$4 sm:$0xff]  }
 0x6dc   :  { %14277 = vmatprep.subr.bf16.mxu0 %v22210_v0  ;;  %v22256_v0 = vld [vmem:[#allocation6 + $0x1480] ss:$20 sps:$4 sm:$0xff]  }
 0x6de   :  { %13918 = vmatpush1.bf16.msra.mxu1 %v22205_v11  ;;  %v22264_v11 = vld [vmem:[#allocation6 + $0x1f0] ss:$20 sps:$4 sm:$0xff]  }
 0x6df   :  { %14278 = vmatpush1.bf16.msra.mxu0 %v22208_v16  ;;  %13919 = vmatprep.subr.bf16.mxu1 %v22213_v18  ;;  %v22263_v16 = vld [vmem:[#allocation6 + $0x14ac] ss:$20 sps:$4 sm:$0xff]   ;;  %v22261_v18 = vld [vmem:[#allocation6 + $0x14a8] ss:$20 sps:$4 sm:$0xff]  }
 0x6e0   :  { %14279 = vmatprep.subr.bf16.mxu0 %v22216_v50  ;;  %v22269_v50 = vld [vmem:[#allocation6 + $0x218] ss:$20 sps:$4 sm:$0xff]  }
 0x6e2   :  { %13920 = vmatpush1.bf16.msra.mxu1 %v22211_v19  ;;  %v22268_v19 = vld [vmem:[#allocation6 + $0x14d4] ss:$20 sps:$4 sm:$0xff]  }
 0x6e3   :  { %14280 = vmatpush1.bf16.msra.mxu0 %v22214_v9  ;;  %13921 = vmatprep.subr.bf16.mxu1 %v22219_v20  ;;  %v22270_v9 = vld [vmem:[#allocation6 + $0xd8] ss:$20 sps:$4 sm:$0xff]   ;;  %v22266_v20 = vld [vmem:[#allocation6 + $0x14d0] ss:$20 sps:$4 sm:$0xff]  }
 0x6e4   :  { %14281 = vmatprep.subr.bf16.mxu0 %v22222_v21  ;;  %v22274_v21 = vld [vmem:[#allocation6 + $0x240] ss:$20 sps:$4 sm:$0xff]  }
 0x6e6   :  { %13922 = vmatpush1.bf16.msra.mxu1 %v22217_v23  ;;  %v22273_v23 = vld [vmem:[#allocation6 + $0x14fc] ss:$20 sps:$4 sm:$0xff]  }
 0x6e7   :  { %14282 = vmatpush1.bf16.msra.mxu0 %v22220_v26  ;;  %13923 = vmatprep.subr.bf16.mxu1 %v22225_v27  ;;  %v22275_v26 = vld [vmem:[#allocation6 + $0x100] ss:$20 sps:$4 sm:$0xff]   ;;  %v22271_v27 = vld [vmem:[#allocation6 + $0x14f8] ss:$20 sps:$4 sm:$0xff]  }
 0x6e8   :  { %14283 = vmatprep.subr.bf16.mxu0 %v22228_v28  ;;  %v22279_v28 = vld [vmem:[#allocation6 + $0x268] ss:$20 sps:$4 sm:$0xff]  }
 0x6ea   :  { %13924 = vmatpush1.bf16.msra.mxu1 %v22223_v34  ;;  %v22278_v34 = vld [vmem:[#allocation6 + $0x1524] ss:$20 sps:$4 sm:$0xff]  }
 0x6eb   :  { %14284 = vmatpush1.bf16.msra.mxu0 %v22226_v39  ;;  %13925 = vmatprep.subr.bf16.mxu1 %v22231_v54  ;;  %v22280_v39 = vld [vmem:[#allocation6 + $0x128] ss:$20 sps:$4 sm:$0xff]   ;;  %v22276_v54 = vld [vmem:[#allocation6 + $0x1520] ss:$20 sps:$4 sm:$0xff]  }
 0x6ec   :  { %14285 = vmatprep.subr.bf16.mxu0 %v22234_v57  ;;  %v22284_v57 = vld [vmem:[#allocation6 + $0x3d0] ss:$20 sps:$4 sm:$0xff]  }
 0x6ee   :  { %13926 = vmatpush1.bf16.msra.mxu1 %v22229_v58  ;;  %v22283_v58 = vld [vmem:[#allocation6 + $0x154c] ss:$20 sps:$4 sm:$0xff]  }
 0x6ef   :  { %14286 = vmatpush1.bf16.msra.mxu0 %v22232_v61  ;;  %13927 = vmatprep.subr.bf16.mxu1 %v22237_v17  ;;  %v22285_v61 = vld [vmem:[#allocation6 + $0x290] ss:$20 sps:$4 sm:$0xff]   ;;  %v22281_v17 = vld [vmem:[#allocation6 + $0x1548] ss:$20 sps:$4 sm:$0xff]  }
 0x6f0   :  { %14287 = vmatprep.subr.bf16.mxu0 %v22240_v63  ;;  %v22289_v63 = vld [vmem:[#allocation6 + $0x3f8] ss:$20 sps:$4 sm:$0xff]  }
 0x6f2   :  { %13928 = vmatpush1.bf16.msra.mxu1 %v22235_v2  ;;  %v22288_v2 = vld [vmem:[#allocation6 + $0x1574] ss:$20 sps:$4 sm:$0xff]  }
 0x6f3   :  { %14288 = vmatpush1.bf16.msra.mxu0 %v22238_v4  ;;  %19175 = vmatprep.subr.bf16.mxu1 %v22244_v5  ;;  %v22290_v4 = vld [vmem:[#allocation6 + $0x2b8] ss:$20 sps:$4 sm:$0xff]   ;;  %v22286_v5 = vld [vmem:[#allocation6 + $0x1570] ss:$20 sps:$4 sm:$0xff]  }
 0x6f4   :  { %14300 = vmatprep.subr.bf16.mxu0 %v22243_v6  ;;  %v22294_v6 = vld [vmem:[#allocation6 + $0x420] ss:$20 sps:$4 sm:$0xff]  }
 0x6f5   :  { %13946 = vmatmul.mubr.bf16.vlgmr.msra.gmra.mrb[32].mxu1 %v23507_v30 }
 0x6f6   :  { %14290 = vmatmul.mubr.bf16.vlgmr.msra.gmra.mrb[20].mxu0 %v23477_v36  ;;  %19176 = vmatpush3.bf16.msra.mxu1 %v22245_v24  ;;  %v22293_v24 = vld [vmem:[#allocation6 + $0x159c] ss:$20 sps:$4 sm:$0xff]  }
 0x6f7   :  { %14301 = vmatpush1.bf16.msra.mxu0 %v22241_v8  ;;  %14332 = vmatprep.mubr.bf16.mxu0 %v23519_v60  ;;  %v22295_v8 = vld [vmem:[#allocation6 + $0x2e0] ss:$20 sps:$4 sm:$0xff]  }
 0x6f8   :  { %14418 = vmatprep.mubr.bf16.mxu1 %v23372_v33  ;;  %14302 = vmatprep.subr.bf16.mxu0 %v22248_v41  ;;  %v22265_v33 = vld [vmem:[#allocation6 + $0xb0] ss:$20 sps:$4 sm:$0xff]   ;;  %v22291_v41 = vld [vmem:[#allocation6 + $0x1598] ss:$20 sps:$4 sm:$0xff]  }
 0x6f9   :  { %19177 = vmatprep.subr.bf16.mxu1 %v22249_v12  ;;  %v22299_v12 = vld [vmem:[#allocation6 + $0x448] ss:$20 sps:$4 sm:$0xff]  }
 0x6fa   :  { %19178 = vmatpush3.bf16.msra.mxu1 %v22250_v10  ;;  %v22298_v10 = vld [vmem:[#allocation6 + $0x15c4] ss:$20 sps:$4 sm:$0xff]  }
 0x6fb   :  { %14303 = vmatpush1.bf16.msra.mxu0 %v22246_v13  ;;  %19179 = vmatprep.subr.bf16.mxu1 %v22254_v14  ;;  %v22296_v13 = vld [vmem:[#allocation6 + $0x15c0] ss:$20 sps:$4 sm:$0xff]  }
 0x6fc   :  { %14304 = vmatprep.subr.bf16.mxu0 %v22253_v43  ;;  %v22303_v14 = vld [vmem:[#allocation6 + $0x15ec] ss:$20 sps:$4 sm:$0xff]   ;;  %v22305_v43 = vld [vmem:[#allocation6 + $0x330] ss:$20 sps:$4 sm:$0xff]  }
 0x6fe   :  { %19180 = vmatpush3.bf16.msra.mxu1 %v22255_v1  ;;  %v22301_v1 = vld [vmem:[#allocation6 + $0x15e8] ss:$20 sps:$4 sm:$0xff]  }
 0x6ff   :  { %14305 = vmatpush1.bf16.msra.mxu0 %v22251_v7  ;;  %19181 = vmatprep.subr.bf16.mxu1 %v22259_v44  ;;  %v22309_v7 = vld [vmem:[#allocation6 + $0x498] ss:$20 sps:$4 sm:$0xff]   ;;  %v22308_v44 = vld [vmem:[#allocation6 + $0x1614] ss:$20 sps:$4 sm:$0xff]  }
 0x700   :  { %14306 = vmatprep.subr.bf16.mxu0 %v22258_v45  ;;  %v22310_v45 = vld [vmem:[#allocation6 + $0x358] ss:$20 sps:$4 sm:$0xff]  }
 0x702   :  { %19182 = vmatpush3.bf16.msra.mxu1 %v22260_v15  ;;  %v22306_v15 = vld [vmem:[#allocation6 + $0x1610] ss:$20 sps:$4 sm:$0xff]  }
 0x703   :  { %14307 = vmatpush1.bf16.msra.mxu0 %v22256_v0  ;;  %19183 = vmatprep.subr.bf16.mxu1 %v22264_v11  ;;  %v22314_v0 = vld [vmem:[#allocation6 + $0x4c0] ss:$20 sps:$4 sm:$0xff]   ;;  %v22313_v11 = vld [vmem:[#allocation6 + $0x163c] ss:$20 sps:$4 sm:$0xff]  }
 0x704   :  { %14308 = vmatprep.subr.bf16.mxu0 %v22263_v16  ;;  %v22315_v16 = vld [vmem:[#allocation6 + $0x380] ss:$20 sps:$4 sm:$0xff]  }
 0x706   :  { %19184 = vmatpush3.bf16.msra.mxu1 %v22265_v33  ;;  %v22311_v33 = vld [vmem:[#allocation6 + $0x1638] ss:$20 sps:$4 sm:$0xff]  }
 0x707   :  { %14309 = vmatpush1.bf16.msra.mxu0 %v22261_v18  ;;  %19185 = vmatprep.subr.bf16.mxu1 %v22269_v50  ;;  %v22319_v18 = vld [vmem:[#allocation6 + $0x4e8] ss:$20 sps:$4 sm:$0xff]   ;;  %v22318_v50 = vld [vmem:[#allocation6 + $0x1664] ss:$20 sps:$4 sm:$0xff]  }
 0x708   :  { %14310 = vmatprep.subr.bf16.mxu0 %v22268_v19  ;;  %v22320_v19 = vld [vmem:[#allocation6 + $0x3a8] ss:$20 sps:$4 sm:$0xff]  }
 0x70a   :  { %19186 = vmatpush3.bf16.msra.mxu1 %v22270_v9  ;;  %v22316_v9 = vld [vmem:[#allocation6 + $0x1660] ss:$20 sps:$4 sm:$0xff]  }
 0x70b   :  { %14311 = vmatpush1.bf16.msra.mxu0 %v22266_v20  ;;  %19187 = vmatprep.subr.bf16.mxu1 %v22274_v21  ;;  %v22324_v20 = vld [vmem:[#allocation6 + $0x650] ss:$20 sps:$4 sm:$0xff]   ;;  %v22323_v21 = vld [vmem:[#allocation6 + $0x168c] ss:$20 sps:$4 sm:$0xff]  }
 0x70c   :  { %14312 = vmatprep.subr.bf16.mxu0 %v22273_v23  ;;  %v22325_v23 = vld [vmem:[#allocation6 + $0x510] ss:$20 sps:$4 sm:$0xff]  }
 0x70e   :  { %19188 = vmatpush3.bf16.msra.mxu1 %v22275_v26  ;;  %v22321_v26 = vld [vmem:[#allocation6 + $0x1688] ss:$20 sps:$4 sm:$0xff]  }
 0x70f   :  { %14313 = vmatpush1.bf16.msra.mxu0 %v22271_v27  ;;  %19189 = vmatprep.subr.bf16.mxu1 %v22279_v28  ;;  %v22328_v27 = vld [vmem:[#allocation6 + $0x16b4] ss:$20 sps:$4 sm:$0xff]   ;;  %v22329_v28 = vld [vmem:[#allocation6 + $0x678] ss:$20 sps:$4 sm:$0xff]  }
 0x710   :  { %14314 = vmatprep.subr.bf16.mxu0 %v22278_v34  ;;  %v22330_v34 = vld [vmem:[#allocation6 + $0x538] ss:$20 sps:$4 sm:$0xff]  }
 0x712   :  { %19190 = vmatpush3.bf16.msra.mxu1 %v22280_v39  ;;  %v22326_v39 = vld [vmem:[#allocation6 + $0x16b0] ss:$20 sps:$4 sm:$0xff]  }
 0x713   :  { %14315 = vmatpush1.bf16.msra.mxu0 %v22276_v54  ;;  %19197 = vmatprep.subr.bf16.mxu1 %v22284_v57  ;;  %v22334_v54 = vld [vmem:[#allocation6 + $0x6a0] ss:$20 sps:$4 sm:$0xff]   ;;  %v22333_v57 = vld [vmem:[#allocation6 + $0x16dc] ss:$20 sps:$4 sm:$0xff]  }
 0x714   :  { %14316 = vmatprep.subr.bf16.mxu0 %v22283_v58  ;;  %v22335_v58 = vld [vmem:[#allocation6 + $0x560] ss:$20 sps:$4 sm:$0xff]  }
 0x715   :  { %14419 = vmatmul.mubr.bf16.vlgmr.msra.gmra.mrb[36].mxu1 %v23368_v25  ;;  %v22300_v25 = vld [vmem:[#allocation6 + $0x308] ss:$20 sps:$4 sm:$0xff]  }
 0x716   :  { %19198 = vmatpush3.bf16.msra.mxu1 %v22285_v61  ;;  %14459 = vmatprep.mubr.bf16.mxu1 %v23374_v38  ;;  %v22304_v38 = vld [vmem:[#allocation6 + $0x470] ss:$20 sps:$4 sm:$0xff]   ;;  %v22331_v61 = vld [vmem:[#allocation6 + $0x16d8] ss:$20 sps:$4 sm:$0xff]  }
 0x717   :  { %14317 = vmatpush1.bf16.msra.mxu0 %v22281_v17  ;;  %19199 = vmatprep.subr.bf16.mxu1 %v22289_v63  ;;  %v22338_v17 = vld [vmem:[#allocation6 + $0x1704] ss:$20 sps:$4 sm:$0xff]   ;;  %v22340_v63 = vld [vmem:[#allocation6 + $0x588] ss:$20 sps:$4 sm:$0xff]  }
 0x718   :  { %14318 = vmatprep.subr.bf16.mxu0 %v22288_v2  ;;  %v22336_v2 = vld [vmem:[#allocation6 + $0x1700] ss:$20 sps:$4 sm:$0xff]  }
 0x71a   :  { %19200 = vmatpush3.bf16.msra.mxu1 %v22290_v4  ;;  %v22343_v4 = vld [vmem:[#allocation6 + $0x172c] ss:$20 sps:$4 sm:$0xff]  }
 0x71b   :  { %14319 = vmatpush1.bf16.msra.mxu0 %v22286_v5  ;;  %19201 = vmatprep.subr.bf16.mxu1 %v22294_v6  ;;  %v22345_v5 = vld [vmem:[#allocation6 + $0x5b0] ss:$20 sps:$4 sm:$0xff]   ;;  %v22341_v6 = vld [vmem:[#allocation6 + $0x1728] ss:$20 sps:$4 sm:$0xff]  }
 0x71c   :  { %14320 = vmatprep.subr.bf16.mxu0 %v22293_v24  ;;  %v22349_v24 = vld [vmem:[#allocation6 + $0x718] ss:$20 sps:$4 sm:$0xff]  }
 0x71e   :  { %19202 = vmatpush3.bf16.msra.mxu1 %v22295_v8  ;;  %v22348_v8 = vld [vmem:[#allocation6 + $0x1754] ss:$20 sps:$4 sm:$0xff]  }
 0x71f   :  { %14321 = vmatpush1.bf16.msra.mxu0 %v22291_v41  ;;  %19203 = vmatprep.subr.bf16.mxu1 %v22299_v12  ;;  %v22350_v41 = vld [vmem:[#allocation6 + $0x5d8] ss:$20 sps:$4 sm:$0xff]   ;;  %v22346_v12 = vld [vmem:[#allocation6 + $0x1750] ss:$20 sps:$4 sm:$0xff]  }
 0x720   :  { %14322 = vmatprep.subr.bf16.mxu0 %v22298_v10  ;;  %v22354_v10 = vld [vmem:[#allocation6 + $0x740] ss:$20 sps:$4 sm:$0xff]  }
 0x722   :  { %19204 = vmatpush3.bf16.msra.mxu1 %v22300_v25  ;;  %v22353_v25 = vld [vmem:[#allocation6 + $0x177c] ss:$20 sps:$4 sm:$0xff]  }
 0x723   :  { %14323 = vmatpush1.bf16.msra.mxu0 %v22296_v13  ;;  %19205 = vmatprep.subr.bf16.mxu1 %v22304_v38  ;;  %v22355_v13 = vld [vmem:[#allocation6 + $0x600] ss:$20 sps:$4 sm:$0xff]   ;;  %v22351_v38 = vld [vmem:[#allocation6 + $0x1778] ss:$20 sps:$4 sm:$0xff]  }
 0x724   :  { %14324 = vmatprep.subr.bf16.mxu0 %v22303_v14  ;;  %v22359_v14 = vld [vmem:[#allocation6 + $0x768] ss:$20 sps:$4 sm:$0xff]  }
 0x726   :  { %19206 = vmatpush3.bf16.msra.mxu1 %v22305_v43  ;;  %v22358_v43 = vld [vmem:[#allocation6 + $0x17a4] ss:$20 sps:$4 sm:$0xff]  }
 0x727   :  { %14325 = vmatpush1.bf16.msra.mxu0 %v22301_v1  ;;  %19207 = vmatprep.subr.bf16.mxu1 %v22309_v7  ;;  %v22360_v1 = vld [vmem:[#allocation6 + $0x628] ss:$20 sps:$4 sm:$0xff]   ;;  %v22356_v7 = vld [vmem:[#allocation6 + $0x17a0] ss:$20 sps:$4 sm:$0xff]  }
 0x728   :  { %14326 = vmatprep.subr.bf16.mxu0 %v22308_v44  ;;  %v22362_v44 = vld [vmem:[#allocation6 + $0xb50] ss:$20 sps:$4 sm:$0xff]  }
 0x72a   :  { %19208 = vmatpush3.bf16.msra.mxu1 %v22310_v45  ;;  %v22361_v45 = vld [vmem:[#allocation6 + $0x8d0] ss:$20 sps:$4 sm:$0xff]  }
 0x72b   :  { %14327 = vmatpush1.bf16.msra.mxu0 %v22306_v15  ;;  %19209 = vmatprep.subr.bf16.mxu1 %v22314_v0  ;;  %v22364_v15 = vld [vmem:[#allocation6 + $0xa10] ss:$20 sps:$4 sm:$0xff]  }
 0x72c   :  { %14328 = vmatprep.subr.bf16.mxu0 %v22313_v11  ;;  %v22363_v0 = vld [vmem:[#allocation6 + $0x790] ss:$20 sps:$4 sm:$0xff]   ;;  %v22365_v11 = vld [vmem:[#allocation6 + $0x8f8] ss:$20 sps:$4 sm:$0xff]  }
 0x72e   :  { %19210 = vmatpush3.bf16.msra.mxu1 %v22315_v16  ;;  %v22366_v16 = vld [vmem:[#allocation6 + $0xb78] ss:$20 sps:$4 sm:$0xff]  }
 0x72f   :  { %14329 = vmatpush1.bf16.msra.mxu0 %v22311_v33  ;;  %19211 = vmatprep.subr.bf16.mxu1 %v22319_v18  ;;  %v22368_v33 = vld [vmem:[#allocation6 + $0xa38] ss:$20 sps:$4 sm:$0xff]  }
 0x730   :  { %14330 = vmatprep.subr.bf16.mxu0 %v22318_v50  ;;  %v22367_v18 = vld [vmem:[#allocation6 + $0x7b8] ss:$20 sps:$4 sm:$0xff]   ;;  %v22370_v50 = vld [vmem:[#allocation6 + $0xba0] ss:$20 sps:$4 sm:$0xff]  }
 0x732   :  { %19212 = vmatpush3.bf16.msra.mxu1 %v22320_v19  ;;  %v22369_v19 = vld [vmem:[#allocation6 + $0x920] ss:$20 sps:$4 sm:$0xff]  }
 0x733   :  { %14331 = vmatpush1.bf16.msra.mxu0 %v22316_v9  ;;  %19219 = vmatprep.subr.bf16.mxu1 %v22324_v20  ;;  %v22372_v9 = vld [vmem:[#allocation6 + $0xa60] ss:$20 sps:$4 sm:$0xff]   ;;  %v22374_v20 = vld [vmem:[#allocation6 + $0xbc8] ss:$20 sps:$4 sm:$0xff]  }
 0x734   :  { %14343 = vmatprep.subr.bf16.mxu0 %v22323_v21  ;;  %v22373_v21 = vld [vmem:[#allocation6 + $0x948] ss:$20 sps:$4 sm:$0xff]  }
 0x735   :  { %14460 = vmatmul.mubr.bf16.vlgmr.msra.gmra.mrb[40].mxu1 %v23370_v29  ;;  %v22339_v29 = vld [vmem:[#allocation6 + $0x6c8] ss:$20 sps:$4 sm:$0xff]  }
 0x736   :  { %14333 = vmatmul.mubr.bf16.vlgmr.msra.gmra.mrb[20].mxu0 %v23517_v48  ;;  %19220 = vmatpush3.bf16.msra.mxu1 %v22325_v23  ;;  %v22376_v23 = vld [vmem:[#allocation6 + $0xa88] ss:$20 sps:$4 sm:$0xff]  }
 0x737   :  { %14344 = vmatpush1.bf16.msra.mxu0 %v22321_v26  ;;  %14500 = vmatprep.mubr.bf16.mxu1 %v23409_v47  ;;  %v22344_v47 = vld [vmem:[#allocation6 + $0x6f0] ss:$20 sps:$4 sm:$0xff]  }
 0x738   :  { %14345 = vmatprep.subr.bf16.mxu0 %v22328_v27  ;;  %19221 = vmatprep.subr.bf16.mxu1 %v22329_v28  ;;  %v22378_v26 = vld [vmem:[#allocation6 + $0xbf0] ss:$20 sps:$4 sm:$0xff]  }
 0x739   :  { %14375 = vmatprep.mubr.bf16.mxu0 %v23104_v35  ;;  %v22377_v27 = vld [vmem:[#allocation6 + $0x970] ss:$20 sps:$4 sm:$0xff]  }
 0x73a   :  { %19222 = vmatpush3.bf16.msra.mxu1 %v22330_v34  ;;  %v22379_v28 = vld [vmem:[#allocation6 + $0x830] ss:$20 sps:$4 sm:$0xff]   ;;  %v22382_v34 = vld [vmem:[#allocation6 + $0xc18] ss:$20 sps:$4 sm:$0xff]  }
 0x73b   :  { %14346 = vmatpush1.bf16.msra.mxu0 %v22326_v39  ;;  %19223 = vmatprep.subr.bf16.mxu1 %v22334_v54  ;;  %v22381_v39 = vld [vmem:[#allocation6 + $0x998] ss:$20 sps:$4 sm:$0xff]  }
 0x73c   :  { %14347 = vmatprep.subr.bf16.mxu0 %v22333_v57  ;;  %v22384_v54 = vld [vmem:[#allocation6 + $0xad8] ss:$20 sps:$4 sm:$0xff]  }
 0x73d   :  { %v22383_v57 = vld [vmem:[#allocation6 + $0x858] ss:$20 sps:$4 sm:$0xff]  }
 0x73e   :  { %19224 = vmatpush3.bf16.msra.mxu1 %v22335_v58  ;;  %v22386_v58 = vld [vmem:[#allocation6 + $0xc40] ss:$20 sps:$4 sm:$0xff]  }
 0x73f   :  { %14348 = vmatpush1.bf16.msra.mxu0 %v22331_v61  ;;  %19225 = vmatprep.subr.bf16.mxu1 %v22339_v29  ;;  %v22385_v61 = vld [vmem:[#allocation6 + $0x9c0] ss:$20 sps:$4 sm:$0xff]  }
 0x740   :  { %14349 = vmatprep.subr.bf16.mxu0 %v22338_v17  ;;  %v22388_v29 = vld [vmem:[#allocation6 + $0xb00] ss:$20 sps:$4 sm:$0xff]  }
 0x741   :  { %v22387_v17 = vld [vmem:[#allocation6 + $0x880] ss:$20 sps:$4 sm:$0xff]  }
 0x742   :  { %19226 = vmatpush3.bf16.msra.mxu1 %v22340_v63  ;;  %v22390_v63 = vld [vmem:[#allocation6 + $0xc68] ss:$20 sps:$4 sm:$0xff]  }
 0x743   :  { %14350 = vmatpush1.bf16.msra.mxu0 %v22336_v2  ;;  %19227 = vmatprep.subr.bf16.mxu1 %v22344_v47  ;;  %v22389_v2 = vld [vmem:[#allocation6 + $0x9e8] ss:$20 sps:$4 sm:$0xff]  }
 0x744   :  { %14351 = vmatprep.subr.bf16.mxu0 %v22343_v4  ;;  %v22392_v47 = vld [vmem:[#allocation6 + $0xb28] ss:$20 sps:$4 sm:$0xff]  }
 0x745   :  { %v22391_v4 = vld [vmem:[#allocation6 + $0x8a8] ss:$20 sps:$4 sm:$0xff]  }
 0x746   :  { %19228 = vmatpush3.bf16.msra.mxu1 %v22345_v5  ;;  %v22394_v5 = vld [vmem:[#allocation6 + $0x1050] ss:$20 sps:$4 sm:$0xff]  }
 0x747   :  { %14352 = vmatpush1.bf16.msra.mxu0 %v22341_v6  ;;  %19229 = vmatprep.subr.bf16.mxu1 %v22349_v24  ;;  %v22393_v6 = vld [vmem:[#allocation6 + $0xdd0] ss:$20 sps:$4 sm:$0xff]  }
 0x748   :  { %14353 = vmatprep.subr.bf16.mxu0 %v22348_v8  ;;  %v22396_v24 = vld [vmem:[#allocation6 + $0xf10] ss:$20 sps:$4 sm:$0xff]  }
 0x749   :  { %v22395_v8 = vld [vmem:[#allocation6 + $0xc90] ss:$20 sps:$4 sm:$0xff]  }
 0x74a   :  { %19230 = vmatpush3.bf16.msra.mxu1 %v22350_v41  ;;  %v22397_v41 = vld [vmem:[#allocation6 + $0xdf8] ss:$20 sps:$4 sm:$0xff]  }
 0x74b   :  { %14354 = vmatpush1.bf16.msra.mxu0 %v22346_v12  ;;  %19231 = vmatprep.subr.bf16.mxu1 %v22354_v10  ;;  %v22398_v12 = vld [vmem:[#allocation6 + $0x1078] ss:$20 sps:$4 sm:$0xff]  }
 0x74c   :  { %14355 = vmatprep.subr.bf16.mxu0 %v22353_v25  ;;  %v22400_v10 = vld [vmem:[#allocation6 + $0xf38] ss:$20 sps:$4 sm:$0xff]  }
 0x74d   :  { %v22399_v25 = vld [vmem:[#allocation6 + $0xcb8] ss:$20 sps:$4 sm:$0xff]  }
 0x74e   :  { %19232 = vmatpush3.bf16.msra.mxu1 %v22355_v13  ;;  %v22402_v13 = vld [vmem:[#allocation6 + $0x10a0] ss:$20 sps:$4 sm:$0xff]  }
 0x74f   :  { %14356 = vmatpush1.bf16.msra.mxu0 %v22351_v38  ;;  %19233 = vmatprep.subr.bf16.mxu1 %v22359_v14  ;;  %v22401_v38 = vld [vmem:[#allocation6 + $0xe20] ss:$20 sps:$4 sm:$0xff]  }
 0x750   :  { %14357 = vmatprep.subr.bf16.mxu0 %v22358_v43  ;;  %v22404_v14 = vld [vmem:[#allocation6 + $0xf60] ss:$20 sps:$4 sm:$0xff]   ;;  %v22406_v43 = vld [vmem:[#allocation6 + $0x10c8] ss:$20 sps:$4 sm:$0xff]  }
 0x752   :  { %19234 = vmatpush3.bf16.msra.mxu1 %v22360_v1  ;;  %v22408_v1 = vld [vmem:[#allocation6 + $0xf88] ss:$20 sps:$4 sm:$0xff]  }
 0x753   :  { %14358 = vmatpush1.bf16.msra.mxu0 %v22356_v7  ;;  %19263 = vmatprep.subr.bf16.mxu1 %v22362_v44  ;;  %v22410_v7 = vld [vmem:[#allocation6 + $0x10f0] ss:$20 sps:$4 sm:$0xff]  }
 0x754   :  { %19241 = vmatprep.subr.bf16.mxu0 %v22361_v45  ;;  %v22409_v44 = vld [vmem:[#allocation6 + $0xe70] ss:$20 sps:$4 sm:$0xff]  }
 0x755   :  { %14501 = vmatmul.mubr.bf16.vlgmr.msra.gmra.mrb[44].mxu1 %v23405_v31  ;;  %v22371_v31 = vld [vmem:[#allocation6 + $0x7e0] ss:$20 sps:$4 sm:$0xff]   ;;  %v22411_v45 = vld [vmem:[#allocation6 + $0xd30] ss:$20 sps:$4 sm:$0xff]  }
 0x756   :  { %14376 = vmatmul.mubr.bf16.vlgmr.msra.gmra.mrb[20].mxu0 %v23507_v30  ;;  %19264 = vmatpush3.bf16.msra.mxu1 %v22364_v15  ;;  %v22414_v15 = vld [vmem:[#allocation6 + $0x1118] ss:$20 sps:$4 sm:$0xff]  }
 0x757   :  { %19242 = vmatpush3.bf16.msra.mxu0 %v22363_v0  ;;  %14541 = vmatprep.mubr.bf16.mxu0 %v23411_v53  ;;  %v22375_v53 = vld [vmem:[#allocation6 + $0x808] ss:$20 sps:$4 sm:$0xff]   ;;  %v22413_v0 = vld [vmem:[#allocation6 + $0xe98] ss:$20 sps:$4 sm:$0xff]  }
 0x758   :  { %14582 = vmatprep.mubr.bf16.mxu1 %v23437_v59  ;;  %19243 = vmatprep.subr.bf16.mxu0 %v22365_v11  ;;  %v22380_v59 = vld [vmem:[#allocation6 + $0xab0] ss:$20 sps:$4 sm:$0xff]   ;;  %v22416_v11 = vld [vmem:[#allocation6 + $0xfd8] ss:$20 sps:$4 sm:$0xff]  }
 0x759   :  { %19265 = vmatprep.subr.bf16.mxu1 %v22366_v16  ;;  %v22415_v16 = vld [vmem:[#allocation6 + $0xd58] ss:$20 sps:$4 sm:$0xff]  }
 0x75a   :  { %19266 = vmatpush3.bf16.msra.mxu1 %v22368_v33  ;;  %v22418_v33 = vld [vmem:[#allocation6 + $0x1140] ss:$20 sps:$4 sm:$0xff]  }
 0x75b   :  { %19244 = vmatpush3.bf16.msra.mxu0 %v22367_v18  ;;  %19267 = vmatprep.subr.bf16.mxu1 %v22370_v50  ;;  %v22417_v18 = vld [vmem:[#allocation6 + $0xec0] ss:$20 sps:$4 sm:$0xff]  }
 0x75c   :  { %19245 = vmatprep.subr.bf16.mxu0 %v22369_v19  ;;  %v22420_v50 = vld [vmem:[#allocation6 + $0x1000] ss:$20 sps:$4 sm:$0xff]  }
 0x75d   :  { %v22419_v19 = vld [vmem:[#allocation6 + $0xd80] ss:$20 sps:$4 sm:$0xff]  }
 0x75e   :  { %19268 = vmatpush3.bf16.msra.mxu1 %v22372_v9  ;;  %v22422_v9 = vld [vmem:[#allocation6 + $0x1168] ss:$20 sps:$4 sm:$0xff]  }
 0x75f   :  { %19246 = vmatpush3.bf16.msra.mxu0 %v22371_v31  ;;  %19269 = vmatprep.subr.bf16.mxu1 %v22374_v20  ;;  %v22421_v31 = vld [vmem:[#allocation6 + $0xee8] ss:$20 sps:$4 sm:$0xff]  }
 0x760   :  { %19247 = vmatprep.subr.bf16.mxu0 %v22373_v21  ;;  %v22424_v20 = vld [vmem:[#allocation6 + $0x1028] ss:$20 sps:$4 sm:$0xff]  }
 0x761   :  { %v22423_v21 = vld [vmem:[#allocation6 + $0xda8] ss:$20 sps:$4 sm:$0xff]  }
 0x762   :  { %19270 = vmatpush3.bf16.msra.mxu1 %v22376_v23  ;;  %v22426_v23 = vld [vmem:[#allocation6 + $0x1550] ss:$20 sps:$4 sm:$0xff]  }
 0x763   :  { %19248 = vmatpush3.bf16.msra.mxu0 %v22375_v53  ;;  %19271 = vmatprep.subr.bf16.mxu1 %v22378_v26  ;;  %v22425_v53 = vld [vmem:[#allocation6 + $0x12d0] ss:$20 sps:$4 sm:$0xff]  }
 0x764   :  { %19249 = vmatprep.subr.bf16.mxu0 %v22377_v27  ;;  %v22428_v26 = vld [vmem:[#allocation6 + $0x1410] ss:$20 sps:$4 sm:$0xff]  }
 0x765   :  { %v22427_v27 = vld [vmem:[#allocation6 + $0x1190] ss:$20 sps:$4 sm:$0xff]  }
 0x766   :  { %19272 = vmatpush3.bf16.msra.mxu1 %v22380_v59  ;;  %v22429_v59 = vld [vmem:[#allocation6 + $0x12f8] ss:$20 sps:$4 sm:$0xff]  }
 0x767   :  { %19250 = vmatpush3.bf16.msra.mxu0 %v22379_v28  ;;  %19273 = vmatprep.subr.bf16.mxu1 %v22382_v34  ;;  %v22430_v28 = vld [vmem:[#allocation6 + $0x1578] ss:$20 sps:$4 sm:$0xff]  }
 0x768   :  { %19251 = vmatprep.subr.bf16.mxu0 %v22381_v39  ;;  %v22432_v34 = vld [vmem:[#allocation6 + $0x1438] ss:$20 sps:$4 sm:$0xff]  }
 0x769   :  { %v22431_v39 = vld [vmem:[#allocation6 + $0x11b8] ss:$20 sps:$4 sm:$0xff]  }
 0x76a   :  { %19274 = vmatpush3.bf16.msra.mxu1 %v22384_v54  ;;  %v22434_v54 = vld [vmem:[#allocation6 + $0x15a0] ss:$20 sps:$4 sm:$0xff]  }
 0x76b   :  { %19252 = vmatpush3.bf16.msra.mxu0 %v22383_v57  ;;  %19275 = vmatprep.subr.bf16.mxu1 %v22386_v58  ;;  %v22433_v57 = vld [vmem:[#allocation6 + $0x1320] ss:$20 sps:$4 sm:$0xff]  }
 0x76c   :  { %19253 = vmatprep.subr.bf16.mxu0 %v22385_v61  ;;  %v22436_v58 = vld [vmem:[#allocation6 + $0x1460] ss:$20 sps:$4 sm:$0xff]   ;;  %v22438_v61 = vld [vmem:[#allocation6 + $0x15c8] ss:$20 sps:$4 sm:$0xff]  }
 0x76e   :  { %19276 = vmatpush3.bf16.msra.mxu1 %v22388_v29  ;;  %v22440_v29 = vld [vmem:[#allocation6 + $0x1488] ss:$20 sps:$4 sm:$0xff]  }
 0x76f   :  { %19254 = vmatpush3.bf16.msra.mxu0 %v22387_v17  ;;  %19277 = vmatprep.subr.bf16.mxu1 %v22390_v63  ;;  %v22442_v17 = vld [vmem:[#allocation6 + $0x15f0] ss:$20 sps:$4 sm:$0xff]  }
 0x770   :  { %19255 = vmatprep.subr.bf16.mxu0 %v22389_v2  ;;  %v22441_v63 = vld [vmem:[#allocation6 + $0x1370] ss:$20 sps:$4 sm:$0xff]  }
 0x771   :  { %v22443_v2 = vld [vmem:[#allocation6 + $0x1230] ss:$20 sps:$4 sm:$0xff]  }
 0x772   :  { %19278 = vmatpush3.bf16.msra.mxu1 %v22392_v47  ;;  %v22446_v47 = vld [vmem:[#allocation6 + $0x1618] ss:$20 sps:$4 sm:$0xff]  }
 0x773   :  { %19256 = vmatpush3.bf16.msra.mxu0 %v22391_v4  ;;  %19307 = vmatprep.subr.bf16.mxu1 %v22394_v5  ;;  %v22445_v4 = vld [vmem:[#allocation6 + $0x1398] ss:$20 sps:$4 sm:$0xff]  }
 0x774   :  { %19285 = vmatprep.subr.bf16.mxu0 %v22393_v6  ;;  %v22448_v5 = vld [vmem:[#allocation6 + $0x14d8] ss:$20 sps:$4 sm:$0xff]  }
 0x775   :  { %14583 = vmatmul.mubr.bf16.vlgmr.msra.gmra.mrb[48].mxu1 %v23433_v42  ;;  %v22403_v42 = vld [vmem:[#allocation6 + $0xce0] ss:$20 sps:$4 sm:$0xff]   ;;  %v22447_v6 = vld [vmem:[#allocation6 + $0x1258] ss:$20 sps:$4 sm:$0xff]  }
 0x776   :  { %14542 = vmatmul.mubr.bf16.vlgmr.msra.gmra.mrb[24].mxu0 %v23407_v37  ;;  %19308 = vmatpush3.bf16.msra.mxu1 %v22396_v24  ;;  %v22405_v37 = vld [vmem:[#allocation6 + $0xe48] ss:$20 sps:$4 sm:$0xff]   ;;  %v22450_v24 = vld [vmem:[#allocation6 + $0x1640] ss:$20 sps:$4 sm:$0xff]  }
 0x777   :  { %19286 = vmatpush3.bf16.msra.mxu0 %v22395_v8  ;;  %14623 = vmatprep.mubr.bf16.mxu0 %v23439_v62  ;;  %v22407_v62 = vld [vmem:[#allocation6 + $0xd08] ss:$20 sps:$4 sm:$0xff]   ;;  %v22449_v8 = vld [vmem:[#allocation6 + $0x13c0] ss:$20 sps:$4 sm:$0xff]  }
 0x778   :  { %14664 = vmatprep.mubr.bf16.mxu1 %v23479_v32  ;;  %19287 = vmatprep.subr.bf16.mxu0 %v22397_v41  ;;  %v22412_v32 = vld [vmem:[#allocation6 + $0xfb0] ss:$20 sps:$4 sm:$0xff]   ;;  %v22452_v41 = vld [vmem:[#allocation6 + $0x1500] ss:$20 sps:$4 sm:$0xff]  }
 0x779   :  { %19309 = vmatprep.subr.bf16.mxu1 %v22398_v12  ;;  %v22451_v12 = vld [vmem:[#allocation6 + $0x1280] ss:$20 sps:$4 sm:$0xff]  }
 0x77a   :  { %19310 = vmatpush3.bf16.msra.mxu1 %v22400_v10  ;;  %v22454_v10 = vld [vmem:[#allocation6 + $0x1668] ss:$20 sps:$4 sm:$0xff]  }
 0x77b   :  { %19288 = vmatpush3.bf16.msra.mxu0 %v22399_v25  ;;  %19311 = vmatprep.subr.bf16.mxu1 %v22402_v13  ;;  %v22453_v25 = vld [vmem:[#allocation6 + $0x13e8] ss:$20 sps:$4 sm:$0xff]  }
 0x77c   :  { %19289 = vmatprep.subr.bf16.mxu0 %v22401_v38  ;;  %v22456_v13 = vld [vmem:[#allocation6 + $0x1528] ss:$20 sps:$4 sm:$0xff]  }
 0x77d   :  { %v22455_v38 = vld [vmem:[#allocation6 + $0x12a8] ss:$20 sps:$4 sm:$0xff]  }
 0x77e   :  { %19312 = vmatpush3.bf16.msra.mxu1 %v22404_v14  ;;  %v22459_v14 = vld [vmem:[#allocation9 + $0x4] ss:$20 sps:$4 sm:$0xff]  }
 0x77f   :  { %19290 = vmatpush3.bf16.msra.mxu0 %v22403_v42  ;;  %19313 = vmatprep.subr.bf16.mxu1 %v22406_v43  ;;  %v22457_v42 = vld [vmem:[#allocation9] ss:$20 sps:$4 sm:$0xff]  }
 0x780   :  { %19291 = vmatprep.subr.bf16.mxu0 %v22405_v37  ;;  %v22460_v43 = vld [vmem:[#allocation6 + $0x1690] ss:$20 sps:$4 sm:$0xff]  }
 0x781   :  { %v22463_v37 = vld [vmem:[#allocation9 + $0x2c] ss:$20 sps:$4 sm:$0xff]  }
 0x782   :  { %19314 = vmatpush3.bf16.msra.mxu1 %v22408_v1  ;;  %v22461_v1 = vld [vmem:[#allocation9 + $0x28] ss:$20 sps:$4 sm:$0xff]  }
 0x783   :  { %19292 = vmatpush3.bf16.msra.mxu0 %v22407_v62  ;;  %19315 = vmatprep.subr.bf16.mxu1 %v22410_v7  ;;  %v22464_v62 = vld [vmem:[#allocation6 + $0x16b8] ss:$20 sps:$4 sm:$0xff]  }
 0x784   :  { %19293 = vmatprep.subr.bf16.mxu0 %v22409_v44  ;;  %v22467_v7 = vld [vmem:[#allocation9 + $0x54] ss:$20 sps:$4 sm:$0xff]   ;;  %v22465_v44 = vld [vmem:[#allocation9 + $0x50] ss:$20 sps:$4 sm:$0xff]  }
 0x786   :  { %19316 = vmatpush3.bf16.msra.mxu1 %v22412_v32  ;;  %v22468_v32 = vld [vmem:[#allocation6 + $0x16e0] ss:$20 sps:$4 sm:$0xff]  }
 0x787   :  { %19294 = vmatpush3.bf16.msra.mxu0 %v22411_v45  ;;  %19317 = vmatprep.subr.bf16.mxu1 %v22414_v15  ;;  %v22471_v45 = vld [vmem:[#allocation9 + $0x7c] ss:$20 sps:$4 sm:$0xff]   ;;  %v22475_v15 = vld [vmem:[#allocation9 + $0xa4] ss:$20 sps:$4 sm:$0xff]  }
 0x788   :  { %19295 = vmatprep.subr.bf16.mxu0 %v22413_v0  ;;  %v22473_v0 = vld [vmem:[#allocation9 + $0xa0] ss:$20 sps:$4 sm:$0xff]  }
 0x78a   :  { %19318 = vmatpush3.bf16.msra.mxu1 %v22416_v11  ;;  %v23567_v11 = vld [vmem:[#allocation7] sm:$0x1f] }
 0x78b   :  { %19296 = vmatpush3.bf16.msra.mxu0 %v22415_v16  ;;  %19319 = vmatprep.subr.bf16.mxu1 %v22418_v33  ;;  %v22476_v16 = vld [vmem:[#allocation6 + $0x1730] ss:$20 sps:$4 sm:$0xff]  }
 0x78c   :  { %19297 = vmatprep.subr.bf16.mxu0 %v22417_v18  ;;  %v22479_v33 = vld [vmem:[#allocation9 + $0xcc] ss:$20 sps:$4 sm:$0xff]   ;;  %v9552_v18 = vrot.slane %v23567_v11, %v23349_v51 }
 0x78e   :  { %19320 = vmatpush3.bf16.msra.mxu1 %v22420_v50  ;;  %v9556_v50 = vrot.slane %v23567_v11, %v23355_v55 }
 0x78f   :  { %19298 = vmatpush3.bf16.msra.mxu0 %v22419_v19  ;;  %19321 = vmatprep.subr.bf16.mxu1 %v22422_v9  ;;  %v22477_v19 = vld [vmem:[#allocation9 + $0xc8] ss:$20 sps:$4 sm:$0xff]  }
 0x790   :  { %19299 = vmatprep.subr.bf16.mxu0 %v22421_v31  ;;  %v22480_v9 = vld [vmem:[#allocation6 + $0x1758] ss:$20 sps:$4 sm:$0xff]  }
 0x791   :  { %v22483_v31 = vld [vmem:[#allocation9 + $0xf4] ss:$20 sps:$4 sm:$0xff]  }
 0x792   :  { %19322 = vmatpush3.bf16.msra.mxu1 %v22424_v20 }
 0x793   :  { %19300 = vmatpush3.bf16.msra.mxu0 %v22423_v21  ;;  %19351 = vmatprep.subr.bf16.mxu1 %v22426_v23 }
 0x794   :  { %19329 = vmatprep.subr.bf16.mxu0 %v22425_v53 }
 0x795   :  { %14665 = vmatmul.mubr.bf16.vlgmr.msra.gmra.mrb[52].mxu1 %v23475_v22  ;;  %v22435_v22 = vld [vmem:[#allocation6 + $0x11e0] ss:$20 sps:$4 sm:$0xff]  }
 0x796   :  { %14624 = vmatmul.mubr.bf16.vlgmr.msra.gmra.mrb[28].mxu0 %v23435_v49  ;;  %19352 = vmatpush3.bf16.msra.mxu1 %v22428_v26  ;;  %v22437_v49 = vld [vmem:[#allocation6 + $0x1348] ss:$20 sps:$4 sm:$0xff]  }
 0x797   :  { %19330 = vmatpush3.bf16.msra.mxu0 %v22427_v27  ;;  %14705 = vmatprep.mubr.bf16.mxu0 %v23481_v46  ;;  %v22439_v46 = vld [vmem:[#allocation6 + $0x1208] ss:$20 sps:$4 sm:$0xff]  }
 0x798   :  { %14746 = vmatprep.mubr.bf16.mxu1 %v23519_v60  ;;  %19331 = vmatprep.subr.bf16.mxu0 %v22429_v59  ;;  %v22444_v60 = vld [vmem:[#allocation6 + $0x14b0] ss:$20 sps:$4 sm:$0xff]   ;;  %v22481_v27 = vld [vmem:[#allocation9 + $0xf0] ss:$20 sps:$4 sm:$0xff]  }
 0x799   :  { %19353 = vmatprep.subr.bf16.mxu1 %v22430_v28 }
 0x79a   :  { %19354 = vmatpush3.bf16.msra.mxu1 %v22432_v34 }
 0x79b   :  { %19332 = vmatpush3.bf16.msra.mxu0 %v22431_v39  ;;  %19355 = vmatprep.subr.bf16.mxu1 %v22434_v54  ;;  %v22484_v39 = vld [vmem:[#allocation6 + $0x1780] ss:$20 sps:$4 sm:$0xff]  }
 0x79c   :  { %19333 = vmatprep.subr.bf16.mxu0 %v22433_v57  ;;  %v22487_v54 = vld [vmem:[#allocation9 + $0x11c] ss:$20 sps:$4 sm:$0xff]  }
 0x79e   :  { %19356 = vmatpush3.bf16.msra.mxu1 %v22436_v58 }
 0x79f   :  { %19334 = vmatpush3.bf16.msra.mxu0 %v22435_v22  ;;  %19357 = vmatprep.subr.bf16.mxu1 %v22438_v61 }
 0x7a0   :  { %19335 = vmatprep.subr.bf16.mxu0 %v22437_v49  ;;  %v22485_v49 = vld [vmem:[#allocation9 + $0x118] ss:$20 sps:$4 sm:$0xff]  }
 0x7a2   :  { %19358 = vmatpush3.bf16.msra.mxu1 %v22440_v29  ;;  %v22488_v29 = vld [vmem:[#allocation6 + $0x17a8] ss:$20 sps:$4 sm:$0xff]  }
 0x7a3   :  { %19336 = vmatpush3.bf16.msra.mxu0 %v22439_v46  ;;  %19359 = vmatprep.subr.bf16.mxu1 %v22442_v17  ;;  %v22491_v46 = vld [vmem:[#allocation9 + $0x144] ss:$20 sps:$4 sm:$0xff]   ;;  %v22494_v17 = vld [vmem:[#allocation9 + $0xc] ss:$20 sps:$4 sm:$0xff]  }
 0x7a4   :  { %19337 = vmatprep.subr.bf16.mxu0 %v22441_v63  ;;  %v22489_v63 = vld [vmem:[#allocation9 + $0x140] ss:$20 sps:$4 sm:$0xff]  }
 0x7a6   :  { %19360 = vmatpush3.bf16.msra.mxu1 %v22444_v60  ;;  %v22492_v60 = vld [vmem:[#allocation9 + $0x8] ss:$20 sps:$4 sm:$0xff]  }
 0x7a7   :  { %19338 = vmatpush3.bf16.msra.mxu0 %v22443_v2  ;;  %19361 = vmatprep.subr.bf16.mxu1 %v22446_v47  ;;  %v22497_v2 = vld [vmem:[#allocation9 + $0x16c] ss:$20 sps:$4 sm:$0xff]   ;;  %v22500_v47 = vld [vmem:[#allocation9 + $0x34] ss:$20 sps:$4 sm:$0xff]  }
 0x7a8   :  { %19339 = vmatprep.subr.bf16.mxu0 %v22445_v4  ;;  %v22495_v4 = vld [vmem:[#allocation9 + $0x168] ss:$20 sps:$4 sm:$0xff]  }
 0x7aa   :  { %19362 = vmatpush3.bf16.msra.mxu1 %v22448_v5 }
 0x7ab   :  { %19340 = vmatpush3.bf16.msra.mxu0 %v22447_v6  ;;  %19363 = vmatprep.subr.bf16.mxu1 %v22450_v24  ;;  %v22498_v6 = vld [vmem:[#allocation9 + $0x30] ss:$20 sps:$4 sm:$0xff]   ;;  %v22503_v24 = vld [vmem:[#allocation9 + $0x194] ss:$20 sps:$4 sm:$0xff]  }
 0x7ac   :  { %19341 = vmatprep.subr.bf16.mxu0 %v22449_v8 }
 0x7ae   :  { %19364 = vmatpush3.bf16.msra.mxu1 %v22452_v41 }
 0x7af   :  { %19342 = vmatpush3.bf16.msra.mxu0 %v22451_v12  ;;  %19365 = vmatprep.subr.bf16.mxu1 %v22454_v10  ;;  %v22506_v12 = vld [vmem:[#allocation9 + $0x5c] ss:$20 sps:$4 sm:$0xff]  }
 0x7b0   :  { %19343 = vmatprep.subr.bf16.mxu0 %v22453_v25 }
 0x7b2   :  { %19366 = vmatpush3.bf16.msra.mxu1 %v22456_v13 }
 0x7b3   :  { %19344 = vmatpush3.bf16.msra.mxu0 %v22455_v38  ;;  %16148 = vmatprep.subr.bf16.mxu1 %v22459_v14  ;;  %v22501_v14 = vld [vmem:[#allocation9 + $0x190] ss:$20 sps:$4 sm:$0xff]  }
 0x7b4   :  { %19508 = vmatprep.subr.bf16.mxu0 %v23105_v3 }
 0x7b5   :  { %14747 = vmatmul.mubr.bf16.vlgmr.msra.gmra.mrb[56].mxu1 %v23517_v48  ;;  %v22472_v48 = vld [vmem:[#allocation6 + $0x1708] ss:$20 sps:$4 sm:$0xff]  }
 0x7b6   :  { %14706 = vmatmul.mubr.bf16.vlgmr.msra.gmra.mrb[32].mxu0 %v23477_v36  ;;  %16149 = vmatpush1.bf16.msra.mxu1 %v22457_v42  ;;  %v22469_v36 = vld [vmem:[#allocation9 + $0x78] ss:$20 sps:$4 sm:$0xff]  }
 0x7b7   :  { %19509 = vmatpush3.bf16.msra.mxu0 %v22460_v43  ;;  %16150 = vmatprep.subr.bf16.mxu1 %v22463_v37  ;;  %v22509_v43 = vld [vmem:[#allocation9 + $0x1bc] ss:$20 sps:$4 sm:$0xff]  }
 0x7b8   :  { %19510 = vmatprep.subr.bf16.mxu0 %v23105_v3  ;;  %19524 = vmatprep.mubr.msk.bf16.mxu0 %vm23106_vm0, %v23105_v3 }
 0x7ba   :  { %16151 = vmatpush1.bf16.msra.mxu1 %v22461_v1 }
 0x7bb   :  { %19511 = vmatpush3.bf16.msra.mxu0 %v22464_v62  ;;  %16152 = vmatprep.subr.bf16.mxu1 %v22467_v7  ;;  %v22512_v62 = vld [vmem:[#allocation9 + $0x84] ss:$20 sps:$4 sm:$0xff]  }
 0x7bc   :  { %19512 = vmatprep.subr.bf16.mxu0 %v23105_v3 }
 0x7be   :  { %16153 = vmatpush1.bf16.msra.mxu1 %v22465_v44 }
 0x7bf   :  { %19513 = vmatpush3.bf16.msra.mxu0 %v22468_v32  ;;  %16154 = vmatprep.subr.bf16.mxu1 %v22471_v45  ;;  %v22507_v45 = vld [vmem:[#allocation9 + $0x1b8] ss:$20 sps:$4 sm:$0xff]  }
 0x7c0   :  { %19514 = vmatprep.subr.bf16.mxu0 %v23105_v3 }
 0x7c2   :  { %16155 = vmatpush1.bf16.msra.mxu1 %v22469_v36 }
 0x7c3   :  { %19515 = vmatpush3.bf16.msra.mxu0 %v22472_v48  ;;  %16156 = vmatprep.subr.bf16.mxu1 %v22475_v15  ;;  %v22510_v48 = vld [vmem:[#allocation9 + $0x80] ss:$20 sps:$4 sm:$0xff]   ;;  %v22515_v15 = vld [vmem:[#allocation9 + $0x1e4] ss:$20 sps:$4 sm:$0xff]  }
 0x7c4   :  { %19516 = vmatprep.subr.bf16.mxu0 %v23105_v3 }
 0x7c6   :  { %16157 = vmatpush1.bf16.msra.mxu1 %v22473_v0  ;;  %v22518_v0 = vld [vmem:[#allocation9 + $0xac] ss:$20 sps:$4 sm:$0xff]  }
 0x7c7   :  { %19517 = vmatpush3.bf16.msra.mxu0 %v22476_v16  ;;  %16158 = vmatprep.subr.bf16.mxu1 %v22479_v33  ;;  %v22513_v16 = vld [vmem:[#allocation9 + $0x1e0] ss:$20 sps:$4 sm:$0xff]   ;;  %v22516_v33 = vld [vmem:[#allocation9 + $0xa8] ss:$20 sps:$4 sm:$0xff]  }
 0x7c8   :  { %v13947_v20 = vpop.f32.mrb[32].mxu1  ;;  %19518 = vmatprep.subr.bf16.mxu0 %v23105_v3 }
 0x7c9   :  { %v19604_v21 = vadd.f32 %v13947_v20, %v9552_v18  ;;  %v13949_v23 = vpop.f32.mrb[33].mxu1 }
 0x7ca   :  { %v19605_v53 = vadd.f32 %v13949_v23, %v9556_v50  ;;  %v13951_v26 = vpop.f32.mrb[34].mxu1  ;;  %16159 = vmatpush1.bf16.msra.mxu1 %v22477_v19  ;;  %v22519_v19 = vld [vmem:[#allocation9 + $0x208] ss:$20 sps:$4 sm:$0xff]  }
 0x7cb   :  { %v14796_v59 = vmul.f32 0.5, %v19604_v21  ;;  %v19606_v28 = vadd.f32 %v13951_v26, %v9552_v18  ;;  %19519 = vmatpush3.bf16.msra.mxu0 %v22480_v9  ;;  %v13953_v34 = vpop.f32.mrb[35].mxu1  ;;  %16160 = vmatprep.subr.bf16.mxu1 %v22483_v31  ;;  %v22521_v18 = vld [vmem:[#allocation9 + $0x20c] ss:$20 sps:$4 sm:$0xff]   ;;  %v22522_v9 = vld [vmem:[#allocation9 + $0xd0] ss:$20 sps:$4 sm:$0xff]  }
 0x7cc   :  { %v14797_v57 = vmul.f32 0.5, %v19605_v53  ;;  %v19607_v58 = vadd.f32 %v13953_v34, %v9556_v50  ;;  %19520 = vmatprep.subr.bf16.mxu0 %v23105_v3  ;;  %v22524_v50 = vld [vmem:[#allocation9 + $0xd4] ss:$20 sps:$4 sm:$0xff]   ;;  %v22530_v21 = vld [vmem:[#allocation9 + $0xfc] ss:$20 sps:$4 sm:$0xff]  }
 0x7cd   :  { %22861 = vtanh.f32 %v14796_v59  ;;  %v14801_v22 = vmul.f32 0.5, %v19606_v28  ;;  %v22527_v31 = vld [vmem:[#allocation9 + $0x234] ss:$20 sps:$4 sm:$0xff]   ;;  %v22528_v28 = vld [vmem:[#allocation9 + $0xf8] ss:$20 sps:$4 sm:$0xff]  }
 0x7ce   :  { %22863 = vtanh.f32 %v14797_v57  ;;  %v14802_v61 = vmul.f32 0.5, %v19607_v58  ;;  %16161 = vmatpush1.bf16.msra.mxu1 %v22481_v27  ;;  %v22525_v27 = vld [vmem:[#allocation9 + $0x230] ss:$20 sps:$4 sm:$0xff]   ;;  %v22531_v57 = vld [vmem:[#allocation9 + $0x258] ss:$20 sps:$4 sm:$0xff]  }
 0x7cf   :  { %22865 = vtanh.f32 %v14801_v22  ;;  %19521 = vmatpush3.bf16.msra.mxu0 %v22484_v39  ;;  %16162 = vmatprep.subr.bf16.mxu1 %v22487_v54  ;;  %v22533_v34 = vld [vmem:[#allocation9 + $0x25c] ss:$20 sps:$4 sm:$0xff]   ;;  %v22536_v54 = vld [vmem:[#allocation9 + $0x124] ss:$20 sps:$4 sm:$0xff]   ;;  %v22534_v58 = vld [vmem:[#allocation9 + $0x120] ss:$20 sps:$4 sm:$0xff]  }
 0x7d0   :  { %22867 = vtanh.f32 %v14802_v61  ;;  %19522 = vmatprep.subr.bf16.mxu0 %v23105_v3  ;;  %v22551_v22 = vld [vmem:[#allocation9 + $0x284] ss:$20 sps:$4 sm:$0xff]   ;;  %v22539_v61 = vld [vmem:[#allocation9 + $0x14c] ss:$20 sps:$4 sm:$0xff]  }
 0x7d2   :  { %16163 = vmatpush1.bf16.msra.mxu1 %v22485_v49  ;;  %v22549_v49 = vld [vmem:[#allocation9 + $0x280] ss:$20 sps:$4 sm:$0xff]  }
 0x7d3   :  { %19523 = vmatpush3.bf16.msra.mxu0 %v22488_v29  ;;  %16164 = vmatprep.subr.bf16.mxu1 %v22491_v46  ;;  %v22537_v29 = vld [vmem:[#allocation9 + $0x148] ss:$20 sps:$4 sm:$0xff]   ;;  %v22557_v46 = vld [vmem:[#allocation9 + $0x2ac] ss:$20 sps:$4 sm:$0xff]  }
 0x7d4   :  { %16277 = vmatprep.subr.bf16.mxu0 %v22494_v17  ;;  %v22542_v17 = vld [vmem:[#allocation9 + $0x174] ss:$20 sps:$4 sm:$0xff]  }
 0x7d6   :  { %19525 = vmatmul.mubr.bf16.vlgmr.msra.gmra.mrb[36].mxu0 %v23507_v30  ;;  %16165 = vmatpush1.bf16.msra.mxu1 %v22489_v63  ;;  %v22504_v30 = vld [vmem:[#allocation9 + $0x58] ss:$20 sps:$4 sm:$0xff]   ;;  %v22555_v63 = vld [vmem:[#allocation9 + $0x2a8] ss:$20 sps:$4 sm:$0xff]  }
 0x7d7   :  { %v22862_v5 = vpop.eup %22861  ;;  %16278 = vmatpush1.bf16.msra.mxu0 %v22492_v60  ;;  %16166 = vmatprep.subr.bf16.mxu1 %v22497_v2  ;;  %v22540_v60 = vld [vmem:[#allocation9 + $0x170] ss:$20 sps:$4 sm:$0xff]   ;;  %v22563_v2 = vld [vmem:[#allocation9 + $0x2d4] ss:$20 sps:$4 sm:$0xff]  }
 0x7d8   :  { %v22864_v8 = vpop.eup %22863  ;;  %v14816_v41 = vmul.f32 0.5, %v22862_v5  ;;  %16279 = vmatprep.subr.bf16.mxu0 %v22500_v47  ;;  %v22545_v47 = vld [vmem:[#allocation9 + $0x19c] ss:$20 sps:$4 sm:$0xff]   ;;  %v22543_v5 = vld [vmem:[#allocation9 + $0x198] ss:$20 sps:$4 sm:$0xff]  }
 0x7d9   :  { %v22866_v10 = vpop.eup %22865  ;;  %v14817_v25 = vmul.f32 0.5, %v22864_v8  ;;  %v22567_v8 = vld [vmem:[#allocation9 + $0x2f8] ss:$20 sps:$4 sm:$0xff]  }
 0x7da   :  { %v22868_v13 = vpop.eup %22867  ;;  %v14821_v38 = vmul.f32 0.5, %v22866_v10  ;;  %16167 = vmatpush1.bf16.msra.mxu1 %v22495_v4  ;;  %v14826_v37 = vadd.f32 0.5, %v14816_v41  ;;  %v22561_v4 = vld [vmem:[#allocation9 + $0x2d0] ss:$20 sps:$4 sm:$0xff]   ;;  %v22546_v41 = vld [vmem:[#allocation9 + $0x1c0] ss:$20 sps:$4 sm:$0xff]  }
 0x7db   :  { %v14822_v42 = vmul.f32 0.5, %v22868_v13  ;;  %16280 = vmatpush1.bf16.msra.mxu0 %v22498_v6  ;;  %16168 = vmatprep.subr.bf16.mxu1 %v22503_v24  ;;  %v14827_v7 = vadd.f32 0.5, %v14817_v25  ;;  %v22569_v6 = vld [vmem:[#allocation9 + $0x2fc] ss:$20 sps:$4 sm:$0xff]   ;;  %v22548_v24 = vld [vmem:[#allocation9 + $0x1c4] ss:$20 sps:$4 sm:$0xff]  }
 0x7dc   :  { %v14831_v1 = vadd.f32 0.5, %v14821_v38  ;;  %16281 = vmatprep.subr.bf16.mxu0 %v22506_v12  ;;  %v22575_v12 = vld [vmem:[#allocation9 + $0x324] ss:$20 sps:$4 sm:$0xff]   ;;  %v22554_v10 = vld [vmem:[#allocation9 + $0x1ec] ss:$20 sps:$4 sm:$0xff]  }
 0x7dd   :  { %v14832_v44 = vadd.f32 0.5, %v14822_v42  ;;  %v22573_v25 = vld [vmem:[#allocation9 + $0x320] ss:$20 sps:$4 sm:$0xff]   ;;  %v22552_v13 = vld [vmem:[#allocation9 + $0x1e8] ss:$20 sps:$4 sm:$0xff]   ;;  %v9568_v42 = vrot.slane %v23567_v11, %v23389_v40 }
 0x7de   :  { %v23578_v32 = vpack.c.bf16 %v14831_v1, %v14826_v37  ;;  %16169 = vmatpush1.bf16.msra.mxu1 %v22501_v14  ;;  %v22581_v38 = vld [vmem:[#allocation9 + $0x34c] ss:$20 sps:$4 sm:$0xff]   ;;  %v22560_v14 = vld [vmem:[#allocation9 + $0x214] ss:$20 sps:$4 sm:$0xff]  }
 0x7df   :  { %16282 = vmatpush1.bf16.msra.mxu0 %v22504_v30  ;;  %16170 = vmatprep.subr.bf16.mxu1 %v22509_v43  ;;  %v23580_v36 = vpack.c.bf16 %v14832_v44, %v14827_v7  ;;  %v22579_v30 = vld [vmem:[#allocation9 + $0x348] ss:$20 sps:$4 sm:$0xff]   ;;  %v22558_v43 = vld [vmem:[#allocation9 + $0x210] ss:$20 sps:$4 sm:$0xff]  }
 0x7e0   :  { %16283 = vmatprep.subr.bf16.mxu0 %v22512_v62  ;;  %v22587_v37 = vld [vmem:[#allocation9 + $0x374] ss:$20 sps:$4 sm:$0xff]   ;;  %v22566_v62 = vld [vmem:[#allocation9 + $0x23c] ss:$20 sps:$4 sm:$0xff]  }
 0x7e1   :  { %16180 = vmatprep.mubr.bf16.mxu1 %v23580_v36  ;;  %16309 = vmatprep.mubr.bf16.mxu0 %v23580_v36 }
 0x7e2   :  { %16171 = vmatpush1.bf16.msra.mxu1 %v22507_v45 }
 0x7e3   :  { %16284 = vmatpush1.bf16.msra.mxu0 %v22510_v48  ;;  %16172 = vmatprep.subr.bf16.mxu1 %v22515_v15  ;;  %v22585_v15 = vld [vmem:[#allocation9 + $0x370] ss:$20 sps:$4 sm:$0xff]  }
 0x7e4   :  { %16285 = vmatprep.subr.bf16.mxu0 %v22518_v0 }
 0x7e6   :  { %16173 = vmatpush1.bf16.msra.mxu1 %v22513_v16  ;;  %v22564_v16 = vld [vmem:[#allocation9 + $0x238] ss:$20 sps:$4 sm:$0xff]  }
 0x7e7   :  { %16286 = vmatpush1.bf16.msra.mxu0 %v22516_v33  ;;  %16174 = vmatprep.subr.bf16.mxu1 %v22521_v18  ;;  %v22593_v33 = vld [vmem:[#allocation9 + $0x39c] ss:$20 sps:$4 sm:$0xff]  }
 0x7e8   :  { %v19191_v20 = vpop.f32.mrb[36].mxu1  ;;  %16287 = vmatprep.subr.bf16.mxu0 %v22524_v50 }
 0x7e9   :  { %v19192_v23 = vpop.f32.mrb[37].mxu1 }
 0x7ea   :  { %v23584_v53 = vadd.f32 %v19192_v23, %v19191_v20  ;;  %v19194_v26 = vpop.f32.mrb[38].mxu1  ;;  %16175 = vmatpush1.bf16.msra.mxu1 %v22519_v19  ;;  %v22591_v20 = vld [vmem:[#allocation9 + $0x398] ss:$20 sps:$4 sm:$0xff]  }
 0x7eb   :  { %16288 = vmatpush1.bf16.msra.mxu0 %v22522_v9  ;;  %v19195_v59 = vpop.f32.mrb[39].mxu1  ;;  %16176 = vmatprep.subr.bf16.mxu1 %v22527_v31  ;;  %v22572_v9 = vld [vmem:[#allocation9 + $0x264] ss:$20 sps:$4 sm:$0xff]  }
 0x7ec   :  { %v23586_v39 = vadd.f32 %v19195_v59, %v19194_v26  ;;  %16289 = vmatprep.subr.bf16.mxu0 %v22530_v21  ;;  %v14421_v44 = vadd.f32 %v23584_v53, %v9568_v42  ;;  %v22570_v21 = vld [vmem:[#allocation9 + $0x260] ss:$20 sps:$4 sm:$0xff]   ;;  %v22599_v23 = vld [vmem:[#allocation9 + $0x3c4] ss:$20 sps:$4 sm:$0xff]  }
 0x7ed   :  { %v22578_v53 = vld [vmem:[#allocation9 + $0x28c] ss:$20 sps:$4 sm:$0xff]  }
 0x7ee   :  { %16177 = vmatpush1.bf16.msra.mxu1 %v22525_v27  ;;  %v14424_v18 = vadd.f32 %v23586_v39, %v9568_v42  ;;  %v22597_v26 = vld [vmem:[#allocation9 + $0x3c0] ss:$20 sps:$4 sm:$0xff]   ;;  %v22576_v27 = vld [vmem:[#allocation9 + $0x288] ss:$20 sps:$4 sm:$0xff]   ;;  %v22582_v39 = vld [vmem:[#allocation9 + $0x2b0] ss:$20 sps:$4 sm:$0xff]  }
 0x7ef   :  { %16290 = vmatpush1.bf16.msra.mxu0 %v22528_v28  ;;  %16178 = vmatprep.subr.bf16.mxu1 %v22533_v34  ;;  %v22605_v59 = vld [vmem:[#allocation9 + $0x3ec] ss:$20 sps:$4 sm:$0xff]   ;;  %v22584_v28 = vld [vmem:[#allocation9 + $0x2b4] ss:$20 sps:$4 sm:$0xff]  }
 0x7f0   :  { %16291 = vmatprep.subr.bf16.mxu0 %v22536_v54  ;;  %v22603_v34 = vld [vmem:[#allocation9 + $0x3e8] ss:$20 sps:$4 sm:$0xff]  }
 0x7f1   :  { %v22611_v54 = vld [vmem:[#allocation9 + $0x414] ss:$20 sps:$4 sm:$0xff]  }
 0x7f2   :  { %16179 = vmatpush1.bf16.msra.mxu1 %v22531_v57  ;;  %v22590_v57 = vld [vmem:[#allocation9 + $0x2dc] ss:$20 sps:$4 sm:$0xff]  }
 0x7f3   :  { %16292 = vmatpush1.bf16.msra.mxu0 %v22534_v58  ;;  %16191 = vmatprep.subr.bf16.mxu1 %v22551_v22  ;;  %v22609_v58 = vld [vmem:[#allocation9 + $0x410] ss:$20 sps:$4 sm:$0xff]   ;;  %v22588_v22 = vld [vmem:[#allocation9 + $0x2d8] ss:$20 sps:$4 sm:$0xff]  }
 0x7f4   :  { %16293 = vmatprep.subr.bf16.mxu0 %v22539_v61  ;;  %v22617_v61 = vld [vmem:[#allocation9 + $0x43c] ss:$20 sps:$4 sm:$0xff]  }
 0x7f5   :  { %16181 = vmatmul.mubr.bf16.vlgmr.msra.gmra.mrb[60].mxu1 %v23578_v32 }
 0x7f6   :  { %16192 = vmatpush1.bf16.msra.mxu1 %v22549_v49  ;;  %v22596_v49 = vld [vmem:[#allocation9 + $0x304] ss:$20 sps:$4 sm:$0xff]  }
 0x7f7   :  { %16294 = vmatpush1.bf16.msra.mxu0 %v22537_v29  ;;  %16193 = vmatprep.subr.bf16.mxu1 %v22557_v46  ;;  %v22615_v29 = vld [vmem:[#allocation9 + $0x438] ss:$20 sps:$4 sm:$0xff]   ;;  %v22594_v46 = vld [vmem:[#allocation9 + $0x300] ss:$20 sps:$4 sm:$0xff]  }
 0x7f8   :  { %16295 = vmatprep.subr.bf16.mxu0 %v22542_v17  ;;  %v22623_v17 = vld [vmem:[#allocation9 + $0x464] ss:$20 sps:$4 sm:$0xff]  }
 0x7fa   :  { %16194 = vmatpush1.bf16.msra.mxu1 %v22555_v63  ;;  %v22602_v63 = vld [vmem:[#allocation9 + $0x32c] ss:$20 sps:$4 sm:$0xff]  }
 0x7fb   :  { %16296 = vmatpush1.bf16.msra.mxu0 %v22540_v60  ;;  %16195 = vmatprep.subr.bf16.mxu1 %v22563_v2  ;;  %v22621_v60 = vld [vmem:[#allocation9 + $0x460] ss:$20 sps:$4 sm:$0xff]   ;;  %v22600_v2 = vld [vmem:[#allocation9 + $0x328] ss:$20 sps:$4 sm:$0xff]  }
 0x7fc   :  { %16297 = vmatprep.subr.bf16.mxu0 %v22545_v47  ;;  %v22629_v47 = vld [vmem:[#allocation9 + $0x48c] ss:$20 sps:$4 sm:$0xff]  }
 0x7fe   :  { %16196 = vmatpush1.bf16.msra.mxu1 %v22561_v4  ;;  %v22608_v4 = vld [vmem:[#allocation9 + $0x354] ss:$20 sps:$4 sm:$0xff]  }
 0x7ff   :  { %16298 = vmatpush1.bf16.msra.mxu0 %v22543_v5  ;;  %16197 = vmatprep.subr.bf16.mxu1 %v22569_v6  ;;  %v9560_v5 = vrot.slane %v23567_v11, %v23352_v52  ;;  %v22627_v6 = vld [vmem:[#allocation9 + $0x488] ss:$20 sps:$4 sm:$0xff]  }
 0x800   :  { %16299 = vmatprep.subr.bf16.mxu0 %v22548_v24  ;;  %v9564_v24 = vrot.slane %v23567_v11, %v23358_v56  ;;  %v22641_v11 = vld [vmem:[#allocation9 + $0x4dc] ss:$20 sps:$4 sm:$0xff]  }
 0x802   :  { %16198 = vmatpush1.bf16.msra.mxu1 %v22567_v8  ;;  %v22606_v8 = vld [vmem:[#allocation9 + $0x350] ss:$20 sps:$4 sm:$0xff]  }
 0x803   :  { %16300 = vmatpush1.bf16.msra.mxu0 %v22546_v41  ;;  %16199 = vmatprep.subr.bf16.mxu1 %v22575_v12  ;;  %v22635_v41 = vld [vmem:[#allocation9 + $0x4b4] ss:$20 sps:$4 sm:$0xff]  }
 0x804   :  { %16301 = vmatprep.subr.bf16.mxu0 %v22554_v10  ;;  %v22614_v10 = vld [vmem:[#allocation9 + $0x37c] ss:$20 sps:$4 sm:$0xff]  }
 0x806   :  { %16200 = vmatpush1.bf16.msra.mxu1 %v22573_v25 }
 0x807   :  { %16302 = vmatpush1.bf16.msra.mxu0 %v22552_v13  ;;  %16201 = vmatprep.subr.bf16.mxu1 %v22581_v38 }
 0x808   :  { %v19213_v1 = vpop.f32.mrb[40].mxu1  ;;  %16303 = vmatprep.subr.bf16.mxu0 %v22560_v14 }
 0x809   :  { %v19214_v7 = vpop.f32.mrb[41].mxu1 }
 0x80a   :  { %v19215_v45 = vadd.f32 %v19214_v7, %v19213_v1  ;;  %v19216_v48 = vpop.f32.mrb[42].mxu1  ;;  %16202 = vmatpush1.bf16.msra.mxu1 %v22579_v30  ;;  %v22612_v7 = vld [vmem:[#allocation9 + $0x378] ss:$20 sps:$4 sm:$0xff]  }
 0x80b   :  { %16304 = vmatpush1.bf16.msra.mxu0 %v22558_v43  ;;  %v19217_v0 = vpop.f32.mrb[43].mxu1  ;;  %16203 = vmatprep.subr.bf16.mxu1 %v22587_v37  ;;  %v22633_v43 = vld [vmem:[#allocation9 + $0x4b0] ss:$20 sps:$4 sm:$0xff]  }
 0x80c   :  { %v23593_v50 = vadd.f32 %v19215_v45, %v14421_v44  ;;  %v19218_v19 = vadd.f32 %v19217_v0, %v19216_v48  ;;  %16305 = vmatprep.subr.bf16.mxu0 %v22566_v62 }
 0x80e   :  { %v23595_v31 = vadd.f32 %v19218_v19, %v14424_v18  ;;  %16204 = vmatpush1.bf16.msra.mxu1 %v22585_v15 }
 0x80f   :  { %16306 = vmatpush1.bf16.msra.mxu0 %v22564_v16  ;;  %16205 = vmatprep.subr.bf16.mxu1 %v22593_v33  ;;  %v22620_v16 = vld [vmem:[#allocation9 + $0x3a4] ss:$20 sps:$4 sm:$0xff]  }
 0x810   :  { %16307 = vmatprep.subr.bf16.mxu0 %v22572_v9 }
 0x812   :  { %16206 = vmatpush1.bf16.msra.mxu1 %v22591_v20  ;;  %v22639_v20 = vld [vmem:[#allocation9 + $0x4d8] ss:$20 sps:$4 sm:$0xff]  }
 0x813   :  { %16308 = vmatpush1.bf16.msra.mxu0 %v22570_v21  ;;  %16207 = vmatprep.subr.bf16.mxu1 %v22599_v23  ;;  %v22618_v23 = vld [vmem:[#allocation9 + $0x3a0] ss:$20 sps:$4 sm:$0xff]  }
 0x814   :  { %16320 = vmatprep.subr.bf16.mxu0 %v22578_v53  ;;  %v22626_v53 = vld [vmem:[#allocation9 + $0x3cc] ss:$20 sps:$4 sm:$0xff]  }
 0x816   :  { %16310 = vmatmul.mubr.bf16.vlgmr.msra.gmra.mrb[40].mxu0 %v23578_v32  ;;  %16208 = vmatpush1.bf16.msra.mxu1 %v22597_v26  ;;  %v22624_v26 = vld [vmem:[#allocation9 + $0x3c8] ss:$20 sps:$4 sm:$0xff]  }
 0x817   :  { %16321 = vmatpush1.bf16.msra.mxu0 %v22576_v27  ;;  %16209 = vmatprep.subr.bf16.mxu1 %v22605_v59  ;;  %v22632_v27 = vld [vmem:[#allocation9 + $0x3f4] ss:$20 sps:$4 sm:$0xff]  }
 0x818   :  { %16322 = vmatprep.subr.bf16.mxu0 %v22584_v28  ;;  %v22638_v28 = vld [vmem:[#allocation9 + $0x41c] ss:$20 sps:$4 sm:$0xff]  }
 0x81a   :  { %16210 = vmatpush1.bf16.msra.mxu1 %v22603_v34 }
 0x81b   :  { %16323 = vmatpush1.bf16.msra.mxu0 %v22582_v39  ;;  %16211 = vmatprep.subr.bf16.mxu1 %v22611_v54 }
 0x81c   :  { %16324 = vmatprep.subr.bf16.mxu0 %v22590_v57 }
 0x81e   :  { %16212 = vmatpush1.bf16.msra.mxu1 %v22609_v58 }
 0x81f   :  { %16325 = vmatpush1.bf16.msra.mxu0 %v22588_v22  ;;  %16213 = vmatprep.subr.bf16.mxu1 %v22617_v61  ;;  %v22636_v61 = vld [vmem:[#allocation9 + $0x418] ss:$20 sps:$4 sm:$0xff]  }
 0x820   :  { %16326 = vmatprep.subr.bf16.mxu0 %v22596_v49 }
 0x822   :  { %16214 = vmatpush1.bf16.msra.mxu1 %v22615_v29  ;;  %v22644_v29 = vld [vmem:[#allocation9 + $0x444] ss:$20 sps:$4 sm:$0xff]  }
 0x823   :  { %16327 = vmatpush1.bf16.msra.mxu0 %v22594_v46  ;;  %16215 = vmatprep.subr.bf16.mxu1 %v22623_v17 }
 0x824   :  { %16328 = vmatprep.subr.bf16.mxu0 %v22602_v63 }
 0x826   :  { %16216 = vmatpush1.bf16.msra.mxu1 %v22621_v60 }
 0x827   :  { %16329 = vmatpush1.bf16.msra.mxu0 %v22600_v2  ;;  %16217 = vmatprep.subr.bf16.mxu1 %v22629_v47  ;;  %v22642_v47 = vld [vmem:[#allocation9 + $0x440] ss:$20 sps:$4 sm:$0xff]  }
 0x828   :  { %v19235_v12 = vpop.f32.mrb[44].mxu1  ;;  %16330 = vmatprep.subr.bf16.mxu0 %v22608_v4 }
 0x829   :  { %v14377_v25 = vpop.f32.mrb[20].mxu0  ;;  %v19236_v13 = vpop.f32.mrb[45].mxu1 }
 0x82a   :  { %v19608_v38 = vadd.f32 %v14377_v25, %v9560_v5  ;;  %v14379_v14 = vpop.f32.mrb[21].mxu0  ;;  %v19237_v42 = vadd.f32 %v19236_v13, %v19235_v12  ;;  %v19238_v30 = vpop.f32.mrb[46].mxu1  ;;  %16218 = vmatpush1.bf16.msra.mxu1 %v22627_v6  ;;  %v22657_v6 = vld [vmem:[#allocation9 + $0x500] ss:$20 sps:$4 sm:$0xff]   ;;  %v22663_v12 = vld [vmem:[#allocation9 + $0x528] ss:$20 sps:$4 sm:$0xff]  }
 0x82b   :  { %v19609_v37 = vadd.f32 %v14379_v14, %v9564_v24  ;;  %v14381_v1 = vpop.f32.mrb[22].mxu0  ;;  %16331 = vmatpush1.bf16.msra.mxu0 %v22606_v8  ;;  %v19239_v62 = vpop.f32.mrb[47].mxu1  ;;  %16219 = vmatprep.subr.bf16.mxu1 %v22635_v41  ;;  %v22645_v8 = vld [vmem:[#allocation9 + $0x468] ss:$20 sps:$4 sm:$0xff]   ;;  %v22648_v25 = vld [vmem:[#allocation9 + $0x490] ss:$20 sps:$4 sm:$0xff]  }
 0x82c   :  { %v14798_v44 = vmul.f32 0.5, %v19608_v38  ;;  %v23603_v45 = vadd.f32 %v19237_v42, %v23593_v50  ;;  %v19610_v48 = vadd.f32 %v14381_v1, %v9560_v5  ;;  %v14383_v15 = vpop.f32.mrb[23].mxu0  ;;  %v19240_v0 = vadd.f32 %v19239_v62, %v19238_v30  ;;  %16332 = vmatprep.subr.bf16.mxu0 %v22614_v10  ;;  %v22659_v50 = vld [vmem:[#allocation9 + $0x504] ss:$20 sps:$4 sm:$0xff]   ;;  %v22647_v5 = vld [vmem:[#allocation9 + $0x46c] ss:$20 sps:$4 sm:$0xff]  }
 0x82d   :  { %v14799_v33 = vmul.f32 0.5, %v19609_v37  ;;  %v19611_v18 = vadd.f32 %v14383_v15, %v9564_v24  ;;  %v22665_v24 = vld [vmem:[#allocation9 + $0x52c] ss:$20 sps:$4 sm:$0xff]   ;;  %v22650_v41 = vld [vmem:[#allocation9 + $0x494] ss:$20 sps:$4 sm:$0xff]  }
 0x82e   :  { %22869 = vtanh.f32 %v14798_v44  ;;  %v14803_v19 = vmul.f32 0.5, %v19610_v48  ;;  %v23606_v9 = vadd.f32 %v19240_v0, %v23595_v31  ;;  %16220 = vmatpush1.bf16.msra.mxu1 %v22633_v43  ;;  %v22630_v31 = vld [vmem:[#allocation9 + $0x3f0] ss:$20 sps:$4 sm:$0xff]   ;;  %v22671_v10 = vld [vmem:[#allocation9 + $0x554] ss:$20 sps:$4 sm:$0xff]  }
 0x82f   :  { %22871 = vtanh.f32 %v14799_v33  ;;  %v14804_v21 = vmul.f32 0.5, %v19611_v18  ;;  %16333 = vmatpush1.bf16.msra.mxu0 %v22612_v7  ;;  %16221 = vmatprep.subr.bf16.mxu1 %v22641_v11  ;;  %v22653_v38 = vld [vmem:[#allocation9 + $0x4bc] ss:$20 sps:$4 sm:$0xff]   ;;  %v22651_v48 = vld [vmem:[#allocation9 + $0x4b8] ss:$20 sps:$4 sm:$0xff]  }
 0x830   :  { %22873 = vtanh.f32 %v14803_v19  ;;  %16334 = vmatprep.subr.bf16.mxu0 %v22620_v16  ;;  %v22669_v14 = vld [vmem:[#allocation9 + $0x550] ss:$20 sps:$4 sm:$0xff]   ;;  %v22675_v33 = vld [vmem:[#allocation9 + $0x578] ss:$20 sps:$4 sm:$0xff]  }
 0x831   :  { %22875 = vtanh.f32 %v14804_v21  ;;  %v22677_v43 = vld [vmem:[#allocation9 + $0x57c] ss:$20 sps:$4 sm:$0xff]   ;;  %v22656_v16 = vld [vmem:[#allocation9 + $0x4e4] ss:$20 sps:$4 sm:$0xff]  }
 0x832   :  { %16222 = vmatpush1.bf16.msra.mxu1 %v22639_v20  ;;  %v22683_v20 = vld [vmem:[#allocation9 + $0x5a4] ss:$20 sps:$4 sm:$0xff]  }
 0x833   :  { %16335 = vmatpush1.bf16.msra.mxu0 %v22618_v23  ;;  %16234 = vmatprep.subr.bf16.mxu1 %v22659_v50  ;;  %v22654_v50 = vld [vmem:[#allocation9 + $0x4e0] ss:$20 sps:$4 sm:$0xff]  }
 0x834   :  { %16336 = vmatprep.subr.bf16.mxu0 %v22626_v53  ;;  %v22662_v53 = vld [vmem:[#allocation9 + $0x50c] ss:$20 sps:$4 sm:$0xff]  }
 0x837   :  { %16337 = vmatpush1.bf16.msra.mxu0 %v22624_v26  ;;  %v22681_v26 = vld [vmem:[#allocation9 + $0x5a0] ss:$20 sps:$4 sm:$0xff]  }
 0x838   :  { %v22870_v59 = vpop.eup %22869  ;;  %16338 = vmatprep.subr.bf16.mxu0 %v22632_v27 }
 0x839   :  { %v22872_v34 = vpop.eup %22871  ;;  %v14818_v39 = vmul.f32 0.5, %v22870_v59  ;;  %v22660_v59 = vld [vmem:[#allocation9 + $0x508] ss:$20 sps:$4 sm:$0xff]  }
 0x83a   :  { %v22874_v54 = vpop.eup %22873  ;;  %v14819_v57 = vmul.f32 0.5, %v22872_v34  ;;  %v22695_v34 = vld [vmem:[#allocation9 + $0x5f4] ss:$20 sps:$4 sm:$0xff]  }
 0x83b   :  { %v22876_v58 = vpop.eup %22875  ;;  %v14823_v22 = vmul.f32 0.5, %v22874_v54  ;;  %16339 = vmatpush1.bf16.msra.mxu0 %v22630_v31  ;;  %v14828_v46 = vadd.f32 0.5, %v14818_v39  ;;  %v22689_v31 = vld [vmem:[#allocation9 + $0x5cc] ss:$20 sps:$4 sm:$0xff]   ;;  %v22674_v39 = vld [vmem:[#allocation9 + $0x55c] ss:$20 sps:$4 sm:$0xff]  }
 0x83c   :  { %v14824_v49 = vmul.f32 0.5, %v22876_v58  ;;  %16340 = vmatprep.subr.bf16.mxu0 %v22638_v28  ;;  %v14829_v63 = vadd.f32 0.5, %v14819_v57  ;;  %v22687_v28 = vld [vmem:[#allocation9 + $0x5c8] ss:$20 sps:$4 sm:$0xff]   ;;  %v22693_v54 = vld [vmem:[#allocation9 + $0x5f0] ss:$20 sps:$4 sm:$0xff]  }
 0x83d   :  { %v14833_v17 = vadd.f32 0.5, %v14823_v22  ;;  %v22701_v57 = vld [vmem:[#allocation9 + $0x61c] ss:$20 sps:$4 sm:$0xff]   ;;  %v22672_v58 = vld [vmem:[#allocation9 + $0x558] ss:$20 sps:$4 sm:$0xff]  }
 0x83e   :  { %v14834_v60 = vadd.f32 0.5, %v14824_v49  ;;  %v22680_v22 = vld [vmem:[#allocation9 + $0x584] ss:$20 sps:$4 sm:$0xff]  }
 0x83f   :  { %v23608_v2 = vpack.c.bf16 %v14833_v17, %v14828_v46  ;;  %16341 = vmatpush1.bf16.msra.mxu0 %v22636_v61  ;;  %v22699_v61 = vld [vmem:[#allocation9 + $0x618] ss:$20 sps:$4 sm:$0xff]   ;;  %v22705_v49 = vld [vmem:[#allocation9 + $0x150] ss:$20 sps:$4 sm:$0xff]   ;;  %v22692_v17 = vld [vmem:[#allocation9 + $0x5d4] ss:$20 sps:$4 sm:$0xff]  }
 0x840   :  { %v23610_v4 = vpack.c.bf16 %v14834_v60, %v14829_v63  ;;  %16342 = vmatprep.subr.bf16.mxu0 %v22644_v29  ;;  %v22678_v29 = vld [vmem:[#allocation9 + $0x580] ss:$20 sps:$4 sm:$0xff]   ;;  %v22690_v63 = vld [vmem:[#allocation9 + $0x5d0] ss:$20 sps:$4 sm:$0xff]  }
 0x841   :  { %v22686_v46 = vld [vmem:[#allocation9 + $0x5ac] ss:$20 sps:$4 sm:$0xff]  }
 0x842   :  { %16223 = vmatprep.mubr.bf16.mxu1 %v23610_v4  ;;  %16352 = vmatprep.mubr.bf16.mxu0 %v23610_v4 }
 0x843   :  { %16224 = vmatmul.mubr.bf16.vlgmr.msra.gmra.mrb[60].mxu1 %v23608_v2  ;;  %16343 = vmatpush1.bf16.msra.mxu0 %v22642_v47  ;;  %v22698_v47 = vld [vmem:[#allocation9 + $0x5fc] ss:$20 sps:$4 sm:$0xff]  }
 0x844   :  { %16344 = vmatprep.subr.bf16.mxu0 %v22647_v5  ;;  %16235 = vmatpush1.bf16.msra.mxu1 %v22657_v6 }
 0x845   :  { %16236 = vmatprep.subr.bf16.mxu1 %v22665_v24  ;;  %16266 = vmatprep.mubr.bf16.mxu1 %v23104_v35 }
 0x847   :  { %16345 = vmatpush1.bf16.msra.mxu0 %v22645_v8 }
 0x848   :  { %v19279_v13 = vpop.f32.mrb[48].mxu1  ;;  %16346 = vmatprep.subr.bf16.mxu0 %v22650_v41  ;;  %16237 = vmatpush1.bf16.msra.mxu1 %v22663_v12 }
 0x849   :  { %v19257_v42 = vpop.f32.mrb[24].mxu0  ;;  %v19280_v30 = vpop.f32.mrb[49].mxu1  ;;  %16238 = vmatprep.subr.bf16.mxu1 %v22671_v10 }
 0x84a   :  { %v19258_v37 = vpop.f32.mrb[25].mxu0  ;;  %v19281_v1 = vadd.f32 %v19280_v30, %v19279_v13  ;;  %v19282_v62 = vpop.f32.mrb[50].mxu1  ;;  %v22696_v13 = vld [vmem:[#allocation9 + $0x5f8] ss:$20 sps:$4 sm:$0xff]  }
 0x84b   :  { %v19259_v7 = vadd.f32 %v19258_v37, %v19257_v42  ;;  %v19260_v11 = vpop.f32.mrb[26].mxu0  ;;  %16347 = vmatpush1.bf16.msra.mxu0 %v22648_v25  ;;  %v19283_v44 = vpop.f32.mrb[51].mxu1  ;;  %v22704_v42 = vld [vmem:[#allocation9 + $0x624] ss:$20 sps:$4 sm:$0xff]  }
 0x84c   :  { %v19261_v15 = vpop.f32.mrb[27].mxu0  ;;  %v19284_v0 = vadd.f32 %v19283_v44, %v19282_v62  ;;  %16348 = vmatprep.subr.bf16.mxu0 %v22653_v38  ;;  %16239 = vmatpush1.bf16.msra.mxu1 %v22669_v14  ;;  %v22702_v62 = vld [vmem:[#allocation9 + $0x620] ss:$20 sps:$4 sm:$0xff]  }
 0x84d   :  { %v14544_v18 = vadd.f32 %v19259_v7, %v23603_v45  ;;  %v19262_v19 = vadd.f32 %v19261_v15, %v19260_v11  ;;  %16240 = vmatprep.subr.bf16.mxu1 %v22677_v43  ;;  %v22668_v45 = vld [vmem:[#allocation9 + $0x534] ss:$20 sps:$4 sm:$0xff]   ;;  %v22706_v7 = vld [vmem:[#allocation9 + $0x3d0] ss:$20 sps:$4 sm:$0xff]  }
 0x84f   :  { %v23617_v21 = vadd.f32 %v19281_v1, %v14544_v18  ;;  %v14547_v23 = vadd.f32 %v19262_v19, %v23606_v9  ;;  %16349 = vmatpush1.bf16.msra.mxu0 %v22651_v48  ;;  %v22666_v9 = vld [vmem:[#allocation9 + $0x530] ss:$20 sps:$4 sm:$0xff]  }
 0x850   :  { %16350 = vmatprep.subr.bf16.mxu0 %v22656_v16  ;;  %16241 = vmatpush1.bf16.msra.mxu1 %v22675_v33 }
 0x851   :  { %v14588_v27 = vadd.f32 %v19284_v0, %v14547_v23  ;;  %16242 = vmatprep.subr.bf16.mxu1 %v22683_v20 }
 0x853   :  { %16351 = vmatpush1.bf16.msra.mxu0 %v22654_v50 }
 0x854   :  { %16363 = vmatprep.subr.bf16.mxu0 %v22662_v53  ;;  %16243 = vmatpush1.bf16.msra.mxu1 %v22681_v26 }
 0x855   :  { %16244 = vmatprep.subr.bf16.mxu1 %v22689_v31 }
 0x856   :  { %16353 = vmatmul.mubr.bf16.vlgmr.msra.gmra.mrb[40].mxu0 %v23608_v2 }
 0x857   :  { %16364 = vmatpush1.bf16.msra.mxu0 %v22660_v59  ;;  %16395 = vmatprep.mubr.bf16.mxu0 %v23104_v35  ;;  %v22684_v35 = vld [vmem:[#allocation9 + $0x5a8] ss:$20 sps:$4 sm:$0xff]  }
 0x858   :  { %16365 = vmatprep.subr.bf16.mxu0 %v22668_v45  ;;  %16245 = vmatpush1.bf16.msra.mxu1 %v22687_v28 }
 0x859   :  { %16246 = vmatprep.subr.bf16.mxu1 %v22695_v34 }
 0x85b   :  { %16366 = vmatpush1.bf16.msra.mxu0 %v22666_v9 }
 0x85c   :  { %16367 = vmatprep.subr.bf16.mxu0 %v22674_v39  ;;  %16247 = vmatpush1.bf16.msra.mxu1 %v22693_v54 }
 0x85d   :  { %16248 = vmatprep.subr.bf16.mxu1 %v22701_v57 }
 0x85f   :  { %16368 = vmatpush1.bf16.msra.mxu0 %v22672_v58 }
 0x860   :  { %16369 = vmatprep.subr.bf16.mxu0 %v22680_v22  ;;  %16249 = vmatpush1.bf16.msra.mxu1 %v22699_v61 }
 0x861   :  { %19382 = vmatprep.subr.bf16.mxu1 %v22705_v49 }
 0x863   :  { %16370 = vmatpush1.bf16.msra.mxu0 %v22678_v29 }
 0x864   :  { %16371 = vmatprep.subr.bf16.mxu0 %v22686_v46 }
 0x867   :  { %16372 = vmatpush1.bf16.msra.mxu0 %v22684_v35  ;;  %v22707_v35 = vld [vmem:[#allocation9 + $0x10] ss:$20 sps:$4 sm:$0xff]  }
 0x868   :  { %v19323_v60 = vpop.f32.mrb[52].mxu1  ;;  %16373 = vmatprep.subr.bf16.mxu0 %v22692_v17  ;;  %v22708_v17 = vld [vmem:[#allocation9 + $0x290] ss:$20 sps:$4 sm:$0xff]  }
 0x869   :  { %v19301_v5 = vpop.f32.mrb[28].mxu0  ;;  %v19324_v6 = vpop.f32.mrb[53].mxu1 }
 0x86a   :  { %v19302_v24 = vpop.f32.mrb[29].mxu0  ;;  %v19325_v8 = vadd.f32 %v19324_v6, %v19323_v60  ;;  %v19326_v41 = vpop.f32.mrb[54].mxu1  ;;  %v22709_v60 = vld [vmem:[#allocation9 + $0x178] ss:$20 sps:$4 sm:$0xff]  }
 0x86b   :  { %v19303_v12 = vadd.f32 %v19302_v24, %v19301_v5  ;;  %v19304_v10 = vpop.f32.mrb[30].mxu0  ;;  %v19327_v25 = vpop.f32.mrb[55].mxu1  ;;  %16374 = vmatpush1.bf16.msra.mxu0 %v22690_v63  ;;  %v22711_v5 = vld [vmem:[#allocation9 + $0x38] ss:$20 sps:$4 sm:$0xff]   ;;  %v22713_v24 = vld [vmem:[#allocation9 + $0x1a0] ss:$20 sps:$4 sm:$0xff]  }
 0x86c   :  { %v19305_v38 = vpop.f32.mrb[31].mxu0  ;;  %v19328_v14 = vadd.f32 %v19327_v25, %v19326_v41  ;;  %16375 = vmatprep.subr.bf16.mxu0 %v22698_v47  ;;  %v22710_v47 = vld [vmem:[#allocation9 + $0x3f8] ss:$20 sps:$4 sm:$0xff]   ;;  %v22715_v41 = vld [vmem:[#allocation9 + $0x60] ss:$20 sps:$4 sm:$0xff]  }
 0x86d   :  { %v14626_v30 = vadd.f32 %v19303_v12, %v23617_v21  ;;  %v19306_v43 = vadd.f32 %v19305_v38, %v19304_v10  ;;  %v22712_v6 = vld [vmem:[#allocation9 + $0x2b8] ss:$20 sps:$4 sm:$0xff]   ;;  %v22716_v12 = vld [vmem:[#allocation9 + $0x2e0] ss:$20 sps:$4 sm:$0xff]   ;;  %v22717_v10 = vld [vmem:[#allocation9 + $0x1c8] ss:$20 sps:$4 sm:$0xff]  }
 0x86e   :  { %v22718_v25 = vld [vmem:[#allocation9 + $0x448] ss:$20 sps:$4 sm:$0xff]  }
 0x86f   :  { %v14667_v37 = vadd.f32 %v19325_v8, %v14626_v30  ;;  %v14629_v1 = vadd.f32 %v19306_v43, %v14588_v27  ;;  %16376 = vmatpush1.bf16.msra.mxu0 %v22696_v13  ;;  %v22714_v8 = vld [vmem:[#allocation9 + $0x420] ss:$20 sps:$4 sm:$0xff]   ;;  %v22719_v13 = vld [vmem:[#allocation9 + $0x88] ss:$20 sps:$4 sm:$0xff]   ;;  %v22725_v30 = vld [vmem:[#allocation9 + $0x218] ss:$20 sps:$4 sm:$0xff]  }
 0x870   :  { %16377 = vmatprep.subr.bf16.mxu0 %v22704_v42  ;;  %v22720_v38 = vld [vmem:[#allocation9 + $0x308] ss:$20 sps:$4 sm:$0xff]   ;;  %v22724_v42 = vld [vmem:[#allocation9 + $0x330] ss:$20 sps:$4 sm:$0xff]   ;;  %v22726_v43 = vld [vmem:[#allocation9 + $0x498] ss:$20 sps:$4 sm:$0xff]  }
 0x871   :  { %v14670_v11 = vadd.f32 %v19328_v14, %v14629_v1  ;;  %v22723_v14 = vld [vmem:[#allocation9 + $0xb0] ss:$20 sps:$4 sm:$0xff]   ;;  %v22728_v1 = vld [vmem:[#allocation9 + $0x358] ss:$20 sps:$4 sm:$0xff]  }
 0x873   :  { %16378 = vmatpush1.bf16.msra.mxu0 %v22702_v62  ;;  %v22729_v62 = vld [vmem:[#allocation9 + $0x240] ss:$20 sps:$4 sm:$0xff]  }
 0x874   :  { %19404 = vmatprep.subr.bf16.mxu0 %v22706_v7  ;;  %v22730_v7 = vld [vmem:[#allocation9 + $0x4c0] ss:$20 sps:$4 sm:$0xff]  }
 0x888   :  { %v19367_v44 = vpop.f32.mrb[56].mxu1 }
 0x889   :  { %v19345_v48 = vpop.f32.mrb[32].mxu0  ;;  %v19368_v15 = vpop.f32.mrb[57].mxu1 }
 0x88a   :  { %v19346_v0 = vpop.f32.mrb[33].mxu0  ;;  %v19369_v16 = vadd.f32 %v19368_v15, %v19367_v44  ;;  %v19370_v33 = vpop.f32.mrb[58].mxu1  ;;  %v22732_v44 = vld [vmem:[#allocation9 + $0x380] ss:$20 sps:$4 sm:$0xff]   ;;  %v22734_v15 = vld [vmem:[#allocation9 + $0x4e8] ss:$20 sps:$4 sm:$0xff]  }
 0x88b   :  { %v19347_v18 = vadd.f32 %v19346_v0, %v19345_v48  ;;  %v19348_v19 = vpop.f32.mrb[34].mxu0  ;;  %v19371_v20 = vpop.f32.mrb[59].mxu1  ;;  %v22733_v48 = vld [vmem:[#allocation9 + $0x268] ss:$20 sps:$4 sm:$0xff]  }
 0x88c   :  { %v19349_v21 = vpop.f32.mrb[35].mxu0  ;;  %v19372_v23 = vadd.f32 %v19371_v20, %v19370_v33  ;;  %v22735_v0 = vld [vmem:[#allocation9 + $0x128] ss:$20 sps:$4 sm:$0xff]   ;;  %v22749_v20 = vld [vmem:[#allocation12 + $0x48] sm:$0xff]  }
 0x88d   :  { %v14708_v50 = vadd.f32 %v19347_v18, %v14667_v37  ;;  %v19350_v53 = vadd.f32 %v19349_v21, %v19348_v19  ;;  %v22727_v37 = vld [vmem:[#allocation9 + $0xd8] ss:$20 sps:$4 sm:$0xff]   ;;  %v22737_v18 = vld [vmem:[#allocation9 + $0x510] ss:$20 sps:$4 sm:$0xff]  }
 0x88e   :  { %v22745_v33 = vld [vmem:[#allocation12 + $0x40] sm:$0xff]  }
 0x88f   :  { %v14711_v26 = vadd.f32 %v19350_v53, %v14670_v11  ;;  %v14749_v27 = vadd.f32 %v19369_v16, %v14708_v50  ;;  %v22731_v11 = vld [vmem:[#allocation9 + $0x100] ss:$20 sps:$4 sm:$0xff]   ;;  %v22736_v16 = vld [vmem:[#allocation9 + $0x3a8] ss:$20 sps:$4 sm:$0xff]   ;;  %v22738_v21 = vld [vmem:[#allocation9 + $0x538] ss:$20 sps:$4 sm:$0xff]  }
 0x890   :  { %v22747_v19 = vld [vmem:[#allocation12] sm:$0xff]   ;;  %v22739_v50 = vld [vmem:[#allocation9 + $0x560] ss:$20 sps:$4 sm:$0xff]  }
 0x891   :  { %v14752_v31 = vadd.f32 %v19372_v23, %v14711_v26  ;;  %v22751_v23 = vld [vmem:[#allocation12 + $0x8] sm:$0xff]   ;;  %v22740_v53 = vld [vmem:[#allocation9 + $0x588] ss:$20 sps:$4 sm:$0xff]  }
 0x892   :  { %v22743_v26 = vld [vmem:[#allocation9 + $0x600] ss:$20 sps:$4 sm:$0xff]  }
 0x8a9   :  { %v14789_v59 = vpop.f32.mrb[36].mxu0 }
 0x8aa   :  { %v14790_v45 = vadd.f32 %v14789_v59, %v14749_v27  ;;  %v19526_v28 = vpop.f32.mrb[37].mxu0  ;;  %v22744_v27 = vld [vmem:[#allocation9 + $0x628] ss:$20 sps:$4 sm:$0xff]  }
 0x8ab   :  { %v14792_v34 = vpop.f32.mrb[38].mxu0  ;;  %v22748_v59 = vld [vmem:[#allocation12 + $0x80] sm:$0xff]   ;;  %v22752_v28 = vld [vmem:[#allocation12 + $0x88] sm:$0xff]  }
 0x8ac   :  { %v14800_v9 = vmul.f32 0.5, %v14790_v45  ;;  %v14793_v39 = vadd.f32 %v14792_v34, %v14752_v31  ;;  %v19527_v54 = vpop.f32.mrb[39].mxu0  ;;  %v22746_v31 = vld [vmem:[#allocation12 + $0xc0] sm:$0xff]   ;;  %v22750_v45 = vld [vmem:[#allocation12 + $0xc8] sm:$0xff]   ;;  %v22753_v34 = vld [vmem:[#allocation12 + $0x50] sm:$0xff]  }
 0x8ad   :  { %v22756_v54 = vld [vmem:[#allocation12 + $0x90] sm:$0xff]  }
 0x8ae   :  { %22877 = vtanh.f32 %v14800_v9  ;;  %v14805_v57 = vmul.f32 0.5, %v14793_v39  ;;  %v22754_v9 = vld [vmem:[#allocation12 + $0xd0] sm:$0xff]  }
 0x8af   :  { %v22755_v39 = vld [vmem:[#allocation12 + $0x10] sm:$0xff]  }
 0x8b0   :  { %22879 = vtanh.f32 %v14805_v57  ;;  %v22757_v57 = vld [vmem:[#allocation12 + $0x58] sm:$0xff]  }
 0x8b8   :  { %v22878_v58 = vpop.eup %22877 }
 0x8b9   :  { %v14820_v22 = vmul.f32 0.5, %v22878_v58  ;;  %v22758_v58 = vld [vmem:[#allocation12 + $0xd8] sm:$0xff]  }
 0x8ba   :  { %v22880_v61 = vpop.eup %22879 }
 0x8bb   :  { %v14825_v49 = vmul.f32 0.5, %v22880_v61  ;;  %v14830_v29 = vadd.f32 0.5, %v14820_v22  ;;  %v22759_v22 = vld [vmem:[#allocation12 + $0x18] sm:$0xff]  }
 0x8bc   :  { %v22760_v61 = vld [vmem:[#allocation12 + $0x98] sm:$0xff]  }
 0x8bd   :  { %v14835_v46 = vadd.f32 0.5, %v14825_v49  ;;  %v22761_v49 = vld [vmem:[#allocation12 + $0x60] sm:$0xff]  }
 0x8bf   :  { %v23623_v63 = vpack.c.bf16 %v14835_v46, %v14830_v29  ;;  %v22762_v29 = vld [vmem:[#allocation12 + $0xe0] sm:$0xff]  }
 0x8c0   :  { %v22763_v46 = vld [vmem:[#allocation12 + $0x20] sm:$0xff]  }
 0x8c1   :  { %16267 = vmatmul.mubr.bf16.vlgmr.msra.gmra.mrb[60].mxu1 %v23623_v63  ;;  %16396 = vmatmul.mubr.bf16.vlgmr.msra.gmra.mrb[40].mxu0 %v23623_v63 }
 0x8c2   :  { %19383 = vmatpush3.bf16.msra.mxu1 %v22707_v35  ;;  %19405 = vmatpush3.bf16.msra.mxu0 %v22708_v17  ;;  %v22764_v35 = vld [vmem:[#allocation12 + $0xa0] sm:$0xff]   ;;  %v22765_v17 = vld [vmem:[#allocation12 + $0x68] sm:$0xff]  }
 0x8c3   :  { %16438 = vmatprep.mubr.bf16.mxu1 %v23580_v36  ;;  %16479 = vmatprep.mubr.bf16.mxu0 %v23610_v4  ;;  %v22721_v36 = vld [vmem:[#allocation9 + $0x1f0] ss:$20 sps:$4 sm:$0xff]  }
 0x8c4   :  { %19384 = vmatprep.subr.bf16.mxu1 %v22709_v60  ;;  %19406 = vmatprep.subr.bf16.mxu0 %v22710_v47  ;;  %v22722_v4 = vld [vmem:[#allocation9 + $0x470] ss:$20 sps:$4 sm:$0xff]  }
 0x8c5   :  { %v22767_v60 = vld [vmem:[#allocation12 + $0x28] sm:$0xff]  }
 0x8c6   :  { %19385 = vmatpush3.bf16.msra.mxu1 %v22711_v5  ;;  %19407 = vmatpush3.bf16.msra.mxu0 %v22712_v6  ;;  %v22768_v47 = vld [vmem:[#allocation12 + $0xa8] sm:$0xff]   ;;  %v22769_v5 = vld [vmem:[#allocation12 + $0x70] sm:$0xff]  }
 0x8c7   :  { %19386 = vmatprep.subr.bf16.mxu1 %v22713_v24  ;;  %19408 = vmatprep.subr.bf16.mxu0 %v22714_v8  ;;  %v22770_v6 = vld [vmem:[#allocation12 + $0xf0] sm:$0xff]  }
 0x8c8   :  { %v22771_v24 = vld [vmem:[#allocation12 + $0x30] sm:$0xff]  }
 0x8c9   :  { %v22772_v8 = vld [vmem:[#allocation12 + $0xb0] sm:$0xff]  }
 0x8ca   :  { %19387 = vmatpush3.bf16.msra.mxu1 %v22715_v41  ;;  %19409 = vmatpush3.bf16.msra.mxu0 %v22716_v12  ;;  %v22773_v41 = vld [vmem:[#allocation12 + $0x78] sm:$0xff]  }
 0x8cb   :  { %19388 = vmatprep.subr.bf16.mxu1 %v22717_v10  ;;  %19410 = vmatprep.subr.bf16.mxu0 %v22718_v25  ;;  %v22774_v12 = vld [vmem:[#allocation12 + $0xf8] sm:$0xff]  }
 0x8cc   :  { %v22775_v10 = vld [vmem:[#allocation12 + $0x38] sm:$0xff]  }
 0x8cd   :  { %v22776_v25 = vld [vmem:[#allocation12 + $0xb8] sm:$0xff]  }
 0x8ce   :  { %19389 = vmatpush3.bf16.msra.mxu1 %v22719_v13  ;;  %19411 = vmatpush3.bf16.msra.mxu0 %v22720_v38  ;;  %v23643_v13 = vld [vmem:[#allocation10] sm:$0x1f] }
 0x8cf   :  { %19390 = vmatprep.subr.bf16.mxu1 %v22721_v36  ;;  %19412 = vmatprep.subr.bf16.mxu0 %v22722_v4  ;;  %v15086_v38 = vrot.slane %v23643_v13, %v23349_v51  ;;  %v15094_v36 = vrot.slane %v23643_v13, %v23352_v52  ;;  %v15090_v4 = vrot.slane %v23643_v13, %v23355_v55 }
 0x8d2   :  { %19391 = vmatpush3.bf16.msra.mxu1 %v22723_v14  ;;  %19413 = vmatpush3.bf16.msra.mxu0 %v22724_v42  ;;  %v15098_v14 = vrot.slane %v23643_v13, %v23358_v56 }
 0x8d3   :  { %19392 = vmatprep.subr.bf16.mxu1 %v22725_v30  ;;  %19414 = vmatprep.subr.bf16.mxu0 %v22726_v43 }
 0x8d6   :  { %19393 = vmatpush3.bf16.msra.mxu1 %v22727_v37  ;;  %19415 = vmatpush3.bf16.msra.mxu0 %v22728_v1 }
 0x8d7   :  { %19394 = vmatprep.subr.bf16.mxu1 %v22729_v62  ;;  %19416 = vmatprep.subr.bf16.mxu0 %v22730_v7 }
 0x8da   :  { %19395 = vmatpush3.bf16.msra.mxu1 %v22731_v11  ;;  %19417 = vmatpush3.bf16.msra.mxu0 %v22732_v44 }
 0x8db   :  { %19396 = vmatprep.subr.bf16.mxu1 %v22733_v48  ;;  %19418 = vmatprep.subr.bf16.mxu0 %v22734_v15 }
 0x8de   :  { %19397 = vmatpush3.bf16.msra.mxu1 %v22735_v0  ;;  %19419 = vmatpush3.bf16.msra.mxu0 %v22736_v16 }
 0x8df   :  { %19528 = vmatprep.subr.bf16.mxu1 %v23105_v3  ;;  %19435 = vmatprep.subr.bf16.mxu0 %v22745_v33 }
 0x8e1   :  { %16439 = vmatmul.mubr.bf16.vlgmr.msra.gmra.mrb[64].mxu1 %v23578_v32  ;;  %16480 = vmatmul.mubr.bf16.vlgmr.msra.gmra.mrb[44].mxu0 %v23608_v2  ;;  %v22741_v32 = vld [vmem:[#allocation9 + $0x5b0] ss:$20 sps:$4 sm:$0xff]   ;;  %v22742_v2 = vld [vmem:[#allocation9 + $0x5d8] ss:$20 sps:$4 sm:$0xff]  }
 0x8e2   :  { %19529 = vmatpush3.bf16.msra.mxu1 %v22737_v18  ;;  %19544 = vmatprep.mubr.msk.bf16.mxu1 %vm23106_vm0, %v23105_v3 }
 0x8e3   :  { %19530 = vmatprep.subr.bf16.mxu1 %v23105_v3  ;;  %19436 = vmatpush3.bf16.msra.mxu0 %v22747_v19 }
 0x8e4   :  { %19437 = vmatprep.subr.bf16.mxu0 %v22749_v20 }
 0x8e6   :  { %19531 = vmatpush3.bf16.msra.mxu1 %v22738_v21 }
 0x8e7   :  { %19532 = vmatprep.subr.bf16.mxu1 %v23105_v3  ;;  %19438 = vmatpush3.bf16.msra.mxu0 %v22751_v23 }
 0x8e8   :  { %19439 = vmatprep.subr.bf16.mxu0 %v22753_v34 }
 0x8ea   :  { %19533 = vmatpush3.bf16.msra.mxu1 %v22739_v50 }
 0x8eb   :  { %19534 = vmatprep.subr.bf16.mxu1 %v23105_v3  ;;  %19440 = vmatpush3.bf16.msra.mxu0 %v22755_v39 }
 0x8ec   :  { %19441 = vmatprep.subr.bf16.mxu0 %v22757_v57 }
 0x8ee   :  { %19535 = vmatpush3.bf16.msra.mxu1 %v22740_v53 }
 0x8ef   :  { %19536 = vmatprep.subr.bf16.mxu1 %v23105_v3  ;;  %19442 = vmatpush3.bf16.msra.mxu0 %v22759_v22 }
 0x8f0   :  { %19443 = vmatprep.subr.bf16.mxu0 %v22761_v49 }
 0x8f2   :  { %19537 = vmatpush3.bf16.msra.mxu1 %v22741_v32 }
 0x8f3   :  { %19538 = vmatprep.subr.bf16.mxu1 %v23105_v3  ;;  %19444 = vmatpush3.bf16.msra.mxu0 %v22763_v46 }
 0x8f4   :  { %19445 = vmatprep.subr.bf16.mxu0 %v22765_v17 }
 0x8f6   :  { %19539 = vmatpush3.bf16.msra.mxu1 %v22742_v2 }
 0x8f7   :  { %19540 = vmatprep.subr.bf16.mxu1 %v23105_v3  ;;  %19446 = vmatpush3.bf16.msra.mxu0 %v22767_v60 }
 0x8f8   :  { %19447 = vmatprep.subr.bf16.mxu0 %v22769_v5 }
 0x8fa   :  { %19541 = vmatpush3.bf16.msra.mxu1 %v22743_v26 }
 0x8fb   :  { %19542 = vmatprep.subr.bf16.mxu1 %v23105_v3  ;;  %19448 = vmatpush3.bf16.msra.mxu0 %v22771_v24  ;;  %v22777_v24 = vld [vmem:[#allocation12 + $0x100] sm:$0xff]  }
 0x8fc   :  { %19449 = vmatprep.subr.bf16.mxu0 %v22773_v41  ;;  %v22778_v41 = vld [vmem:[#allocation12 + $0x108] sm:$0xff]  }
 0x8fe   :  { %19543 = vmatpush3.bf16.msra.mxu1 %v22744_v27 }
 0x8ff   :  { %19457 = vmatprep.subr.bf16.mxu1 %v22746_v31  ;;  %19450 = vmatpush3.bf16.msra.mxu0 %v22775_v10 }
 0x900   :  { %19548 = vmatprep.subr.bf16.mxu0 %v23105_v3 }
 0x901   :  { %19545 = vmatmul.mubr.bf16.vlgmr.msra.gmra.mrb[68].mxu1 %v23623_v63  ;;  %v22766_v63 = vld [vmem:[#allocation12 + $0xe8] sm:$0xff]  }
 0x902   :  { %19458 = vmatpush3.bf16.msra.mxu1 %v22748_v59 }
 0x903   :  { %19459 = vmatprep.subr.bf16.mxu1 %v22750_v45 }
 0x906   :  { %19460 = vmatpush3.bf16.msra.mxu1 %v22752_v28 }
 0x907   :  { %19461 = vmatprep.subr.bf16.mxu1 %v22754_v9 }
 0x90a   :  { %19462 = vmatpush3.bf16.msra.mxu1 %v22756_v54 }
 0x90b   :  { %19463 = vmatprep.subr.bf16.mxu1 %v22758_v58 }
 0x90e   :  { %19464 = vmatpush3.bf16.msra.mxu1 %v22760_v61 }
 0x90f   :  { %19465 = vmatprep.subr.bf16.mxu1 %v22762_v29 }
 0x912   :  { %19466 = vmatpush3.bf16.msra.mxu1 %v22764_v35 }
 0x913   :  { %19467 = vmatprep.subr.bf16.mxu1 %v22766_v63 }
 0x916   :  { %19468 = vmatpush3.bf16.msra.mxu1 %v22768_v47 }
 0x917   :  { %19469 = vmatprep.subr.bf16.mxu1 %v22770_v6 }
 0x91a   :  { %19470 = vmatpush3.bf16.msra.mxu1 %v22772_v8 }
 0x91b   :  { %19471 = vmatprep.subr.bf16.mxu1 %v22774_v12 }
 0x91e   :  { %19472 = vmatpush3.bf16.msra.mxu1 %v22776_v25  ;;  %v15102_v25 = vrot.slane %v23643_v13, %v23389_v40  ;;  %v22781_v13 = vld [vmem:[#allocation12 + $0x120] sm:$0xff]  }
 0x994   :  { %v16268_v42 = vpop.f32.mrb[60].mxu1  ;;  %v16397_v30 = vpop.f32.mrb[40].mxu0 }
 0x995   :  { %v19612_v43 = vadd.f32 %v16268_v42, %v15086_v38  ;;  %v19616_v37 = vadd.f32 %v16397_v30, %v15094_v36  ;;  %v16270_v1 = vpop.f32.mrb[61].mxu1  ;;  %v16399_v62 = vpop.f32.mrb[41].mxu0 }
 0x996   :  { %v19613_v7 = vadd.f32 %v16270_v1, %v15090_v4  ;;  %v19617_v11 = vadd.f32 %v16399_v62, %v15098_v14  ;;  %v16272_v44 = vpop.f32.mrb[62].mxu1  ;;  %v16401_v48 = vpop.f32.mrb[42].mxu0 }
 0x997   :  { %v16529_v51 = vmul.f32 0.5, %v19612_v43  ;;  %v16531_v15 = vmul.f32 0.5, %v19616_v37  ;;  %v19614_v0 = vadd.f32 %v16272_v44, %v15086_v38  ;;  %v19618_v52 = vadd.f32 %v16401_v48, %v15094_v36  ;;  %v16274_v16 = vpop.f32.mrb[63].mxu1  ;;  %v16403_v33 = vpop.f32.mrb[43].mxu0  ;;  %v22779_v43 = vld [vmem:[#allocation12 + $0x110] sm:$0xff]  }
 0x998   :  { %v16530_v55 = vmul.f32 0.5, %v19613_v7  ;;  %v16532_v18 = vmul.f32 0.5, %v19617_v11  ;;  %v19615_v19 = vadd.f32 %v16274_v16, %v15090_v4  ;;  %v19619_v56 = vadd.f32 %v16403_v33, %v15098_v14 }
 0x999   :  { %22881 = vtanh.f32 %v16529_v51  ;;  %v16534_v20 = vmul.f32 0.5, %v19614_v0  ;;  %v16536_v21 = vmul.f32 0.5, %v19618_v52  ;;  %v22780_v51 = vld [vmem:[#allocation12 + $0x118] sm:$0xff]   ;;  %v22783_v0 = vld [vmem:[#allocation12 + $0x130] sm:$0xff]  }
 0x99a   :  { %22883 = vtanh.f32 %v16531_v15  ;;  %v16535_v23 = vmul.f32 0.5, %v19615_v19  ;;  %v16537_v50 = vmul.f32 0.5, %v19619_v56  ;;  %v22782_v15 = vld [vmem:[#allocation12 + $0x128] sm:$0xff]   ;;  %v22784_v52 = vld [vmem:[#allocation12 + $0x138] sm:$0xff]  }
 0x99b   :  { %22885 = vtanh.f32 %v16530_v55 }
 0x99c   :  { %22887 = vtanh.f32 %v16532_v18 }
 0x99d   :  { %22889 = vtanh.f32 %v16534_v20 }
 0x99e   :  { %22891 = vtanh.f32 %v16536_v21 }
 0x99f   :  { %22893 = vtanh.f32 %v16535_v23 }
 0x9a0   :  { %22895 = vtanh.f32 %v16537_v50 }
 0x9a3   :  { %v22882_v53 = vpop.eup %22881 }
 0x9a4   :  { %v22884_v32 = vpop.eup %22883  ;;  %v16549_v27 = vmul.f32 0.5, %v22882_v53 }
 0x9a5   :  { %v22886_v2 = vpop.eup %22885  ;;  %v16551_v59 = vmul.f32 0.5, %v22884_v32 }
 0x9a6   :  { %v22888_v26 = vpop.eup %22887  ;;  %v16550_v28 = vmul.f32 0.5, %v22886_v2  ;;  %v16559_v58 = vadd.f32 0.5, %v16549_v27 }
 0x9a7   :  { %v22890_v31 = vpop.eup %22889  ;;  %v16552_v39 = vmul.f32 0.5, %v22888_v26  ;;  %v16561_v49 = vadd.f32 0.5, %v16551_v59  ;;  %v19059_v59 = vld [vmem:[#allocation13] ss:$0 sm:$0xff] }
 0x9a8   :  { %v22892_v45 = vpop.eup %22891  ;;  %v16554_v34 = vmul.f32 0.5, %v22890_v31  ;;  %v16560_v35 = vadd.f32 0.5, %v16550_v28 }
 0x9a9   :  { %v22894_v9 = vpop.eup %22893  ;;  %v16556_v54 = vmul.f32 0.5, %v22892_v45  ;;  %v16562_v60 = vadd.f32 0.5, %v16552_v39 }
 0x9aa   :  { %v22896_v57 = vpop.eup %22895  ;;  %v16564_v22 = vadd.f32 0.5, %v16554_v34  ;;  %v16555_v61 = vmul.f32 0.5, %v22894_v9 }
 0x9ab   :  { %v16566_v29 = vadd.f32 0.5, %v16556_v54  ;;  %v16557_v46 = vmul.f32 0.5, %v22896_v57 }
 0x9ac   :  { %v16569_v17 = vpack.c.bf16 %v16564_v22, %v16559_v58  ;;  %v16565_v63 = vadd.f32 0.5, %v16555_v61 }
 0x9ad   :  { %v16571_v47 = vpack.c.bf16 %v16566_v29, %v16561_v49  ;;  %v16567_v5 = vadd.f32 0.5, %v16557_v46 }
 0x9ae   :  { %v16570_v6 = vpack.c.bf16 %v16565_v63, %v16560_v35 }
 0x9af   :  { %v16572_v8 = vpack.c.bf16 %v16567_v5, %v16562_v60 }
 0x9b0   :  { %16933 = vmatprep.mubr.bf16.mxu0 %v16570_v6 }
 0x9b1   :  { %16974 = vmatprep.mubr.bf16.mxu1 %v16572_v8  ;;  %16934 = vmatmul.mubr.bf16.vlgmr.msra.gmra.mrb[48].mxu0 %v16569_v17 }
 0x9b2   :  { %16975 = vmatmul.mubr.bf16.vlgmr.msra.gmra.mrb[72].mxu1 %v16571_v47  ;;  %19549 = vmatpush3.bf16.msra.mxu0 %v22777_v24 }
 0x9b3   :  { %19550 = vmatprep.subr.bf16.mxu0 %v23105_v3  ;;  %19564 = vmatprep.mubr.msk.bf16.mxu0 %vm23106_vm0, %v23105_v3 }
 0x9b4   :  { %v19398_v12 = vpop.f32.mrb[64].mxu1  ;;  %v19420_v10 = vpop.f32.mrb[44].mxu0 }
 0x9b5   :  { %v19399_v38 = vpop.f32.mrb[65].mxu1  ;;  %v19421_v36 = vpop.f32.mrb[45].mxu0 }
 0x9b6   :  { %v19400_v4 = vadd.f32 %v19399_v38, %v19398_v12  ;;  %v19422_v14 = vadd.f32 %v19421_v36, %v19420_v10  ;;  %v19401_v42 = vpop.f32.mrb[66].mxu1  ;;  %v19423_v30 = vpop.f32.mrb[46].mxu0  ;;  %19551 = vmatpush3.bf16.msra.mxu0 %v22778_v41 }
 0x9b7   :  { %v19402_v37 = vpop.f32.mrb[67].mxu1  ;;  %v19424_v1 = vpop.f32.mrb[47].mxu0  ;;  %19552 = vmatprep.subr.bf16.mxu0 %v23105_v3 }
 0x9b8   :  { %v16441_v62 = vadd.f32 %v19400_v4, %v15102_v25  ;;  %v19403_v7 = vadd.f32 %v19402_v37, %v19401_v42  ;;  %v19425_v11 = vadd.f32 %v19424_v1, %v19423_v30 }
 0x9ba   :  { %v16444_v44 = vadd.f32 %v19403_v7, %v15102_v25  ;;  %v16482_v48 = vadd.f32 %v19422_v14, %v16441_v62  ;;  %19553 = vmatpush3.bf16.msra.mxu0 %v22779_v43 }
 0x9bb   :  { %19554 = vmatprep.subr.bf16.mxu0 %v23105_v3 }
 0x9bc   :  { %v16485_v40 = vadd.f32 %v19425_v11, %v16444_v44 }
 0x9be   :  { %19555 = vmatpush3.bf16.msra.mxu0 %v22780_v51 }
 0x9bf   :  { %19556 = vmatprep.subr.bf16.mxu0 %v23105_v3 }
 0x9c2   :  { %19557 = vmatpush3.bf16.msra.mxu0 %v22781_v13 }
 0x9c3   :  { %19558 = vmatprep.subr.bf16.mxu0 %v23105_v3 }
 0x9c6   :  { %19559 = vmatpush3.bf16.msra.mxu0 %v22782_v15 }
 0x9c7   :  { %19560 = vmatprep.subr.bf16.mxu0 %v23105_v3 }
 0x9ca   :  { %19561 = vmatpush3.bf16.msra.mxu0 %v22783_v0 }
 0x9cb   :  { %19562 = vmatprep.subr.bf16.mxu0 %v23105_v3 }
 0x9ce   :  { %19563 = vmatpush3.bf16.msra.mxu0 %v22784_v52 }
 0x9d4   :  { %v16522_v16 = vpop.f32.mrb[68].mxu1 }
 0x9d5   :  { %v16523_v33 = vadd.f32 %v16522_v16, %v16482_v48  ;;  %v19546_v55 = vpop.f32.mrb[69].mxu1 }
 0x9d6   :  { %v16525_v18 = vpop.f32.mrb[70].mxu1 }
 0x9d7   :  { %v16533_v19 = vmul.f32 0.5, %v16523_v33  ;;  %v16526_v56 = vadd.f32 %v16525_v18, %v16485_v40  ;;  %v19547_v20 = vpop.f32.mrb[71].mxu1 }
 0x9d9   :  { %22897 = vtanh.f32 %v16533_v19  ;;  %v16538_v21 = vmul.f32 0.5, %v16526_v56 }
 0x9db   :  { %22899 = vtanh.f32 %v16538_v21 }
 0x9e3   :  { %v22898_v23 = vpop.eup %22897 }
 0x9e4   :  { %v16553_v50 = vmul.f32 0.5, %v22898_v23 }
 0x9e5   :  { %v22900_v53 = vpop.eup %22899 }
 0x9e6   :  { %v16558_v32 = vmul.f32 0.5, %v22900_v53  ;;  %v16563_v2 = vadd.f32 0.5, %v16553_v50 }
 0x9e8   :  { %v16568_v26 = vadd.f32 0.5, %v16558_v32 }
 0x9ea   :  { %v16573_v27 = vpack.c.bf16 %v16568_v26, %v16563_v2 }
 0x9ec   :  { %19565 = vmatmul.mubr.bf16.vlgmr.msra.gmra.mrb[52].mxu0 %v16573_v27 }
 0xa84   :  { %v19451_v3 = vpop.f32.mrb[48].mxu0 }
 0xa85   :  { %v19473_v31 = vpop.f32.mrb[72].mxu1  ;;  %v19452_v45 = vpop.f32.mrb[49].mxu0 }
 0xa86   :  { %v19453_v28 = vadd.f32 %v19452_v45, %v19451_v3  ;;  %v19474_v34 = vpop.f32.mrb[73].mxu1  ;;  %v19454_v9 = vpop.f32.mrb[50].mxu0 }
 0xa87   :  { %v19475_v39 = vadd.f32 %v19474_v34, %v19473_v31  ;;  %v19476_v54 = vpop.f32.mrb[74].mxu1  ;;  %v19455_v57 = vpop.f32.mrb[51].mxu0 }
 0xa88   :  { %v16936_v58 = vadd.f32 %v19453_v28, %v19059_v59  ;;  %v19456_v22 = vadd.f32 %v19455_v57, %v19454_v9  ;;  %v19477_v61 = vpop.f32.mrb[75].mxu1 }
 0xa89   :  { %v19478_v49 = vadd.f32 %v19477_v61, %v19476_v54 }
 0xa8a   :  { %v16939_v29 = vadd.f32 %v19456_v22, %v19059_v59  ;;  %v16977_v46 = vadd.f32 %v19475_v39, %v16936_v58 }
 0xa8c   :  { %v16980_v35 = vadd.f32 %v19478_v49, %v16939_v29 }
 0xabf   :  { %v17017_v17 = vpop.f32.mrb[52].mxu0 }
 0xac0   :  { %v17018_v63 = vadd.f32 %v17017_v17, %v16977_v46  ;;  %v19566_v60 = vpop.f32.mrb[53].mxu0 }
 0xac1   :  { %v17020_v47 = vpop.f32.mrb[54].mxu0 }
 0xac2   :  { %17024 = vst [vmem:[%s23679_s9] sm:$0xff] %v17018_v63  ;;  %v17021_v5 = vadd.f32 %v17020_v47, %v16980_v35  ;;  %v19567_v6 = vpop.f32.mrb[55].mxu0 }
 0xac4   :  { %17025 = vst [vmem:[%s23679_s9 + $0x8] sm:$0xff] %v17021_v5 }
 0xac5   :  { %17030 = vsyncpa [#allocation3], 1 }
 0xac6   :  { %17031 = vsyncpa [#allocation5], 1 }
 0xac7   :  { %17032 = vsyncpa [#allocation8], 1 }
 0xac8   :  { %17033 = vsyncpa [#allocation11], 1 }
 0xac9   :  { %17034 = vsyncpa [#allocation14], 1 }

</bundles_post_ra>
